<compile_context>
chip_gen: v6e
topology: v6e:2x2x1
jax: 0.10.0
libtpu: 0.0.40
codegen_flags: <defaults>
</compile_context>

<pallas_src>
import numpy as np
import jax
import jax.numpy as jnp
from jax.experimental import pallas as pl
from jax.experimental.pallas import tpu as pltpu


def basic_block_kernel(x_ref, band1_ref, band2_ref, cmap_ref, cmapT_ref,
                       fc1_w_ref, fc1_b_ref, fc2_w_ref, fc2_b_ref,
                       bn1_g_ref, bn1_b_ref, bn2_g_ref, bn2_b_ref,
                       out_ref, pad_ref):
    B, H, WC = x_ref.shape
    C = cmap_ref.shape[0]
    W = WC // C
    BH = B * H
    n_bn = float(B * H * W)     # BN reduces over (B, H, W) per channel
    n_pool = float(H * W)       # global average pool reduces over (H, W)
    eps = 1e-5

    x3 = x_ref[...]             # (B, H, W*C)  lane-dense input / residual
    cmap = cmap_ref[...]        # (C, W*C):  cmap[c, w*C + c'] = (c == c')
    cmapT = cmapT_ref[...]      # (W*C, C)

    def to_channels(v):         # (R, W*C) -> (R, C): sum the W copies per channel
        return jnp.dot(v, cmapT, preferred_element_type=jnp.float32)

    def to_lanes(v):            # (R, C) -> (R, W*C): per-channel lane broadcast
        return jnp.dot(v, cmap, preferred_element_type=jnp.float32)

    def conv3x3(band_ref):      # banded 3x3 conv -> (B*H, W*C), stays lane-dense
        acc = jnp.zeros((BH, WC), jnp.float32)
        for ky in range(3):     # H-shifted row block @ (W*C, W*C) band matrix
            rows = pad_ref[:, ky:ky + H, :].reshape(BH, WC)
            acc = acc + jnp.dot(rows, band_ref[ky],
                                preferred_element_type=jnp.float32)
        return acc

    def batchnorm(y, g_ref, b_ref):   # training-mode batch stats, biased variance
        mean_c = to_channels(jnp.sum(y, axis=0, keepdims=True)) / n_bn    # (1, C)
        d = y - to_lanes(mean_c)
        var_c = to_channels(jnp.sum(d * d, axis=0, keepdims=True)) / n_bn
        scale = to_lanes(g_ref[...] * jax.lax.rsqrt(var_c + eps))         # (1, W*C)
        shift = to_lanes(b_ref[...])
        return d * scale + shift

    # ---- stage conv1 input: zero only the 2 H-halo rows, interior = x --------
    pad_ref[:, 0:1, :] = jnp.zeros((B, 1, WC), jnp.float32)
    pad_ref[:, H + 1:H + 2, :] = jnp.zeros((B, 1, WC), jnp.float32)
    pad_ref[:, 1:H + 1, :] = x3

    out = conv3x3(band1_ref)                                    # (B*H, W*C)

    # ---- SE / channel-pruning gate (out channels == input channels branch) ---
    pooled = to_channels(jnp.sum(x3, axis=1)) / n_pool          # (B, C) GAP
    h = jnp.dot(pooled, fc1_w_ref[...],
                preferred_element_type=jnp.float32) + fc1_b_ref[...]
    h = jnp.maximum(h, 0.0)
    s = jnp.dot(h, fc2_w_ref[...],
                preferred_element_type=jnp.float32) + fc2_b_ref[...]
    s = jax.nn.sigmoid(s)                                       # (B, C)

    # value at ascending-sorted index k (== torch.sort(...)[:, k]) without a sort
    k = int(0.2 * C)
    le = (s[:, None, :] <= s[:, :, None]).astype(jnp.float32)   # (B, C, C), C small
    cnt = jnp.sum(le, axis=-1)                                  # #{j : s[j] <= s[i]}
    thr = jnp.min(jnp.where(cnt >= float(k + 1), s, jnp.inf),
                  axis=-1, keepdims=True)                       # (B, 1)
    sep = jnp.maximum(s - thr, 0.0)                             # (B, C)
    sep_wc = to_lanes(sep)                                      # (B, W*C)

    out = (out.reshape(B, H, WC) * sep_wc[:, None, :]).reshape(BH, WC)
    out = jnp.maximum(batchnorm(out, bn1_g_ref, bn1_b_ref), 0.0)

    # ---- conv2: reuse padded scratch (halo rows are still zero) --------------
    pad_ref[:, 1:H + 1, :] = out.reshape(B, H, WC)
    out = conv3x3(band2_ref)

    # ---- bn2 + residual + relu, lane-dense store ------------------------------
    out = batchnorm(out, bn2_g_ref, bn2_b_ref)
    out_ref[...] = jnp.maximum(out.reshape(B, H, WC) + x3, 0.0)


def _band_weights(wt, width):
    """PyTorch conv weight (Cout, Cin, 3, 3) -> (3, W*Cin, W*Cout) block-banded
    matrices: Band[ky][w_in*Cin+ci, w*Cout+co] = wt[co, ci, ky, w_in-w+1] for
    |w_in - w| <= 1 (zero elsewhere).  This folds the W-direction taps and the
    W-direction zero padding of the 3x3 conv into one full-depth matmul per ky."""
    c_out, c_in = wt.shape[0], wt.shape[1]
    blocks = jnp.transpose(wt, (2, 3, 1, 0))               # (ky, kx, Cin, Cout)
    bands = []
    for ky in range(3):
        m = jnp.zeros((width * c_in, width * c_out), wt.dtype)
        for kx in range(3):
            off = kx - 1                                    # reads x column w + off
            shift = jnp.eye(width, k=-off, dtype=wt.dtype)  # shift[w_in, w] = (w_in == w+off)
            m = m + jnp.kron(shift, blocks[ky, kx])
        bands.append(m)
    return jnp.stack(bands)


def basic_block_forward(x_nchw, params):
    """x_nchw: (B, C, H, W) float32. Returns (B, C, H, W) float32."""
    B, C, H, W = x_nchw.shape
    # NCHW -> lane-dense (B, H, W*C).  (The NCHW interface transpose is the only
    # unavoidable wrapper-side relayout; padding is folded into the kernel.)
    x_dense = jnp.transpose(x_nchw, (0, 2, 3, 1)).reshape(B, H, W * C)

    # TODO(synk): in steady-state inference the band matrices / cmap would be
    # precomputed once per layer rather than rebuilt every forward call.
    band1 = _band_weights(params["conv1_w"], W)             # (3, W*C, W*C)
    band2 = _band_weights(params["conv2_w"], W)
    cmap = jnp.tile(jnp.eye(C, dtype=jnp.float32), (1, W))  # (C, W*C)
    cmapT = cmap.T                                          # (W*C, C)

    # PyTorch Linear weight (out, in); kernel consumes (in, out): y = x @ W.T + b
    fc1_w = params["fc1_w"].T
    fc2_w = params["fc2_w"].T
    fc1_b = params["fc1_b"].reshape(1, -1)
    fc2_b = params["fc2_b"].reshape(1, -1)
    bn1_g = params["bn1_g"].reshape(1, -1)
    bn1_b = params["bn1_b"].reshape(1, -1)
    bn2_g = params["bn2_g"].reshape(1, -1)
    bn2_b = params["bn2_b"].reshape(1, -1)

    out_dense = pl.pallas_call(
        basic_block_kernel,
        out_shape=jax.ShapeDtypeStruct((B, H, W * C), jnp.float32),
        in_specs=[pl.BlockSpec(memory_space=pltpu.MemorySpace.VMEM)] * 13,
        out_specs=pl.BlockSpec(memory_space=pltpu.MemorySpace.VMEM),
        scratch_shapes=[pltpu.VMEM((B, H + 2, W * C), jnp.float32)],
        compiler_params=pltpu.CompilerParams(vmem_limit_bytes=32 << 20),
    )(x_dense, band1, band2, cmap, cmapT, fc1_w, fc1_b, fc2_w, fc2_b,
      bn1_g, bn1_b, bn2_g, bn2_b)
    return jnp.transpose(out_dense.reshape(B, H, W, C), (0, 3, 1, 2))


def reference_forward(x, p):
    """Plain-JAX NCHW reference mirroring the PyTorch forward."""
    hi = jax.lax.Precision.HIGHEST

    def conv3x3(y, w):
        return jax.lax.conv_general_dilated(
            y, w, (1, 1), ((1, 1), (1, 1)),
            dimension_numbers=("NCHW", "OIHW", "NCHW"), precision=hi)

    def bn(y, g, b):
        mu = jnp.mean(y, axis=(0, 2, 3), keepdims=True)
        var = jnp.mean((y - mu) ** 2, axis=(0, 2, 3), keepdims=True)
        return ((y - mu) / jnp.sqrt(var + 1e-5)) * g.reshape(1, -1, 1, 1) \
            + b.reshape(1, -1, 1, 1)

    out = conv3x3(x, p["conv1_w"])
    pooled = jnp.mean(x, axis=(2, 3))
    h = jax.nn.relu(jnp.dot(pooled, p["fc1_w"].T, precision=hi) + p["fc1_b"])
    s = jax.nn.sigmoid(jnp.dot(h, p["fc2_w"].T, precision=hi) + p["fc2_b"])
    C = s.shape[1]
    k = int(0.2 * C)
    thr = jnp.sort(s, axis=1)[:, k:k + 1]
    sep = jax.nn.relu(s - thr)
    out = out * sep[:, :, None, None]
    out = jax.nn.relu(bn(out, p["bn1_g"], p["bn1_b"]))
    out = conv3x3(out, p["conv2_w"])
    out = bn(out, p["bn2_g"], p["bn2_b"])
    return jax.nn.relu(out + x)


if __name__ == "__main__":
    # planes == inplanes == 16 -> same-channel SE branch; AvgPool2d(32) means
    # spatial must be 32x32 for the fc shapes to be consistent.
    B, C, H, W = 2, 16, 32, 32
    Cr = C // 4  # fc bottleneck = round(planes / 4)

    key = jax.random.PRNGKey(0)
    ks = jax.random.split(key, 8)
    params = {
        "conv1_w": 0.1 * jax.random.normal(ks[0], (C, C, 3, 3), jnp.float32),
        "conv2_w": 0.1 * jax.random.normal(ks[1], (C, C, 3, 3), jnp.float32),
        "fc1_w": 0.2 * jax.random.normal(ks[2], (Cr, C), jnp.float32),
        "fc1_b": 0.05 * jax.random.normal(ks[3], (Cr,), jnp.float32),
        "fc2_w": 0.2 * jax.random.normal(ks[4], (C, Cr), jnp.float32),
        "fc2_b": 0.05 * jax.random.normal(ks[5], (C,), jnp.float32),
        "bn1_g": jnp.ones((C,), jnp.float32),
        "bn1_b": jnp.zeros((C,), jnp.float32),
        "bn2_g": jnp.ones((C,), jnp.float32),
        "bn2_b": jnp.zeros((C,), jnp.float32),
    }
    x = jax.random.normal(ks[6], (B, C, H, W), jnp.float32)

    out = jax.block_until_ready(basic_block_forward(x, params))
    ref = jax.block_until_ready(reference_forward(x, params))

    np.testing.assert_allclose(np.asarray(out), np.asarray(ref),
                               rtol=2e-3, atol=2e-3)
    print("KERNEL_OK")
</pallas_src>

<mosaic_0001>
module attributes {stable_mosaic.version = 11 : i64} {
  func.func @basic_block_kernel(%arg0: memref<2x32x512xf32, #tpu.memory_space<vmem>>, %arg1: memref<3x512x512xf32, #tpu.memory_space<vmem>>, %arg2: memref<3x512x512xf32, #tpu.memory_space<vmem>>, %arg3: memref<16x512xf32, #tpu.memory_space<vmem>>, %arg4: memref<512x16xf32, #tpu.memory_space<vmem>>, %arg5: memref<16x4xf32, #tpu.memory_space<vmem>>, %arg6: memref<1x4xf32, #tpu.memory_space<vmem>>, %arg7: memref<4x16xf32, #tpu.memory_space<vmem>>, %arg8: memref<1x16xf32, #tpu.memory_space<vmem>>, %arg9: memref<1x16xf32, #tpu.memory_space<vmem>>, %arg10: memref<1x16xf32, #tpu.memory_space<vmem>>, %arg11: memref<1x16xf32, #tpu.memory_space<vmem>>, %arg12: memref<1x16xf32, #tpu.memory_space<vmem>>, %arg13: memref<2x32x512xf32, #tpu.memory_space<vmem>>, %arg14: memref<2x34x512xf32, #tpu.memory_space<vmem>>) attributes {dimension_semantics = [], scalar_prefetch = 0 : i64, scratch_operands = 1 : i64, tpu.core_type = #tpu.core_type<tc>} {
    %c0 = arith.constant 0 : index
    %c0_0 = arith.constant 0 : index
    %c0_1 = arith.constant 0 : index
    %0 = vector.load %arg0[%c0, %c0_0, %c0_1] : memref<2x32x512xf32, #tpu.memory_space<vmem>>, vector<2x32x512xf32>
    %c0_2 = arith.constant 0 : index
    %c0_3 = arith.constant 0 : index
    %1 = vector.load %arg3[%c0_2, %c0_3] : memref<16x512xf32, #tpu.memory_space<vmem>>, vector<16x512xf32>
    %c0_4 = arith.constant 0 : index
    %c0_5 = arith.constant 0 : index
    %2 = vector.load %arg4[%c0_4, %c0_5] : memref<512x16xf32, #tpu.memory_space<vmem>>, vector<512x16xf32>
    %cst = arith.constant 0.000000e+00 : f32
    %3 = vector.broadcast %cst : f32 to vector<2x1x512xf32>
    %c0_6 = arith.constant 0 : index
    %c0_7 = arith.constant 0 : index
    %c0_8 = arith.constant 0 : index
    %4 = vector.load %arg14[%c0_6, %c0_7, %c0_8] : memref<2x34x512xf32, #tpu.memory_space<vmem>>, vector<2x1x512xf32>
    tpu.vector_store %arg14[%c0_6, %c0_7, %c0_8], %3 {strides = array<i32>} : memref<2x34x512xf32, #tpu.memory_space<vmem>>, vector<2x1x512xf32>,
    %cst_9 = arith.constant 0.000000e+00 : f32
    %5 = vector.broadcast %cst_9 : f32 to vector<2x1x512xf32>
    %c0_10 = arith.constant 0 : index
    %c33 = arith.constant 33 : index
    %c0_11 = arith.constant 0 : index
    %6 = vector.load %arg14[%c0_10, %c33, %c0_11] : memref<2x34x512xf32, #tpu.memory_space<vmem>>, vector<2x1x512xf32>
    tpu.vector_store %arg14[%c0_10, %c33, %c0_11], %5 {strides = array<i32>} : memref<2x34x512xf32, #tpu.memory_space<vmem>>, vector<2x1x512xf32>,
    %c0_12 = arith.constant 0 : index
    %c1 = arith.constant 1 : index
    %c0_13 = arith.constant 0 : index
    %7 = vector.load %arg14[%c0_12, %c1, %c0_13] : memref<2x34x512xf32, #tpu.memory_space<vmem>>, vector<2x32x512xf32>
    tpu.vector_store %arg14[%c0_12, %c1, %c0_13], %0 {strides = array<i32>} : memref<2x34x512xf32, #tpu.memory_space<vmem>>, vector<2x32x512xf32>,
    %cst_14 = arith.constant 0.000000e+00 : f32
    %8 = vector.broadcast %cst_14 : f32 to vector<64x512xf32>
    %c0_15 = arith.constant 0 : index
    %c0_16 = arith.constant 0 : index
    %c0_17 = arith.constant 0 : index
    %9 = vector.load %arg14[%c0_15, %c0_16, %c0_17] : memref<2x34x512xf32, #tpu.memory_space<vmem>>, vector<2x32x512xf32>
    %10 = vector.shape_cast %9 : vector<2x32x512xf32> to vector<64x512xf32>
    %c0_18 = arith.constant 0 : index
    %c0_19 = arith.constant 0 : index
    %c0_20 = arith.constant 0 : index
    %11 = vector.load %arg1[%c0_18, %c0_19, %c0_20] : memref<3x512x512xf32, #tpu.memory_space<vmem>>, vector<1x512x512xf32>
    %12 = vector.shape_cast %11 : vector<1x512x512xf32> to vector<512x512xf32>
    %cst_21 = arith.constant dense<0.000000e+00> : vector<64x512xf32>
    %13 = tpu.matmul %10, %12, %cst_21 {dimension_numbers = #tpu.dot_dimension_numbers<[1], [0], [0], [1], [0, 0, 1, 1], [], []>} : vector<64x512xf32>, vector<512x512xf32>, vector<64x512xf32> -> vector<64x512xf32>
    %14 = arith.addf %8, %13 : vector<64x512xf32>
    %c0_22 = arith.constant 0 : index
    %c1_23 = arith.constant 1 : index
    %c0_24 = arith.constant 0 : index
    %15 = vector.load %arg14[%c0_22, %c1_23, %c0_24] : memref<2x34x512xf32, #tpu.memory_space<vmem>>, vector<2x32x512xf32>
    %16 = vector.shape_cast %15 : vector<2x32x512xf32> to vector<64x512xf32>
    %c1_25 = arith.constant 1 : index
    %c0_26 = arith.constant 0 : index
    %c0_27 = arith.constant 0 : index
    %17 = vector.load %arg1[%c1_25, %c0_26, %c0_27] : memref<3x512x512xf32, #tpu.memory_space<vmem>>, vector<1x512x512xf32>
    %18 = vector.shape_cast %17 : vector<1x512x512xf32> to vector<512x512xf32>
    %cst_28 = arith.constant dense<0.000000e+00> : vector<64x512xf32>
    %19 = tpu.matmul %16, %18, %cst_28 {dimension_numbers = #tpu.dot_dimension_numbers<[1], [0], [0], [1], [0, 0, 1, 1], [], []>} : vector<64x512xf32>, vector<512x512xf32>, vector<64x512xf32> -> vector<64x512xf32>
    %20 = arith.addf %14, %19 : vector<64x512xf32>
    %c0_29 = arith.constant 0 : index
    %c2 = arith.constant 2 : index
    %c0_30 = arith.constant 0 : index
    %21 = vector.load %arg14[%c0_29, %c2, %c0_30] : memref<2x34x512xf32, #tpu.memory_space<vmem>>, vector<2x32x512xf32>
    %22 = vector.shape_cast %21 : vector<2x32x512xf32> to vector<64x512xf32>
    %c2_31 = arith.constant 2 : index
    %c0_32 = arith.constant 0 : index
    %c0_33 = arith.constant 0 : index
    %23 = vector.load %arg1[%c2_31, %c0_32, %c0_33] : memref<3x512x512xf32, #tpu.memory_space<vmem>>, vector<1x512x512xf32>
    %24 = vector.shape_cast %23 : vector<1x512x512xf32> to vector<512x512xf32>
    %cst_34 = arith.constant dense<0.000000e+00> : vector<64x512xf32>
    %25 = tpu.matmul %22, %24, %cst_34 {dimension_numbers = #tpu.dot_dimension_numbers<[1], [0], [0], [1], [0, 0, 1, 1], [], []>} : vector<64x512xf32>, vector<512x512xf32>, vector<64x512xf32> -> vector<64x512xf32>
    %26 = arith.addf %20, %25 : vector<64x512xf32>
    %cst_35 = arith.constant dense<0.000000e+00> : vector<2x512xf32>
    %27 = vector.multi_reduction <add>, %0, %cst_35 [1] : vector<2x32x512xf32> to vector<2x512xf32>
    %cst_36 = arith.constant dense<0.000000e+00> : vector<2x16xf32>
    %28 = tpu.matmul %27, %2, %cst_36 {dimension_numbers = #tpu.dot_dimension_numbers<[1], [0], [0], [1], [0, 0, 1, 1], [], []>} : vector<2x512xf32>, vector<512x16xf32>, vector<2x16xf32> -> vector<2x16xf32>
    %cst_37 = arith.constant 1.024000e+03 : f32
    %29 = vector.broadcast %cst_37 : f32 to vector<2x16xf32>
    %30 = arith.divf %28, %29 : vector<2x16xf32>
    %c0_38 = arith.constant 0 : index
    %c0_39 = arith.constant 0 : index
    %31 = vector.load %arg5[%c0_38, %c0_39] : memref<16x4xf32, #tpu.memory_space<vmem>>, vector<16x4xf32>
    %cst_40 = arith.constant dense<0.000000e+00> : vector<2x4xf32>
    %32 = tpu.matmul %30, %31, %cst_40 {dimension_numbers = #tpu.dot_dimension_numbers<[1], [0], [0], [1], [0, 0, 1, 1], [], []>} : vector<2x16xf32>, vector<16x4xf32>, vector<2x4xf32> -> vector<2x4xf32>
    %c0_41 = arith.constant 0 : index
    %c0_42 = arith.constant 0 : index
    %33 = vector.load %arg6[%c0_41, %c0_42] : memref<1x4xf32, #tpu.memory_space<vmem>>, vector<1x4xf32>
    %34 = vector.broadcast %33 : vector<1x4xf32> to vector<2x4xf32>
    %35 = arith.addf %32, %34 : vector<2x4xf32>
    %cst_43 = arith.constant 0.000000e+00 : f32
    %36 = vector.broadcast %cst_43 : f32 to vector<2x4xf32>
    %37 = arith.maximumf %35, %36 : vector<2x4xf32>
    %c0_44 = arith.constant 0 : index
    %c0_45 = arith.constant 0 : index
    %38 = vector.load %arg7[%c0_44, %c0_45] : memref<4x16xf32, #tpu.memory_space<vmem>>, vector<4x16xf32>
    %cst_46 = arith.constant dense<0.000000e+00> : vector<2x16xf32>
    %39 = tpu.matmul %37, %38, %cst_46 {dimension_numbers = #tpu.dot_dimension_numbers<[1], [0], [0], [1], [0, 0, 1, 1], [], []>} : vector<2x4xf32>, vector<4x16xf32>, vector<2x16xf32> -> vector<2x16xf32>
    %c0_47 = arith.constant 0 : index
    %c0_48 = arith.constant 0 : index
    %40 = vector.load %arg8[%c0_47, %c0_48] : memref<1x16xf32, #tpu.memory_space<vmem>>, vector<1x16xf32>
    %41 = vector.broadcast %40 : vector<1x16xf32> to vector<2x16xf32>
    %42 = arith.addf %39, %41 : vector<2x16xf32>
    %43 = arith.negf %42 : vector<2x16xf32>
    %44 = math.exp %43 : vector<2x16xf32>
    %cst_49 = arith.constant 1.000000e+00 : f32
    %45 = vector.broadcast %cst_49 : f32 to vector<2x16xf32>
    %46 = arith.addf %45, %44 : vector<2x16xf32>
    %47 = arith.divf %45, %46 : vector<2x16xf32>
    %48 = vector.shape_cast %47 : vector<2x16xf32> to vector<2x1x16xf32>
    %49 = vector.shape_cast %47 : vector<2x16xf32> to vector<2x16x1xf32>
    %50 = vector.broadcast %48 : vector<2x1x16xf32> to vector<2x16x16xf32>
    %51 = vector.broadcast %49 : vector<2x16x1xf32> to vector<2x16x16xf32>
    %52 = arith.cmpf ole, %50, %51 : vector<2x16x16xf32>
    %53 = arith.extui %52 : vector<2x16x16xi1> to vector<2x16x16xi32>
    %54 = arith.sitofp %53 : vector<2x16x16xi32> to vector<2x16x16xf32>
    %cst_50 = arith.constant dense<0.000000e+00> : vector<2x16xf32>
    %55 = vector.multi_reduction <add>, %54, %cst_50 [2] : vector<2x16x16xf32> to vector<2x16xf32>
    %cst_51 = arith.constant 4.000000e+00 : f32
    %56 = vector.broadcast %cst_51 : f32 to vector<2x16xf32>
    %57 = arith.cmpf oge, %55, %56 : vector<2x16xf32>
    %cst_52 = arith.constant 0x7F800000 : f32
    %58 = vector.broadcast %cst_52 : f32 to vector<2x16xf32>
    %59 = arith.select %57, %47, %58 : vector<2x16xi1>, vector<2x16xf32>
    %cst_53 = arith.constant dense<0x7F800000> : vector<2xf32>
    %60 = vector.multi_reduction <minimumf>, %59, %cst_53 [1] : vector<2x16xf32> to vector<2xf32>
    %61 = vector.shape_cast %60 : vector<2xf32> to vector<2x1xf32>
    %62 = vector.broadcast %61 : vector<2x1xf32> to vector<2x16xf32>
    %63 = arith.subf %47, %62 : vector<2x16xf32>
    %cst_54 = arith.constant 0.000000e+00 : f32
    %64 = vector.broadcast %cst_54 : f32 to vector<2x16xf32>
    %65 = arith.maximumf %63, %64 : vector<2x16xf32>
    %cst_55 = arith.constant dense<0.000000e+00> : vector<2x512xf32>
    %66 = tpu.matmul %65, %1, %cst_55 {dimension_numbers = #tpu.dot_dimension_numbers<[1], [0], [0], [1], [0, 0, 1, 1], [], []>} : vector<2x16xf32>, vector<16x512xf32>, vector<2x512xf32> -> vector<2x512xf32>
    %67 = vector.shape_cast %26 : vector<64x512xf32> to vector<2x32x512xf32>
    %68 = vector.shape_cast %66 : vector<2x512xf32> to vector<2x1x512xf32>
    %69 = vector.broadcast %68 : vector<2x1x512xf32> to vector<2x32x512xf32>
    %70 = arith.mulf %67, %69 : vector<2x32x512xf32>
    %71 = vector.shape_cast %70 : vector<2x32x512xf32> to vector<64x512xf32>
    %cst_56 = arith.constant dense<0.000000e+00> : vector<512xf32>
    %72 = vector.multi_reduction <add>, %71, %cst_56 [0] : vector<64x512xf32> to vector<512xf32>
    %73 = vector.shape_cast %72 : vector<512xf32> to vector<1x512xf32>
    %cst_57 = arith.constant dense<0.000000e+00> : vector<1x16xf32>
    %74 = tpu.matmul %73, %2, %cst_57 {dimension_numbers = #tpu.dot_dimension_numbers<[1], [0], [0], [1], [0, 0, 1, 1], [], []>} : vector<1x512xf32>, vector<512x16xf32>, vector<1x16xf32> -> vector<1x16xf32>
    %cst_58 = arith.constant 2.048000e+03 : f32
    %75 = vector.broadcast %cst_58 : f32 to vector<1x16xf32>
    %76 = arith.divf %74, %75 : vector<1x16xf32>
    %cst_59 = arith.constant dense<0.000000e+00> : vector<1x512xf32>
    %77 = tpu.matmul %76, %1, %cst_59 {dimension_numbers = #tpu.dot_dimension_numbers<[1], [0], [0], [1], [0, 0, 1, 1], [], []>} : vector<1x16xf32>, vector<16x512xf32>, vector<1x512xf32> -> vector<1x512xf32>
    %78 = vector.broadcast %77 : vector<1x512xf32> to vector<64x512xf32>
    %79 = arith.subf %71, %78 : vector<64x512xf32>
    %80 = arith.mulf %79, %79 : vector<64x512xf32>
    %cst_60 = arith.constant dense<0.000000e+00> : vector<512xf32>
    %81 = vector.multi_reduction <add>, %80, %cst_60 [0] : vector<64x512xf32> to vector<512xf32>
    %82 = vector.shape_cast %81 : vector<512xf32> to vector<1x512xf32>
    %cst_61 = arith.constant dense<0.000000e+00> : vector<1x16xf32>
    %83 = tpu.matmul %82, %2, %cst_61 {dimension_numbers = #tpu.dot_dimension_numbers<[1], [0], [0], [1], [0, 0, 1, 1], [], []>} : vector<1x512xf32>, vector<512x16xf32>, vector<1x16xf32> -> vector<1x16xf32>
    %cst_62 = arith.constant 2.048000e+03 : f32
    %84 = vector.broadcast %cst_62 : f32 to vector<1x16xf32>
    %85 = arith.divf %83, %84 : vector<1x16xf32>
    %c0_63 = arith.constant 0 : index
    %c0_64 = arith.constant 0 : index
    %86 = vector.load %arg9[%c0_63, %c0_64] : memref<1x16xf32, #tpu.memory_space<vmem>>, vector<1x16xf32>
    %cst_65 = arith.constant 9.99999974E-6 : f32
    %87 = vector.broadcast %cst_65 : f32 to vector<1x16xf32>
    %88 = arith.addf %85, %87 : vector<1x16xf32>
    %89 = math.rsqrt %88 : vector<1x16xf32>
    %90 = arith.mulf %86, %89 : vector<1x16xf32>
    %cst_66 = arith.constant dense<0.000000e+00> : vector<1x512xf32>
    %91 = tpu.matmul %90, %1, %cst_66 {dimension_numbers = #tpu.dot_dimension_numbers<[1], [0], [0], [1], [0, 0, 1, 1], [], []>} : vector<1x16xf32>, vector<16x512xf32>, vector<1x512xf32> -> vector<1x512xf32>
    %c0_67 = arith.constant 0 : index
    %c0_68 = arith.constant 0 : index
    %92 = vector.load %arg10[%c0_67, %c0_68] : memref<1x16xf32, #tpu.memory_space<vmem>>, vector<1x16xf32>
    %cst_69 = arith.constant dense<0.000000e+00> : vector<1x512xf32>
    %93 = tpu.matmul %92, %1, %cst_69 {dimension_numbers = #tpu.dot_dimension_numbers<[1], [0], [0], [1], [0, 0, 1, 1], [], []>} : vector<1x16xf32>, vector<16x512xf32>, vector<1x512xf32> -> vector<1x512xf32>
    %94 = vector.broadcast %91 : vector<1x512xf32> to vector<64x512xf32>
    %95 = arith.mulf %79, %94 : vector<64x512xf32>
    %96 = vector.broadcast %93 : vector<1x512xf32> to vector<64x512xf32>
    %97 = arith.addf %95, %96 : vector<64x512xf32>
    %cst_70 = arith.constant 0.000000e+00 : f32
    %98 = vector.broadcast %cst_70 : f32 to vector<64x512xf32>
    %99 = arith.maximumf %97, %98 : vector<64x512xf32>
    %100 = vector.shape_cast %99 : vector<64x512xf32> to vector<2x32x512xf32>
    %c0_71 = arith.constant 0 : index
    %c1_72 = arith.constant 1 : index
    %c0_73 = arith.constant 0 : index
    %101 = vector.load %arg14[%c0_71, %c1_72, %c0_73] : memref<2x34x512xf32, #tpu.memory_space<vmem>>, vector<2x32x512xf32>
    tpu.vector_store %arg14[%c0_71, %c1_72, %c0_73], %100 {strides = array<i32>} : memref<2x34x512xf32, #tpu.memory_space<vmem>>, vector<2x32x512xf32>,
    %cst_74 = arith.constant 0.000000e+00 : f32
    %102 = vector.broadcast %cst_74 : f32 to vector<64x512xf32>
    %c0_75 = arith.constant 0 : index
    %c0_76 = arith.constant 0 : index
    %c0_77 = arith.constant 0 : index
    %103 = vector.load %arg14[%c0_75, %c0_76, %c0_77] : memref<2x34x512xf32, #tpu.memory_space<vmem>>, vector<2x32x512xf32>
    %104 = vector.shape_cast %103 : vector<2x32x512xf32> to vector<64x512xf32>
    %c0_78 = arith.constant 0 : index
    %c0_79 = arith.constant 0 : index
    %c0_80 = arith.constant 0 : index
    %105 = vector.load %arg2[%c0_78, %c0_79, %c0_80] : memref<3x512x512xf32, #tpu.memory_space<vmem>>, vector<1x512x512xf32>
    %106 = vector.shape_cast %105 : vector<1x512x512xf32> to vector<512x512xf32>
    %cst_81 = arith.constant dense<0.000000e+00> : vector<64x512xf32>
    %107 = tpu.matmul %104, %106, %cst_81 {dimension_numbers = #tpu.dot_dimension_numbers<[1], [0], [0], [1], [0, 0, 1, 1], [], []>} : vector<64x512xf32>, vector<512x512xf32>, vector<64x512xf32> -> vector<64x512xf32>
    %108 = arith.addf %102, %107 : vector<64x512xf32>
    %c0_82 = arith.constant 0 : index
    %c1_83 = arith.constant 1 : index
    %c0_84 = arith.constant 0 : index
    %109 = vector.load %arg14[%c0_82, %c1_83, %c0_84] : memref<2x34x512xf32, #tpu.memory_space<vmem>>, vector<2x32x512xf32>
    %110 = vector.shape_cast %109 : vector<2x32x512xf32> to vector<64x512xf32>
    %c1_85 = arith.constant 1 : index
    %c0_86 = arith.constant 0 : index
    %c0_87 = arith.constant 0 : index
    %111 = vector.load %arg2[%c1_85, %c0_86, %c0_87] : memref<3x512x512xf32, #tpu.memory_space<vmem>>, vector<1x512x512xf32>
    %112 = vector.shape_cast %111 : vector<1x512x512xf32> to vector<512x512xf32>
    %cst_88 = arith.constant dense<0.000000e+00> : vector<64x512xf32>
    %113 = tpu.matmul %110, %112, %cst_88 {dimension_numbers = #tpu.dot_dimension_numbers<[1], [0], [0], [1], [0, 0, 1, 1], [], []>} : vector<64x512xf32>, vector<512x512xf32>, vector<64x512xf32> -> vector<64x512xf32>
    %114 = arith.addf %108, %113 : vector<64x512xf32>
    %c0_89 = arith.constant 0 : index
    %c2_90 = arith.constant 2 : index
    %c0_91 = arith.constant 0 : index
    %115 = vector.load %arg14[%c0_89, %c2_90, %c0_91] : memref<2x34x512xf32, #tpu.memory_space<vmem>>, vector<2x32x512xf32>
    %116 = vector.shape_cast %115 : vector<2x32x512xf32> to vector<64x512xf32>
    %c2_92 = arith.constant 2 : index
    %c0_93 = arith.constant 0 : index
    %c0_94 = arith.constant 0 : index
    %117 = vector.load %arg2[%c2_92, %c0_93, %c0_94] : memref<3x512x512xf32, #tpu.memory_space<vmem>>, vector<1x512x512xf32>
    %118 = vector.shape_cast %117 : vector<1x512x512xf32> to vector<512x512xf32>
    %cst_95 = arith.constant dense<0.000000e+00> : vector<64x512xf32>
    %119 = tpu.matmul %116, %118, %cst_95 {dimension_numbers = #tpu.dot_dimension_numbers<[1], [0], [0], [1], [0, 0, 1, 1], [], []>} : vector<64x512xf32>, vector<512x512xf32>, vector<64x512xf32> -> vector<64x512xf32>
    %120 = arith.addf %114, %119 : vector<64x512xf32>
    %cst_96 = arith.constant dense<0.000000e+00> : vector<512xf32>
    %121 = vector.multi_reduction <add>, %120, %cst_96 [0] : vector<64x512xf32> to vector<512xf32>
    %122 = vector.shape_cast %121 : vector<512xf32> to vector<1x512xf32>
    %cst_97 = arith.constant dense<0.000000e+00> : vector<1x16xf32>
    %123 = tpu.matmul %122, %2, %cst_97 {dimension_numbers = #tpu.dot_dimension_numbers<[1], [0], [0], [1], [0, 0, 1, 1], [], []>} : vector<1x512xf32>, vector<512x16xf32>, vector<1x16xf32> -> vector<1x16xf32>
    %cst_98 = arith.constant 2.048000e+03 : f32
    %124 = vector.broadcast %cst_98 : f32 to vector<1x16xf32>
    %125 = arith.divf %123, %124 : vector<1x16xf32>
    %cst_99 = arith.constant dense<0.000000e+00> : vector<1x512xf32>
    %126 = tpu.matmul %125, %1, %cst_99 {dimension_numbers = #tpu.dot_dimension_numbers<[1], [0], [0], [1], [0, 0, 1, 1], [], []>} : vector<1x16xf32>, vector<16x512xf32>, vector<1x512xf32> -> vector<1x512xf32>
    %127 = vector.broadcast %126 : vector<1x512xf32> to vector<64x512xf32>
    %128 = arith.subf %120, %127 : vector<64x512xf32>
    %129 = arith.mulf %128, %128 : vector<64x512xf32>
    %cst_100 = arith.constant dense<0.000000e+00> : vector<512xf32>
    %130 = vector.multi_reduction <add>, %129, %cst_100 [0] : vector<64x512xf32> to vector<512xf32>
    %131 = vector.shape_cast %130 : vector<512xf32> to vector<1x512xf32>
    %cst_101 = arith.constant dense<0.000000e+00> : vector<1x16xf32>
    %132 = tpu.matmul %131, %2, %cst_101 {dimension_numbers = #tpu.dot_dimension_numbers<[1], [0], [0], [1], [0, 0, 1, 1], [], []>} : vector<1x512xf32>, vector<512x16xf32>, vector<1x16xf32> -> vector<1x16xf32>
    %cst_102 = arith.constant 2.048000e+03 : f32
    %133 = vector.broadcast %cst_102 : f32 to vector<1x16xf32>
    %134 = arith.divf %132, %133 : vector<1x16xf32>
    %c0_103 = arith.constant 0 : index
    %c0_104 = arith.constant 0 : index
    %135 = vector.load %arg11[%c0_103, %c0_104] : memref<1x16xf32, #tpu.memory_space<vmem>>, vector<1x16xf32>
    %cst_105 = arith.constant 9.99999974E-6 : f32
    %136 = vector.broadcast %cst_105 : f32 to vector<1x16xf32>
    %137 = arith.addf %134, %136 : vector<1x16xf32>
    %138 = math.rsqrt %137 : vector<1x16xf32>
    %139 = arith.mulf %135, %138 : vector<1x16xf32>
    %cst_106 = arith.constant dense<0.000000e+00> : vector<1x512xf32>
    %140 = tpu.matmul %139, %1, %cst_106 {dimension_numbers = #tpu.dot_dimension_numbers<[1], [0], [0], [1], [0, 0, 1, 1], [], []>} : vector<1x16xf32>, vector<16x512xf32>, vector<1x512xf32> -> vector<1x512xf32>
    %c0_107 = arith.constant 0 : index
    %c0_108 = arith.constant 0 : index
    %141 = vector.load %arg12[%c0_107, %c0_108] : memref<1x16xf32, #tpu.memory_space<vmem>>, vector<1x16xf32>
    %cst_109 = arith.constant dense<0.000000e+00> : vector<1x512xf32>
    %142 = tpu.matmul %141, %1, %cst_109 {dimension_numbers = #tpu.dot_dimension_numbers<[1], [0], [0], [1], [0, 0, 1, 1], [], []>} : vector<1x16xf32>, vector<16x512xf32>, vector<1x512xf32> -> vector<1x512xf32>
    %143 = vector.broadcast %140 : vector<1x512xf32> to vector<64x512xf32>
    %144 = arith.mulf %128, %143 : vector<64x512xf32>
    %145 = vector.broadcast %142 : vector<1x512xf32> to vector<64x512xf32>
    %146 = arith.addf %144, %145 : vector<64x512xf32>
    %147 = vector.shape_cast %146 : vector<64x512xf32> to vector<2x32x512xf32>
    %148 = arith.addf %147, %0 : vector<2x32x512xf32>
    %cst_110 = arith.constant 0.000000e+00 : f32
    %149 = vector.broadcast %cst_110 : f32 to vector<2x32x512xf32>
    %150 = arith.maximumf %148, %149 : vector<2x32x512xf32>
    %c0_111 = arith.constant 0 : index
    %c0_112 = arith.constant 0 : index
    %c0_113 = arith.constant 0 : index
    %151 = vector.load %arg13[%c0_111, %c0_112, %c0_113] : memref<2x32x512xf32, #tpu.memory_space<vmem>>, vector<2x32x512xf32>
    tpu.vector_store %arg13[%c0_111, %c0_112, %c0_113], %150 {strides = array<i32>} : memref<2x32x512xf32, #tpu.memory_space<vmem>>, vector<2x32x512xf32>,
    return
  }
}

</mosaic_0001>

<bundles_post_ra>
// kernel: tpu_custom_call.1
= control target key start
LH: loop header
LB: loop body
LE: loop exit
PB: predicated region body
PF: predicated region fallthrough
CT: control target
= control target key end

     0   :  { %18 = vsyncpa [#allocation4], 0  ;;  %s13748_s0 = inlined_call_operand.hbm [shape: f32[2,32,512], index: 0, kind: input, shape index: {}]   ;;  %s13749_s1 = inlined_call_operand.hbm [shape: f32[3,512,512], index: 1, kind: input, shape index: {}]   ;;  %s13750_s2 = inlined_call_operand.hbm [shape: f32[3,512,512], index: 2, kind: input, shape index: {}]   ;;  %s13751_s3 = inlined_call_operand.hbm [shape: f32[16,512], index: 3, kind: input, shape index: {}]   ;;  %s13752_s4 = inlined_call_operand.vmem [shape: f32[512,16], index: 4, kind: input, shape index: {}]   ;;  %s13753_s5 = inlined_call_operand.vmem [shape: f32[16,4], index: 5, kind: input, shape index: {}]   ;;  %s13754_s6 = inlined_call_operand.hbm [shape: f32[1,4], index: 6, kind: input, shape index: {}]   ;;  %s13755_s7 = inlined_call_operand.hbm [shape: f32[4,16], index: 7, kind: input, shape index: {}]   ;;  %s13756_s8 = inlined_call_operand.hbm [shape: f32[1,16], index: 8, kind: input, shape index: {}]   ;;  %s13757_s9 = inlined_call_operand.hbm [shape: f32[1,16], index: 9, kind: input, shape index: {}]   ;;  %s13758_s10 = inlined_call_operand.hbm [shape: f32[1,16], index: 10, kind: input, shape index: {}]   ;;  %s13759_s11 = inlined_call_operand.hbm [shape: f32[1,16], index: 11, kind: input, shape index: {}]   ;;  %s13760_s12 = inlined_call_operand.hbm [shape: f32[1,16], index: 12, kind: input, shape index: {}]   ;;  %s13761_s13 = inlined_call_operand.hbm [shape: f32[2,32,512], index: 13, kind: output, shape index: {}]  }
   0x1   :  { %19 = vsyncpa [#allocation7], 0 }
   0x2   :  { %20 = vsyncpa [#allocation10], 0 }
   0x3   :  { %21 = vsyncpa [#allocation13], 0 }
   0x4   :  { %22 = vsyncpa [#allocation16], 0 }
   0x5   :  { %23 = vsyncpa [#allocation19], 0 }
   0x6   :  { %24 = vsyncpa [#allocation5], 0  ;;  %s9503_s25 = smov [#allocation6]   ;;  %s9504_s27 = smov [#allocation9]  }
   0x7   :  { %s42_s26 = sshll.u32 %s9503_s25, 4  ;;  %s66_s28 = sshll.u32 %s9504_s27, 4  ;;  %s43_s26 = int_to_ptr.vmem [resolvable:$true] %s42_s26  ;;  %s67_s28 = int_to_ptr.vmem [resolvable:$true] %s66_s28 }
   0x8   :  { %s9257_s29 = scalar_lea.vmem %s43_s26, 98304  ;;  %p9262_p1 = scmp.lt.s32.totalorder %s43_s26, %s43_s26 }
   0x9   :  { %p9258_p0 = scmp.ne.s32.totalorder %s43_s26, %s9257_s29  ;;  %p9263_p2 = scmp.lt.s32.totalorder %s9257_s29, %s9257_s29 }
   0xb   :  { %p9264_p3 = por %p9263_p2, %p9262_p1 }
   0xd   :  { %p9265_p4 = pnand %p9264_p3, %p9258_p0 }
   0xf   :  { %9268 = shalt.err (!%p9265_p4)
}
  0x10   :  { %s9505_s30 = smov 512   ;;  %s9506_s14 = smov 32  }
  0x11   :  { %48 = dma.hbm_to_vmem [thread:$0]  %s13749_s1, 98304, %s43_s26, [#allocation7], %s9505_s30, %s9505_s30, %s9506_s14  }
  0x12   :  { %s9277_s17 = scalar_lea.vmem %s67_s28, 1024  ;;  %p9282_p6 = scmp.lt.s32.totalorder %s67_s28, %s67_s28 }
  0x13   :  { %p9278_p5 = scmp.ne.s32.totalorder %s67_s28, %s9277_s17  ;;  %p9283_p7 = scmp.lt.s32.totalorder %s9277_s17, %s9277_s17 }
  0x15   :  { %p9284_p8 = por %p9283_p7, %p9282_p6 }
  0x17   :  { %p9285_p9 = pnand %p9284_p8, %p9278_p5 }
  0x19   :  { %9288 = shalt.err (!%p9285_p9)
}
  0x1a   :  { %72 = dma.hbm_to_vmem [thread:$0]  %s13751_s3, 1024, %s67_s28, [#allocation10], %s9505_s30, %s9505_s30, %s9506_s14  }
  0x1b   :  { %s9507_s20 = smov [#allocation12]   ;;  %s9508_s22 = smov [#allocation15]  }
  0x1c   :  { %s93_s21 = sshll.u32 %s9507_s20, 4  ;;  %s113_s23 = sshll.u32 %s9508_s22, 4  ;;  %s94_s21 = int_to_ptr.vmem [resolvable:$true] %s93_s21  ;;  %s114_s23 = int_to_ptr.vmem [resolvable:$true] %s113_s23 }
  0x1d   :  { %s9297_s1 = scalar_lea.vmem %s94_s21, 64  ;;  %p9302_p11 = scmp.lt.s32.totalorder %s94_s21, %s94_s21 }
  0x1e   :  { %p9298_p10 = scmp.ne.s32.totalorder %s94_s21, %s9297_s1  ;;  %p9303_p12 = scmp.lt.s32.totalorder %s9297_s1, %s9297_s1 }
  0x20   :  { %p9304_p13 = por %p9303_p12, %p9302_p11 }
  0x22   :  { %p9305_p0 = pnand %p9304_p13, %p9298_p10 }
  0x24   :  { %9308 = shalt.err (!%p9305_p0)
}
  0x25   :  { %96 = dma.hbm_to_vmem [thread:$0]  %s13755_s7, 64, %s94_s21, [#allocation13]  }
  0x26   :  { %s9317_s26 = scalar_lea.vmem %s114_s23, 16  ;;  %s9321_s3 = scalar_lea.vmem %s114_s23, 32 }
  0x27   :  { %p9318_p1 = scmp.ne.s32.totalorder %s114_s23, %s9317_s26  ;;  %p9322_p2 = scmp.lt.s32.totalorder %s114_s23, %s114_s23 }
  0x28   :  { %p9323_p3 = scmp.lt.s32.totalorder %s9321_s3, %s9317_s26 }
  0x2a   :  { %p9324_p4 = por %p9323_p3, %p9322_p2 }
  0x2c   :  { %p9325_p5 = pnand %p9324_p4, %p9318_p1 }
  0x2e   :  { %9328 = shalt.err (!%p9325_p5)
}
  0x2f   :  { %116 = dma.hbm_to_vmem [thread:$0]  %s13757_s9, 16, %s114_s23, [#allocation16]  }
  0x30   :  { %s9509_s29 = smov [#allocation18]   ;;  %s9510_s16 = smov [#allocation3]  }
  0x31   :  { %s133_s15 = sshll.u32 %s9509_s29, 4  ;;  %s30_s17 = sshll.u32 %s9510_s16, 4  ;;  %s134_s15 = int_to_ptr.vmem [resolvable:$true] %s133_s15  ;;  %s31_s17 = int_to_ptr.vmem [resolvable:$true] %s30_s17 }
  0x32   :  { %s9337_s18 = scalar_lea.vmem %s134_s15, 16  ;;  %s9341_s7 = scalar_lea.vmem %s134_s15, 32 }
  0x33   :  { %p9338_p6 = scmp.ne.s32.totalorder %s134_s15, %s9337_s18  ;;  %p9342_p7 = scmp.lt.s32.totalorder %s134_s15, %s134_s15 }
  0x34   :  { %p9343_p8 = scmp.lt.s32.totalorder %s9341_s7, %s9337_s18 }
  0x36   :  { %p9344_p9 = por %p9343_p8, %p9342_p7 }
  0x38   :  { %p9345_p10 = pnand %p9344_p9, %p9338_p6 }
  0x3a   :  { %9348 = shalt.err (!%p9345_p10)
}
  0x3b   :  { %136 = dma.hbm_to_vmem [thread:$0]  %s13759_s11, 16, %s134_s15, [#allocation19]  }
  0x3c   :  { %s9357_s21 = scalar_lea.vmem %s31_s17, 4096  ;;  %p9362_p12 = scmp.lt.s32.totalorder %s31_s17, %s31_s17 }
  0x3d   :  { %p9358_p11 = scmp.ne.s32.totalorder %s31_s17, %s9357_s21  ;;  %p9363_p13 = scmp.lt.s32.totalorder %s9357_s21, %s9357_s21 }
  0x3f   :  { %p9364_p0 = por %p9363_p13, %p9362_p12 }
  0x41   :  { %p9365_p1 = pnand %p9364_p0, %p9358_p11 }
  0x43   :  { %9368 = shalt.err (!%p9365_p1)
}
  0x44   :  { %36 = dma.hbm_to_vmem [thread:$0]  %s13748_s0, 4096, %s31_s17, [#allocation4], %s9505_s30, %s9505_s30, %s9506_s14  }
  0x45   :  { %s9511_s23 = smov [#allocation8]   ;;  %s9512_s24 = smov [#allocation11]  }
  0x46   :  { %s54_s1 = sshll.u32 %s9511_s23, 4  ;;  %s83_s25 = sshll.u32 %s9512_s24, 4  ;;  %s55_s1 = int_to_ptr.vmem [resolvable:$true] %s54_s1  ;;  %s84_s25 = int_to_ptr.vmem [resolvable:$true] %s83_s25 }
  0x47   :  { %s9377_s11 = scalar_lea.vmem %s55_s1, 98304  ;;  %p9382_p3 = scmp.lt.s32.totalorder %s55_s1, %s55_s1 }
  0x48   :  { %p9378_p2 = scmp.ne.s32.totalorder %s55_s1, %s9377_s11  ;;  %p9383_p4 = scmp.lt.s32.totalorder %s9377_s11, %s9377_s11 }
  0x4a   :  { %p9384_p5 = por %p9383_p4, %p9382_p3 }
  0x4c   :  { %p9385_p6 = pnand %p9384_p5, %p9378_p2 }
  0x4e   :  { %9388 = shalt.err (!%p9385_p6)
}
  0x4f   :  { %60 = dma.hbm_to_vmem [thread:$0]  %s13750_s2, 98304, %s55_s1, [#allocation7], %s9505_s30, %s9505_s30, %s9506_s14  }
  0x50   :  { %s9397_s0 = scalar_lea.vmem %s84_s25, 16  ;;  %s9401_s27 = scalar_lea.vmem %s84_s25, 32 }
  0x51   :  { %p9398_p7 = scmp.ne.s32.totalorder %s84_s25, %s9397_s0  ;;  %p9402_p8 = scmp.lt.s32.totalorder %s84_s25, %s84_s25 }
  0x52   :  { %p9403_p9 = scmp.lt.s32.totalorder %s9401_s27, %s9397_s0 }
  0x54   :  { %p9404_p10 = por %p9403_p9, %p9402_p8 }
  0x56   :  { %p9405_p11 = pnand %p9404_p10, %p9398_p7 }
  0x58   :  { %9408 = shalt.err (!%p9405_p11)
}
  0x59   :  { %86 = dma.hbm_to_vmem [thread:$0]  %s13754_s6, 16, %s84_s25, [#allocation10]  }
  0x5a   :  { %s9513_s15 = smov [#allocation14]   ;;  %s9514_s17 = smov [#allocation17]  }
  0x5b   :  { %s103_s16 = sshll.u32 %s9513_s15, 4  ;;  %s123_s18 = sshll.u32 %s9514_s17, 4  ;;  %s104_s16 = int_to_ptr.vmem [resolvable:$true] %s103_s16  ;;  %s124_s18 = int_to_ptr.vmem [resolvable:$true] %s123_s18 }
  0x5c   :  { %s9417_s7 = scalar_lea.vmem %s104_s16, 16  ;;  %s9421_s2 = scalar_lea.vmem %s104_s16, 32 }
  0x5d   :  { %p9418_p12 = scmp.ne.s32.totalorder %s104_s16, %s9417_s7  ;;  %p9422_p13 = scmp.lt.s32.totalorder %s104_s16, %s104_s16 }
  0x5e   :  { %p9423_p0 = scmp.lt.s32.totalorder %s9421_s2, %s9417_s7 }
  0x60   :  { %p9424_p1 = por %p9423_p0, %p9422_p13 }
  0x62   :  { %p9425_p2 = pnand %p9424_p1, %p9418_p12 }
  0x64   :  { %9428 = shalt.err (!%p9425_p2)
}
  0x65   :  { %106 = dma.hbm_to_vmem [thread:$0]  %s13756_s8, 16, %s104_s16, [#allocation13]  }
  0x66   :  { %s9437_s21 = scalar_lea.vmem %s124_s18, 16  ;;  %s9441_s6 = scalar_lea.vmem %s124_s18, 32 }
  0x67   :  { %p9438_p3 = scmp.ne.s32.totalorder %s124_s18, %s9437_s21  ;;  %p9442_p4 = scmp.lt.s32.totalorder %s124_s18, %s124_s18 }
  0x68   :  { %p9443_p5 = scmp.lt.s32.totalorder %s9441_s6, %s9437_s21 }
  0x6a   :  { %p9444_p6 = por %p9443_p5, %p9442_p4 }
  0x6c   :  { %p9445_p7 = pnand %p9444_p6, %p9438_p3 }
  0x6e   :  { %9448 = shalt.err (!%p9445_p7)
}
  0x6f   :  { %126 = dma.hbm_to_vmem [thread:$0]  %s13758_s10, 16, %s124_s18, [#allocation16]  }
  0x70   :  { %s9515_s23 = smov [#allocation20]  }
  0x71   :  { %s143_s1 = sshll.u32 %s9515_s23, 4  ;;  %s144_s1 = int_to_ptr.vmem [resolvable:$true] %s143_s1 }
  0x72   :  { %s9457_s24 = scalar_lea.vmem %s144_s1, 16  ;;  %s9461_s25 = scalar_lea.vmem %s144_s1, 32 }
  0x73   :  { %p9458_p8 = scmp.ne.s32.totalorder %s144_s1, %s9457_s24  ;;  %p9462_p9 = scmp.lt.s32.totalorder %s144_s1, %s144_s1 }
  0x74   :  { %p9463_p10 = scmp.lt.s32.totalorder %s9461_s25, %s9457_s24 }
  0x76   :  { %p9464_p11 = por %p9463_p10, %p9462_p9 }
  0x78   :  { %p9465_p12 = pnand %p9464_p11, %p9458_p8 }
  0x7a   :  { %9468 = shalt.err (!%p9465_p12)
}
  0x7b   :  { %146 = dma.hbm_to_vmem [thread:$0]  %s13760_s12, 16, %s144_s1, [#allocation19]  }
  0x7c   :  { %9489 = dma.done.wait [#allocation4], 4096  }
  0x7d   :  { %9490 = vsyncadd [#allocation4], 4294963200 }
  0x7e   :  { %9491 = dma.done.wait [#allocation7], 196608  }
  0x7f   :  { %9492 = vsyncadd [#allocation7], 4294770688 }
  0x80   :  { %9493 = dma.done.wait [#allocation10], 1040  }
  0x81   :  { %9494 = vsyncadd [#allocation10], 4294966256 }
  0x82   :  { %9495 = dma.done.wait [#allocation13], 80  }
  0x83   :  { %9496 = vsyncadd [#allocation13], 4294967216 }
  0x84   :  { %9497 = dma.done.wait [#allocation16], 32  }
  0x85   :  { %9498 = vsyncadd [#allocation16], 4294967264 }
  0x86   :  { %9499 = dma.done.wait [#allocation19], 32  }
  0x87   :  { %9500 = vsyncadd [#allocation19], 4294967264  ;;  %v979_v0 = vld [vmem:[#allocation6 + $0x9e8] sm:$0xff]  ;;  %v978_v2 = vld [vmem:[#allocation6 + $0x9e0] sm:$0xff]  ;;  %vm331_vm0 = vcmask 1040384   ;;  %vm812_vm1 = vcmask 1046528  }
  0x88   :  { %v1107_v1 = vld [vmem:[#allocation6 + $0xde8] sm:$0xff]  ;;  %1174 = vmatprep.subr.mxu0 %v979_v0  ;;  %v1106_v3 = vld [vmem:[#allocation6 + $0xde0] sm:$0xff]  ;;  %vm2110_vm3 = vcmask 1045504   ;;  %vm3036_vm4 = vcmask 1041409   ;;  %vm9517_vm5 = vmmov 0   ;;  %vm3196_vm6 = vcmask 130048  }
  0x89   :  { %1287 = vmatprep.subr.mxu1 %v1107_v1  ;;  %v975_v4 = vld [vmem:[#allocation6 + $0x9c8] sm:$0xff]  ;;  %1175 = vmatpush1.msra.mxu0 %v978_v2  ;;  %v974_v6 = vld [vmem:[#allocation6 + $0x9c0] sm:$0xff]  ;;  %vm3283_vm7 = vcmask 1043456   ;;  %vm3279_vm8 = vcmask 31744  }
  0x8a   :  { %v1103_v5 = vld [vmem:[#allocation6 + $0xdc8] sm:$0xff]  ;;  %1288 = vmatpush1.msra.mxu1 %v1106_v3  ;;  %v1102_v7 = vld [vmem:[#allocation6 + $0xdc0] sm:$0xff]  ;;  %1176 = vmatprep.subr.mxu0 %v975_v4 }
  0x8b   :  { %v971_v8 = vld [vmem:[#allocation6 + $0x9a8] sm:$0xff]  ;;  %1289 = vmatprep.subr.mxu1 %v1103_v5  ;;  %v970_v10 = vld [vmem:[#allocation6 + $0x9a0] sm:$0xff]  ;;  %1177 = vmatpush1.msra.mxu0 %v974_v6 }
  0x8c   :  { %v1099_v9 = vld [vmem:[#allocation6 + $0xda8] sm:$0xff]  ;;  %v1098_v11 = vld [vmem:[#allocation6 + $0xda0] sm:$0xff]  ;;  %1290 = vmatpush1.msra.mxu1 %v1102_v7  ;;  %1178 = vmatprep.subr.mxu0 %v971_v8 }
  0x8d   :  { %v967_v12 = vld [vmem:[#allocation6 + $0x988] sm:$0xff]  ;;  %1291 = vmatprep.subr.mxu1 %v1099_v9  ;;  %v966_v14 = vld [vmem:[#allocation6 + $0x980] sm:$0xff]  ;;  %1179 = vmatpush1.msra.mxu0 %v970_v10 }
  0x8e   :  { %v1095_v13 = vld [vmem:[#allocation6 + $0xd88] sm:$0xff]  ;;  %v1094_v15 = vld [vmem:[#allocation6 + $0xd80] sm:$0xff]  ;;  %1292 = vmatpush1.msra.mxu1 %v1098_v11  ;;  %1180 = vmatprep.subr.mxu0 %v967_v12 }
  0x8f   :  { %v963_v16 = vld [vmem:[#allocation6 + $0x968] sm:$0xff]  ;;  %1293 = vmatprep.subr.mxu1 %v1095_v13  ;;  %v962_v18 = vld [vmem:[#allocation6 + $0x960] sm:$0xff]  ;;  %1181 = vmatpush1.msra.mxu0 %v966_v14 }
  0x90   :  { %v1091_v17 = vld [vmem:[#allocation6 + $0xd68] sm:$0xff]  ;;  %v1090_v19 = vld [vmem:[#allocation6 + $0xd60] sm:$0xff]  ;;  %1294 = vmatpush1.msra.mxu1 %v1094_v15  ;;  %1182 = vmatprep.subr.mxu0 %v963_v16 }
  0x91   :  { %v959_v20 = vld [vmem:[#allocation6 + $0x948] sm:$0xff]  ;;  %1295 = vmatprep.subr.mxu1 %v1091_v17  ;;  %v958_v22 = vld [vmem:[#allocation6 + $0x940] sm:$0xff]  ;;  %1183 = vmatpush1.msra.mxu0 %v962_v18 }
  0x92   :  { %v1087_v21 = vld [vmem:[#allocation6 + $0xd48] sm:$0xff]  ;;  %v1086_v23 = vld [vmem:[#allocation6 + $0xd40] sm:$0xff]  ;;  %1296 = vmatpush1.msra.mxu1 %v1090_v19  ;;  %1184 = vmatprep.subr.mxu0 %v959_v20 }
  0x93   :  { %v955_v24 = vld [vmem:[#allocation6 + $0x928] sm:$0xff]  ;;  %1297 = vmatprep.subr.mxu1 %v1087_v21  ;;  %v954_v26 = vld [vmem:[#allocation6 + $0x920] sm:$0xff]  ;;  %1185 = vmatpush1.msra.mxu0 %v958_v22 }
  0x94   :  { %v1083_v25 = vld [vmem:[#allocation6 + $0xd28] sm:$0xff]  ;;  %v1082_v27 = vld [vmem:[#allocation6 + $0xd20] sm:$0xff]  ;;  %1298 = vmatpush1.msra.mxu1 %v1086_v23  ;;  %1186 = vmatprep.subr.mxu0 %v955_v24 }
  0x95   :  { %v951_v28 = vld [vmem:[#allocation6 + $0x908] sm:$0xff]  ;;  %1299 = vmatprep.subr.mxu1 %v1083_v25  ;;  %v950_v30 = vld [vmem:[#allocation6 + $0x900] sm:$0xff]  ;;  %1187 = vmatpush1.msra.mxu0 %v954_v26 }
  0x96   :  { %v1079_v29 = vld [vmem:[#allocation6 + $0xd08] sm:$0xff]  ;;  %v1078_v31 = vld [vmem:[#allocation6 + $0xd00] sm:$0xff]  ;;  %1300 = vmatpush1.msra.mxu1 %v1082_v27  ;;  %1188 = vmatprep.subr.mxu0 %v951_v28 }
  0x97   :  { %v947_v32 = vld [vmem:[#allocation6 + $0x8e8] sm:$0xff]  ;;  %1301 = vmatprep.subr.mxu1 %v1079_v29  ;;  %v946_v34 = vld [vmem:[#allocation6 + $0x8e0] sm:$0xff]  ;;  %1189 = vmatpush1.msra.mxu0 %v950_v30 }
  0x98   :  { %v1075_v33 = vld [vmem:[#allocation6 + $0xce8] sm:$0xff]  ;;  %v1074_v35 = vld [vmem:[#allocation6 + $0xce0] sm:$0xff]  ;;  %1302 = vmatpush1.msra.mxu1 %v1078_v31  ;;  %1190 = vmatprep.subr.mxu0 %v947_v32  ;;  %v9639_v31 = vld [vmem:[#allocation3 + $0x18] sm:$0xff] }
  0x99   :  { %v943_v36 = vld [vmem:[#allocation6 + $0x8c8] sm:$0xff]  ;;  %1303 = vmatprep.subr.mxu1 %v1075_v33  ;;  %v942_v38 = vld [vmem:[#allocation6 + $0x8c0] sm:$0xff]  ;;  %1191 = vmatpush1.msra.mxu0 %v946_v34  ;;  %v335_v33 = vrot.slane %v9639_v31, 7 }
  0x9a   :  { %v1071_v37 = vld [vmem:[#allocation6 + $0xcc8] sm:$0xff]  ;;  %v1070_v39 = vld [vmem:[#allocation6 + $0xcc0] sm:$0xff]  ;;  %1304 = vmatpush1.msra.mxu1 %v1074_v35  ;;  %1192 = vmatprep.subr.mxu0 %v943_v36  ;;  %v9644_v35 = vld [vmem:[#allocation3 + $0x10] sm:$0xff] }
  0x9b   :  { %v939_v40 = vld [vmem:[#allocation6 + $0x8a8] sm:$0xff]  ;;  %1305 = vmatprep.subr.mxu1 %v1071_v37  ;;  %v938_v42 = vld [vmem:[#allocation6 + $0x8a0] sm:$0xff]  ;;  %1193 = vmatpush1.msra.mxu0 %v942_v38  ;;  %431 = vst [vmem:[#allocation2 + $0x18] sm:$0xfe] %v335_v33 }
  0x9c   :  { %v1067_v41 = vld [vmem:[#allocation6 + $0xca8] sm:$0xff]  ;;  %v1066_v43 = vld [vmem:[#allocation6 + $0xca0] sm:$0xff]  ;;  %1306 = vmatpush1.msra.mxu1 %v1070_v39  ;;  %1194 = vmatprep.subr.mxu0 %v939_v40  ;;  %v334_v39 = vrot.slane %v9644_v35, 7 }
  0x9d   :  { %v935_v44 = vld [vmem:[#allocation6 + $0x888] sm:$0xff]  ;;  %1307 = vmatprep.subr.mxu1 %v1067_v41  ;;  %v934_v46 = vld [vmem:[#allocation6 + $0x880] sm:$0xff]  ;;  %1195 = vmatpush1.msra.mxu0 %v938_v42 }
  0x9e   :  { %v1063_v45 = vld [vmem:[#allocation6 + $0xc88] sm:$0xff]  ;;  %v1062_v47 = vld [vmem:[#allocation6 + $0xc80] sm:$0xff]  ;;  %1308 = vmatpush1.msra.mxu1 %v1066_v43  ;;  %1196 = vmatprep.subr.mxu0 %v935_v44  ;;  %430 = vst [vmem:[#allocation2 + $0x10] sm:$0xfe] %v334_v39 }
  0x9f   :  { %v931_v48 = vld [vmem:[#allocation6 + $0x868] sm:$0xff]  ;;  %1309 = vmatprep.subr.mxu1 %v1063_v45  ;;  %v930_v50 = vld [vmem:[#allocation6 + $0x860] sm:$0xff]  ;;  %1197 = vmatpush1.msra.mxu0 %v934_v46 }
  0xa0   :  { %v1059_v49 = vld [vmem:[#allocation6 + $0xc68] sm:$0xff]  ;;  %v1058_v51 = vld [vmem:[#allocation6 + $0xc60] sm:$0xff]  ;;  %1310 = vmatpush1.msra.mxu1 %v1062_v47  ;;  %1198 = vmatprep.subr.mxu0 %v931_v48  ;;  %v9658_v48 = vld [vmem:[#allocation3 + $0x38] sm:$0xff] }
  0xa1   :  { %v927_v52 = vld [vmem:[#allocation6 + $0x848] sm:$0xff]  ;;  %1311 = vmatprep.subr.mxu1 %v1059_v49  ;;  %v926_v54 = vld [vmem:[#allocation6 + $0x840] sm:$0xff]  ;;  %1199 = vmatpush1.msra.mxu0 %v930_v50 }
  0xa2   :  { %v1055_v53 = vld [vmem:[#allocation6 + $0xc48] sm:$0xff]  ;;  %v1054_v55 = vld [vmem:[#allocation6 + $0xc40] sm:$0xff]  ;;  %1312 = vmatpush1.msra.mxu1 %v1058_v51  ;;  %1200 = vmatprep.subr.mxu0 %v927_v52  ;;  %v9662_v51 = vld [vmem:[#allocation3 + $0x30] sm:$0xff] }
  0xa3   :  { %v923_v56 = vld [vmem:[#allocation6 + $0x828] sm:$0xff]  ;;  %1313 = vmatprep.subr.mxu1 %v1055_v53  ;;  %v922_v58 = vld [vmem:[#allocation6 + $0x820] sm:$0xff]  ;;  %1201 = vmatpush1.msra.mxu0 %v926_v54 }
  0xa4   :  { %v1051_v57 = vld [vmem:[#allocation6 + $0xc28] sm:$0xff]  ;;  %v1050_v59 = vld [vmem:[#allocation6 + $0xc20] sm:$0xff]  ;;  %1314 = vmatpush1.msra.mxu1 %v1054_v55  ;;  %1202 = vmatprep.subr.mxu0 %v923_v56 }
  0xa5   :  { %v919_v60 = vld [vmem:[#allocation6 + $0x808] sm:$0xff]  ;;  %1315 = vmatprep.subr.mxu1 %v1051_v57  ;;  %v918_v62 = vld [vmem:[#allocation6 + $0x800] sm:$0xff]  ;;  %1203 = vmatpush1.msra.mxu0 %v922_v58  ;;  %v342_v57 = vrot.slane %v9658_v48, 7 }
  0xa6   :  { %v1047_v61 = vld [vmem:[#allocation6 + $0xc08] sm:$0xff]  ;;  %v1046_v63 = vld [vmem:[#allocation6 + $0xc00] sm:$0xff]  ;;  %1316 = vmatpush1.msra.mxu1 %v1050_v59  ;;  %1204 = vmatprep.subr.mxu0 %v919_v60 }
  0xa7   :  { %v1043_v0 = vld [vmem:[#allocation6 + $0xbe8] sm:$0xff]  ;;  %1317 = vmatprep.subr.mxu1 %v1047_v61  ;;  %v1042_v2 = vld [vmem:[#allocation6 + $0xbe0] sm:$0xff]  ;;  %1205 = vmatpush1.msra.mxu0 %v918_v62  ;;  %v340_v61 = vrot.slane %v9662_v51, 7  ;;  %v920_v51 = vld [vmem:[#allocation6 + $0x810] sm:$0xff] }
  0xa8   :  { %v1171_v1 = vld [vmem:[#allocation6 + $0xfe8] sm:$0xff]  ;;  %v1170_v3 = vld [vmem:[#allocation6 + $0xfe0] sm:$0xff]  ;;  %1318 = vmatpush1.msra.mxu1 %v1046_v63  ;;  %1206 = vmatprep.subr.mxu0 %v1043_v0 }
  0xa9   :  { %v1039_v4 = vld [vmem:[#allocation6 + $0xbc8] sm:$0xff]  ;;  %1319 = vmatprep.subr.mxu1 %v1171_v1  ;;  %v1038_v6 = vld [vmem:[#allocation6 + $0xbc0] sm:$0xff]  ;;  %1207 = vmatpush2.msra.mxu0 %v1042_v2 }
  0xaa   :  { %v1167_v5 = vld [vmem:[#allocation6 + $0xfc8] sm:$0xff]  ;;  %v1166_v7 = vld [vmem:[#allocation6 + $0xfc0] sm:$0xff]  ;;  %1320 = vmatpush2.msra.mxu1 %v1170_v3  ;;  %1208 = vmatprep.subr.mxu0 %v1039_v4 }
  0xab   :  { %v1035_v8 = vld [vmem:[#allocation6 + $0xba8] sm:$0xff]  ;;  %1321 = vmatprep.subr.mxu1 %v1167_v5  ;;  %v1034_v10 = vld [vmem:[#allocation6 + $0xba0] sm:$0xff]  ;;  %1209 = vmatpush2.msra.mxu0 %v1038_v6 }
  0xac   :  { %v1163_v9 = vld [vmem:[#allocation6 + $0xfa8] sm:$0xff]  ;;  %v1162_v11 = vld [vmem:[#allocation6 + $0xfa0] sm:$0xff]  ;;  %1322 = vmatpush2.msra.mxu1 %v1166_v7  ;;  %1210 = vmatprep.subr.mxu0 %v1035_v8  ;;  %v9680_v7 = vsel %vm331_vm0, %v335_v33, %v342_v57  ;;  %v759_v8 = vld [vmem:[#allocation2 + $0x18] sm:$0xfe] }
  0xad   :  { %v1031_v12 = vld [vmem:[#allocation6 + $0xb88] sm:$0xff]  ;;  %1323 = vmatprep.subr.mxu1 %v1163_v9  ;;  %v1030_v14 = vld [vmem:[#allocation6 + $0xb80] sm:$0xff]  ;;  %1211 = vmatpush2.msra.mxu0 %v1034_v10 }
  0xae   :  { %v1159_v13 = vld [vmem:[#allocation6 + $0xf88] sm:$0xff]  ;;  %v1158_v15 = vld [vmem:[#allocation6 + $0xf80] sm:$0xff]  ;;  %1324 = vmatpush2.msra.mxu1 %v1162_v11  ;;  %1212 = vmatprep.subr.mxu0 %v1031_v12  ;;  %v9694_v12 = vsel %vm331_vm0, %v334_v39, %v340_v61  ;;  %v1108_v39 = vld [vmem:[#allocation6 + $0xdf0] sm:$0xff] }
  0xaf   :  { %v1027_v16 = vld [vmem:[#allocation6 + $0xb68] sm:$0xff]  ;;  %1325 = vmatprep.subr.mxu1 %v1159_v13  ;;  %v1026_v18 = vld [vmem:[#allocation6 + $0xb60] sm:$0xff]  ;;  %1213 = vmatpush2.msra.mxu0 %v1030_v14  ;;  %v758_v13 = vld [vmem:[#allocation2 + $0x10] sm:$0xfe] }
  0xb0   :  { %v1155_v17 = vld [vmem:[#allocation6 + $0xf68] sm:$0xff]  ;;  %v1154_v19 = vld [vmem:[#allocation6 + $0xf60] sm:$0xff]  ;;  %1326 = vmatpush2.msra.mxu1 %v1158_v15  ;;  %1214 = vmatprep.subr.mxu0 %v1027_v16 }
  0xb1   :  { %v1023_v20 = vld [vmem:[#allocation6 + $0xb48] sm:$0xff]  ;;  %1327 = vmatprep.subr.mxu1 %v1155_v17  ;;  %v1022_v22 = vld [vmem:[#allocation6 + $0xb40] sm:$0xff]  ;;  %1215 = vmatpush2.msra.mxu0 %v1026_v18 }
  0xb2   :  { %v1151_v21 = vld [vmem:[#allocation6 + $0xf48] sm:$0xff]  ;;  %v1150_v23 = vld [vmem:[#allocation6 + $0xf40] sm:$0xff]  ;;  %1328 = vmatpush2.msra.mxu1 %v1154_v19  ;;  %1216 = vmatprep.subr.mxu0 %v1023_v20  ;;  %v822_v20 = vrot.slane %v759_v8, 1 }
  0xb3   :  { %v1019_v24 = vld [vmem:[#allocation6 + $0xb28] sm:$0xff]  ;;  %v1018_v26 = vld [vmem:[#allocation6 + $0xb20] sm:$0xff]  ;;  %1329 = vmatprep.subr.mxu1 %v1151_v21  ;;  %1217 = vmatpush2.msra.mxu0 %v1022_v22  ;;  %v823_v21 = vrot.slane %v9680_v7, 1 }
  0xb4   :  { %v1147_v25 = vld [vmem:[#allocation6 + $0xf28] sm:$0xff]  ;;  %v1146_v28 = vld [vmem:[#allocation6 + $0xf20] sm:$0xff]  ;;  %1330 = vmatpush2.msra.mxu1 %v1150_v23  ;;  %1218 = vmatprep.subr.mxu0 %v1019_v24 }
  0xb5   :  { %v9636_v27 = vld [vmem:[#allocation3 + $0x8] sm:$0xff]  ;;  %v9642_v34 = vld [vmem:[#allocation3] sm:$0xff]  ;;  %1331 = vmatprep.subr.mxu1 %v1147_v25  ;;  %1219 = vmatpush2.msra.mxu0 %v1018_v26  ;;  %v819_v26 = vrot.slane %v758_v13, 1  ;;  %v9708_v33 = vsel %vm812_vm1, %v822_v20, %v823_v21  ;;  %v1084_v20 = vld [vmem:[#allocation6 + $0xd30] sm:$0xff] }
  0xb6   :  { %v1015_v29 = vld [vmem:[#allocation6 + $0xb08] sm:$0xff]  ;;  %v333_v30 = vrot.slane %v9636_v27, 7  ;;  %v1014_v36 = vld [vmem:[#allocation6 + $0xb00] sm:$0xff]  ;;  %v332_v38 = vrot.slane %v9642_v34, 7  ;;  %1332 = vmatpush2.msra.mxu1 %v1146_v28  ;;  %v820_v27 = vrot.slane %v9694_v12, 1  ;;  %1351 = vmatprep.mubr.f32.mxu1 %v9708_v33 }
  0xb7   :  { %v1143_v32 = vld [vmem:[#allocation6 + $0xf08] sm:$0xff]  ;;  %v1142_v37 = vld [vmem:[#allocation6 + $0xf00] sm:$0xff]  ;;  %1220 = vmatprep.subr.mxu0 %v1015_v29 }
  0xb8   :  { %429 = vst [vmem:[#allocation2 + $0x8] sm:$0xfe] %v333_v30  ;;  %v1011_v40 = vld [vmem:[#allocation6 + $0xae8] sm:$0xff]  ;;  %v1010_v42 = vld [vmem:[#allocation6 + $0xae0] sm:$0xff]  ;;  %1333 = vmatprep.subr.mxu1 %v1143_v32  ;;  %428 = vst [vmem:[#allocation2] sm:$0xfe] %v332_v38  ;;  %1221 = vmatpush2.msra.mxu0 %v1014_v36  ;;  %v9718_v35 = vsel %vm812_vm1, %v819_v26, %v820_v27 }
  0xb9   :  { %v1139_v41 = vld [vmem:[#allocation6 + $0xee8] sm:$0xff]  ;;  %v1138_v43 = vld [vmem:[#allocation6 + $0xee0] sm:$0xff]  ;;  %1334 = vmatpush2.msra.mxu1 %v1142_v37  ;;  %1222 = vmatprep.subr.mxu0 %v1011_v40  ;;  %v981_v36 = vld [vmem:[#allocation6 + $0x9f8] sm:$0xff] }
  0xba   :  { %v1007_v44 = vld [vmem:[#allocation6 + $0xac8] sm:$0xff]  ;;  %v1006_v47 = vld [vmem:[#allocation6 + $0xac0] sm:$0xff]  ;;  %1335 = vmatprep.subr.mxu1 %v1139_v41  ;;  %1223 = vmatpush2.msra.mxu0 %v1010_v42  ;;  %v1109_v37 = vld [vmem:[#allocation6 + $0xdf8] sm:$0xff] }
  0xbb   :  { %v9652_v45 = vld [vmem:[#allocation3 + $0x28] sm:$0xff]  ;;  %v1134_v49 = vld [vmem:[#allocation6 + $0xec0] sm:$0xff]  ;;  %1336 = vmatpush2.msra.mxu1 %v1138_v43  ;;  %1224 = vmatprep.subr.mxu0 %v1007_v44  ;;  %v977_v40 = vld [vmem:[#allocation6 + $0x9d8] sm:$0xff] }
  0xbc   :  { %v1135_v46 = vld [vmem:[#allocation6 + $0xec8] sm:$0xff]  ;;  %v9660_v50 = vld [vmem:[#allocation3 + $0x20] sm:$0xff]  ;;  %v338_v54 = vrot.slane %v9652_v45, 7  ;;  %1225 = vmatpush2.msra.mxu0 %v1006_v47  ;;  %v1105_v41 = vld [vmem:[#allocation6 + $0xdd8] sm:$0xff] }
  0xbd   :  { %v1003_v52 = vld [vmem:[#allocation6 + $0xaa8] sm:$0xff]  ;;  %1337 = vmatprep.subr.mxu1 %v1135_v46  ;;  %v1002_v55 = vld [vmem:[#allocation6 + $0xaa0] sm:$0xff]  ;;  %v336_v60 = vrot.slane %v9660_v50, 7  ;;  %v976_v42 = vld [vmem:[#allocation6 + $0x9d0] sm:$0xff] }
  0xbe   :  { %v1131_v53 = vld [vmem:[#allocation6 + $0xea8] sm:$0xff]  ;;  %v1130_v56 = vld [vmem:[#allocation6 + $0xea0] sm:$0xff]  ;;  %1338 = vmatpush2.msra.mxu1 %v1134_v49  ;;  %1226 = vmatprep.subr.mxu0 %v1003_v52  ;;  %v9673_v3 = vsel %vm331_vm0, %v333_v30, %v338_v54  ;;  %v1104_v43 = vld [vmem:[#allocation6 + $0xdd0] sm:$0xff] }
  0xbf   :  { %v999_v58 = vld [vmem:[#allocation6 + $0xa88] sm:$0xff]  ;;  %1339 = vmatprep.subr.mxu1 %v1131_v53  ;;  %v998_v62 = vld [vmem:[#allocation6 + $0xa80] sm:$0xff]  ;;  %1227 = vmatpush2.msra.mxu0 %v1002_v55  ;;  %v9687_v10 = vsel %vm331_vm0, %v332_v38, %v336_v60  ;;  %v817_v17 = vrot.slane %v9673_v3, 1  ;;  %v980_v38 = vld [vmem:[#allocation6 + $0x9f0] sm:$0xff] }
  0xc0   :  { %v1127_v59 = vld [vmem:[#allocation6 + $0xe88] sm:$0xff]  ;;  %v1126_v63 = vld [vmem:[#allocation6 + $0xe80] sm:$0xff]  ;;  %1340 = vmatpush2.msra.mxu1 %v1130_v56  ;;  %1228 = vmatprep.subr.mxu0 %v999_v58  ;;  %v814_v25 = vrot.slane %v9687_v10, 1  ;;  %v973_v44 = vld [vmem:[#allocation6 + $0x9b8] sm:$0xff] }
  0xc1   :  { %v995_v0 = vld [vmem:[#allocation6 + $0xa68] sm:$0xff]  ;;  %v994_v2 = vld [vmem:[#allocation6 + $0xa60] sm:$0xff]  ;;  %1341 = vmatprep.subr.mxu1 %v1127_v59  ;;  %1229 = vmatpush2.msra.mxu0 %v998_v62  ;;  %v1101_v46 = vld [vmem:[#allocation6 + $0xdb8] sm:$0xff] }
  0xc2   :  { %v1123_v1 = vld [vmem:[#allocation6 + $0xe68] sm:$0xff]  ;;  %v1122_v5 = vld [vmem:[#allocation6 + $0xe60] sm:$0xff]  ;;  %1342 = vmatpush2.msra.mxu1 %v1126_v63  ;;  %1230 = vmatprep.subr.mxu0 %v995_v0  ;;  %v972_v47 = vld [vmem:[#allocation6 + $0x9b0] sm:$0xff] }
  0xc3   :  { %v757_v4 = vld [vmem:[#allocation2 + $0x8] sm:$0xfe]  ;;  %v756_v11 = vld [vmem:[#allocation2] sm:$0xfe]  ;;  %1343 = vmatprep.subr.mxu1 %v1123_v1  ;;  %1231 = vmatpush2.msra.mxu0 %v994_v2  ;;  %v1100_v49 = vld [vmem:[#allocation6 + $0xdb0] sm:$0xff] }
  0xc4   :  { %v991_v6 = vld [vmem:[#allocation6 + $0xa48] sm:$0xff]  ;;  %v990_v14 = vld [vmem:[#allocation6 + $0xa40] sm:$0xff]  ;;  %v816_v16 = vrot.slane %v757_v4, 1  ;;  %1344 = vmatpush2.msra.mxu1 %v1122_v5  ;;  %v813_v24 = vrot.slane %v756_v11, 1  ;;  %v969_v52 = vld [vmem:[#allocation6 + $0x998] sm:$0xff] }
  0xc5   :  { %v1119_v9 = vld [vmem:[#allocation6 + $0xe48] sm:$0xff]  ;;  %v1118_v15 = vld [vmem:[#allocation6 + $0xe40] sm:$0xff]  ;;  %1232 = vmatprep.subr.mxu0 %v991_v6  ;;  %v1097_v53 = vld [vmem:[#allocation6 + $0xd98] sm:$0xff] }
  0xc6   :  { %v987_v18 = vld [vmem:[#allocation6 + $0xa28] sm:$0xff]  ;;  %1345 = vmatprep.subr.mxu1 %v1119_v9  ;;  %v986_v22 = vld [vmem:[#allocation6 + $0xa20] sm:$0xff]  ;;  %1233 = vmatpush2.msra.mxu0 %v990_v14  ;;  %v9703_v31 = vsel %vm812_vm1, %v816_v16, %v817_v17  ;;  %v9713_v34 = vsel %vm812_vm1, %v813_v24, %v814_v25  ;;  %v968_v55 = vld [vmem:[#allocation6 + $0x990] sm:$0xff] }
  0xc7   :  { %v1115_v19 = vld [vmem:[#allocation6 + $0xe28] sm:$0xff]  ;;  %v1114_v23 = vld [vmem:[#allocation6 + $0xe20] sm:$0xff]  ;;  %1346 = vmatpush2.msra.mxu1 %v1118_v15  ;;  %1234 = vmatprep.subr.mxu0 %v987_v18  ;;  %v1096_v56 = vld [vmem:[#allocation6 + $0xd90] sm:$0xff] }
  0xc8   :  { %v983_v28 = vld [vmem:[#allocation6 + $0xa08] sm:$0xff]  ;;  %1347 = vmatprep.subr.mxu1 %v1115_v19  ;;  %v982_v30 = vld [vmem:[#allocation6 + $0xa00] sm:$0xff]  ;;  %1235 = vmatpush2.msra.mxu0 %v986_v22  ;;  %v965_v58 = vld [vmem:[#allocation6 + $0x978] sm:$0xff] }
  0xc9   :  { %v1111_v29 = vld [vmem:[#allocation6 + $0xe08] sm:$0xff]  ;;  %1348 = vmatpush2.msra.mxu1 %v1114_v23  ;;  %v1110_v32 = vld [vmem:[#allocation6 + $0xe00] sm:$0xff]  ;;  %1236 = vmatprep.subr.mxu0 %v983_v28  ;;  %v1093_v59 = vld [vmem:[#allocation6 + $0xd78] sm:$0xff] }
  0xca   :  { %1349 = vmatprep.subr.mxu1 %v1111_v29  ;;  %1237 = vmatpush2.msra.mxu0 %v982_v30  ;;  %v964_v62 = vld [vmem:[#allocation6 + $0x970] sm:$0xff]  ;;  %v9724_v0 = vld [vmem:[#allocation3 + $0x68] sm:$0xff]  ;;  %v9726_v1 = vld [vmem:[#allocation3 + $0x78] sm:$0xff] }
  0xcb   :  { %1238 = vmatprep.mubr.f32.mxu0 %v9703_v31  ;;  %1350 = vmatpush2.msra.mxu1 %v1110_v32  ;;  %v1092_v63 = vld [vmem:[#allocation6 + $0xd70] sm:$0xff]  ;;  %v961_v2 = vld [vmem:[#allocation6 + $0x958] sm:$0xff]  ;;  %v354_v5 = vrot.slane %v9724_v0, 7  ;;  %v358_v6 = vrot.slane %v9726_v1, 7  ;;  %v9730_v8 = vld [vmem:[#allocation3 + $0x60] sm:$0xff] }
  0xcc   :  { %1239 = vmatmul.mubr.f32.vlgmr.msra.gmra.mxu0 %v9713_v34  ;;  %1352 = vmatmul.mubr.f32.vlgmr.msra.gmra.mxu1 %v9718_v35  ;;  %v1089_v4 = vld [vmem:[#allocation6 + $0xd58] sm:$0xff]  ;;  %v960_v9 = vld [vmem:[#allocation6 + $0x950] sm:$0xff]  ;;  %v352_v13 = vrot.slane %v9730_v8, 7  ;;  %v9744_v30 = vld [vmem:[#allocation3 + $0x88] sm:$0xff] }
  0xcd   :  { %1400 = vmatprep.subr.mxu0 %v981_v36  ;;  %1513 = vmatprep.subr.mxu1 %v1109_v37  ;;  %v1088_v11 = vld [vmem:[#allocation6 + $0xd50] sm:$0xff]  ;;  %v957_v15 = vld [vmem:[#allocation6 + $0x938] sm:$0xff]  ;;  %445 = vst [vmem:[#allocation2 + $0x88] sm:$0x1] %v354_v5  ;;  %447 = vst [vmem:[#allocation2 + $0x98] sm:$0x1] %v358_v6 }
  0xce   :  { %1401 = vmatpush1.msra.mxu0 %v980_v38  ;;  %1514 = vmatpush1.msra.mxu1 %v1108_v39  ;;  %v9733_v14 = vld [vmem:[#allocation3 + $0x70] sm:$0xff]  ;;  %v1085_v16 = vld [vmem:[#allocation6 + $0xd38] sm:$0xff]  ;;  %444 = vst [vmem:[#allocation2 + $0x80] sm:$0x1] %v352_v13  ;;  %v361_v39 = vrot.slane %v9744_v30, 7  ;;  %v9953_v30 = vld [vmem:[#allocation3 + $0xc8] sm:$0xff] }
  0xcf   :  { %1402 = vmatprep.subr.mxu0 %v977_v40  ;;  %1515 = vmatprep.subr.mxu1 %v1105_v41  ;;  %v356_v18 = vrot.slane %v9733_v14, 7  ;;  %v956_v19 = vld [vmem:[#allocation6 + $0x930] sm:$0xff]  ;;  %v953_v22 = vld [vmem:[#allocation6 + $0x918] sm:$0xff] }
  0xd0   :  { %1403 = vmatpush1.msra.mxu0 %v976_v42  ;;  %1516 = vmatpush1.msra.mxu1 %v1104_v43  ;;  %v1081_v23 = vld [vmem:[#allocation6 + $0xd18] sm:$0xff]  ;;  %v952_v24 = vld [vmem:[#allocation6 + $0x910] sm:$0xff]  ;;  %v9750_v42 = vld [vmem:[#allocation3 + $0x80] sm:$0xff]  ;;  %449 = vst [vmem:[#allocation2 + $0xa8] sm:$0xfe] %v361_v39 }
  0xd1   :  { %1404 = vmatprep.subr.mxu0 %v973_v44  ;;  %1517 = vmatprep.subr.mxu1 %v1101_v46  ;;  %446 = vst [vmem:[#allocation2 + $0x90] sm:$0x1] %v356_v18  ;;  %v1080_v26 = vld [vmem:[#allocation6 + $0xd10] sm:$0xff]  ;;  %v949_v28 = vld [vmem:[#allocation6 + $0x8f8] sm:$0xff] }
  0xd2   :  { %1405 = vmatpush1.msra.mxu0 %v972_v47  ;;  %1518 = vmatpush1.msra.mxu1 %v1100_v49  ;;  %v1077_v29 = vld [vmem:[#allocation6 + $0xcf8] sm:$0xff]  ;;  %v948_v36 = vld [vmem:[#allocation6 + $0x8f0] sm:$0xff]  ;;  %v360_v49 = vrot.slane %v9750_v42, 7 }
  0xd3   :  { %1406 = vmatprep.subr.mxu0 %v969_v52  ;;  %1519 = vmatprep.subr.mxu1 %v1097_v53  ;;  %v9746_v32 = vld [vmem:[#allocation3 + $0x98] sm:$0xff]  ;;  %v1076_v37 = vld [vmem:[#allocation6 + $0xcf0] sm:$0xff]  ;;  %v9759_v53 = vld [vmem:[#allocation3 + $0x48] sm:$0xff] }
  0xd4   :  { %1407 = vmatpush1.msra.mxu0 %v968_v55  ;;  %1520 = vmatpush1.msra.mxu1 %v1096_v56  ;;  %v945_v38 = vld [vmem:[#allocation6 + $0x8d8] sm:$0xff]  ;;  %v363_v40 = vrot.slane %v9746_v32, 7  ;;  %v9752_v43 = vld [vmem:[#allocation3 + $0x90] sm:$0xff]  ;;  %448 = vst [vmem:[#allocation2 + $0xa0] sm:$0xfe] %v360_v49 }
  0xd5   :  { %1408 = vmatprep.subr.mxu0 %v965_v58  ;;  %1521 = vmatprep.subr.mxu1 %v1093_v59  ;;  %v1073_v41 = vld [vmem:[#allocation6 + $0xcd8] sm:$0xff]  ;;  %v944_v44 = vld [vmem:[#allocation6 + $0x8d0] sm:$0xff] }
  0xd6   :  { %1409 = vmatpush1.msra.mxu0 %v964_v62  ;;  %1522 = vmatpush1.msra.mxu1 %v1092_v63  ;;  %v1072_v46 = vld [vmem:[#allocation6 + $0xcd0] sm:$0xff]  ;;  %v941_v47 = vld [vmem:[#allocation6 + $0x8b8] sm:$0xff]  ;;  %451 = vst [vmem:[#allocation2 + $0xb8] sm:$0xfe] %v363_v40  ;;  %v362_v62 = vrot.slane %v9752_v43, 7 }
  0xd7   :  { %1410 = vmatprep.subr.mxu0 %v961_v2  ;;  %1523 = vmatprep.subr.mxu1 %v1089_v4  ;;  %v1069_v52 = vld [vmem:[#allocation6 + $0xcb8] sm:$0xff]  ;;  %v940_v56 = vld [vmem:[#allocation6 + $0x8b0] sm:$0xff]  ;;  %v9766_v2 = vld [vmem:[#allocation3 + $0x40] sm:$0xff] }
  0xd8   :  { %1411 = vmatpush1.msra.mxu0 %v960_v9  ;;  %1524 = vmatpush1.msra.mxu1 %v1088_v11  ;;  %v9761_v55 = vld [vmem:[#allocation3 + $0x58] sm:$0xff]  ;;  %v1068_v58 = vld [vmem:[#allocation6 + $0xcb0] sm:$0xff]  ;;  %450 = vst [vmem:[#allocation2 + $0xb0] sm:$0xfe] %v362_v62 }
  0xd9   :  { %1412 = vmatprep.subr.mxu0 %v957_v15  ;;  %1525 = vmatprep.subr.mxu1 %v1085_v16  ;;  %v937_v59 = vld [vmem:[#allocation6 + $0x898] sm:$0xff]  ;;  %v9768_v4 = vld [vmem:[#allocation3 + $0x50] sm:$0xff]  ;;  %v346_v15 = vrot.slane %v9759_v53, 7  ;;  %v350_v16 = vrot.slane %v9761_v55, 7  ;;  %v9891_v53 = vld [vmem:[#allocation3 + $0xa8] sm:$0xff] }
  0xda   :  { %1413 = vmatpush1.msra.mxu0 %v956_v19  ;;  %1526 = vmatpush1.msra.mxu1 %v1084_v20  ;;  %v1065_v63 = vld [vmem:[#allocation6 + $0xc98] sm:$0xff]  ;;  %v936_v9 = vld [vmem:[#allocation6 + $0x890] sm:$0xff]  ;;  %v13762_v19 = vlaneseq }
  0xdb   :  { %1414 = vmatprep.subr.mxu0 %v953_v22  ;;  %1527 = vmatprep.subr.mxu1 %v1081_v23  ;;  %v1064_v11 = vld [vmem:[#allocation6 + $0xc90] sm:$0xff]  ;;  %v933_v20 = vld [vmem:[#allocation6 + $0x878] sm:$0xff] }
  0xdc   :  { %1415 = vmatpush1.msra.mxu0 %v952_v24  ;;  %1528 = vmatpush1.msra.mxu1 %v1080_v26  ;;  %v1061_v22 = vld [vmem:[#allocation6 + $0xc78] sm:$0xff]  ;;  %v932_v23 = vld [vmem:[#allocation6 + $0x870] sm:$0xff]  ;;  %v344_v26 = vrot.slane %v9766_v2, 7  ;;  %vm286_vm2 = vcmp.lt.s32.totalorder %v13762_v19, 512 }
  0xdd   :  { %1416 = vmatprep.subr.mxu0 %v949_v28  ;;  %1529 = vmatprep.subr.mxu1 %v1077_v29  ;;  %v1060_v24 = vld [vmem:[#allocation6 + $0xc70] sm:$0xff]  ;;  %v348_v28 = vrot.slane %v9768_v4, 7  ;;  %v929_v29 = vld [vmem:[#allocation6 + $0x858] sm:$0xff] }
  0xde   :  { %1417 = vmatpush1.msra.mxu0 %v948_v36  ;;  %1530 = vmatpush1.msra.mxu1 %v1076_v37  ;;  %v1057_v36 = vld [vmem:[#allocation6 + $0xc58] sm:$0xff]  ;;  %v13764_v37 = vmov 0.0   ;;  %v9800_v45 = vsel %vm331_vm0, %v336_v60, %v344_v26  ;;  %v1168_v2 = vld [vmem:[#allocation6 + $0xfd0] sm:$0xff] }
  0xdf   :  { %1418 = vmatprep.subr.mxu0 %v945_v38  ;;  %1531 = vmatprep.subr.mxu1 %v1073_v41  ;;  %288 = vst.msk [vmem:[#allocation2] ss:$8 sm:$0xf] %vm286_vm2, %v13764_v37  ;;  %291 = vst.msk [vmem:[#allocation2 + $0xa0] ss:$8 sm:$0xf] %vm286_vm2, %v13764_v37  ;;  %v9807_v48 = vsel %vm331_vm0, %v340_v61, %v348_v28 }
  0xe0   :  { %1419 = vmatpush1.msra.mxu0 %v944_v44  ;;  %1532 = vmatpush1.msra.mxu1 %v1072_v46  ;;  %294 = vst.msk [vmem:[#allocation2 + $0x81] ss:$8 sm:$0xf] %vm286_vm2, %v13764_v37  ;;  %297 = vst.msk [vmem:[#allocation2 + $0x121] ss:$8 sm:$0xf] %vm286_vm2, %v13764_v37  ;;  %v9786_v44 = vsel %vm331_vm0, %v338_v54, %v346_v15  ;;  %v9793_v46 = vsel %vm331_vm0, %v342_v57, %v350_v16 }
  0xe1   :  { %1420 = vmatprep.subr.mxu0 %v941_v47  ;;  %1533 = vmatprep.subr.mxu1 %v1069_v52  ;;  %v928_v38 = vld [vmem:[#allocation6 + $0x850] sm:$0xff]  ;;  %v925_v47 = vld [vmem:[#allocation6 + $0x838] sm:$0xff]  ;;  %v9809_v54 = vld [vmem:[#allocation3 + $0xe8] sm:$0xff]  ;;  %v827_v50 = vrot.slane %v9786_v44, 1  ;;  %v831_v60 = vrot.slane %v9793_v46, 1 }
  0xe2   :  { %1421 = vmatpush1.msra.mxu0 %v940_v56  ;;  %1534 = vmatpush1.msra.mxu1 %v1068_v58  ;;  %v1056_v41 = vld [vmem:[#allocation6 + $0xc50] sm:$0xff]  ;;  %v1053_v52 = vld [vmem:[#allocation6 + $0xc38] sm:$0xff] }
  0xe3   :  { %1422 = vmatprep.subr.mxu0 %v937_v59  ;;  %1535 = vmatprep.subr.mxu1 %v1065_v63  ;;  %v924_v56 = vld [vmem:[#allocation6 + $0x830] sm:$0xff]  ;;  %v9811_v57 = vld [vmem:[#allocation3 + $0xf8] sm:$0xff]  ;;  %v9848_v0 = vsel %vm812_vm1, %v817_v17, %v827_v50  ;;  %v9855_v1 = vsel %vm812_vm1, %v823_v21, %v831_v60  ;;  %v9866_v17 = vsel %vm331_vm0, %v344_v26, %v352_v13 }
  0xe4   :  { %1423 = vmatpush1.msra.mxu0 %v936_v9  ;;  %1536 = vmatpush1.msra.mxu1 %v1064_v11  ;;  %v1052_v58 = vld [vmem:[#allocation6 + $0xc30] sm:$0xff]  ;;  %v921_v59 = vld [vmem:[#allocation6 + $0x818] sm:$0xff]  ;;  %v13769_v9 = vrot.slane %v9809_v54, 7  ;;  %v9816_v11 = vld [vmem:[#allocation3 + $0xe0] sm:$0xff]  ;;  %v9873_v21 = vsel %vm331_vm0, %v348_v28, %v356_v18  ;;  %v13773_v26 = vrot.slane %v9866_v17, 1  ;;  %v13911_v42 = vrot.slane %v9866_v17, 1 }
  0xe5   :  { %1424 = vmatprep.subr.mxu0 %v933_v20  ;;  %1537 = vmatprep.subr.mxu1 %v1061_v22  ;;  %v1049_v63 = vld [vmem:[#allocation6 + $0xc18] sm:$0xff]  ;;  %v1048_v61 = vld [vmem:[#allocation6 + $0xc10] sm:$0xff]  ;;  %v13768_v20 = vrot.slane %v9811_v57, 7  ;;  %v13772_v28 = vrot.slane %v9873_v21, 1 }
  0xe6   :  { %1425 = vmatpush1.msra.mxu0 %v932_v23  ;;  %1538 = vmatpush1.msra.mxu1 %v1060_v24  ;;  %v9819_v22 = vld [vmem:[#allocation3 + $0xf0] sm:$0xff]  ;;  %v1045_v23 = vld [vmem:[#allocation6 + $0xbf8] sm:$0xff]  ;;  %465 = vst [vmem:[#allocation2 + $0x128] sm:$0x1] %v13769_v9 }
  0xe7   :  { %1426 = vmatprep.subr.mxu0 %v929_v29  ;;  %1539 = vmatprep.subr.mxu1 %v1057_v36  ;;  %v1173_v24 = vld [vmem:[#allocation6 + $0xff8] sm:$0xff]  ;;  %v825_v29 = vrot.slane %v9800_v45, 1  ;;  %v829_v36 = vrot.slane %v9807_v48, 1  ;;  %467 = vst [vmem:[#allocation2 + $0x138] sm:$0x1] %v13768_v20 }
  0xe8   :  { %1427 = vmatpush1.msra.mxu0 %v928_v38  ;;  %1540 = vmatpush1.msra.mxu1 %v1056_v41  ;;  %v13767_v38 = vrot.slane %v9816_v11, 7  ;;  %v13766_v41 = vrot.slane %v9819_v22, 7  ;;  %v9893_v55 = vld [vmem:[#allocation3 + $0xb8] sm:$0xff] }
  0xe9   :  { %1428 = vmatprep.subr.mxu0 %v925_v47  ;;  %1541 = vmatprep.subr.mxu1 %v1053_v52  ;;  %v1044_v47 = vld [vmem:[#allocation6 + $0xbf0] sm:$0xff]  ;;  %v9880_v8 = vsel %vm812_vm1, %v814_v25, %v825_v29  ;;  %v9887_v13 = vsel %vm812_vm1, %v820_v27, %v829_v36  ;;  %v1037_v4 = vld [vmem:[#allocation6 + $0xbb8] sm:$0xff] }
  0xea   :  { %1429 = vmatpush1.msra.mxu0 %v924_v56  ;;  %1542 = vmatpush1.msra.mxu1 %v1052_v58  ;;  %v1172_v52 = vld [vmem:[#allocation6 + $0xff0] sm:$0xff]  ;;  %v9832_v56 = vsel %vm331_vm0, %v346_v15, %v354_v5  ;;  %v9839_v58 = vsel %vm331_vm0, %v350_v16, %v358_v6  ;;  %464 = vst [vmem:[#allocation2 + $0x120] sm:$0x1] %v13767_v38  ;;  %466 = vst [vmem:[#allocation2 + $0x130] sm:$0x1] %v13766_v41  ;;  %v1041_v5 = vld [vmem:[#allocation6 + $0xbd8] sm:$0xff] }
  0xeb   :  { %1430 = vmatprep.subr.mxu0 %v921_v59  ;;  %1543 = vmatprep.subr.mxu1 %v1049_v63  ;;  %v1169_v6 = vld [vmem:[#allocation6 + $0xfd8] sm:$0xff]  ;;  %v835_v14 = vrot.slane %v9832_v56, 1  ;;  %v839_v18 = vrot.slane %v9839_v58, 1  ;;  %v1040_v25 = vld [vmem:[#allocation6 + $0xbd0] sm:$0xff]  ;;  %v761_v59 = vld [vmem:[#allocation2 + $0x88] sm:$0x1] }
  0xec   :  { %1431 = vmatpush1.msra.mxu0 %v920_v51  ;;  %1544 = vmatpush1.msra.mxu1 %v1048_v61  ;;  %v1165_v15 = vld [vmem:[#allocation6 + $0xfb8] sm:$0xff]  ;;  %v1036_v27 = vld [vmem:[#allocation6 + $0xbb0] sm:$0xff]  ;;  %v13771_v51 = vrot.slane %v9891_v53, 7  ;;  %v13770_v61 = vrot.slane %v9893_v55, 7  ;;  %v843_v19 = vrot.slane %v761_v59, 1 }
  0xed   :  { %1432 = vmatprep.subr.mxu0 %v1045_v23  ;;  %1545 = vmatprep.subr.mxu1 %v1173_v24  ;;  %v1164_v16 = vld [vmem:[#allocation6 + $0xfb0] sm:$0xff]  ;;  %v763_v63 = vld [vmem:[#allocation2 + $0x98] sm:$0x1]  ;;  %v9908_v23 = vsel %vm812_vm1, %v827_v50, %v835_v14  ;;  %v9915_v24 = vsel %vm812_vm1, %v831_v60, %v839_v18  ;;  %v9926_v50 = vsel %vm812_vm1, %v825_v29, %v13773_v26 }
  0xee   :  { %1433 = vmatpush2.msra.mxu0 %v1044_v47  ;;  %1546 = vmatpush2.msra.mxu1 %v1172_v52  ;;  %v1033_v47 = vld [vmem:[#allocation6 + $0xb98] sm:$0xff]  ;;  %v9917_v52 = vld [vmem:[#allocation3 + $0xa0] sm:$0xff]  ;;  %v9933_v60 = vsel %vm812_vm1, %v829_v36, %v13772_v28  ;;  %v847_v37 = vrot.slane %v763_v63, 1  ;;  %v1028_v41 = vld [vmem:[#allocation6 + $0xb70] sm:$0xff]  ;;  %v9942_v29 = vsel %vm331_vm0, %v361_v39, %v13771_v51  ;;  %v9949_v36 = vsel %vm331_vm0, %v363_v40, %v13770_v61 }
  0xef   :  { %1244 = vmatprep.mubr.f32.mxu0 %v9848_v0  ;;  %1357 = vmatprep.mubr.f32.mxu1 %v9855_v1  ;;  %v13775_v59 = vrot.slane %v9917_v52, 7  ;;  %v1156_v38 = vld [vmem:[#allocation6 + $0xf70] sm:$0xff]  ;;  %v9955_v39 = vld [vmem:[#allocation3 + $0xd8] sm:$0xff]  ;;  %v765_v40 = vld [vmem:[#allocation2 + $0xa8] sm:$0xfe]  ;;  %v13776_v51 = vrot.slane %v9949_v36, 1 }
  0xf0   :  { %1434 = vmatprep.subr.mxu0 %v1041_v5  ;;  %1547 = vmatprep.subr.mxu1 %v1169_v6  ;;  %v9919_v5 = vld [vmem:[#allocation3 + $0xb0] sm:$0xff]  ;;  %v1161_v6 = vld [vmem:[#allocation6 + $0xf98] sm:$0xff]  ;;  %v9971_v28 = vld [vmem:[#allocation3 + $0xc0] sm:$0xff]  ;;  %v852_v43 = vrot.slane %v765_v40, 1 }
  0xf1   :  { %1245 = vmatmul.mubr.f32.gmra.mxu0 %v9880_v8  ;;  %1358 = vmatmul.mubr.f32.gmra.mxu1 %v9887_v13  ;;  %v13774_v63 = vrot.slane %v9919_v5, 7  ;;  %v1025_v32 = vld [vmem:[#allocation6 + $0xb58] sm:$0xff]  ;;  %v9973_v26 = vld [vmem:[#allocation3 + $0xd0] sm:$0xff] }
  0xf2   :  { %1435 = vmatpush2.msra.mxu0 %v1040_v25  ;;  %1548 = vmatpush2.msra.mxu1 %v1168_v2  ;;  %v760_v25 = vld [vmem:[#allocation2 + $0x80] sm:$0x1]  ;;  %v762_v2 = vld [vmem:[#allocation2 + $0x90] sm:$0x1]  ;;  %v767_v61 = vld [vmem:[#allocation2 + $0xb8] sm:$0xfe] }
  0xf3   :  { %1436 = vmatprep.subr.mxu0 %v1037_v4  ;;  %1549 = vmatprep.subr.mxu1 %v1165_v15  ;;  %v1032_v4 = vld [vmem:[#allocation6 + $0xb90] sm:$0xff]  ;;  %v841_v20 = vrot.slane %v760_v25, 1  ;;  %v845_v9 = vrot.slane %v762_v2, 1  ;;  %v1153_v25 = vld [vmem:[#allocation6 + $0xf58] sm:$0xff]  ;;  %v13777_v2 = vrot.slane %v9942_v29, 1 }
  0xf4   :  { %1437 = vmatpush2.msra.mxu0 %v1036_v27  ;;  %1550 = vmatpush2.msra.mxu1 %v1164_v16  ;;  %v1160_v15 = vld [vmem:[#allocation6 + $0xf90] sm:$0xff]  ;;  %v1029_v27 = vld [vmem:[#allocation6 + $0xb78] sm:$0xff] }
  0xf5   :  { %1250 = vmatprep.mubr.f32.mxu0 %v9908_v23  ;;  %1363 = vmatprep.mubr.f32.mxu1 %v9915_v24  ;;  %v1157_v16 = vld [vmem:[#allocation6 + $0xf78] sm:$0xff]  ;;  %v1020_v40 = vld [vmem:[#allocation6 + $0xb30] sm:$0xff] }
  0xf6   :  { %1438 = vmatprep.subr.mxu0 %v1033_v47  ;;  %1551 = vmatprep.subr.mxu1 %v1161_v6  ;;  %v9962_v47 = vsel %vm812_vm1, %v835_v14, %v843_v19  ;;  %v9967_v6 = vsel %vm812_vm1, %v839_v18, %v847_v37  ;;  %v9980_v19 = vsel %vm331_vm0, %v360_v49, %v13775_v59  ;;  %v764_v37 = vld [vmem:[#allocation2 + $0xa0] sm:$0xfe]  ;;  %v766_v18 = vld [vmem:[#allocation2 + $0xb0] sm:$0xfe] }
  0xf7   :  { %1251 = vmatmul.mubr.f32.gmra.mxu0 %v9926_v50  ;;  %1364 = vmatmul.mubr.f32.gmra.mxu1 %v9933_v60  ;;  %v9987_v14 = vsel %vm331_vm0, %v362_v62, %v13774_v63  ;;  %v9994_v49 = vsel %vm812_vm1, %v13911_v42, %v841_v20  ;;  %v858_v62 = vrot.slane %v767_v61, 1  ;;  %v1021_v20 = vld [vmem:[#allocation6 + $0xb38] sm:$0xff]  ;;  %v849_v63 = vrot.slane %v764_v37, 1  ;;  %v1148_v59 = vld [vmem:[#allocation6 + $0xf30] sm:$0xff] }
  0xf8   :  { %1439 = vmatpush2.msra.mxu0 %v1032_v4  ;;  %1552 = vmatpush2.msra.mxu1 %v1160_v15  ;;  %v374_v4 = vrot.slane %v9953_v30, 7  ;;  %v378_v15 = vrot.slane %v9955_v39, 7  ;;  %v1024_v30 = vld [vmem:[#allocation6 + $0xb50] sm:$0xff]  ;;  %v1149_v42 = vld [vmem:[#allocation6 + $0xf38] sm:$0xff]  ;;  %v856_v61 = vrot.slane %v9987_v14, 1  ;;  %v10022_v37 = vsel %vm812_vm1, %v852_v43, %v13777_v2 }
  0xf9   :  { %1440 = vmatprep.subr.mxu0 %v1029_v27  ;;  %1553 = vmatprep.subr.mxu1 %v1157_v16  ;;  %v13912_v27 = vrot.slane %v9873_v21, 1  ;;  %v1152_v39 = vld [vmem:[#allocation6 + $0xf50] sm:$0xff] }
  0xfa   :  { %1441 = vmatpush2.msra.mxu0 %v1028_v41  ;;  %1554 = vmatpush2.msra.mxu1 %v1156_v38  ;;  %v372_v38 = vrot.slane %v9971_v28, 7  ;;  %v376_v41 = vrot.slane %v9973_v26, 7  ;;  %v13913_v28 = vrot.slane %v9891_v53, 7  ;;  %v1017_v53 = vld [vmem:[#allocation6 + $0xb18] sm:$0xff] }
  0xfb   :  { %v9999_v16 = vsel %vm812_vm1, %v13912_v27, %v845_v9  ;;  %1256 = vmatprep.mubr.f32.mxu0 %v9962_v47  ;;  %1369 = vmatprep.mubr.f32.mxu1 %v9967_v6  ;;  %v850_v9 = vrot.slane %v9980_v19, 1  ;;  %v855_v27 = vrot.slane %v766_v18, 1  ;;  %v10027_v18 = vsel %vm812_vm1, %v858_v62, %v13776_v51 }
  0xfc   :  { %1442 = vmatprep.subr.mxu0 %v1025_v32  ;;  %1555 = vmatprep.subr.mxu1 %v1153_v25  ;;  %v10012_v26 = vsel %vm331_vm0, %v13913_v28, %v374_v4  ;;  %v13915_v32 = vrot.slane %v9893_v55, 7  ;;  %v1145_v28 = vld [vmem:[#allocation6 + $0xf18] sm:$0xff]  ;;  %v13917_v55 = vrot.slane %v9917_v52, 7  ;;  %v13921_v51 = vrot.slane %v9809_v54, 7 }
  0xfd   :  { %1257 = vmatmul.mubr.f32.gmra.mxu0 %v9994_v49  ;;  %1370 = vmatmul.mubr.f32.gmra.mxu1 %v9999_v16  ;;  %13914 = vst [vmem:[#allocation29_spill] sm:$0xff] %v10012_v26  ;;  %v10040_v43 = vsel %vm812_vm1, %v849_v63, %v850_v9  ;;  %v10043_v62 = vsel %vm812_vm1, %v855_v27, %v856_v61  ;;  %v1012_v27 = vld [vmem:[#allocation6 + $0xaf0] sm:$0xff]  ;;  %v1009_v54 = vld [vmem:[#allocation6 + $0xad8] sm:$0xff] }
  0xfe   :  { %v10017_v25 = vsel %vm331_vm0, %v13915_v32, %v378_v15  ;;  %1443 = vmatpush2.msra.mxu0 %v1024_v30  ;;  %1556 = vmatpush2.msra.mxu1 %v1152_v39  ;;  %v10032_v32 = vsel %vm331_vm0, %v13917_v55, %v372_v38  ;;  %v13919_v30 = vrot.slane %v9919_v5, 7  ;;  %v1016_v5 = vld [vmem:[#allocation6 + $0xb10] sm:$0xff]  ;;  %v10056_v2 = vsel %vm331_vm0, %v374_v4, %v13921_v51  ;;  %v1137_v51 = vld [vmem:[#allocation6 + $0xed8] sm:$0xff] }
  0xff   :  { %13916 = vst [vmem:[#allocation30_spill] sm:$0xff] %v10017_v25  ;;  %1444 = vmatprep.subr.mxu0 %v1021_v20  ;;  %1557 = vmatprep.subr.mxu1 %v1149_v42  ;;  %13918 = vst [vmem:[#allocation31_spill] sm:$0xff] %v10032_v32  ;;  %v863_v20 = vrot.slane %v10012_v26, 1  ;;  %v867_v52 = vrot.slane %v10017_v25, 1  ;;  %v1144_v42 = vld [vmem:[#allocation6 + $0xf10] sm:$0xff]  ;;  %v861_v63 = vrot.slane %v10032_v32, 1 }
 0x100   :  { %v10037_v39 = vsel %vm331_vm0, %v13919_v30, %v376_v41  ;;  %1445 = vmatpush2.msra.mxu0 %v1020_v40  ;;  %1558 = vmatpush2.msra.mxu1 %v1148_v59  ;;  %v1013_v40 = vld [vmem:[#allocation6 + $0xaf8] sm:$0xff]  ;;  %v1140_v30 = vld [vmem:[#allocation6 + $0xef0] sm:$0xff]  ;;  %13922 = vst [vmem:[#allocation33_spill] sm:$0xff] %v10056_v2  ;;  %v13926_v32 = vrot.slane %v9949_v36, 1 }
 0x101   :  { %13920 = vst [vmem:[#allocation32_spill] sm:$0xff] %v10037_v39  ;;  %1262 = vmatprep.mubr.f32.mxu0 %v10022_v37  ;;  %1375 = vmatprep.mubr.f32.mxu1 %v10027_v18  ;;  %v1141_v59 = vld [vmem:[#allocation6 + $0xef8] sm:$0xff]  ;;  %v865_v55 = vrot.slane %v10037_v39, 1  ;;  %v13925_v39 = vrot.slane %v9942_v29, 1 }
 0x102   :  { %1446 = vmatprep.subr.mxu0 %v1017_v53  ;;  %1559 = vmatprep.subr.mxu1 %v1145_v28  ;;  %v13923_v53 = vrot.slane %v9811_v57, 7  ;;  %v10071_v26 = vsel %vm812_vm1, %v13926_v32, %v867_v52  ;;  %v13927_v57 = vrot.slane %v9816_v11, 7 }
 0x103   :  { %1263 = vmatmul.mubr.f32.gmra.mxu0 %v10040_v43  ;;  %1376 = vmatmul.mubr.f32.gmra.mxu1 %v10043_v62  ;;  %v10066_v25 = vsel %vm812_vm1, %v13925_v39, %v863_v20  ;;  %v10084_v39 = vsel %vm812_vm1, %v850_v9, %v861_v63  ;;  %v10087_v32 = vsel %vm812_vm1, %v856_v61, %v865_v55 }
 0x104   :  { %v10061_v28 = vsel %vm331_vm0, %v378_v15, %v13923_v53  ;;  %1447 = vmatpush2.msra.mxu0 %v1016_v5  ;;  %1560 = vmatpush2.msra.mxu1 %v1144_v42  ;;  %v10076_v4 = vsel %vm331_vm0, %v372_v38, %v13927_v57  ;;  %v13929_v15 = vrot.slane %v9819_v22, 7  ;;  %v871_v42 = vrot.slane %v10056_v2, 1  ;;  %v1008_v22 = vld [vmem:[#allocation6 + $0xad0] sm:$0xff]  ;;  %v771_v53 = vld [vmem:[#allocation2 + $0x138] sm:$0x1] }
 0x105   :  { %13924 = vst [vmem:[#allocation34_spill] sm:$0xff] %v10061_v28  ;;  %1448 = vmatprep.subr.mxu0 %v1013_v40  ;;  %1561 = vmatprep.subr.mxu1 %v1141_v59  ;;  %13928 = vst [vmem:[#allocation35_spill] sm:$0xff] %v10076_v4  ;;  %v875_v11 = vrot.slane %v10061_v28, 1  ;;  %v1136_v38 = vld [vmem:[#allocation6 + $0xed0] sm:$0xff]  ;;  %v1133_v40 = vld [vmem:[#allocation6 + $0xeb8] sm:$0xff]  ;;  %v869_v9 = vrot.slane %v10076_v4, 1 }
 0x106   :  { %v10081_v5 = vsel %vm331_vm0, %v376_v41, %v13929_v15  ;;  %1449 = vmatpush2.msra.mxu0 %v1012_v27  ;;  %1562 = vmatpush2.msra.mxu1 %v1140_v30  ;;  %v1005_v41 = vld [vmem:[#allocation6 + $0xab8] sm:$0xff]  ;;  %v1004_v59 = vld [vmem:[#allocation6 + $0xab0] sm:$0xff]  ;;  %v769_v30 = vld [vmem:[#allocation2 + $0x128] sm:$0x1]  ;;  %v10098_v57 = vsel %vm812_vm1, %v863_v20, %v871_v42  ;;  %v883_v20 = vrot.slane %v771_v53, 1 }
 0x107   :  { %13930 = vst [vmem:[#allocation36_spill] sm:$0xff] %v10081_v5  ;;  %1268 = vmatprep.mubr.f32.mxu0 %v10066_v25  ;;  %1381 = vmatprep.mubr.f32.mxu1 %v10071_v26  ;;  %v873_v61 = vrot.slane %v10081_v5, 1  ;;  %v1132_v27 = vld [vmem:[#allocation6 + $0xeb0] sm:$0xff]  ;;  %v1129_v15 = vld [vmem:[#allocation6 + $0xe98] sm:$0xff]  ;;  %v768_v5 = vld [vmem:[#allocation2 + $0x120] sm:$0x1]  ;;  %v10104_v4 = vsel %vm812_vm1, %v861_v63, %v869_v9 }
 0x108   :  { %1450 = vmatprep.subr.mxu0 %v1009_v54  ;;  %1563 = vmatprep.subr.mxu1 %v1137_v51  ;;  %v10101_v54 = vsel %vm812_vm1, %v867_v52, %v875_v11  ;;  %v1001_v51 = vld [vmem:[#allocation6 + $0xa98] sm:$0xff]  ;;  %v770_v28 = vld [vmem:[#allocation2 + $0x130] sm:$0x1]  ;;  %v10117_v53 = vsel %vm812_vm1, %v875_v11, %v883_v20 }
 0x109   :  { %1269 = vmatmul.mubr.f32.gmra.mxu0 %v10084_v39  ;;  %1382 = vmatmul.mubr.f32.gmra.mxu1 %v10087_v32  ;;  %v1000_v52 = vld [vmem:[#allocation6 + $0xa90] sm:$0xff]  ;;  %v1125_v2 = vld [vmem:[#allocation6 + $0xe78] sm:$0xff] }
 0x10a   :  { %1451 = vmatpush2.msra.mxu0 %v1008_v22  ;;  %1564 = vmatpush2.msra.mxu1 %v1136_v38  ;;  %v10107_v22 = vsel %vm812_vm1, %v865_v55, %v873_v61  ;;  %v879_v38 = vrot.slane %v769_v30, 1  ;;  %v996_v63 = vld [vmem:[#allocation6 + $0xa70] sm:$0xff]  ;;  %v989_v11 = vld [vmem:[#allocation6 + $0xa38] sm:$0xff] }
 0x10b   :  { %1452 = vmatprep.subr.mxu0 %v1005_v41  ;;  %1565 = vmatprep.subr.mxu1 %v1133_v40  ;;  %v1128_v41 = vld [vmem:[#allocation6 + $0xe90] sm:$0xff]  ;;  %v997_v40 = vld [vmem:[#allocation6 + $0xa78] sm:$0xff] }
 0x10c   :  { %1453 = vmatpush2.msra.mxu0 %v1004_v59  ;;  %1566 = vmatpush2.msra.mxu1 %v1132_v27  ;;  %v877_v59 = vrot.slane %v768_v5, 1  ;;  %v881_v27 = vrot.slane %v770_v28, 1  ;;  %v1124_v55 = vld [vmem:[#allocation6 + $0xe70] sm:$0xff]  ;;  %v10114_v30 = vsel %vm812_vm1, %v871_v42, %v879_v38 }
 0x10d   :  { %1274 = vmatprep.mubr.f32.mxu0 %v10098_v57  ;;  %1387 = vmatprep.mubr.f32.mxu1 %v10101_v54  ;;  %v992_v42 = vld [vmem:[#allocation6 + $0xa50] sm:$0xff] }
 0x10e   :  { %1454 = vmatprep.subr.mxu0 %v1001_v51  ;;  %1567 = vmatprep.subr.mxu1 %v1129_v15  ;;  %v993_v51 = vld [vmem:[#allocation6 + $0xa58] sm:$0xff]  ;;  %v10120_v28 = vsel %vm812_vm1, %v869_v9, %v877_v59  ;;  %v10123_v5 = vsel %vm812_vm1, %v873_v61, %v881_v27  ;;  %v1120_v38 = vld [vmem:[#allocation6 + $0xe50] sm:$0xff]  ;;  %v561_v59 = vld [vmem:[#allocation6 + $0x1e8] sm:$0xff] }
 0x10f   :  { %1275 = vmatmul.mubr.f32.gmra.mxu0 %v10104_v4  ;;  %1388 = vmatmul.mubr.f32.gmra.mxu1 %v10107_v22  ;;  %v1121_v15 = vld [vmem:[#allocation6 + $0xe58] sm:$0xff]  ;;  %v988_v20 = vld [vmem:[#allocation6 + $0xa30] sm:$0xff]  ;;  %v689_v27 = vld [vmem:[#allocation6 + $0x5e8] sm:$0xff] }
 0x110   :  { %1455 = vmatpush2.msra.mxu0 %v1000_v52  ;;  %1568 = vmatpush2.msra.mxu1 %v1128_v41  ;;  %v1116_v9 = vld [vmem:[#allocation6 + $0xe30] sm:$0xff]  ;;  %v985_v61 = vld [vmem:[#allocation6 + $0xa18] sm:$0xff] }
 0x111   :  { %1456 = vmatprep.subr.mxu0 %v997_v40  ;;  %1569 = vmatprep.subr.mxu1 %v1125_v2  ;;  %v1117_v2 = vld [vmem:[#allocation6 + $0xe38] sm:$0xff]  ;;  %v984_v41 = vld [vmem:[#allocation6 + $0xa10] sm:$0xff] }
 0x112   :  { %1457 = vmatpush2.msra.mxu0 %v996_v63  ;;  %1570 = vmatpush2.msra.mxu1 %v1124_v55  ;;  %v1113_v52 = vld [vmem:[#allocation6 + $0xe18] sm:$0xff]  ;;  %v1112_v40 = vld [vmem:[#allocation6 + $0xe10] sm:$0xff]  ;;  %v560_v63 = vld [vmem:[#allocation6 + $0x1e0] sm:$0xff] }
 0x113   :  { %1280 = vmatprep.mubr.f32.mxu0 %v10114_v30  ;;  %1393 = vmatprep.mubr.f32.mxu1 %v10117_v53  ;;  %v688_v55 = vld [vmem:[#allocation6 + $0x5e0] sm:$0xff] }
 0x114   :  { %1458 = vmatprep.subr.mxu0 %v993_v51  ;;  %1571 = vmatprep.subr.mxu1 %v1121_v15  ;;  %v557_v51 = vld [vmem:[#allocation6 + $0x1c8] sm:$0xff] }
 0x115   :  { %1281 = vmatmul.mubr.f32.gmra.mxu0 %v10120_v28  ;;  %1394 = vmatmul.mubr.f32.gmra.mxu1 %v10123_v5  ;;  %v685_v15 = vld [vmem:[#allocation6 + $0x5c8] sm:$0xff] }
 0x116   :  { %1459 = vmatpush2.msra.mxu0 %v992_v42  ;;  %1572 = vmatpush2.msra.mxu1 %v1120_v38  ;;  %v556_v42 = vld [vmem:[#allocation6 + $0x1c0] sm:$0xff] }
 0x117   :  { %1460 = vmatprep.subr.mxu0 %v989_v11  ;;  %1573 = vmatprep.subr.mxu1 %v1117_v2  ;;  %v684_v38 = vld [vmem:[#allocation6 + $0x5c0] sm:$0xff]  ;;  %v681_v11 = vld [vmem:[#allocation6 + $0x5a8] sm:$0xff] }
 0x118   :  { %1461 = vmatpush2.msra.mxu0 %v988_v20  ;;  %1574 = vmatpush2.msra.mxu1 %v1116_v9  ;;  %v552_v2 = vld [vmem:[#allocation6 + $0x1a0] sm:$0xff]  ;;  %v549_v20 = vld [vmem:[#allocation6 + $0x188] sm:$0xff] }
 0x119   :  { %1462 = vmatprep.subr.mxu0 %v985_v61  ;;  %1575 = vmatprep.subr.mxu1 %v1113_v52  ;;  %v676_v9 = vld [vmem:[#allocation6 + $0x580] sm:$0xff]  ;;  %v545_v61 = vld [vmem:[#allocation6 + $0x168] sm:$0xff] }
 0x11a   :  { %1463 = vmatpush2.msra.mxu0 %v984_v41  ;;  %1464 = vmatprep.mubr.f32.mxu0 %v9703_v31  ;;  %v553_v31 = vld [vmem:[#allocation6 + $0x1a8] sm:$0xff]  ;;  %v544_v41 = vld [vmem:[#allocation6 + $0x160] sm:$0xff] }
 0x11b   :  { %1576 = vmatpush2.msra.mxu1 %v1112_v40  ;;  %1577 = vmatprep.mubr.f32.mxu1 %v9708_v33  ;;  %v680_v33 = vld [vmem:[#allocation6 + $0x5a0] sm:$0xff]  ;;  %v673_v52 = vld [vmem:[#allocation6 + $0x568] sm:$0xff] }
 0x11c   :  { %1465 = vmatmul.mubr.f32.vlgmr.msra.gmra.mxu0 %v9713_v34  ;;  %1578 = vmatmul.mubr.f32.vlgmr.msra.gmra.mxu1 %v9718_v35  ;;  %v677_v34 = vld [vmem:[#allocation6 + $0x588] sm:$0xff]  ;;  %v548_v35 = vld [vmem:[#allocation6 + $0x180] sm:$0xff] }
 0x11d   :  { %1626 = vmatprep.subr.mxu0 %v561_v59  ;;  %1739 = vmatprep.subr.mxu1 %v689_v27  ;;  %v672_v40 = vld [vmem:[#allocation6 + $0x560] sm:$0xff]  ;;  %v541_v59 = vld [vmem:[#allocation6 + $0x148] sm:$0xff] }
 0x11e   :  { %1627 = vmatpush1.msra.mxu0 %v560_v63  ;;  %1740 = vmatpush1.msra.mxu1 %v688_v55  ;;  %v669_v27 = vld [vmem:[#allocation6 + $0x548] sm:$0xff]  ;;  %v540_v63 = vld [vmem:[#allocation6 + $0x140] sm:$0xff] }
 0x11f   :  { %1628 = vmatprep.subr.mxu0 %v557_v51  ;;  %1741 = vmatprep.subr.mxu1 %v685_v15  ;;  %v668_v55 = vld [vmem:[#allocation6 + $0x540] sm:$0xff]  ;;  %v537_v51 = vld [vmem:[#allocation6 + $0x128] sm:$0xff] }
 0x120   :  { %1629 = vmatpush1.msra.mxu0 %v556_v42  ;;  %1742 = vmatpush1.msra.mxu1 %v684_v38  ;;  %v665_v15 = vld [vmem:[#allocation6 + $0x528] sm:$0xff]  ;;  %v536_v42 = vld [vmem:[#allocation6 + $0x120] sm:$0xff] }
 0x121   :  { %1630 = vmatprep.subr.mxu0 %v553_v31  ;;  %1743 = vmatprep.subr.mxu1 %v681_v11  ;;  %v664_v38 = vld [vmem:[#allocation6 + $0x520] sm:$0xff]  ;;  %v533_v31 = vld [vmem:[#allocation6 + $0x108] sm:$0xff] }
 0x122   :  { %1631 = vmatpush1.msra.mxu0 %v552_v2  ;;  %1744 = vmatpush1.msra.mxu1 %v680_v33  ;;  %v661_v11 = vld [vmem:[#allocation6 + $0x508] sm:$0xff]  ;;  %v532_v2 = vld [vmem:[#allocation6 + $0x100] sm:$0xff] }
 0x123   :  { %1632 = vmatprep.subr.mxu0 %v549_v20  ;;  %1745 = vmatprep.subr.mxu1 %v677_v34  ;;  %v660_v33 = vld [vmem:[#allocation6 + $0x500] sm:$0xff]  ;;  %v529_v20 = vld [vmem:[#allocation6 + $0xe8] sm:$0xff] }
 0x124   :  { %1633 = vmatpush1.msra.mxu0 %v548_v35  ;;  %1746 = vmatpush1.msra.mxu1 %v676_v9  ;;  %v657_v34 = vld [vmem:[#allocation6 + $0x4e8] sm:$0xff]  ;;  %v528_v35 = vld [vmem:[#allocation6 + $0xe0] sm:$0xff] }
 0x125   :  { %1634 = vmatprep.subr.mxu0 %v545_v61  ;;  %1747 = vmatprep.subr.mxu1 %v673_v52  ;;  %v656_v9 = vld [vmem:[#allocation6 + $0x4e0] sm:$0xff]  ;;  %v525_v61 = vld [vmem:[#allocation6 + $0xc8] sm:$0xff] }
 0x126   :  { %1635 = vmatpush1.msra.mxu0 %v544_v41  ;;  %1748 = vmatpush1.msra.mxu1 %v672_v40  ;;  %v653_v52 = vld [vmem:[#allocation6 + $0x4c8] sm:$0xff]  ;;  %v524_v41 = vld [vmem:[#allocation6 + $0xc0] sm:$0xff] }
 0x127   :  { %1636 = vmatprep.subr.mxu0 %v541_v59  ;;  %1749 = vmatprep.subr.mxu1 %v669_v27  ;;  %v652_v40 = vld [vmem:[#allocation6 + $0x4c0] sm:$0xff]  ;;  %v521_v59 = vld [vmem:[#allocation6 + $0xa8] sm:$0xff] }
 0x128   :  { %1637 = vmatpush1.msra.mxu0 %v540_v63  ;;  %1750 = vmatpush1.msra.mxu1 %v668_v55  ;;  %v649_v27 = vld [vmem:[#allocation6 + $0x4a8] sm:$0xff]  ;;  %v520_v63 = vld [vmem:[#allocation6 + $0xa0] sm:$0xff] }
 0x129   :  { %1638 = vmatprep.subr.mxu0 %v537_v51  ;;  %1751 = vmatprep.subr.mxu1 %v665_v15  ;;  %v648_v55 = vld [vmem:[#allocation6 + $0x4a0] sm:$0xff]  ;;  %v517_v51 = vld [vmem:[#allocation6 + $0x88] sm:$0xff] }
 0x12a   :  { %1639 = vmatpush1.msra.mxu0 %v536_v42  ;;  %1752 = vmatpush1.msra.mxu1 %v664_v38  ;;  %v645_v15 = vld [vmem:[#allocation6 + $0x488] sm:$0xff]  ;;  %v516_v42 = vld [vmem:[#allocation6 + $0x80] sm:$0xff] }
 0x12b   :  { %1640 = vmatprep.subr.mxu0 %v533_v31  ;;  %1753 = vmatprep.subr.mxu1 %v661_v11  ;;  %v644_v38 = vld [vmem:[#allocation6 + $0x480] sm:$0xff]  ;;  %v513_v31 = vld [vmem:[#allocation6 + $0x68] sm:$0xff] }
 0x12c   :  { %1641 = vmatpush1.msra.mxu0 %v532_v2  ;;  %1754 = vmatpush1.msra.mxu1 %v660_v33  ;;  %v641_v11 = vld [vmem:[#allocation6 + $0x468] sm:$0xff]  ;;  %v512_v2 = vld [vmem:[#allocation6 + $0x60] sm:$0xff] }
 0x12d   :  { %1642 = vmatprep.subr.mxu0 %v529_v20  ;;  %1755 = vmatprep.subr.mxu1 %v657_v34  ;;  %v640_v33 = vld [vmem:[#allocation6 + $0x460] sm:$0xff]  ;;  %v509_v20 = vld [vmem:[#allocation6 + $0x48] sm:$0xff] }
 0x12e   :  { %1643 = vmatpush1.msra.mxu0 %v528_v35  ;;  %1756 = vmatpush1.msra.mxu1 %v656_v9  ;;  %v637_v34 = vld [vmem:[#allocation6 + $0x448] sm:$0xff]  ;;  %v508_v35 = vld [vmem:[#allocation6 + $0x40] sm:$0xff] }
 0x12f   :  { %1644 = vmatprep.subr.mxu0 %v525_v61  ;;  %1757 = vmatprep.subr.mxu1 %v653_v52  ;;  %v636_v9 = vld [vmem:[#allocation6 + $0x440] sm:$0xff]  ;;  %v505_v61 = vld [vmem:[#allocation6 + $0x28] sm:$0xff] }
 0x130   :  { %1645 = vmatpush1.msra.mxu0 %v524_v41  ;;  %1758 = vmatpush1.msra.mxu1 %v652_v40  ;;  %v633_v52 = vld [vmem:[#allocation6 + $0x428] sm:$0xff]  ;;  %v504_v41 = vld [vmem:[#allocation6 + $0x20] sm:$0xff] }
 0x131   :  { %1646 = vmatprep.subr.mxu0 %v521_v59  ;;  %1759 = vmatprep.subr.mxu1 %v649_v27  ;;  %v632_v40 = vld [vmem:[#allocation6 + $0x420] sm:$0xff]  ;;  %v501_v59 = vld [vmem:[#allocation6 + $0x8] sm:$0xff] }
 0x132   :  { %1647 = vmatpush1.msra.mxu0 %v520_v63  ;;  %1760 = vmatpush1.msra.mxu1 %v648_v55  ;;  %v629_v27 = vld [vmem:[#allocation6 + $0x408] sm:$0xff]  ;;  %v500_v63 = vld [vmem:[#allocation6] sm:$0xff] }
 0x133   :  { %1648 = vmatprep.subr.mxu0 %v517_v51  ;;  %1761 = vmatprep.subr.mxu1 %v645_v15  ;;  %v628_v55 = vld [vmem:[#allocation6 + $0x400] sm:$0xff]  ;;  %v625_v51 = vld [vmem:[#allocation6 + $0x3e8] sm:$0xff] }
 0x134   :  { %1649 = vmatpush1.msra.mxu0 %v516_v42  ;;  %1762 = vmatpush1.msra.mxu1 %v644_v38  ;;  %v753_v15 = vld [vmem:[#allocation6 + $0x7e8] sm:$0xff]  ;;  %v624_v42 = vld [vmem:[#allocation6 + $0x3e0] sm:$0xff] }
 0x135   :  { %1650 = vmatprep.subr.mxu0 %v513_v31  ;;  %1763 = vmatprep.subr.mxu1 %v641_v11  ;;  %v752_v38 = vld [vmem:[#allocation6 + $0x7e0] sm:$0xff]  ;;  %v621_v31 = vld [vmem:[#allocation6 + $0x3c8] sm:$0xff] }
 0x136   :  { %1651 = vmatpush1.msra.mxu0 %v512_v2  ;;  %1764 = vmatpush1.msra.mxu1 %v640_v33  ;;  %v749_v11 = vld [vmem:[#allocation6 + $0x7c8] sm:$0xff]  ;;  %v620_v2 = vld [vmem:[#allocation6 + $0x3c0] sm:$0xff] }
 0x137   :  { %1652 = vmatprep.subr.mxu0 %v509_v20  ;;  %1765 = vmatprep.subr.mxu1 %v637_v34  ;;  %v748_v33 = vld [vmem:[#allocation6 + $0x7c0] sm:$0xff]  ;;  %v617_v20 = vld [vmem:[#allocation6 + $0x3a8] sm:$0xff] }
 0x138   :  { %1653 = vmatpush1.msra.mxu0 %v508_v35  ;;  %1766 = vmatpush1.msra.mxu1 %v636_v9  ;;  %v745_v34 = vld [vmem:[#allocation6 + $0x7a8] sm:$0xff]  ;;  %v616_v35 = vld [vmem:[#allocation6 + $0x3a0] sm:$0xff] }
 0x139   :  { %1654 = vmatprep.subr.mxu0 %v505_v61  ;;  %1767 = vmatprep.subr.mxu1 %v633_v52  ;;  %v744_v9 = vld [vmem:[#allocation6 + $0x7a0] sm:$0xff]  ;;  %v613_v61 = vld [vmem:[#allocation6 + $0x388] sm:$0xff] }
 0x13a   :  { %1655 = vmatpush1.msra.mxu0 %v504_v41  ;;  %1768 = vmatpush1.msra.mxu1 %v632_v40  ;;  %v740_v52 = vld [vmem:[#allocation6 + $0x780] sm:$0xff] }
 0x13b   :  { %1656 = vmatprep.subr.mxu0 %v501_v59  ;;  %1769 = vmatprep.subr.mxu1 %v629_v27  ;;  %v608_v41 = vld [vmem:[#allocation6 + $0x360] sm:$0xff]  ;;  %v605_v59 = vld [vmem:[#allocation6 + $0x348] sm:$0xff] }
 0x13c   :  { %1657 = vmatpush1.msra.mxu0 %v500_v63  ;;  %1770 = vmatpush1.msra.mxu1 %v628_v55  ;;  %v736_v40 = vld [vmem:[#allocation6 + $0x760] sm:$0xff] }
 0x13d   :  { %1658 = vmatprep.subr.mxu0 %v625_v51  ;;  %1771 = vmatprep.subr.mxu1 %v753_v15  ;;  %v732_v27 = vld [vmem:[#allocation6 + $0x740] sm:$0xff]  ;;  %v597_v51 = vld [vmem:[#allocation6 + $0x308] sm:$0xff] }
 0x13e   :  { %1659 = vmatpush2.msra.mxu0 %v624_v42  ;;  %1772 = vmatpush2.msra.mxu1 %v752_v38  ;;  %v600_v63 = vld [vmem:[#allocation6 + $0x320] sm:$0xff] }
 0x13f   :  { %1470 = vmatprep.mubr.f32.mxu0 %v9848_v0  ;;  %1583 = vmatprep.mubr.f32.mxu1 %v9855_v1  ;;  %v741_v0 = vld [vmem:[#allocation6 + $0x788] sm:$0xff]  ;;  %v612_v1 = vld [vmem:[#allocation6 + $0x380] sm:$0xff] }
 0x140   :  { %1660 = vmatprep.subr.mxu0 %v621_v31  ;;  %1773 = vmatprep.subr.mxu1 %v749_v11  ;;  %v728_v55 = vld [vmem:[#allocation6 + $0x720] sm:$0xff]  ;;  %v589_v31 = vld [vmem:[#allocation6 + $0x2c8] sm:$0xff] }
 0x141   :  { %1471 = vmatmul.mubr.f32.gmra.mxu0 %v9880_v8  ;;  %1584 = vmatmul.mubr.f32.gmra.mxu1 %v9887_v13  ;;  %v609_v8 = vld [vmem:[#allocation6 + $0x368] sm:$0xff]  ;;  %v724_v15 = vld [vmem:[#allocation6 + $0x700] sm:$0xff] }
 0x142   :  { %1661 = vmatpush2.msra.mxu0 %v620_v2  ;;  %1774 = vmatpush2.msra.mxu1 %v748_v33  ;;  %v737_v13 = vld [vmem:[#allocation6 + $0x768] sm:$0xff]  ;;  %v592_v42 = vld [vmem:[#allocation6 + $0x2e0] sm:$0xff] }
 0x143   :  { %1662 = vmatprep.subr.mxu0 %v617_v20  ;;  %1775 = vmatprep.subr.mxu1 %v745_v34  ;;  %v720_v38 = vld [vmem:[#allocation6 + $0x6e0] sm:$0xff]  ;;  %v581_v20 = vld [vmem:[#allocation6 + $0x288] sm:$0xff] }
 0x144   :  { %1663 = vmatpush2.msra.mxu0 %v616_v35  ;;  %1776 = vmatpush2.msra.mxu1 %v744_v9  ;;  %v716_v11 = vld [vmem:[#allocation6 + $0x6c0] sm:$0xff] }
 0x145   :  { %1476 = vmatprep.mubr.f32.mxu0 %v9908_v23  ;;  %1589 = vmatprep.mubr.f32.mxu1 %v9915_v24  ;;  %v733_v23 = vld [vmem:[#allocation6 + $0x748] sm:$0xff]  ;;  %v604_v24 = vld [vmem:[#allocation6 + $0x340] sm:$0xff] }
 0x146   :  { %1664 = vmatprep.subr.mxu0 %v613_v61  ;;  %1777 = vmatprep.subr.mxu1 %v741_v0  ;;  %v584_v2 = vld [vmem:[#allocation6 + $0x2a0] sm:$0xff]  ;;  %v573_v61 = vld [vmem:[#allocation6 + $0x248] sm:$0xff] }
 0x147   :  { %1477 = vmatmul.mubr.f32.gmra.mxu0 %v9926_v50  ;;  %1590 = vmatmul.mubr.f32.gmra.mxu1 %v9933_v60  ;;  %v601_v50 = vld [vmem:[#allocation6 + $0x328] sm:$0xff]  ;;  %v712_v33 = vld [vmem:[#allocation6 + $0x6a0] sm:$0xff] }
 0x148   :  { %1665 = vmatpush2.msra.mxu0 %v612_v1  ;;  %1778 = vmatpush2.msra.mxu1 %v740_v52  ;;  %v729_v60 = vld [vmem:[#allocation6 + $0x728] sm:$0xff]  ;;  %v708_v34 = vld [vmem:[#allocation6 + $0x680] sm:$0xff] }
 0x149   :  { %1666 = vmatprep.subr.mxu0 %v609_v8  ;;  %1779 = vmatprep.subr.mxu1 %v737_v13  ;;  %v576_v35 = vld [vmem:[#allocation6 + $0x260] sm:$0xff]  ;;  %v565_v8 = vld [vmem:[#allocation6 + $0x208] sm:$0xff] }
 0x14a   :  { %1667 = vmatpush2.msra.mxu0 %v608_v41  ;;  %1780 = vmatpush2.msra.mxu1 %v736_v40  ;;  %v704_v9 = vld [vmem:[#allocation6 + $0x660] sm:$0xff]  ;;  %v693_v13 = vld [vmem:[#allocation6 + $0x608] sm:$0xff]  ;;  %v10163_v40 = vld [vmem:[#allocation2 + $0x18] sm:$0xff] }
 0x14b   :  { %1482 = vmatprep.mubr.f32.mxu0 %v9962_v47  ;;  %1595 = vmatprep.mubr.f32.mxu1 %v9967_v6  ;;  %v725_v47 = vld [vmem:[#allocation6 + $0x708] sm:$0xff]  ;;  %v596_v6 = vld [vmem:[#allocation6 + $0x300] sm:$0xff] }
 0x14c   :  { %1668 = vmatprep.subr.mxu0 %v605_v59  ;;  %1781 = vmatprep.subr.mxu1 %v733_v23  ;;  %v700_v0 = vld [vmem:[#allocation6 + $0x640] sm:$0xff]  ;;  %v563_v59 = vld [vmem:[#allocation6 + $0x1f8] sm:$0xff] }
 0x14d   :  { %1483 = vmatmul.mubr.f32.gmra.mxu0 %v9994_v49  ;;  %1596 = vmatmul.mubr.f32.gmra.mxu1 %v9999_v16  ;;  %v593_v49 = vld [vmem:[#allocation6 + $0x2e8] sm:$0xff]  ;;  %v568_v1 = vld [vmem:[#allocation6 + $0x220] sm:$0xff]  ;;  %v691_v23 = vld [vmem:[#allocation6 + $0x5f8] sm:$0xff] }
 0x14e   :  { %1669 = vmatpush2.msra.mxu0 %v604_v24  ;;  %1782 = vmatpush2.msra.mxu1 %v732_v27  ;;  %v721_v16 = vld [vmem:[#allocation6 + $0x6e8] sm:$0xff]  ;;  %v696_v52 = vld [vmem:[#allocation6 + $0x620] sm:$0xff]  ;;  %v562_v24 = vld [vmem:[#allocation6 + $0x1f0] sm:$0xff] }
 0x14f   :  { %1670 = vmatprep.subr.mxu0 %v601_v50  ;;  %1783 = vmatprep.subr.mxu1 %v729_v60  ;;  %v692_v41 = vld [vmem:[#allocation6 + $0x600] sm:$0xff]  ;;  %v690_v27 = vld [vmem:[#allocation6 + $0x5f0] sm:$0xff]  ;;  %v559_v50 = vld [vmem:[#allocation6 + $0x1d8] sm:$0xff] }
 0x150   :  { %1671 = vmatpush2.msra.mxu0 %v600_v63  ;;  %1784 = vmatpush2.msra.mxu1 %v728_v55  ;;  %v687_v60 = vld [vmem:[#allocation6 + $0x5d8] sm:$0xff]  ;;  %v558_v63 = vld [vmem:[#allocation6 + $0x1d0] sm:$0xff] }
 0x151   :  { %1488 = vmatprep.mubr.f32.mxu0 %v10022_v37  ;;  %1601 = vmatprep.mubr.f32.mxu1 %v10027_v18  ;;  %v717_v37 = vld [vmem:[#allocation6 + $0x6c8] sm:$0xff]  ;;  %v588_v18 = vld [vmem:[#allocation6 + $0x2c0] sm:$0xff]  ;;  %v686_v55 = vld [vmem:[#allocation6 + $0x5d0] sm:$0xff] }
 0x152   :  { %1672 = vmatprep.subr.mxu0 %v597_v51  ;;  %1785 = vmatprep.subr.mxu1 %v725_v47  ;;  %v555_v51 = vld [vmem:[#allocation6 + $0x1b8] sm:$0xff] }
 0x153   :  { %1489 = vmatmul.mubr.f32.gmra.mxu0 %v10040_v43  ;;  %1602 = vmatmul.mubr.f32.gmra.mxu1 %v10043_v62  ;;  %v585_v43 = vld [vmem:[#allocation6 + $0x2a8] sm:$0xff]  ;;  %v683_v47 = vld [vmem:[#allocation6 + $0x5b8] sm:$0xff] }
 0x154   :  { %1673 = vmatpush2.msra.mxu0 %v596_v6  ;;  %1786 = vmatpush2.msra.mxu1 %v724_v15  ;;  %v713_v62 = vld [vmem:[#allocation6 + $0x6a8] sm:$0xff]  ;;  %v554_v6 = vld [vmem:[#allocation6 + $0x1b0] sm:$0xff] }
 0x155   :  { %1674 = vmatprep.subr.mxu0 %v593_v49  ;;  %1787 = vmatprep.subr.mxu1 %v721_v16  ;;  %v682_v15 = vld [vmem:[#allocation6 + $0x5b0] sm:$0xff]  ;;  %v551_v49 = vld [vmem:[#allocation6 + $0x198] sm:$0xff] }
 0x156   :  { %1675 = vmatpush2.msra.mxu0 %v592_v42  ;;  %1788 = vmatpush2.msra.mxu1 %v720_v38  ;;  %v679_v16 = vld [vmem:[#allocation6 + $0x598] sm:$0xff]  ;;  %v550_v42 = vld [vmem:[#allocation6 + $0x190] sm:$0xff] }
 0x157   :  { %1494 = vmatprep.mubr.f32.mxu0 %v10066_v25  ;;  %1607 = vmatprep.mubr.f32.mxu1 %v10071_v26  ;;  %v709_v25 = vld [vmem:[#allocation6 + $0x688] sm:$0xff]  ;;  %v580_v26 = vld [vmem:[#allocation6 + $0x280] sm:$0xff]  ;;  %v678_v38 = vld [vmem:[#allocation6 + $0x590] sm:$0xff] }
 0x158   :  { %1676 = vmatprep.subr.mxu0 %v589_v31  ;;  %1789 = vmatprep.subr.mxu1 %v717_v37  ;;  %v547_v31 = vld [vmem:[#allocation6 + $0x178] sm:$0xff] }
 0x159   :  { %1495 = vmatmul.mubr.f32.gmra.mxu0 %v10084_v39  ;;  %1608 = vmatmul.mubr.f32.gmra.mxu1 %v10087_v32  ;;  %v577_v39 = vld [vmem:[#allocation6 + $0x268] sm:$0xff]  ;;  %v675_v37 = vld [vmem:[#allocation6 + $0x578] sm:$0xff] }
 0x15a   :  { %1677 = vmatpush2.msra.mxu0 %v588_v18  ;;  %1790 = vmatpush2.msra.mxu1 %v716_v11  ;;  %v705_v32 = vld [vmem:[#allocation6 + $0x668] sm:$0xff]  ;;  %v546_v18 = vld [vmem:[#allocation6 + $0x170] sm:$0xff] }
 0x15b   :  { %1678 = vmatprep.subr.mxu0 %v585_v43  ;;  %1791 = vmatprep.subr.mxu1 %v713_v62  ;;  %v674_v11 = vld [vmem:[#allocation6 + $0x570] sm:$0xff]  ;;  %v543_v43 = vld [vmem:[#allocation6 + $0x158] sm:$0xff] }
 0x15c   :  { %1679 = vmatpush2.msra.mxu0 %v584_v2  ;;  %1792 = vmatpush2.msra.mxu1 %v712_v33  ;;  %v671_v62 = vld [vmem:[#allocation6 + $0x558] sm:$0xff]  ;;  %v542_v2 = vld [vmem:[#allocation6 + $0x150] sm:$0xff] }
 0x15d   :  { %1500 = vmatprep.mubr.f32.mxu0 %v10098_v57  ;;  %1613 = vmatprep.mubr.f32.mxu1 %v10101_v54  ;;  %v701_v57 = vld [vmem:[#allocation6 + $0x648] sm:$0xff]  ;;  %v572_v54 = vld [vmem:[#allocation6 + $0x240] sm:$0xff]  ;;  %v670_v33 = vld [vmem:[#allocation6 + $0x550] sm:$0xff] }
 0x15e   :  { %1680 = vmatprep.subr.mxu0 %v581_v20  ;;  %1793 = vmatprep.subr.mxu1 %v709_v25  ;;  %v539_v20 = vld [vmem:[#allocation6 + $0x138] sm:$0xff] }
 0x15f   :  { %1501 = vmatmul.mubr.f32.gmra.mxu0 %v10104_v4  ;;  %1614 = vmatmul.mubr.f32.gmra.mxu1 %v10107_v22  ;;  %v569_v4 = vld [vmem:[#allocation6 + $0x228] sm:$0xff]  ;;  %v667_v25 = vld [vmem:[#allocation6 + $0x538] sm:$0xff] }
 0x160   :  { %1681 = vmatpush2.msra.mxu0 %v580_v26  ;;  %1794 = vmatpush2.msra.mxu1 %v708_v34  ;;  %v697_v22 = vld [vmem:[#allocation6 + $0x628] sm:$0xff]  ;;  %v538_v26 = vld [vmem:[#allocation6 + $0x130] sm:$0xff] }
 0x161   :  { %1682 = vmatprep.subr.mxu0 %v577_v39  ;;  %1795 = vmatprep.subr.mxu1 %v705_v32  ;;  %v666_v34 = vld [vmem:[#allocation6 + $0x530] sm:$0xff]  ;;  %v535_v39 = vld [vmem:[#allocation6 + $0x118] sm:$0xff] }
 0x162   :  { %1683 = vmatpush2.msra.mxu0 %v576_v35  ;;  %1796 = vmatpush2.msra.mxu1 %v704_v9  ;;  %v663_v32 = vld [vmem:[#allocation6 + $0x518] sm:$0xff]  ;;  %v10184_v35 = vld [vmem:[#allocation2 + $0xa8] sm:$0xff]  ;;  %v534_v9 = vld [vmem:[#allocation6 + $0x110] sm:$0xff] }
 0x163   :  { %1506 = vmatprep.mubr.f32.mxu0 %v10114_v30  ;;  %1619 = vmatprep.mubr.f32.mxu1 %v10117_v53  ;;  %v564_v30 = vld [vmem:[#allocation6 + $0x200] sm:$0xff]  ;;  %v10161_v53 = vld [vmem:[#allocation2 + $0x8] sm:$0xff] }
 0x164   :  { %1684 = vmatprep.subr.mxu0 %v573_v61  ;;  %1797 = vmatprep.subr.mxu1 %v701_v57  ;;  %v662_v61 = vld [vmem:[#allocation6 + $0x510] sm:$0xff]  ;;  %v10186_v57 = vld [vmem:[#allocation2 + $0xa0] sm:$0xff] }
 0x165   :  { %1507 = vmatmul.mubr.f32.gmra.mxu0 %v10120_v28  ;;  %1620 = vmatmul.mubr.f32.gmra.mxu1 %v10123_v5  ;;  %v10165_v28 = vld [vmem:[#allocation2] sm:$0xff]  ;;  %v10167_v5 = vld [vmem:[#allocation2 + $0x10] sm:$0xff] }
 0x166   :  { %1685 = vmatpush2.msra.mxu0 %v572_v54  ;;  %1798 = vmatpush2.msra.mxu1 %v700_v0  ;;  %v531_v54 = vld [vmem:[#allocation6 + $0xf8] sm:$0xff] }
 0x167   :  { %1686 = vmatprep.subr.mxu0 %v569_v4  ;;  %1799 = vmatprep.subr.mxu1 %v697_v22  ;;  %v659_v0 = vld [vmem:[#allocation6 + $0x4f8] sm:$0xff]  ;;  %v530_v22 = vld [vmem:[#allocation6 + $0xf0] sm:$0xff] }
 0x168   :  { %1687 = vmatpush2.msra.mxu0 %v568_v1  ;;  %1800 = vmatpush2.msra.mxu1 %v696_v52  ;;  %v10190_v4 = vld [vmem:[#allocation2 + $0xb8] sm:$0xff]  ;;  %v658_v1 = vld [vmem:[#allocation6 + $0x4f0] sm:$0xff] }
 0x169   :  { %1688 = vmatprep.subr.mxu0 %v565_v8  ;;  %1801 = vmatprep.subr.mxu1 %v693_v13  ;;  %v527_v52 = vld [vmem:[#allocation6 + $0xd8] sm:$0xff]  ;;  %v10193_v8 = vld [vmem:[#allocation2 + $0xb0] sm:$0xff] }
 0x16a   :  { %1689 = vmatpush2.msra.mxu0 %v564_v30  ;;  %1690 = vmatprep.mubr.f32.mxu0 %v10161_v53  ;;  %v655_v13 = vld [vmem:[#allocation6 + $0x4d8] sm:$0xff]  ;;  %v526_v30 = vld [vmem:[#allocation6 + $0xd0] sm:$0xff] }
 0x16b   :  { %1802 = vmatpush2.msra.mxu1 %v692_v41  ;;  %1803 = vmatprep.mubr.f32.mxu1 %v10163_v40  ;;  %v654_v41 = vld [vmem:[#allocation6 + $0x4d0] sm:$0xff] }
 0x16c   :  { %1691 = vmatmul.mubr.f32.vlgmr.msra.gmra.mxu0 %v10165_v28  ;;  %1804 = vmatmul.mubr.f32.vlgmr.msra.gmra.mxu1 %v10167_v5 }
 0x16d   :  { %1852 = vmatprep.subr.mxu0 %v563_v59  ;;  %1965 = vmatprep.subr.mxu1 %v691_v23  ;;  %v523_v59 = vld [vmem:[#allocation6 + $0xb8] sm:$0xff] }
 0x16e   :  { %1853 = vmatpush1.msra.mxu0 %v562_v24  ;;  %1966 = vmatpush1.msra.mxu1 %v690_v27  ;;  %v651_v23 = vld [vmem:[#allocation6 + $0x4b8] sm:$0xff]  ;;  %v522_v24 = vld [vmem:[#allocation6 + $0xb0] sm:$0xff] }
 0x16f   :  { %1854 = vmatprep.subr.mxu0 %v559_v50  ;;  %1967 = vmatprep.subr.mxu1 %v687_v60  ;;  %v650_v27 = vld [vmem:[#allocation6 + $0x4b0] sm:$0xff]  ;;  %v519_v50 = vld [vmem:[#allocation6 + $0x98] sm:$0xff] }
 0x170   :  { %1696 = vmatprep.mubr.f32.mxu0 %v9673_v3  ;;  %1855 = vmatpush1.msra.mxu0 %v558_v63  ;;  %v647_v60 = vld [vmem:[#allocation6 + $0x498] sm:$0xff]  ;;  %v518_v63 = vld [vmem:[#allocation6 + $0x90] sm:$0xff] }
 0x171   :  { %1968 = vmatpush1.msra.mxu1 %v686_v55  ;;  %1697 = vmatmul.mubr.f32.gmra.mxu0 %v9687_v10  ;;  %v646_v55 = vld [vmem:[#allocation6 + $0x490] sm:$0xff] }
 0x172   :  { %1856 = vmatprep.subr.mxu0 %v555_v51  ;;  %1969 = vmatprep.subr.mxu1 %v683_v47 }
 0x173   :  { %1809 = vmatprep.mubr.f32.mxu1 %v9680_v7  ;;  %1857 = vmatpush1.msra.mxu0 %v554_v6  ;;  %v515_v6 = vld [vmem:[#allocation6 + $0x78] sm:$0xff] }
 0x174   :  { %1970 = vmatpush1.msra.mxu1 %v682_v15  ;;  %1858 = vmatprep.subr.mxu0 %v551_v49  ;;  %v643_v15 = vld [vmem:[#allocation6 + $0x478] sm:$0xff] }
 0x175   :  { %1810 = vmatmul.mubr.f32.gmra.mxu1 %v9694_v12  ;;  %1971 = vmatprep.subr.mxu1 %v679_v16  ;;  %v13931_v16 = vld [vmem:[#allocation29_spill] sm:$0xff] }
 0x176   :  { %1702 = vmatprep.mubr.f32.mxu0 %v9786_v44  ;;  %1859 = vmatpush1.msra.mxu0 %v550_v42  ;;  %v514_v42 = vld [vmem:[#allocation6 + $0x70] sm:$0xff] }
 0x177   :  { %1972 = vmatpush1.msra.mxu1 %v678_v38  ;;  %1703 = vmatmul.mubr.f32.gmra.mxu0 %v9800_v45  ;;  %v13932_v38 = vld [vmem:[#allocation31_spill] sm:$0xff] }
 0x178   :  { %1860 = vmatprep.subr.mxu0 %v547_v31  ;;  %1973 = vmatprep.subr.mxu1 %v675_v37  ;;  %v642_v31 = vld [vmem:[#allocation6 + $0x470] sm:$0xff]  ;;  %v511_v37 = vld [vmem:[#allocation6 + $0x58] sm:$0xff] }
 0x179   :  { %1815 = vmatprep.mubr.f32.mxu1 %v9793_v46  ;;  %1861 = vmatpush1.msra.mxu0 %v546_v18  ;;  %v639_v18 = vld [vmem:[#allocation6 + $0x458] sm:$0xff] }
 0x17a   :  { %1974 = vmatpush1.msra.mxu1 %v674_v11  ;;  %1862 = vmatprep.subr.mxu0 %v543_v43  ;;  %v13933_v11 = vld [vmem:[#allocation30_spill] sm:$0xff]  ;;  %v510_v43 = vld [vmem:[#allocation6 + $0x50] sm:$0xff] }
 0x17b   :  { %1816 = vmatmul.mubr.f32.gmra.mxu1 %v9807_v48  ;;  %1975 = vmatprep.subr.mxu1 %v671_v62  ;;  %v638_v62 = vld [vmem:[#allocation6 + $0x450] sm:$0xff] }
 0x17c   :  { %1708 = vmatprep.mubr.f32.mxu0 %v9832_v56  ;;  %1863 = vmatpush1.msra.mxu0 %v542_v2  ;;  %v13934_v2 = vld [vmem:[#allocation32_spill] sm:$0xff] }
 0x17d   :  { %1976 = vmatpush1.msra.mxu1 %v670_v33  ;;  %1709 = vmatmul.mubr.f32.gmra.mxu0 %v9866_v17  ;;  %v507_v33 = vld [vmem:[#allocation6 + $0x38] sm:$0xff] }
 0x17e   :  { %1864 = vmatprep.subr.mxu0 %v539_v20  ;;  %1977 = vmatprep.subr.mxu1 %v667_v25  ;;  %v635_v20 = vld [vmem:[#allocation6 + $0x438] sm:$0xff]  ;;  %v13935_v25 = vld [vmem:[#allocation33_spill] sm:$0xff] }
 0x17f   :  { %1821 = vmatprep.mubr.f32.mxu1 %v9839_v58  ;;  %1865 = vmatpush1.msra.mxu0 %v538_v26  ;;  %v506_v26 = vld [vmem:[#allocation6 + $0x30] sm:$0xff] }
 0x180   :  { %1978 = vmatpush1.msra.mxu1 %v666_v34  ;;  %1866 = vmatprep.subr.mxu0 %v535_v39  ;;  %v13936_v34 = vld [vmem:[#allocation35_spill] sm:$0xff]  ;;  %v634_v39 = vld [vmem:[#allocation6 + $0x430] sm:$0xff] }
 0x181   :  { %1822 = vmatmul.mubr.f32.gmra.mxu1 %v9873_v21  ;;  %1979 = vmatprep.subr.mxu1 %v663_v32  ;;  %v503_v32 = vld [vmem:[#allocation6 + $0x18] sm:$0xff] }
 0x182   :  { %1714 = vmatprep.mubr.f32.mxu0 %v10184_v35  ;;  %1867 = vmatpush1.msra.mxu0 %v534_v9  ;;  %v631_v9 = vld [vmem:[#allocation6 + $0x418] sm:$0xff] }
 0x183   :  { %1980 = vmatpush1.msra.mxu1 %v662_v61  ;;  %1715 = vmatmul.mubr.f32.gmra.mxu0 %v10186_v57  ;;  %v13937_v61 = vld [vmem:[#allocation34_spill] sm:$0xff] }
 0x184   :  { %1868 = vmatprep.subr.mxu0 %v531_v54  ;;  %1981 = vmatprep.subr.mxu1 %v659_v0  ;;  %v502_v54 = vld [vmem:[#allocation6 + $0x10] sm:$0xff] }
 0x185   :  { %1827 = vmatprep.mubr.f32.mxu1 %v10190_v4  ;;  %1869 = vmatpush1.msra.mxu0 %v530_v22  ;;  %v630_v0 = vld [vmem:[#allocation6 + $0x410] sm:$0xff]  ;;  %v627_v22 = vld [vmem:[#allocation6 + $0x3f8] sm:$0xff] }
 0x186   :  { %1982 = vmatpush1.msra.mxu1 %v658_v1  ;;  %1870 = vmatprep.subr.mxu0 %v527_v52  ;;  %v755_v1 = vld [vmem:[#allocation6 + $0x7f8] sm:$0xff]  ;;  %v13938_v52 = vld [vmem:[#allocation36_spill] sm:$0xff] }
 0x187   :  { %1828 = vmatmul.mubr.f32.gmra.mxu1 %v10193_v8  ;;  %1983 = vmatprep.subr.mxu1 %v655_v13  ;;  %v626_v13 = vld [vmem:[#allocation6 + $0x3f0] sm:$0xff] }
 0x188   :  { %1720 = vmatprep.mubr.f32.mxu0 %v9942_v29  ;;  %1871 = vmatpush1.msra.mxu0 %v526_v30  ;;  %v754_v30 = vld [vmem:[#allocation6 + $0x7f0] sm:$0xff] }
 0x189   :  { %1984 = vmatpush1.msra.mxu1 %v654_v41  ;;  %1721 = vmatmul.mubr.f32.gmra.mxu0 %v9980_v19  ;;  %v623_v41 = vld [vmem:[#allocation6 + $0x3d8] sm:$0xff] }
 0x18a   :  { %1872 = vmatprep.subr.mxu0 %v523_v59  ;;  %1985 = vmatprep.subr.mxu1 %v651_v23  ;;  %v751_v59 = vld [vmem:[#allocation6 + $0x7d8] sm:$0xff]  ;;  %v622_v23 = vld [vmem:[#allocation6 + $0x3d0] sm:$0xff] }
 0x18b   :  { %1833 = vmatprep.mubr.f32.mxu1 %v9949_v36  ;;  %1873 = vmatpush1.msra.mxu0 %v522_v24  ;;  %v750_v24 = vld [vmem:[#allocation6 + $0x7d0] sm:$0xff] }
 0x18c   :  { %1986 = vmatpush1.msra.mxu1 %v650_v27  ;;  %1874 = vmatprep.subr.mxu0 %v519_v50  ;;  %v1240_v51 = vpop.f32.mrf.mxu0  ;;  %v1353_v47 = vpop.f32.mrf.mxu1  ;;  %v619_v27 = vld [vmem:[#allocation6 + $0x3b8] sm:$0xff] }
 0x18d   :  { %1834 = vmatmul.mubr.f32.gmra.mxu1 %v9987_v14  ;;  %1987 = vmatprep.subr.mxu1 %v647_v60  ;;  %v10201_v49 = vadd.f32 %v1353_v47, %v1240_v51  ;;  %v747_v50 = vld [vmem:[#allocation6 + $0x7b8] sm:$0xff]  ;;  %v618_v60 = vld [vmem:[#allocation6 + $0x3b0] sm:$0xff] }
 0x18e   :  { %1726 = vmatprep.mubr.f32.mxu0 %v13931_v16  ;;  %1875 = vmatpush1.msra.mxu0 %v518_v63  ;;  %v746_v63 = vld [vmem:[#allocation6 + $0x7b0] sm:$0xff]  ;;  %v743_v51 = vld [vmem:[#allocation6 + $0x798] sm:$0xff] }
 0x18f   :  { %1988 = vmatpush1.msra.mxu1 %v646_v55  ;;  %1727 = vmatmul.mubr.f32.gmra.mxu0 %v13932_v38  ;;  %v615_v55 = vld [vmem:[#allocation6 + $0x398] sm:$0xff]  ;;  %v614_v47 = vld [vmem:[#allocation6 + $0x390] sm:$0xff] }
 0x190   :  { %1876 = vmatprep.subr.mxu0 %v515_v6  ;;  %1989 = vmatprep.subr.mxu1 %v643_v15  ;;  %v742_v6 = vld [vmem:[#allocation6 + $0x790] sm:$0xff]  ;;  %v611_v15 = vld [vmem:[#allocation6 + $0x378] sm:$0xff] }
 0x191   :  { %1839 = vmatprep.mubr.f32.mxu1 %v13933_v11  ;;  %1877 = vmatpush1.msra.mxu0 %v514_v42  ;;  %v739_v42 = vld [vmem:[#allocation6 + $0x778] sm:$0xff] }
 0x192   :  { %1990 = vmatpush1.msra.mxu1 %v642_v31  ;;  %1878 = vmatprep.subr.mxu0 %v511_v37  ;;  %v610_v31 = vld [vmem:[#allocation6 + $0x370] sm:$0xff] }
 0x193   :  { %1840 = vmatmul.mubr.f32.gmra.mxu1 %v13934_v2  ;;  %1991 = vmatprep.subr.mxu1 %v639_v18  ;;  %v738_v37 = vld [vmem:[#allocation6 + $0x770] sm:$0xff]  ;;  %v607_v18 = vld [vmem:[#allocation6 + $0x358] sm:$0xff] }
 0x194   :  { %1732 = vmatprep.mubr.f32.mxu0 %v13935_v25  ;;  %1879 = vmatpush1.msra.mxu0 %v510_v43  ;;  %v735_v43 = vld [vmem:[#allocation6 + $0x758] sm:$0xff] }
 0x195   :  { %1992 = vmatpush1.msra.mxu1 %v638_v62  ;;  %1733 = vmatmul.mubr.f32.gmra.mxu0 %v13936_v34  ;;  %v606_v62 = vld [vmem:[#allocation6 + $0x350] sm:$0xff] }
 0x196   :  { %1880 = vmatprep.subr.mxu0 %v507_v33  ;;  %1993 = vmatprep.subr.mxu1 %v635_v20  ;;  %v734_v33 = vld [vmem:[#allocation6 + $0x750] sm:$0xff]  ;;  %v603_v20 = vld [vmem:[#allocation6 + $0x338] sm:$0xff] }
 0x197   :  { %1845 = vmatprep.mubr.f32.mxu1 %v13937_v61  ;;  %1881 = vmatpush1.msra.mxu0 %v506_v26  ;;  %v731_v26 = vld [vmem:[#allocation6 + $0x738] sm:$0xff] }
 0x198   :  { %1994 = vmatpush1.msra.mxu1 %v634_v39  ;;  %1882 = vmatprep.subr.mxu0 %v503_v32  ;;  %v602_v39 = vld [vmem:[#allocation6 + $0x330] sm:$0xff] }
 0x199   :  { %1846 = vmatmul.mubr.f32.gmra.mxu1 %v13938_v52  ;;  %1995 = vmatprep.subr.mxu1 %v631_v9  ;;  %v730_v32 = vld [vmem:[#allocation6 + $0x730] sm:$0xff]  ;;  %v599_v9 = vld [vmem:[#allocation6 + $0x318] sm:$0xff] }
 0x19a   :  { %1883 = vmatpush1.msra.mxu0 %v502_v54  ;;  %1996 = vmatpush1.msra.mxu1 %v630_v0  ;;  %v727_v54 = vld [vmem:[#allocation6 + $0x718] sm:$0xff]  ;;  %v598_v0 = vld [vmem:[#allocation6 + $0x310] sm:$0xff] }
 0x19b   :  { %1884 = vmatprep.subr.mxu0 %v627_v22  ;;  %1997 = vmatprep.subr.mxu1 %v755_v1  ;;  %v726_v22 = vld [vmem:[#allocation6 + $0x710] sm:$0xff]  ;;  %v595_v1 = vld [vmem:[#allocation6 + $0x2f8] sm:$0xff] }
 0x19c   :  { %1885 = vmatpush2.msra.mxu0 %v626_v13  ;;  %1998 = vmatpush2.msra.mxu1 %v754_v30  ;;  %v723_v13 = vld [vmem:[#allocation6 + $0x6f8] sm:$0xff]  ;;  %v594_v30 = vld [vmem:[#allocation6 + $0x2f0] sm:$0xff] }
 0x19d   :  { %1886 = vmatprep.subr.mxu0 %v623_v41  ;;  %1999 = vmatprep.subr.mxu1 %v751_v59  ;;  %v722_v41 = vld [vmem:[#allocation6 + $0x6f0] sm:$0xff]  ;;  %v591_v59 = vld [vmem:[#allocation6 + $0x2d8] sm:$0xff] }
 0x19e   :  { %1887 = vmatpush2.msra.mxu0 %v622_v23  ;;  %2000 = vmatpush2.msra.mxu1 %v750_v24  ;;  %v719_v23 = vld [vmem:[#allocation6 + $0x6d8] sm:$0xff]  ;;  %v590_v24 = vld [vmem:[#allocation6 + $0x2d0] sm:$0xff] }
 0x19f   :  { %1888 = vmatprep.subr.mxu0 %v619_v27  ;;  %2001 = vmatprep.subr.mxu1 %v747_v50  ;;  %v718_v27 = vld [vmem:[#allocation6 + $0x6d0] sm:$0xff]  ;;  %v587_v50 = vld [vmem:[#allocation6 + $0x2b8] sm:$0xff] }
 0x1a0   :  { %1889 = vmatpush2.msra.mxu0 %v618_v60  ;;  %2002 = vmatpush2.msra.mxu1 %v746_v63  ;;  %v715_v60 = vld [vmem:[#allocation6 + $0x6b8] sm:$0xff]  ;;  %v586_v63 = vld [vmem:[#allocation6 + $0x2b0] sm:$0xff] }
 0x1a1   :  { %1890 = vmatprep.subr.mxu0 %v615_v55  ;;  %2003 = vmatprep.subr.mxu1 %v743_v51  ;;  %v714_v55 = vld [vmem:[#allocation6 + $0x6b0] sm:$0xff]  ;;  %v583_v51 = vld [vmem:[#allocation6 + $0x298] sm:$0xff] }
 0x1a2   :  { %1891 = vmatpush2.msra.mxu0 %v614_v47  ;;  %2004 = vmatpush2.msra.mxu1 %v742_v6  ;;  %v711_v47 = vld [vmem:[#allocation6 + $0x698] sm:$0xff]  ;;  %v582_v6 = vld [vmem:[#allocation6 + $0x290] sm:$0xff] }
 0x1a3   :  { %1892 = vmatprep.subr.mxu0 %v611_v15  ;;  %2005 = vmatprep.subr.mxu1 %v739_v42  ;;  %v710_v15 = vld [vmem:[#allocation6 + $0x690] sm:$0xff]  ;;  %v10211_v42 = vpop.f32.mrf.mxu0 }
 0x1a4   :  { %1893 = vmatpush2.msra.mxu0 %v610_v31  ;;  %2006 = vmatpush2.msra.mxu1 %v738_v37  ;;  %13939 = vst [vmem:[#allocation29_spill] sm:$0xff] %v10211_v42  ;;  %v10213_v31 = vpop.f32.mrf.mxu1  ;;  %v579_v37 = vld [vmem:[#allocation6 + $0x278] sm:$0xff]  ;;  %v2092_v42 = vld [vmem:[#allocation2 + $0x130] sm:$0x3] }
 0x1a5   :  { %1894 = vmatprep.subr.mxu0 %v607_v18  ;;  %2007 = vmatprep.subr.mxu1 %v735_v43  ;;  %13940 = vst [vmem:[#allocation31_spill] sm:$0xff] %v10213_v31  ;;  %v707_v18 = vld [vmem:[#allocation6 + $0x678] sm:$0xff]  ;;  %v578_v43 = vld [vmem:[#allocation6 + $0x270] sm:$0xff]  ;;  %v2090_v31 = vld [vmem:[#allocation2 + $0x120] sm:$0x3] }
 0x1a6   :  { %1895 = vmatpush2.msra.mxu0 %v606_v62  ;;  %2008 = vmatpush2.msra.mxu1 %v734_v33  ;;  %v706_v62 = vld [vmem:[#allocation6 + $0x670] sm:$0xff] }
 0x1a7   :  { %1896 = vmatprep.subr.mxu0 %v603_v20  ;;  %2009 = vmatprep.subr.mxu1 %v731_v26  ;;  %v575_v26 = vld [vmem:[#allocation6 + $0x258] sm:$0xff] }
 0x1a8   :  { %1897 = vmatpush2.msra.mxu0 %v602_v39  ;;  %2010 = vmatpush2.msra.mxu1 %v730_v32  ;;  %v703_v39 = vld [vmem:[#allocation6 + $0x658] sm:$0xff] }
 0x1a9   :  { %1898 = vmatprep.subr.mxu0 %v599_v9  ;;  %2011 = vmatprep.subr.mxu1 %v727_v54  ;;  %v574_v9 = vld [vmem:[#allocation6 + $0x250] sm:$0xff] }
 0x1aa   :  { %1899 = vmatpush2.msra.mxu0 %v598_v0  ;;  %2012 = vmatpush2.msra.mxu1 %v726_v22  ;;  %v702_v54 = vld [vmem:[#allocation6 + $0x650] sm:$0xff] }
 0x1ab   :  { %1900 = vmatprep.subr.mxu0 %v595_v1  ;;  %2013 = vmatprep.subr.mxu1 %v723_v13  ;;  %v571_v1 = vld [vmem:[#allocation6 + $0x238] sm:$0xff] }
 0x1ac   :  { %1901 = vmatpush2.msra.mxu0 %v594_v30  ;;  %2014 = vmatpush2.msra.mxu1 %v722_v41  ;;  %v699_v13 = vld [vmem:[#allocation6 + $0x638] sm:$0xff]  ;;  %v570_v30 = vld [vmem:[#allocation6 + $0x230] sm:$0xff] }
 0x1ad   :  { %1902 = vmatprep.subr.mxu0 %v591_v59  ;;  %2015 = vmatprep.subr.mxu1 %v719_v23  ;;  %v698_v41 = vld [vmem:[#allocation6 + $0x630] sm:$0xff]  ;;  %v567_v59 = vld [vmem:[#allocation6 + $0x218] sm:$0xff] }
 0x1ae   :  { %1903 = vmatpush2.msra.mxu0 %v590_v24  ;;  %2016 = vmatpush2.msra.mxu1 %v718_v27  ;;  %v695_v23 = vld [vmem:[#allocation6 + $0x618] sm:$0xff]  ;;  %v566_v24 = vld [vmem:[#allocation6 + $0x210] sm:$0xff] }
 0x1af   :  { %1904 = vmatprep.subr.mxu0 %v587_v50  ;;  %2017 = vmatprep.subr.mxu1 %v715_v60  ;;  %v694_v60 = vld [vmem:[#allocation6 + $0x610] sm:$0xff] }
 0x1b0   :  { %1905 = vmatpush2.msra.mxu0 %v586_v63  ;;  %2018 = vmatpush2.msra.mxu1 %v714_v55 }
 0x1b1   :  { %1906 = vmatprep.subr.mxu0 %v583_v51  ;;  %2019 = vmatprep.subr.mxu1 %v711_v47  ;;  %v1246_v33 = vpop.f32.mrf.mxu0  ;;  %v1359_v20 = vpop.f32.mrf.mxu1  ;;  %v2277_v47 = vld [vmem:[#allocation6 + $0x11e8] sm:$0xff] }
 0x1b2   :  { %1907 = vmatpush2.msra.mxu0 %v582_v6  ;;  %2020 = vmatpush2.msra.mxu1 %v710_v15  ;;  %v10215_v32 = vadd.f32 %v1359_v20, %v1246_v33  ;;  %v2405_v6 = vld [vmem:[#allocation6 + $0x15e8] sm:$0xff]  ;;  %v2276_v15 = vld [vmem:[#allocation6 + $0x11e0] sm:$0xff] }
 0x1b3   :  { %1908 = vmatprep.subr.mxu0 %v579_v37  ;;  %2021 = vmatprep.subr.mxu1 %v707_v18  ;;  %v10217_v0 = vpop.f32.mrf.mxu0  ;;  %v10219_v22 = vpop.f32.mrf.mxu1  ;;  %v2404_v37 = vld [vmem:[#allocation6 + $0x15e0] sm:$0xff]  ;;  %v2273_v18 = vld [vmem:[#allocation6 + $0x11c8] sm:$0xff] }
 0x1b4   :  { %13941 = vst [vmem:[#allocation30_spill] sm:$0xff] %v10217_v0  ;;  %13942 = vst [vmem:[#allocation32_spill] sm:$0xff] %v10219_v22  ;;  %1909 = vmatpush2.msra.mxu0 %v578_v43  ;;  %2022 = vmatpush2.msra.mxu1 %v706_v62  ;;  %v2401_v43 = vld [vmem:[#allocation6 + $0x15c8] sm:$0xff]  ;;  %v2272_v62 = vld [vmem:[#allocation6 + $0x11c0] sm:$0xff] }
 0x1b5   :  { %1910 = vmatprep.subr.mxu0 %v575_v26  ;;  %2023 = vmatprep.subr.mxu1 %v703_v39  ;;  %v2397_v39 = vld [vmem:[#allocation6 + $0x15a8] sm:$0xff] }
 0x1b6   :  { %1911 = vmatpush2.msra.mxu0 %v574_v9  ;;  %2024 = vmatpush2.msra.mxu1 %v702_v54  ;;  %v2396_v54 = vld [vmem:[#allocation6 + $0x15a0] sm:$0xff] }
 0x1b7   :  { %1912 = vmatprep.subr.mxu0 %v571_v1  ;;  %2025 = vmatprep.subr.mxu1 %v699_v13  ;;  %v1252_v27 = vpop.f32.mrf.mxu0  ;;  %v1365_v50 = vpop.f32.mrf.mxu1  ;;  %v2265_v1 = vld [vmem:[#allocation6 + $0x1188] sm:$0xff] }
 0x1b8   :  { %1913 = vmatpush2.msra.mxu0 %v570_v30  ;;  %2026 = vmatpush2.msra.mxu1 %v698_v41  ;;  %v10221_v63 = vadd.f32 %v1365_v50, %v1252_v27  ;;  %v2393_v13 = vld [vmem:[#allocation6 + $0x1588] sm:$0xff]  ;;  %v2264_v30 = vld [vmem:[#allocation6 + $0x1180] sm:$0xff] }
 0x1b9   :  { %1914 = vmatprep.subr.mxu0 %v567_v59  ;;  %2027 = vmatprep.subr.mxu1 %v695_v23  ;;  %v10223_v55 = vpop.f32.mrf.mxu0  ;;  %v10225_v51 = vpop.f32.mrf.mxu1  ;;  %v2392_v23 = vld [vmem:[#allocation6 + $0x1580] sm:$0xff]  ;;  %v2261_v27 = vld [vmem:[#allocation6 + $0x1168] sm:$0xff] }
 0x1ba   :  { %13943 = vst [vmem:[#allocation33_spill] sm:$0xff] %v10223_v55  ;;  %13944 = vst [vmem:[#allocation35_spill] sm:$0xff] %v10225_v51  ;;  %1915 = vmatpush2.msra.mxu0 %v566_v24  ;;  %1916 = vmatprep.mubr.f32.mxu0 %v10161_v53  ;;  %v2400_v53 = vld [vmem:[#allocation6 + $0x15c0] sm:$0xff]  ;;  %v2389_v50 = vld [vmem:[#allocation6 + $0x1568] sm:$0xff] }
 0x1bb   :  { %2028 = vmatpush2.msra.mxu1 %v694_v60  ;;  %2029 = vmatprep.mubr.f32.mxu1 %v10163_v40  ;;  %v2269_v40 = vld [vmem:[#allocation6 + $0x11a8] sm:$0xff] }
 0x1bc   :  { %1917 = vmatmul.mubr.f32.vlgmr.msra.gmra.mxu0 %v10165_v28  ;;  %2030 = vmatmul.mubr.f32.vlgmr.msra.gmra.mxu1 %v10167_v5  ;;  %v2268_v5 = vld [vmem:[#allocation6 + $0x11a0] sm:$0xff] }
 0x1bd   :  { %2472 = vmatprep.subr.mxu0 %v2277_v47  ;;  %2585 = vmatprep.subr.mxu1 %v2405_v6  ;;  %v1258_v33 = vpop.f32.mrf.mxu0  ;;  %v1371_v20 = vpop.f32.mrf.mxu1  ;;  %v2260_v6 = vld [vmem:[#allocation6 + $0x1160] sm:$0xff] }
 0x1be   :  { %2473 = vmatpush1.msra.mxu0 %v2276_v15  ;;  %2586 = vmatpush1.msra.mxu1 %v2404_v37  ;;  %v10231_v26 = vadd.f32 %v1371_v20, %v1258_v33  ;;  %v2388_v15 = vld [vmem:[#allocation6 + $0x1560] sm:$0xff]  ;;  %v2257_v37 = vld [vmem:[#allocation6 + $0x1148] sm:$0xff] }
 0x1bf   :  { %2474 = vmatprep.subr.mxu0 %v2273_v18  ;;  %2587 = vmatprep.subr.mxu1 %v2401_v43  ;;  %v10233_v9 = vpop.f32.mrf.mxu0  ;;  %v10235_v28 = vpop.f32.mrf.mxu1  ;;  %v2385_v18 = vld [vmem:[#allocation6 + $0x1548] sm:$0xff]  ;;  %v2256_v43 = vld [vmem:[#allocation6 + $0x1140] sm:$0xff] }
 0x1c0   :  { %13945 = vst [vmem:[#allocation34_spill] sm:$0xff] %v10233_v9  ;;  %13946 = vst [vmem:[#allocation36_spill] sm:$0xff] %v10235_v28  ;;  %1922 = vmatprep.mubr.f32.mxu0 %v9673_v3  ;;  %2475 = vmatpush1.msra.mxu0 %v2272_v62  ;;  %v2384_v20 = vld [vmem:[#allocation6 + $0x1540] sm:$0xff] }
 0x1c1   :  { %2588 = vmatpush1.msra.mxu1 %v2400_v53  ;;  %1923 = vmatmul.mubr.f32.gmra.mxu0 %v9687_v10 }
 0x1c2   :  { %2476 = vmatprep.subr.mxu0 %v2269_v40  ;;  %2589 = vmatprep.subr.mxu1 %v2397_v39  ;;  %v2253_v40 = vld [vmem:[#allocation6 + $0x1128] sm:$0xff] }
 0x1c3   :  { %2035 = vmatprep.mubr.f32.mxu1 %v9680_v7  ;;  %2477 = vmatpush1.msra.mxu0 %v2268_v5  ;;  %v1264_v41 = vpop.f32.mrf.mxu0  ;;  %v1377_v59 = vpop.f32.mrf.mxu1  ;;  %v2381_v39 = vld [vmem:[#allocation6 + $0x1528] sm:$0xff] }
 0x1c4   :  { %2590 = vmatpush1.msra.mxu1 %v2396_v54  ;;  %2478 = vmatprep.subr.mxu0 %v2265_v1  ;;  %v10240_v24 = vadd.f32 %v1377_v59, %v1264_v41  ;;  %v2252_v1 = vld [vmem:[#allocation6 + $0x1120] sm:$0xff]  ;;  %v2377_v41 = vld [vmem:[#allocation6 + $0x1508] sm:$0xff] }
 0x1c5   :  { %2036 = vmatmul.mubr.f32.gmra.mxu1 %v9694_v12  ;;  %2591 = vmatprep.subr.mxu1 %v2393_v13  ;;  %v10243_v60 = vpop.f32.mrf.mxu0  ;;  %v10245_v47 = vpop.f32.mrf.mxu1  ;;  %v2380_v13 = vld [vmem:[#allocation6 + $0x1520] sm:$0xff] }
 0x1c6   :  { %13947 = vst [vmem:[#allocation37_spill] sm:$0xff] %v10243_v60  ;;  %13948 = vst [vmem:[#allocation38_spill] sm:$0xff] %v10245_v47  ;;  %1928 = vmatprep.mubr.f32.mxu0 %v9786_v44  ;;  %2479 = vmatpush1.msra.mxu0 %v2264_v30  ;;  %v2249_v30 = vld [vmem:[#allocation6 + $0x1108] sm:$0xff]  ;;  %v2248_v59 = vld [vmem:[#allocation6 + $0x1100] sm:$0xff] }
 0x1c7   :  { %2592 = vmatpush1.msra.mxu1 %v2392_v23  ;;  %1929 = vmatmul.mubr.f32.gmra.mxu0 %v9800_v45  ;;  %v2394_v60 = vld [vmem:[#allocation6 + $0x1590] sm:$0xff] }
 0x1c8   :  { %2480 = vmatprep.subr.mxu0 %v2261_v27  ;;  %2593 = vmatprep.subr.mxu1 %v2389_v50  ;;  %v2376_v50 = vld [vmem:[#allocation6 + $0x1500] sm:$0xff] }
 0x1c9   :  { %2041 = vmatprep.mubr.f32.mxu1 %v9793_v46  ;;  %2481 = vmatpush1.msra.mxu0 %v2260_v6  ;;  %v1270_v62 = vpop.f32.mrf.mxu0  ;;  %v1383_v33 = vpop.f32.mrf.mxu1 }
 0x1ca   :  { %2594 = vmatpush1.msra.mxu1 %v2388_v15  ;;  %2482 = vmatprep.subr.mxu0 %v2257_v37  ;;  %v10250_v53 = vadd.f32 %v1383_v33, %v1270_v62  ;;  %v2245_v15 = vld [vmem:[#allocation6 + $0x10e8] sm:$0xff]  ;;  %v2244_v62 = vld [vmem:[#allocation6 + $0x10e0] sm:$0xff] }
 0x1cb   :  { %2042 = vmatmul.mubr.f32.gmra.mxu1 %v9807_v48  ;;  %2595 = vmatprep.subr.mxu1 %v2385_v18  ;;  %v10253_v5 = vpop.f32.mrf.mxu0  ;;  %v10255_v54 = vpop.f32.mrf.mxu1  ;;  %v2373_v37 = vld [vmem:[#allocation6 + $0x14e8] sm:$0xff]  ;;  %v2372_v33 = vld [vmem:[#allocation6 + $0x14e0] sm:$0xff] }
 0x1cc   :  { %13949 = vst [vmem:[#allocation39_spill] sm:$0xff] %v10253_v5  ;;  %13950 = vst [vmem:[#allocation40_spill] sm:$0xff] %v10255_v54  ;;  %1934 = vmatprep.mubr.f32.mxu0 %v9832_v56  ;;  %2483 = vmatpush1.msra.mxu0 %v2256_v43  ;;  %v2080_v54 = vld [vmem:[#allocation2 + $0x10] sm:$0xfc] }
 0x1cd   :  { %2596 = vmatpush1.msra.mxu1 %v2384_v20  ;;  %1935 = vmatmul.mubr.f32.gmra.mxu0 %v9866_v17  ;;  %v2241_v20 = vld [vmem:[#allocation6 + $0x10c8] sm:$0xff] }
 0x1ce   :  { %2484 = vmatprep.subr.mxu0 %v2253_v40  ;;  %2597 = vmatprep.subr.mxu1 %v2381_v39  ;;  %v2369_v40 = vld [vmem:[#allocation6 + $0x14c8] sm:$0xff]  ;;  %v2240_v39 = vld [vmem:[#allocation6 + $0x10c0] sm:$0xff] }
 0x1cf   :  { %2047 = vmatprep.mubr.f32.mxu1 %v9839_v58  ;;  %2485 = vmatpush1.msra.mxu0 %v2252_v1  ;;  %v1276_v23 = vpop.f32.mrf.mxu0  ;;  %v1389_v27 = vpop.f32.mrf.mxu1 }
 0x1d0   :  { %2598 = vmatpush1.msra.mxu1 %v2380_v13  ;;  %2486 = vmatprep.subr.mxu0 %v2249_v30  ;;  %v10260_v6 = vadd.f32 %v1389_v27, %v1276_v23  ;;  %v2368_v30 = vld [vmem:[#allocation6 + $0x14c0] sm:$0xff] }
 0x1d1   :  { %2048 = vmatmul.mubr.f32.gmra.mxu1 %v9873_v21  ;;  %2599 = vmatprep.subr.mxu1 %v2377_v41  ;;  %v10263_v18 = vpop.f32.mrf.mxu0  ;;  %v10265_v43 = vpop.f32.mrf.mxu1  ;;  %v2365_v41 = vld [vmem:[#allocation6 + $0x14a8] sm:$0xff]  ;;  %v2364_v27 = vld [vmem:[#allocation6 + $0x14a0] sm:$0xff] }
 0x1d2   :  { %13951 = vst [vmem:[#allocation41_spill] sm:$0xff] %v10263_v18  ;;  %13952 = vst [vmem:[#allocation42_spill] sm:$0xff] %v10265_v43  ;;  %1940 = vmatprep.mubr.f32.mxu0 %v10184_v35  ;;  %2487 = vmatpush1.msra.mxu0 %v2248_v59  ;;  %v2236_v59 = vld [vmem:[#allocation6 + $0x10a0] sm:$0xff] }
 0x1d3   :  { %2600 = vmatpush1.msra.mxu1 %v2376_v50  ;;  %1941 = vmatmul.mubr.f32.gmra.mxu0 %v10186_v57  ;;  %v2237_v57 = vld [vmem:[#allocation6 + $0x10a8] sm:$0xff]  ;;  %v2078_v18 = vld [vmem:[#allocation2] sm:$0xfc] }
 0x1d4   :  { %2488 = vmatprep.subr.mxu0 %v2245_v15  ;;  %2601 = vmatprep.subr.mxu1 %v2373_v37  ;;  %v2233_v50 = vld [vmem:[#allocation6 + $0x1088] sm:$0xff]  ;;  %v2360_v37 = vld [vmem:[#allocation6 + $0x1480] sm:$0xff] }
 0x1d5   :  { %2053 = vmatprep.mubr.f32.mxu1 %v10190_v4  ;;  %2489 = vmatpush1.msra.mxu0 %v2244_v62  ;;  %v1282_v1 = vpop.f32.mrf.mxu0  ;;  %v1395_v13 = vpop.f32.mrf.mxu1  ;;  %v2361_v15 = vld [vmem:[#allocation6 + $0x1488] sm:$0xff] }
 0x1d6   :  { %2602 = vmatpush1.msra.mxu1 %v2372_v33  ;;  %2490 = vmatprep.subr.mxu0 %v2241_v20  ;;  %v10270_v35 = vadd.f32 %v1395_v13, %v1282_v1  ;;  %v2229_v20 = vld [vmem:[#allocation6 + $0x1068] sm:$0xff]  ;;  %v2228_v1 = vld [vmem:[#allocation6 + $0x1060] sm:$0xff] }
 0x1d7   :  { %2054 = vmatmul.mubr.f32.gmra.mxu1 %v10193_v8  ;;  %2603 = vmatprep.subr.mxu1 %v2369_v40  ;;  %v10274_v23 = vpop.f32.mrf.mxu0  ;;  %v10276_v4 = vpop.f32.mrf.mxu1  ;;  %v2232_v8 = vld [vmem:[#allocation6 + $0x1080] sm:$0xff]  ;;  %v2357_v40 = vld [vmem:[#allocation6 + $0x1468] sm:$0xff] }
 0x1d8   :  { %1946 = vmatprep.mubr.f32.mxu0 %v9942_v29  ;;  %2491 = vmatpush1.msra.mxu0 %v2240_v39  ;;  %13953 = vst [vmem:[#allocation43_spill] sm:$0xff] %v10274_v23  ;;  %13954 = vst [vmem:[#allocation44_spill] sm:$0xff] %v10276_v4  ;;  %v2356_v13 = vld [vmem:[#allocation6 + $0x1460] sm:$0xff]  ;;  %v2457_v4 = vld [vmem:[#allocation6 + $0x1788] sm:$0xff] }
 0x1d9   :  { %2604 = vmatpush1.msra.mxu1 %v2368_v30  ;;  %1947 = vmatmul.mubr.f32.gmra.mxu0 %v9980_v19  ;;  %v2225_v30 = vld [vmem:[#allocation6 + $0x1048] sm:$0xff] }
 0x1da   :  { %2492 = vmatprep.subr.mxu0 %v2237_v57  ;;  %2605 = vmatprep.subr.mxu1 %v2365_v41  ;;  %v2353_v57 = vld [vmem:[#allocation6 + $0x1448] sm:$0xff]  ;;  %v2224_v41 = vld [vmem:[#allocation6 + $0x1040] sm:$0xff] }
 0x1db   :  { %2059 = vmatprep.mubr.f32.mxu1 %v9949_v36  ;;  %2493 = vmatpush1.msra.mxu0 %v2236_v59  ;;  %v2352_v59 = vld [vmem:[#allocation6 + $0x1440] sm:$0xff] }
 0x1dc   :  { %2606 = vmatpush1.msra.mxu1 %v2364_v27  ;;  %2494 = vmatprep.subr.mxu0 %v2233_v50  ;;  %v1466_v62 = vpop.f32.mrf.mxu0  ;;  %v1579_v33 = vpop.f32.mrf.mxu1  ;;  %v2221_v27 = vld [vmem:[#allocation6 + $0x1028] sm:$0xff] }
 0x1dd   :  { %2060 = vmatmul.mubr.f32.gmra.mxu1 %v9987_v14  ;;  %2607 = vmatprep.subr.mxu1 %v2361_v15  ;;  %v10281_v39 = vadd.f32 %v1579_v33, %v1466_v62  ;;  %v2349_v50 = vld [vmem:[#allocation6 + $0x1428] sm:$0xff]  ;;  %v2220_v15 = vld [vmem:[#allocation6 + $0x1020] sm:$0xff] }
 0x1de   :  { %1952 = vmatprep.mubr.f32.mxu0 %v13931_v16  ;;  %2495 = vmatpush1.msra.mxu0 %v2232_v8  ;;  %v2348_v8 = vld [vmem:[#allocation6 + $0x1420] sm:$0xff]  ;;  %v2345_v62 = vld [vmem:[#allocation6 + $0x1408] sm:$0xff]  ;;  %v10293_v23 = vpop.f32.mrf.mxu1 }
 0x1df   :  { %2608 = vmatpush1.msra.mxu1 %v2360_v37  ;;  %1953 = vmatmul.mubr.f32.gmra.mxu0 %v13932_v38  ;;  %v2217_v37 = vld [vmem:[#allocation6 + $0x1008] sm:$0xff]  ;;  %v2216_v33 = vld [vmem:[#allocation6 + $0x1000] sm:$0xff]  ;;  %13956 = vst [vmem:[#allocation46_spill] sm:$0xff] %v10293_v23 }
 0x1e0   :  { %2496 = vmatprep.subr.mxu0 %v2229_v20  ;;  %2609 = vmatprep.subr.mxu1 %v2357_v40  ;;  %v2344_v20 = vld [vmem:[#allocation6 + $0x1400] sm:$0xff]  ;;  %v2341_v40 = vld [vmem:[#allocation6 + $0x13e8] sm:$0xff] }
 0x1e1   :  { %2065 = vmatprep.mubr.f32.mxu1 %v13933_v11  ;;  %2497 = vmatpush1.msra.mxu0 %v2228_v1  ;;  %v2469_v1 = vld [vmem:[#allocation6 + $0x17e8] sm:$0xff] }
 0x1e2   :  { %2610 = vmatpush1.msra.mxu1 %v2356_v13  ;;  %2498 = vmatprep.subr.mxu0 %v2225_v30  ;;  %v2340_v13 = vld [vmem:[#allocation6 + $0x13e0] sm:$0xff] }
 0x1e3   :  { %2066 = vmatmul.mubr.f32.gmra.mxu1 %v13934_v2  ;;  %2611 = vmatprep.subr.mxu1 %v2353_v57  ;;  %v2468_v30 = vld [vmem:[#allocation6 + $0x17e0] sm:$0xff]  ;;  %v2337_v57 = vld [vmem:[#allocation6 + $0x13c8] sm:$0xff] }
 0x1e4   :  { %1958 = vmatprep.mubr.f32.mxu0 %v13935_v25  ;;  %2499 = vmatpush1.msra.mxu0 %v2224_v41  ;;  %v2465_v41 = vld [vmem:[#allocation6 + $0x17c8] sm:$0xff] }
 0x1e5   :  { %2612 = vmatpush1.msra.mxu1 %v2352_v59  ;;  %1959 = vmatmul.mubr.f32.gmra.mxu0 %v13936_v34  ;;  %v2336_v59 = vld [vmem:[#allocation6 + $0x13c0] sm:$0xff] }
 0x1e6   :  { %2500 = vmatprep.subr.mxu0 %v2221_v27  ;;  %2613 = vmatprep.subr.mxu1 %v2349_v50  ;;  %v2464_v27 = vld [vmem:[#allocation6 + $0x17c0] sm:$0xff]  ;;  %v2333_v50 = vld [vmem:[#allocation6 + $0x13a8] sm:$0xff] }
 0x1e7   :  { %2071 = vmatprep.mubr.f32.mxu1 %v13937_v61  ;;  %2501 = vmatpush1.msra.mxu0 %v2220_v15  ;;  %v2461_v15 = vld [vmem:[#allocation6 + $0x17a8] sm:$0xff] }
 0x1e8   :  { %2614 = vmatpush1.msra.mxu1 %v2348_v8  ;;  %2502 = vmatprep.subr.mxu0 %v2217_v37  ;;  %v2332_v8 = vld [vmem:[#allocation6 + $0x13a0] sm:$0xff] }
 0x1e9   :  { %2072 = vmatmul.mubr.f32.gmra.mxu1 %v13938_v52  ;;  %2615 = vmatprep.subr.mxu1 %v2345_v62  ;;  %v2460_v37 = vld [vmem:[#allocation6 + $0x17a0] sm:$0xff]  ;;  %v2329_v62 = vld [vmem:[#allocation6 + $0x1388] sm:$0xff] }
 0x1ea   :  { %2503 = vmatpush1.msra.mxu0 %v2216_v33  ;;  %2616 = vmatpush1.msra.mxu1 %v2344_v20  ;;  %v2328_v33 = vld [vmem:[#allocation6 + $0x1380] sm:$0xff] }
 0x1eb   :  { %2504 = vmatprep.subr.mxu0 %v2341_v40  ;;  %2617 = vmatprep.subr.mxu1 %v2469_v1  ;;  %v2456_v20 = vld [vmem:[#allocation6 + $0x1780] sm:$0xff]  ;;  %v2325_v40 = vld [vmem:[#allocation6 + $0x1368] sm:$0xff] }
 0x1ec   :  { %2505 = vmatpush2.msra.mxu0 %v2340_v13  ;;  %2618 = vmatpush2.msra.mxu1 %v2468_v30  ;;  %v2453_v1 = vld [vmem:[#allocation6 + $0x1768] sm:$0xff]  ;;  %v2324_v13 = vld [vmem:[#allocation6 + $0x1360] sm:$0xff] }
 0x1ed   :  { %2506 = vmatprep.subr.mxu0 %v2337_v57  ;;  %2619 = vmatprep.subr.mxu1 %v2465_v41  ;;  %v2452_v30 = vld [vmem:[#allocation6 + $0x1760] sm:$0xff]  ;;  %v2321_v57 = vld [vmem:[#allocation6 + $0x1348] sm:$0xff] }
 0x1ee   :  { %2507 = vmatpush2.msra.mxu0 %v2336_v59  ;;  %2620 = vmatpush2.msra.mxu1 %v2464_v27  ;;  %v2449_v41 = vld [vmem:[#allocation6 + $0x1748] sm:$0xff]  ;;  %v2320_v59 = vld [vmem:[#allocation6 + $0x1340] sm:$0xff] }
 0x1ef   :  { %2508 = vmatprep.subr.mxu0 %v2333_v50  ;;  %2621 = vmatprep.subr.mxu1 %v2461_v15  ;;  %v2448_v27 = vld [vmem:[#allocation6 + $0x1740] sm:$0xff]  ;;  %v2317_v50 = vld [vmem:[#allocation6 + $0x1328] sm:$0xff] }
 0x1f0   :  { %2509 = vmatpush2.msra.mxu0 %v2332_v8  ;;  %2622 = vmatpush2.msra.mxu1 %v2460_v37  ;;  %v2445_v15 = vld [vmem:[#allocation6 + $0x1728] sm:$0xff]  ;;  %v2316_v8 = vld [vmem:[#allocation6 + $0x1320] sm:$0xff] }
 0x1f1   :  { %2510 = vmatprep.subr.mxu0 %v2329_v62  ;;  %2623 = vmatprep.subr.mxu1 %v2457_v4  ;;  %v2444_v37 = vld [vmem:[#allocation6 + $0x1720] sm:$0xff]  ;;  %v2313_v4 = vld [vmem:[#allocation6 + $0x1308] sm:$0xff] }
 0x1f2   :  { %2511 = vmatpush2.msra.mxu0 %v2328_v33  ;;  %2624 = vmatpush2.msra.mxu1 %v2456_v20  ;;  %v2441_v62 = vld [vmem:[#allocation6 + $0x1708] sm:$0xff]  ;;  %v2312_v33 = vld [vmem:[#allocation6 + $0x1300] sm:$0xff] }
 0x1f3   :  { %2512 = vmatprep.subr.mxu0 %v2325_v40  ;;  %2625 = vmatprep.subr.mxu1 %v2453_v1  ;;  %v2440_v20 = vld [vmem:[#allocation6 + $0x1700] sm:$0xff]  ;;  %v2309_v40 = vld [vmem:[#allocation6 + $0x12e8] sm:$0xff] }
 0x1f4   :  { %2513 = vmatpush2.msra.mxu0 %v2324_v13  ;;  %2626 = vmatpush2.msra.mxu1 %v2452_v30  ;;  %v2437_v1 = vld [vmem:[#allocation6 + $0x16e8] sm:$0xff]  ;;  %v2308_v13 = vld [vmem:[#allocation6 + $0x12e0] sm:$0xff] }
 0x1f5   :  { %2514 = vmatprep.subr.mxu0 %v2321_v57  ;;  %2627 = vmatprep.subr.mxu1 %v2449_v41  ;;  %v2436_v30 = vld [vmem:[#allocation6 + $0x16e0] sm:$0xff]  ;;  %v2305_v57 = vld [vmem:[#allocation6 + $0x12c8] sm:$0xff] }
 0x1f6   :  { %2515 = vmatpush2.msra.mxu0 %v2320_v59  ;;  %2628 = vmatpush2.msra.mxu1 %v2448_v27  ;;  %v2433_v41 = vld [vmem:[#allocation6 + $0x16c8] sm:$0xff]  ;;  %v2304_v59 = vld [vmem:[#allocation6 + $0x12c0] sm:$0xff] }
 0x1f7   :  { %2516 = vmatprep.subr.mxu0 %v2317_v50  ;;  %2629 = vmatprep.subr.mxu1 %v2445_v15  ;;  %v2432_v27 = vld [vmem:[#allocation6 + $0x16c0] sm:$0xff]  ;;  %v2301_v50 = vld [vmem:[#allocation6 + $0x12a8] sm:$0xff] }
 0x1f8   :  { %2517 = vmatpush2.msra.mxu0 %v2316_v8  ;;  %2630 = vmatpush2.msra.mxu1 %v2444_v37  ;;  %v2429_v15 = vld [vmem:[#allocation6 + $0x16a8] sm:$0xff]  ;;  %v2300_v8 = vld [vmem:[#allocation6 + $0x12a0] sm:$0xff] }
 0x1f9   :  { %2518 = vmatprep.subr.mxu0 %v2313_v4  ;;  %2631 = vmatprep.subr.mxu1 %v2441_v62  ;;  %v2428_v37 = vld [vmem:[#allocation6 + $0x16a0] sm:$0xff]  ;;  %v2297_v4 = vld [vmem:[#allocation6 + $0x1288] sm:$0xff] }
 0x1fa   :  { %2519 = vmatpush2.msra.mxu0 %v2312_v33  ;;  %2632 = vmatpush2.msra.mxu1 %v2440_v20  ;;  %v2425_v62 = vld [vmem:[#allocation6 + $0x1688] sm:$0xff]  ;;  %v2296_v33 = vld [vmem:[#allocation6 + $0x1280] sm:$0xff] }
 0x1fb   :  { %2520 = vmatprep.subr.mxu0 %v2309_v40  ;;  %2633 = vmatprep.subr.mxu1 %v2437_v1  ;;  %v2424_v20 = vld [vmem:[#allocation6 + $0x1680] sm:$0xff]  ;;  %v2293_v40 = vld [vmem:[#allocation6 + $0x1268] sm:$0xff]  ;;  %v10291_v1 = vpop.f32.mrf.mxu0 }
 0x1fc   :  { %2521 = vmatpush2.msra.mxu0 %v2308_v13  ;;  %2634 = vmatpush2.msra.mxu1 %v2436_v30  ;;  %13955 = vst [vmem:[#allocation45_spill] sm:$0xff] %v10291_v1  ;;  %v2421_v13 = vld [vmem:[#allocation6 + $0x1668] sm:$0xff]  ;;  %v2292_v30 = vld [vmem:[#allocation6 + $0x1260] sm:$0xff] }
 0x1fd   :  { %2522 = vmatprep.subr.mxu0 %v2305_v57  ;;  %2635 = vmatprep.subr.mxu1 %v2433_v41  ;;  %v2079_v57 = vld [vmem:[#allocation2 + $0x8] sm:$0xfc]  ;;  %v2420_v41 = vld [vmem:[#allocation6 + $0x1660] sm:$0xff] }
 0x1fe   :  { %2523 = vmatpush2.msra.mxu0 %v2304_v59  ;;  %2636 = vmatpush2.msra.mxu1 %v2432_v27  ;;  %v2289_v59 = vld [vmem:[#allocation6 + $0x1248] sm:$0xff]  ;;  %v2081_v27 = vld [vmem:[#allocation2 + $0x18] sm:$0xfc]  ;;  %v2114_v23 = vrot.slane %v2079_v57, 2  ;;  %v2112_v57 = vrot.slane %v9687_v10, 2 }
 0x1ff   :  { %2524 = vmatprep.subr.mxu0 %v2301_v50  ;;  %2637 = vmatprep.subr.mxu1 %v2429_v15  ;;  %v2417_v15 = vld [vmem:[#allocation6 + $0x1648] sm:$0xff]  ;;  %v2120_v47 = vrot.slane %v2081_v27, 2 }
 0x200   :  { %2525 = vmatpush2.msra.mxu0 %v2300_v8  ;;  %2638 = vmatpush2.msra.mxu1 %v2428_v37  ;;  %v2288_v8 = vld [vmem:[#allocation6 + $0x1240] sm:$0xff] }
 0x201   :  { %2526 = vmatprep.subr.mxu0 %v2297_v4  ;;  %2639 = vmatprep.subr.mxu1 %v2425_v62  ;;  %v1472_v43 = vpop.f32.mrf.mxu0  ;;  %v1585_v50 = vpop.f32.mrf.mxu1  ;;  %v2416_v37 = vld [vmem:[#allocation6 + $0x1640] sm:$0xff]  ;;  %v2115_v4 = vrot.slane %v9673_v3, 2  ;;  %v2117_v3 = vrot.slane %v2080_v54, 2 }
 0x202   :  { %2527 = vmatpush2.msra.mxu0 %v2296_v33  ;;  %2640 = vmatpush2.msra.mxu1 %v2424_v20  ;;  %v10295_v1 = vadd.f32 %v1585_v50, %v1472_v43  ;;  %v2285_v33 = vld [vmem:[#allocation6 + $0x1228] sm:$0xff]  ;;  %v2121_v43 = vrot.slane %v9680_v7, 2  ;;  %v2111_v50 = vrot.slane %v2078_v18, 2  ;;  %v2408_v18 = vld [vmem:[#allocation6 + $0x1600] sm:$0xff] }
 0x203   :  { %2528 = vmatprep.subr.mxu0 %v2293_v40  ;;  %2641 = vmatprep.subr.mxu1 %v2421_v13  ;;  %v10298_v62 = vpop.f32.mrf.mxu0  ;;  %v10300_v5 = vpop.f32.mrf.mxu1  ;;  %v2413_v20 = vld [vmem:[#allocation6 + $0x1628] sm:$0xff]  ;;  %v2284_v40 = vld [vmem:[#allocation6 + $0x1220] sm:$0xff]  ;;  %v10306_v27 = vsel %vm2110_vm3, %v2114_v23, %v2115_v4  ;;  %v2125_v23 = vrot.slane %v9786_v44, 2  ;;  %v2127_v44 = vrot.slane %v9807_v48, 2  ;;  %v2402_v48 = vld [vmem:[#allocation6 + $0x15d0] sm:$0xff] }
 0x204   :  { %13957 = vst [vmem:[#allocation47_spill] sm:$0xff] %v10298_v62  ;;  %13958 = vst [vmem:[#allocation48_spill] sm:$0xff] %v10300_v5  ;;  %2529 = vmatpush2.msra.mxu0 %v2292_v30  ;;  %2642 = vmatpush2.msra.mxu1 %v2420_v41  ;;  %v2412_v13 = vld [vmem:[#allocation6 + $0x1620] sm:$0xff]  ;;  %v2118_v62 = vrot.slane %v9694_v12, 2  ;;  %v2281_v30 = vld [vmem:[#allocation6 + $0x1208] sm:$0xff]  ;;  %v10309_v10 = vsel %vm2110_vm3, %v2120_v47, %v2121_v43  ;;  %v10314_v12 = vsel %vm2110_vm3, %v2111_v50, %v2112_v57 }
 0x205   :  { %2530 = vmatprep.subr.mxu0 %v2289_v59  ;;  %2643 = vmatprep.subr.mxu1 %v2417_v15  ;;  %v2409_v41 = vld [vmem:[#allocation6 + $0x1608] sm:$0xff]  ;;  %v2280_v5 = vld [vmem:[#allocation6 + $0x1200] sm:$0xff]  ;;  %v2279_v47 = vld [vmem:[#allocation6 + $0x11f8] sm:$0xff]  ;;  %v2123_v50 = vrot.slane %v9800_v45, 2 }
 0x206   :  { %2531 = vmatpush2.msra.mxu0 %v2288_v8  ;;  %2644 = vmatpush2.msra.mxu1 %v2416_v37  ;;  %v10317_v15 = vsel %vm2110_vm3, %v2117_v3, %v2118_v62  ;;  %v2129_v8 = vrot.slane %v9793_v46, 2  ;;  %v2275_v46 = vld [vmem:[#allocation6 + $0x11d8] sm:$0xff]  ;;  %v2274_v45 = vld [vmem:[#allocation6 + $0x11d0] sm:$0xff] }
 0x207   :  { %2532 = vmatprep.subr.mxu0 %v2285_v33  ;;  %2645 = vmatprep.subr.mxu1 %v2413_v20  ;;  %v1478_v7 = vpop.f32.mrf.mxu0  ;;  %v1591_v59 = vpop.f32.mrf.mxu1  ;;  %v2407_v20 = vld [vmem:[#allocation6 + $0x15f8] sm:$0xff] }
 0x208   :  { %2533 = vmatpush2.msra.mxu0 %v2284_v40  ;;  %2646 = vmatpush2.msra.mxu1 %v2412_v13  ;;  %v10311_v54 = vadd.f32 %v1591_v59, %v1478_v7  ;;  %v2278_v40 = vld [vmem:[#allocation6 + $0x11f0] sm:$0xff]  ;;  %v2403_v3 = vld [vmem:[#allocation6 + $0x15d8] sm:$0xff] }
 0x209   :  { %2534 = vmatprep.subr.mxu0 %v2281_v30  ;;  %2647 = vmatprep.subr.mxu1 %v2409_v41  ;;  %v10321_v37 = vpop.f32.mrf.mxu0  ;;  %v10323_v33 = vpop.f32.mrf.mxu1  ;;  %v2406_v13 = vld [vmem:[#allocation6 + $0x15f0] sm:$0xff]  ;;  %v10335_v30 = vsel %vm2110_vm3, %v2121_v43, %v2129_v8  ;;  %v2137_v43 = vrot.slane %v9839_v58, 2  ;;  %v2395_v58 = vld [vmem:[#allocation6 + $0x1598] sm:$0xff] }
 0x20a   :  { %13959 = vst [vmem:[#allocation49_spill] sm:$0xff] %v10321_v37  ;;  %13960 = vst [vmem:[#allocation50_spill] sm:$0xff] %v10323_v33  ;;  %2535 = vmatpush2.msra.mxu0 %v2280_v5  ;;  %2536 = vmatprep.mubr.f32.mxu0 %v10306_v27  ;;  %v10332_v5 = vsel %vm2110_vm3, %v2115_v4, %v2125_v23  ;;  %v2133_v4 = vrot.slane %v9832_v56, 2  ;;  %v2135_v56 = vrot.slane %v9873_v21, 2  ;;  %v2084_v33 = vld [vmem:[#allocation2 + $0x90] sm:$0x3] }
 0x20b   :  { %2648 = vmatpush2.msra.mxu1 %v2408_v18  ;;  %2649 = vmatprep.mubr.f32.mxu1 %v10309_v10  ;;  %v10340_v18 = vsel %vm2110_vm3, %v2112_v57, %v2123_v50  ;;  %v2270_v57 = vld [vmem:[#allocation6 + $0x11b0] sm:$0xff] }
 0x20c   :  { %2537 = vmatmul.mubr.f32.vlgmr.msra.gmra.mxu0 %v10314_v12  ;;  %2650 = vmatmul.mubr.f32.vlgmr.msra.gmra.mxu1 %v10317_v15  ;;  %v2266_v21 = vld [vmem:[#allocation6 + $0x1190] sm:$0xff] }
 0x20d   :  { %2698 = vmatprep.subr.mxu0 %v2279_v47  ;;  %2811 = vmatprep.subr.mxu1 %v2407_v20  ;;  %v1484_v41 = vpop.f32.mrf.mxu0  ;;  %v1597_v7 = vpop.f32.mrf.mxu1  ;;  %v10343_v47 = vsel %vm2110_vm3, %v2118_v62, %v2127_v44  ;;  %v2267_v62 = vld [vmem:[#allocation6 + $0x1198] sm:$0xff] }
 0x20e   :  { %2699 = vmatpush1.msra.mxu0 %v2278_v40  ;;  %2812 = vmatpush1.msra.mxu1 %v2406_v13  ;;  %v10337_v59 = vadd.f32 %v1597_v7, %v1484_v41  ;;  %v2271_v13 = vld [vmem:[#allocation6 + $0x11b8] sm:$0xff]  ;;  %v2131_v41 = vrot.slane %v9866_v17, 2  ;;  %v2083_v7 = vld [vmem:[#allocation2 + $0x88] sm:$0x3] }
 0x20f   :  { %2700 = vmatprep.subr.mxu0 %v2275_v46  ;;  %2813 = vmatprep.subr.mxu1 %v2403_v3  ;;  %v10347_v20 = vpop.f32.mrf.mxu0  ;;  %v10349_v40 = vpop.f32.mrf.mxu1  ;;  %v2399_v46 = vld [vmem:[#allocation6 + $0x15b8] sm:$0xff]  ;;  %v2398_v3 = vld [vmem:[#allocation6 + $0x15b0] sm:$0xff] }
 0x210   :  { %13961 = vst [vmem:[#allocation51_spill] sm:$0xff] %v10347_v20  ;;  %13962 = vst [vmem:[#allocation52_spill] sm:$0xff] %v10349_v40  ;;  %2542 = vmatprep.mubr.f32.mxu0 %v10332_v5  ;;  %2655 = vmatprep.mubr.f32.mxu1 %v10335_v30  ;;  %v2085_v40 = vld [vmem:[#allocation2 + $0x98] sm:$0x3]  ;;  %v10358_v20 = vsel %vm2110_vm3, %v2125_v23, %v2133_v4  ;;  %v10369_v23 = vsel %vm2110_vm3, %v2127_v44, %v2135_v56 }
 0x211   :  { %2701 = vmatpush1.msra.mxu0 %v2274_v45  ;;  %2814 = vmatpush1.msra.mxu1 %v2402_v48  ;;  %v10361_v45 = vsel %vm2110_vm3, %v2129_v8, %v2137_v43  ;;  %v2082_v48 = vld [vmem:[#allocation2 + $0x80] sm:$0x3]  ;;  %v2141_v8 = vrot.slane %v2083_v7, 2  ;;  %v2259_v44 = vld [vmem:[#allocation6 + $0x1158] sm:$0xff]  ;;  %v2087_v7 = vld [vmem:[#allocation2 + $0xa8] sm:$0xfc] }
 0x212   :  { %2543 = vmatmul.mubr.f32.gmra.mxu0 %v10340_v18  ;;  %2656 = vmatmul.mubr.f32.gmra.mxu1 %v10343_v47 }
 0x213   :  { %2702 = vmatprep.subr.mxu0 %v2271_v13  ;;  %2815 = vmatprep.subr.mxu1 %v2399_v46  ;;  %v1490_v17 = vpop.f32.mrf.mxu0  ;;  %v1603_v37 = vpop.f32.mrf.mxu1  ;;  %v10366_v13 = vsel %vm2110_vm3, %v2123_v50, %v2131_v41  ;;  %v2145_v46 = vrot.slane %v2085_v40, 2  ;;  %v2262_v50 = vld [vmem:[#allocation6 + $0x1170] sm:$0xff]  ;;  %v2387_v40 = vld [vmem:[#allocation6 + $0x1558] sm:$0xff] }
 0x214   :  { %2703 = vmatpush1.msra.mxu0 %v2270_v57  ;;  %2816 = vmatpush1.msra.mxu1 %v2398_v3  ;;  %v10363_v28 = vadd.f32 %v1603_v37, %v1490_v17  ;;  %v2263_v37 = vld [vmem:[#allocation6 + $0x1178] sm:$0xff]  ;;  %v2139_v3 = vrot.slane %v2082_v48, 2 }
 0x215   :  { %2704 = vmatprep.subr.mxu0 %v2267_v62  ;;  %2817 = vmatprep.subr.mxu1 %v2395_v58  ;;  %v10371_v9 = vpop.f32.mrf.mxu0  ;;  %v10373_v51 = vpop.f32.mrf.mxu1  ;;  %v2391_v57 = vld [vmem:[#allocation6 + $0x1578] sm:$0xff]  ;;  %v2143_v62 = vrot.slane %v2084_v33, 2  ;;  %v2390_v58 = vld [vmem:[#allocation6 + $0x1570] sm:$0xff]  ;;  %v10383_v48 = vsel %vm2110_vm3, %v2137_v43, %v2145_v46  ;;  %v2151_v43 = vrot.slane %v9942_v29, 2  ;;  %v2157_v46 = vrot.slane %v9949_v36, 2 }
 0x216   :  { %13963 = vst [vmem:[#allocation53_spill] sm:$0xff] %v10371_v9  ;;  %13964 = vst [vmem:[#allocation54_spill] sm:$0xff] %v10373_v51  ;;  %2548 = vmatprep.mubr.f32.mxu0 %v10358_v20  ;;  %2661 = vmatprep.mubr.f32.mxu1 %v10361_v45  ;;  %v2089_v17 = vld [vmem:[#allocation2 + $0xb8] sm:$0xfc]  ;;  %v10380_v51 = vsel %vm2110_vm3, %v2133_v4, %v2141_v8  ;;  %v2258_v33 = vld [vmem:[#allocation6 + $0x1150] sm:$0xff]  ;;  %v10386_v55 = vsel %vm2110_vm3, %v2131_v41, %v2139_v3  ;;  %v2150_v4 = vrot.slane %v2087_v7, 2 }
 0x217   :  { %2705 = vmatpush1.msra.mxu0 %v2266_v21  ;;  %2818 = vmatpush1.msra.mxu1 %v2394_v60  ;;  %v2386_v9 = vld [vmem:[#allocation6 + $0x1550] sm:$0xff]  ;;  %v10389_v22 = vsel %vm2110_vm3, %v2135_v56, %v2143_v62  ;;  %v2156_v8 = vrot.slane %v2089_v17, 2  ;;  %v2255_v41 = vld [vmem:[#allocation6 + $0x1138] sm:$0xff]  ;;  %v2148_v29 = vrot.slane %v9980_v19, 2  ;;  %v2154_v36 = vrot.slane %v9987_v14, 2 }
 0x218   :  { %2549 = vmatmul.mubr.f32.gmra.mxu0 %v10366_v13  ;;  %2662 = vmatmul.mubr.f32.gmra.mxu1 %v10369_v23  ;;  %v2383_v56 = vld [vmem:[#allocation6 + $0x1538] sm:$0xff]  ;;  %v2254_v3 = vld [vmem:[#allocation6 + $0x1130] sm:$0xff] }
 0x219   :  { %2706 = vmatprep.subr.mxu0 %v2263_v37  ;;  %2819 = vmatprep.subr.mxu1 %v2391_v57  ;;  %v1496_v60 = vpop.f32.mrf.mxu0  ;;  %v1609_v21 = vpop.f32.mrf.mxu1  ;;  %v2086_v37 = vld [vmem:[#allocation2 + $0xa0] sm:$0xfc]  ;;  %v2088_v57 = vld [vmem:[#allocation2 + $0xb0] sm:$0xfc]  ;;  %v2251_v7 = vld [vmem:[#allocation6 + $0x1118] sm:$0xff] }
 0x21a   :  { %2707 = vmatpush1.msra.mxu0 %v2262_v50  ;;  %2820 = vmatpush1.msra.mxu1 %v2390_v58  ;;  %v10391_v0 = vadd.f32 %v1609_v21, %v1496_v60  ;;  %v2382_v62 = vld [vmem:[#allocation6 + $0x1530] sm:$0xff]  ;;  %v2379_v17 = vld [vmem:[#allocation6 + $0x1518] sm:$0xff]  ;;  %v10406_v60 = vsel %vm2110_vm3, %v2150_v4, %v2151_v43  ;;  %v2161_v4 = vrot.slane %v13931_v16, 2  ;;  %v2163_v16 = vrot.slane %v13934_v2, 2 }
 0x21b   :  { %2708 = vmatprep.subr.mxu0 %v2259_v44  ;;  %2821 = vmatprep.subr.mxu1 %v2387_v40  ;;  %v10395_v50 = vpop.f32.mrf.mxu0  ;;  %v10397_v58 = vpop.f32.mrf.mxu1  ;;  %v2147_v44 = vrot.slane %v2086_v37, 2  ;;  %v2153_v40 = vrot.slane %v2088_v57, 2  ;;  %v2250_v19 = vld [vmem:[#allocation6 + $0x1110] sm:$0xff] }
 0x21c   :  { %13965 = vst [vmem:[#allocation55_spill] sm:$0xff] %v10391_v0  ;;  %13966 = vst [vmem:[#allocation56_spill] sm:$0xff] %v10395_v50  ;;  %2554 = vmatprep.mubr.f32.mxu0 %v10380_v51  ;;  %2667 = vmatprep.mubr.f32.mxu1 %v10383_v48  ;;  %v2378_v14 = vld [vmem:[#allocation6 + $0x1510] sm:$0xff] }
 0x21d   :  { %13967 = vst [vmem:[#allocation57_spill] sm:$0xff] %v10397_v58  ;;  %2709 = vmatpush1.msra.mxu0 %v2258_v33  ;;  %2822 = vmatpush1.msra.mxu1 %v2386_v9  ;;  %v10409_v9 = vsel %vm2110_vm3, %v2156_v8, %v2157_v46  ;;  %v10414_v57 = vsel %vm2110_vm3, %v2147_v44, %v2148_v29  ;;  %v2165_v8 = vrot.slane %v13933_v11, 2  ;;  %v2246_v44 = vld [vmem:[#allocation6 + $0x10f0] sm:$0xff]  ;;  %v2243_v11 = vld [vmem:[#allocation6 + $0x10d8] sm:$0xff] }
 0x21e   :  { %2555 = vmatmul.mubr.f32.gmra.mxu0 %v10386_v55  ;;  %2668 = vmatmul.mubr.f32.gmra.mxu1 %v10389_v22  ;;  %v2370_v2 = vld [vmem:[#allocation6 + $0x14d0] sm:$0xff] }
 0x21f   :  { %2710 = vmatprep.subr.mxu0 %v2255_v41  ;;  %2823 = vmatprep.subr.mxu1 %v2383_v56  ;;  %v1502_v33 = vpop.f32.mrf.mxu0  ;;  %v1615_v21 = vpop.f32.mrf.mxu1  ;;  %v10417_v41 = vsel %vm2110_vm3, %v2153_v40, %v2154_v36  ;;  %v2159_v40 = vrot.slane %v13932_v38, 2  ;;  %v2242_v38 = vld [vmem:[#allocation6 + $0x10d0] sm:$0xff] }
 0x220   :  { %2711 = vmatpush1.msra.mxu0 %v2254_v3  ;;  %2824 = vmatpush1.msra.mxu1 %v2382_v62  ;;  %v10411_v37 = vadd.f32 %v1615_v21, %v1502_v33  ;;  %v2247_v62 = vld [vmem:[#allocation6 + $0x10f8] sm:$0xff]  ;;  %v10432_v21 = vsel %vm2110_vm3, %v2151_v43, %v2161_v4  ;;  %v2169_v43 = vrot.slane %v13935_v25, 2 }
 0x221   :  { %2712 = vmatprep.subr.mxu0 %v2251_v7  ;;  %2825 = vmatprep.subr.mxu1 %v2379_v17  ;;  %v10421_v56 = vpop.f32.mrf.mxu0  ;;  %v10423_v3 = vpop.f32.mrf.mxu1  ;;  %v2375_v7 = vld [vmem:[#allocation6 + $0x14f8] sm:$0xff]  ;;  %v2374_v17 = vld [vmem:[#allocation6 + $0x14f0] sm:$0xff]  ;;  %v10440_v58 = vsel %vm2110_vm3, %v2148_v29, %v2159_v40 }
 0x222   :  { %13968 = vst [vmem:[#allocation58_spill] sm:$0xff] %v10411_v37  ;;  %13969 = vst [vmem:[#allocation59_spill] sm:$0xff] %v10421_v56  ;;  %2560 = vmatprep.mubr.f32.mxu0 %v10406_v60  ;;  %2673 = vmatprep.mubr.f32.mxu1 %v10409_v9  ;;  %v2371_v33 = vld [vmem:[#allocation6 + $0x14d8] sm:$0xff]  ;;  %v2238_v29 = vld [vmem:[#allocation6 + $0x10b0] sm:$0xff]  ;;  %v2175_v37 = vrot.slane %v2090_v31, 2 }
 0x223   :  { %13970 = vst [vmem:[#allocation60_spill] sm:$0xff] %v10423_v3  ;;  %2713 = vmatpush1.msra.mxu0 %v2250_v19  ;;  %2826 = vmatpush1.msra.mxu1 %v2378_v14  ;;  %v10435_v19 = vsel %vm2110_vm3, %v2157_v46, %v2165_v8  ;;  %v2173_v46 = vrot.slane %v13937_v61, 2  ;;  %v2363_v25 = vld [vmem:[#allocation6 + $0x1498] sm:$0xff]  ;;  %v2091_v61 = vld [vmem:[#allocation2 + $0x128] sm:$0x3]  ;;  %v2354_v31 = vld [vmem:[#allocation6 + $0x1450] sm:$0xff] }
 0x224   :  { %2561 = vmatmul.mubr.f32.gmra.mxu0 %v10414_v57  ;;  %2674 = vmatmul.mubr.f32.gmra.mxu1 %v10417_v41 }
 0x225   :  { %2714 = vmatprep.subr.mxu0 %v2247_v62  ;;  %2827 = vmatprep.subr.mxu1 %v2375_v7  ;;  %v1508_v14 = vpop.f32.mrf.mxu0  ;;  %v1621_v3 = vpop.f32.mrf.mxu1  ;;  %v10443_v62 = vsel %vm2110_vm3, %v2154_v36, %v2163_v16  ;;  %v2239_v7 = vld [vmem:[#allocation6 + $0x10b8] sm:$0xff] }
 0x226   :  { %2715 = vmatpush1.msra.mxu0 %v2246_v44  ;;  %2828 = vmatpush1.msra.mxu1 %v2374_v17  ;;  %v10437_v56 = vadd.f32 %v1621_v3, %v1508_v14  ;;  %v2367_v44 = vld [vmem:[#allocation6 + $0x14b8] sm:$0xff]  ;;  %v2167_v3 = vrot.slane %v13936_v34, 2  ;;  %v10458_v34 = vsel %vm2110_vm3, %v2161_v4, %v2169_v43  ;;  %v2177_v4 = vrot.slane %v2091_v61, 2 }
 0x227   :  { %2716 = vmatprep.subr.mxu0 %v2243_v11  ;;  %2829 = vmatprep.subr.mxu1 %v2371_v33  ;;  %v10450_v17 = vpop.f32.mrf.mxu0  ;;  %v2366_v11 = vld [vmem:[#allocation6 + $0x14b0] sm:$0xff]  ;;  %v2235_v36 = vld [vmem:[#allocation6 + $0x1098] sm:$0xff]  ;;  %v2171_v33 = vrot.slane %v13938_v52, 2  ;;  %v10455_v50 = vpop.f32.mrf.mxu1 }
 0x228   :  { %13971 = vst [vmem:[#allocation61_spill] sm:$0xff] %v10437_v56  ;;  %2566 = vmatprep.mubr.f32.mxu0 %v10432_v21  ;;  %2679 = vmatprep.mubr.f32.mxu1 %v10435_v19  ;;  %13972 = vst [vmem:[#allocation62_spill] sm:$0xff] %v10450_v17  ;;  %v2093_v14 = vld [vmem:[#allocation2 + $0x138] sm:$0x3]  ;;  %v2362_v52 = vld [vmem:[#allocation6 + $0x1490] sm:$0xff]  ;;  %v10464_v17 = vsel %vm2110_vm3, %v2159_v40, %v2167_v3  ;;  %v10479_v61 = vsel %vm2110_vm3, %v2169_v43, %v2177_v4 }
 0x229   :  { %2717 = vmatpush1.msra.mxu0 %v2242_v38  ;;  %2830 = vmatpush1.msra.mxu1 %v2370_v2  ;;  %13973 = vst [vmem:[#allocation63_spill] sm:$0xff] %v10455_v50  ;;  %v10461_v38 = vsel %vm2110_vm3, %v2165_v8, %v2173_v46  ;;  %v2234_v2 = vld [vmem:[#allocation6 + $0x1090] sm:$0xff] }
 0x22a   :  { %2567 = vmatmul.mubr.f32.gmra.mxu0 %v10440_v58  ;;  %2680 = vmatmul.mubr.f32.gmra.mxu1 %v10443_v62 }
 0x22b   :  { %2718 = vmatprep.subr.mxu0 %v2239_v7  ;;  %2831 = vmatprep.subr.mxu1 %v2367_v44  ;;  %v10467_v7 = vsel %vm2110_vm3, %v2163_v16, %v2171_v33  ;;  %v2181_v44 = vrot.slane %v2093_v14, 2  ;;  %v2179_v16 = vrot.slane %v2092_v42, 2  ;;  %v2226_v42 = vld [vmem:[#allocation6 + $0x1050] sm:$0xff] }
 0x22c   :  { %2719 = vmatpush1.msra.mxu0 %v2238_v29  ;;  %2832 = vmatpush1.msra.mxu1 %v2366_v11  ;;  %v1692_v56 = vpop.f32.mrf.mxu0  ;;  %v2231_v29 = vld [vmem:[#allocation6 + $0x1078] sm:$0xff]  ;;  %v1805_v40 = vpop.f32.mrf.mxu1 }
 0x22d   :  { %2720 = vmatprep.subr.mxu0 %v2235_v36  ;;  %2833 = vmatprep.subr.mxu1 %v2363_v25  ;;  %v1693_v8 = vadd.f32 %v1692_v56, %v10201_v49  ;;  %v2359_v11 = vld [vmem:[#allocation6 + $0x1478] sm:$0xff]  ;;  %v2230_v36 = vld [vmem:[#allocation6 + $0x1070] sm:$0xff]  ;;  %v10482_v14 = vsel %vm2110_vm3, %v2173_v46, %v2181_v44 }
 0x22e   :  { %2572 = vmatprep.mubr.f32.mxu0 %v10458_v34  ;;  %2685 = vmatprep.mubr.f32.mxu1 %v10461_v38  ;;  %v10472_v50 = vpop.f32.mrf.mxu0  ;;  %v2358_v25 = vld [vmem:[#allocation6 + $0x1470] sm:$0xff]  ;;  %v2227_v49 = vld [vmem:[#allocation6 + $0x1058] sm:$0xff]  ;;  %v10491_v43 = vpop.f32.mrf.mxu1 }
 0x22f   :  { %13974 = vst [vmem:[#allocation64_spill] sm:$0xff] %v10472_v50  ;;  %2721 = vmatpush1.msra.mxu0 %v2234_v2  ;;  %2834 = vmatpush1.msra.mxu1 %v2362_v52  ;;  %v10474_v0 = vadd.f32 %v1805_v40, %v1693_v8  ;;  %v2355_v56 = vld [vmem:[#allocation6 + $0x1458] sm:$0xff]  ;;  %v10486_v8 = vsel %vm2110_vm3, %v2167_v3, %v2175_v37  ;;  %13975 = vst [vmem:[#allocation65_spill] sm:$0xff] %v10491_v43  ;;  %v2470_v43 = vld [vmem:[#allocation6 + $0x17f0] sm:$0xff] }
 0x230   :  { %2573 = vmatmul.mubr.f32.gmra.mxu0 %v10464_v17  ;;  %2686 = vmatmul.mubr.f32.gmra.mxu1 %v10467_v7  ;;  %v2223_v46 = vld [vmem:[#allocation6 + $0x1038] sm:$0xff] }
 0x231   :  { %2722 = vmatprep.subr.mxu0 %v2231_v29  ;;  %2835 = vmatprep.subr.mxu1 %v2359_v11  ;;  %v1698_v2 = vpop.f32.mrf.mxu0  ;;  %v10489_v29 = vsel %vm2110_vm3, %v2171_v33, %v2179_v16  ;;  %v2351_v44 = vld [vmem:[#allocation6 + $0x1438] sm:$0xff]  ;;  %v2350_v11 = vld [vmem:[#allocation6 + $0x1430] sm:$0xff] }
 0x232   :  { %2723 = vmatpush1.msra.mxu0 %v2230_v36  ;;  %2836 = vmatpush1.msra.mxu1 %v2358_v25  ;;  %v1699_v52 = vadd.f32 %v1698_v2, %v10215_v32  ;;  %v2222_v32 = vld [vmem:[#allocation6 + $0x1030] sm:$0xff]  ;;  %v2219_v37 = vld [vmem:[#allocation6 + $0x1018] sm:$0xff] }
 0x233   :  { %2724 = vmatprep.subr.mxu0 %v2227_v49  ;;  %2837 = vmatprep.subr.mxu1 %v2355_v56  ;;  %v10493_v4 = vpop.f32.mrf.mxu0  ;;  %v2347_v3 = vld [vmem:[#allocation6 + $0x1418] sm:$0xff]  ;;  %v2218_v36 = vld [vmem:[#allocation6 + $0x1010] sm:$0xff] }
 0x234   :  { %13976 = vst [vmem:[#allocation66_spill] sm:$0xff] %v10493_v4  ;;  %2578 = vmatprep.mubr.f32.mxu0 %v10479_v61  ;;  %2691 = vmatprep.mubr.f32.mxu1 %v10482_v14  ;;  %v2346_v25 = vld [vmem:[#allocation6 + $0x1410] sm:$0xff]  ;;  %v2343_v56 = vld [vmem:[#allocation6 + $0x13f8] sm:$0xff] }
 0x235   :  { %2725 = vmatpush1.msra.mxu0 %v2226_v42  ;;  %2838 = vmatpush1.msra.mxu1 %v2354_v31  ;;  %v1811_v40 = vpop.f32.mrf.mxu1  ;;  %v2471_v2 = vld [vmem:[#allocation6 + $0x17f8] sm:$0xff]  ;;  %v2342_v31 = vld [vmem:[#allocation6 + $0x13f0] sm:$0xff] }
 0x236   :  { %2579 = vmatmul.mubr.f32.gmra.mxu0 %v10486_v8  ;;  %2692 = vmatmul.mubr.f32.gmra.mxu1 %v10489_v29  ;;  %v10499_v33 = vadd.f32 %v1811_v40, %v1699_v52  ;;  %v2339_v52 = vld [vmem:[#allocation6 + $0x13d8] sm:$0xff]  ;;  %v2466_v40 = vld [vmem:[#allocation6 + $0x17d0] sm:$0xff] }
 0x237   :  { %2726 = vmatprep.subr.mxu0 %v2223_v46  ;;  %2839 = vmatprep.subr.mxu1 %v2351_v44  ;;  %v1704_v16 = vpop.f32.mrf.mxu0  ;;  %v10501_v49 = vpop.f32.mrf.mxu1  ;;  %v2467_v46 = vld [vmem:[#allocation6 + $0x17d8] sm:$0xff]  ;;  %v2338_v44 = vld [vmem:[#allocation6 + $0x13d0] sm:$0xff] }
 0x238   :  { %13977 = vst [vmem:[#allocation67_spill] sm:$0xff] %v10501_v49  ;;  %2727 = vmatpush1.msra.mxu0 %v2222_v32  ;;  %2840 = vmatpush1.msra.mxu1 %v2350_v11  ;;  %v1705_v42 = vadd.f32 %v1704_v16, %v10221_v63  ;;  %v2335_v11 = vld [vmem:[#allocation6 + $0x13b8] sm:$0xff] }
 0x239   :  { %2728 = vmatprep.subr.mxu0 %v2219_v37  ;;  %2841 = vmatprep.subr.mxu1 %v2347_v3  ;;  %v10504_v4 = vpop.f32.mrf.mxu0  ;;  %v2463_v49 = vld [vmem:[#allocation6 + $0x17b8] sm:$0xff]  ;;  %v2334_v37 = vld [vmem:[#allocation6 + $0x13b0] sm:$0xff] }
 0x23a   :  { %13978 = vst [vmem:[#allocation68_spill] sm:$0xff] %v10504_v4  ;;  %2729 = vmatpush1.msra.mxu0 %v2218_v36  ;;  %2842 = vmatpush1.msra.mxu1 %v2346_v25  ;;  %v2462_v3 = vld [vmem:[#allocation6 + $0x17b0] sm:$0xff]  ;;  %v2331_v25 = vld [vmem:[#allocation6 + $0x1398] sm:$0xff] }
 0x23b   :  { %2730 = vmatprep.subr.mxu0 %v2343_v56  ;;  %2843 = vmatprep.subr.mxu1 %v2471_v2  ;;  %v1817_v32 = vpop.f32.mrf.mxu1  ;;  %v2459_v56 = vld [vmem:[#allocation6 + $0x1798] sm:$0xff] }
 0x23c   :  { %2731 = vmatpush2.msra.mxu0 %v2342_v31  ;;  %2844 = vmatpush2.msra.mxu1 %v2470_v43  ;;  %v10506_v63 = vadd.f32 %v1817_v32, %v1705_v42  ;;  %v2330_v43 = vld [vmem:[#allocation6 + $0x1390] sm:$0xff]  ;;  %v2327_v42 = vld [vmem:[#allocation6 + $0x1378] sm:$0xff] }
 0x23d   :  { %2732 = vmatprep.subr.mxu0 %v2339_v52  ;;  %2845 = vmatprep.subr.mxu1 %v2467_v46  ;;  %v1710_v16 = vpop.f32.mrf.mxu0  ;;  %v10508_v36 = vpop.f32.mrf.mxu1  ;;  %v2458_v31 = vld [vmem:[#allocation6 + $0x1790] sm:$0xff]  ;;  %v2455_v52 = vld [vmem:[#allocation6 + $0x1778] sm:$0xff] }
 0x23e   :  { %13979 = vst [vmem:[#allocation69_spill] sm:$0xff] %v10508_v36  ;;  %2733 = vmatpush2.msra.mxu0 %v2338_v44  ;;  %2846 = vmatpush2.msra.mxu1 %v2466_v40  ;;  %v1711_v2 = vadd.f32 %v1710_v16, %v10231_v26  ;;  %v2326_v46 = vld [vmem:[#allocation6 + $0x1370] sm:$0xff]  ;;  %v2323_v40 = vld [vmem:[#allocation6 + $0x1358] sm:$0xff] }
 0x23f   :  { %2734 = vmatprep.subr.mxu0 %v2335_v11  ;;  %2847 = vmatprep.subr.mxu1 %v2463_v49  ;;  %v10511_v4 = vpop.f32.mrf.mxu0  ;;  %v2454_v32 = vld [vmem:[#allocation6 + $0x1770] sm:$0xff]  ;;  %v2451_v36 = vld [vmem:[#allocation6 + $0x1758] sm:$0xff] }
 0x240   :  { %13980 = vst [vmem:[#allocation70_spill] sm:$0xff] %v10511_v4  ;;  %2735 = vmatpush2.msra.mxu0 %v2334_v37  ;;  %2848 = vmatpush2.msra.mxu1 %v2462_v3  ;;  %v2322_v49 = vld [vmem:[#allocation6 + $0x1350] sm:$0xff]  ;;  %v2319_v3 = vld [vmem:[#allocation6 + $0x1338] sm:$0xff] }
 0x241   :  { %2736 = vmatprep.subr.mxu0 %v2331_v25  ;;  %2849 = vmatprep.subr.mxu1 %v2459_v56  ;;  %v1823_v44 = vpop.f32.mrf.mxu1  ;;  %v2450_v11 = vld [vmem:[#allocation6 + $0x1750] sm:$0xff]  ;;  %v2447_v25 = vld [vmem:[#allocation6 + $0x1738] sm:$0xff] }
 0x242   :  { %2737 = vmatpush2.msra.mxu0 %v2330_v43  ;;  %2850 = vmatpush2.msra.mxu1 %v2458_v31  ;;  %v10513_v26 = vadd.f32 %v1823_v44, %v1711_v2  ;;  %v2318_v43 = vld [vmem:[#allocation6 + $0x1330] sm:$0xff]  ;;  %v2315_v2 = vld [vmem:[#allocation6 + $0x1318] sm:$0xff] }
 0x243   :  { %2738 = vmatprep.subr.mxu0 %v2327_v42  ;;  %2851 = vmatprep.subr.mxu1 %v2455_v52  ;;  %v1716_v16 = vpop.f32.mrf.mxu0  ;;  %v10515_v37 = vpop.f32.mrf.mxu1  ;;  %v2446_v31 = vld [vmem:[#allocation6 + $0x1730] sm:$0xff]  ;;  %v2443_v42 = vld [vmem:[#allocation6 + $0x1718] sm:$0xff] }
 0x244   :  { %13981 = vst [vmem:[#allocation71_spill] sm:$0xff] %v10515_v37  ;;  %2739 = vmatpush2.msra.mxu0 %v2326_v46  ;;  %2852 = vmatpush2.msra.mxu1 %v2454_v32  ;;  %v1717_v56 = vadd.f32 %v1716_v16, %v10240_v24  ;;  %v2314_v52 = vld [vmem:[#allocation6 + $0x1310] sm:$0xff]  ;;  %v2311_v32 = vld [vmem:[#allocation6 + $0x12f8] sm:$0xff] }
 0x245   :  { %2740 = vmatprep.subr.mxu0 %v2323_v40  ;;  %2853 = vmatprep.subr.mxu1 %v2451_v36  ;;  %v10518_v4 = vpop.f32.mrf.mxu0  ;;  %v2442_v44 = vld [vmem:[#allocation6 + $0x1710] sm:$0xff]  ;;  %v2439_v37 = vld [vmem:[#allocation6 + $0x16f8] sm:$0xff] }
 0x246   :  { %13982 = vst [vmem:[#allocation72_spill] sm:$0xff] %v10518_v4  ;;  %2741 = vmatpush2.msra.mxu0 %v2322_v49  ;;  %2854 = vmatpush2.msra.mxu1 %v2450_v11  ;;  %v2310_v36 = vld [vmem:[#allocation6 + $0x12f0] sm:$0xff]  ;;  %v2307_v11 = vld [vmem:[#allocation6 + $0x12d8] sm:$0xff] }
 0x247   :  { %2742 = vmatprep.subr.mxu0 %v2319_v3  ;;  %2855 = vmatprep.subr.mxu1 %v2447_v25  ;;  %v1829_v46 = vpop.f32.mrf.mxu1  ;;  %v2438_v40 = vld [vmem:[#allocation6 + $0x16f0] sm:$0xff]  ;;  %v2435_v3 = vld [vmem:[#allocation6 + $0x16d8] sm:$0xff] }
 0x248   :  { %2743 = vmatpush2.msra.mxu0 %v2318_v43  ;;  %2856 = vmatpush2.msra.mxu1 %v2446_v31  ;;  %v10520_v24 = vadd.f32 %v1829_v46, %v1717_v56  ;;  %v2306_v43 = vld [vmem:[#allocation6 + $0x12d0] sm:$0xff]  ;;  %v2303_v56 = vld [vmem:[#allocation6 + $0x12b8] sm:$0xff] }
 0x249   :  { %2744 = vmatprep.subr.mxu0 %v2315_v2  ;;  %2857 = vmatprep.subr.mxu1 %v2443_v42  ;;  %v1722_v16 = vpop.f32.mrf.mxu0  ;;  %v10522_v49 = vpop.f32.mrf.mxu1  ;;  %v2434_v31 = vld [vmem:[#allocation6 + $0x16d0] sm:$0xff]  ;;  %v2431_v2 = vld [vmem:[#allocation6 + $0x16b8] sm:$0xff] }
 0x24a   :  { %13983 = vst [vmem:[#allocation73_spill] sm:$0xff] %v10522_v49  ;;  %2745 = vmatpush2.msra.mxu0 %v2314_v52  ;;  %2858 = vmatpush2.msra.mxu1 %v2442_v44  ;;  %v1723_v25 = vadd.f32 %v1722_v16, %v10250_v53  ;;  %v2302_v42 = vld [vmem:[#allocation6 + $0x12b0] sm:$0xff]  ;;  %v2299_v44 = vld [vmem:[#allocation6 + $0x1298] sm:$0xff] }
 0x24b   :  { %2746 = vmatprep.subr.mxu0 %v2311_v32  ;;  %2859 = vmatprep.subr.mxu1 %v2439_v37  ;;  %v10525_v4 = vpop.f32.mrf.mxu0  ;;  %v2430_v46 = vld [vmem:[#allocation6 + $0x16b0] sm:$0xff]  ;;  %v2427_v49 = vld [vmem:[#allocation6 + $0x1698] sm:$0xff] }
 0x24c   :  { %13984 = vst [vmem:[#allocation74_spill] sm:$0xff] %v10525_v4  ;;  %2747 = vmatpush2.msra.mxu0 %v2310_v36  ;;  %2860 = vmatpush2.msra.mxu1 %v2438_v40  ;;  %v2298_v37 = vld [vmem:[#allocation6 + $0x1290] sm:$0xff]  ;;  %v2295_v40 = vld [vmem:[#allocation6 + $0x1278] sm:$0xff] }
 0x24d   :  { %2748 = vmatprep.subr.mxu0 %v2307_v11  ;;  %2861 = vmatprep.subr.mxu1 %v2435_v3  ;;  %v1835_v52 = vpop.f32.mrf.mxu1  ;;  %v2426_v32 = vld [vmem:[#allocation6 + $0x1690] sm:$0xff]  ;;  %v2423_v11 = vld [vmem:[#allocation6 + $0x1678] sm:$0xff] }
 0x24e   :  { %2749 = vmatpush2.msra.mxu0 %v2306_v43  ;;  %2862 = vmatpush2.msra.mxu1 %v2434_v31  ;;  %v10527_v53 = vadd.f32 %v1835_v52, %v1723_v25  ;;  %v2294_v43 = vld [vmem:[#allocation6 + $0x1270] sm:$0xff]  ;;  %v2291_v25 = vld [vmem:[#allocation6 + $0x1258] sm:$0xff] }
 0x24f   :  { %2750 = vmatprep.subr.mxu0 %v2303_v56  ;;  %2863 = vmatprep.subr.mxu1 %v2431_v2  ;;  %v1728_v16 = vpop.f32.mrf.mxu0  ;;  %v10529_v36 = vpop.f32.mrf.mxu1  ;;  %v2422_v31 = vld [vmem:[#allocation6 + $0x1670] sm:$0xff]  ;;  %v2419_v56 = vld [vmem:[#allocation6 + $0x1658] sm:$0xff] }
 0x250   :  { %13985 = vst [vmem:[#allocation75_spill] sm:$0xff] %v10529_v36  ;;  %2751 = vmatpush2.msra.mxu0 %v2302_v42  ;;  %2864 = vmatpush2.msra.mxu1 %v2430_v46  ;;  %v1729_v3 = vadd.f32 %v1728_v16, %v10260_v6  ;;  %v2290_v2 = vld [vmem:[#allocation6 + $0x1250] sm:$0xff]  ;;  %v2287_v46 = vld [vmem:[#allocation6 + $0x1238] sm:$0xff] }
 0x251   :  { %2752 = vmatprep.subr.mxu0 %v2299_v44  ;;  %2865 = vmatprep.subr.mxu1 %v2427_v49  ;;  %v10532_v4 = vpop.f32.mrf.mxu0  ;;  %v2418_v52 = vld [vmem:[#allocation6 + $0x1650] sm:$0xff]  ;;  %v2415_v36 = vld [vmem:[#allocation6 + $0x1638] sm:$0xff] }
 0x252   :  { %13986 = vst [vmem:[#allocation76_spill] sm:$0xff] %v10532_v4  ;;  %2753 = vmatpush2.msra.mxu0 %v2298_v37  ;;  %2866 = vmatpush2.msra.mxu1 %v2426_v32  ;;  %v2286_v49 = vld [vmem:[#allocation6 + $0x1230] sm:$0xff]  ;;  %v2283_v32 = vld [vmem:[#allocation6 + $0x1218] sm:$0xff] }
 0x253   :  { %2754 = vmatprep.subr.mxu0 %v2295_v40  ;;  %2867 = vmatprep.subr.mxu1 %v2423_v11  ;;  %v1841_v42 = vpop.f32.mrf.mxu1  ;;  %v2414_v44 = vld [vmem:[#allocation6 + $0x1630] sm:$0xff]  ;;  %v2411_v40 = vld [vmem:[#allocation6 + $0x1618] sm:$0xff] }
 0x254   :  { %2755 = vmatpush2.msra.mxu0 %v2294_v43  ;;  %2868 = vmatpush2.msra.mxu1 %v2422_v31  ;;  %v10534_v6 = vadd.f32 %v1841_v42, %v1729_v3  ;;  %v2282_v43 = vld [vmem:[#allocation6 + $0x1210] sm:$0xff]  ;;  %v281_v42 = vld [vmem:[%s13752_s4 + $0x1e8] sm:$0xff]  ;;  %v10709_v4 = vld [vmem:[%s13752_s4 + $0x1b8] sm:$0xff] }
 0x255   :  { %2756 = vmatprep.subr.mxu0 %v2291_v25  ;;  %2869 = vmatprep.subr.mxu1 %v2419_v56  ;;  %v1734_v16 = vpop.f32.mrf.mxu0  ;;  %v10536_v37 = vpop.f32.mrf.mxu1  ;;  %v2410_v3 = vld [vmem:[#allocation6 + $0x1610] sm:$0xff]  ;;  %v251_v25 = vld [vmem:[%s13752_s4 + $0xf8] sm:$0xff] }
 0x256   :  { %13987 = vst [vmem:[#allocation77_spill] sm:$0xff] %v10536_v37  ;;  %2757 = vmatpush2.msra.mxu0 %v2290_v2  ;;  %2870 = vmatpush2.msra.mxu1 %v2418_v52  ;;  %v1735_v11 = vadd.f32 %v1734_v16, %v10270_v35  ;;  %v283_v35 = vld [vmem:[%s13752_s4 + $0x1f8] sm:$0xff]  ;;  %v250_v2 = vld [vmem:[%s13752_s4 + $0xf0] sm:$0xff]  ;;  %v9004_v16 = vld [vmem:[#allocation3 + $0x28] sm:$0xff] }
 0x257   :  { %2758 = vmatprep.subr.mxu0 %v2287_v46  ;;  %2871 = vmatprep.subr.mxu1 %v2415_v36  ;;  %v235_v36 = vld [vmem:[%s13752_s4 + $0x78] sm:$0xff]  ;;  %v234_v52 = vld [vmem:[%s13752_s4 + $0x70] sm:$0xff]  ;;  %v233_v46 = vld [vmem:[%s13752_s4 + $0x68] sm:$0xff] }
 0x258   :  { %2759 = vmatpush2.msra.mxu0 %v2286_v49  ;;  %2872 = vmatpush2.msra.mxu1 %v2414_v44  ;;  %v280_v49 = vld [vmem:[%s13752_s4 + $0x1e0] sm:$0xff]  ;;  %v9003_v44 = vld [vmem:[#allocation3 + $0x8] sm:$0xff]  ;;  %v10704_v37 = vld [vmem:[%s13752_s4 + $0xb8] sm:$0xff] }
 0x259   :  { %2760 = vmatprep.subr.mxu0 %v2283_v32  ;;  %2873 = vmatprep.subr.mxu1 %v2411_v40  ;;  %v1847_v31 = vpop.f32.mrf.mxu1  ;;  %v2965_v32 = vadd.f32 %v9004_v16, %v9003_v44  ;;  %v9005_v40 = vld [vmem:[#allocation3 + $0x88] sm:$0xff]  ;;  %v9017_v16 = vld [vmem:[#allocation3 + $0x90] sm:$0xff] }
 0x25a   :  { %2761 = vmatpush2.msra.mxu0 %v2282_v43  ;;  %2762 = vmatprep.mubr.f32.mxu0 %v10306_v27  ;;  %v10546_v56 = vadd.f32 %v1847_v31, %v1735_v11  ;;  %v267_v27 = vld [vmem:[%s13752_s4 + $0x178] sm:$0xff]  ;;  %v9006_v11 = vld [vmem:[#allocation3 + $0xa8] sm:$0xff] }
 0x25b   :  { %2874 = vmatpush2.msra.mxu1 %v2410_v3  ;;  %2875 = vmatprep.mubr.f32.mxu1 %v10309_v10  ;;  %v282_v10 = vld [vmem:[%s13752_s4 + $0x1f0] sm:$0xff]  ;;  %v3001_v43 = vadd.f32 %v9006_v11, %v9005_v40  ;;  %v9007_v3 = vld [vmem:[#allocation3 + $0x18] sm:$0xff] }
 0x25c   :  { %2763 = vmatmul.mubr.f32.vlgmr.msra.gmra.mxu0 %v10314_v12  ;;  %2876 = vmatmul.mubr.f32.vlgmr.msra.gmra.mxu1 %v10317_v15  ;;  %v266_v12 = vld [vmem:[%s13752_s4 + $0x170] sm:$0xff]  ;;  %v249_v15 = vld [vmem:[%s13752_s4 + $0xe8] sm:$0xff] }
 0x25d   :  { %8608 = vmatprep.subr.mxu0 %v251_v25  ;;  %8643 = vmatprep.subr.mxu1 %v283_v35  ;;  %v264_v25 = vld [vmem:[%s13752_s4 + $0x160] sm:$0xff]  ;;  %v9009_v35 = vld [vmem:[#allocation3 + $0x98] sm:$0xff]  ;;  %v9018_v40 = vld [vmem:[#allocation3 + $0xb0] sm:$0xff] }
 0x25e   :  { %8609 = vmatpush3.msra.mxu0 %v235_v36  ;;  %8644 = vmatpush3.msra.mxu1 %v267_v27  ;;  %v9010_v36 = vld [vmem:[#allocation3 + $0xb8] sm:$0xff]  ;;  %v3010_v11 = vadd.f32 %v9018_v40, %v9017_v16  ;;  %v9028_v40 = vld [vmem:[#allocation3 + $0xe8] sm:$0xff] }
 0x25f   :  { %8610 = vmatprep.subr.mxu0 %v250_v2  ;;  %8645 = vmatprep.subr.mxu1 %v282_v10  ;;  %v3019_v27 = vadd.f32 %v9010_v36, %v9009_v35  ;;  %v9011_v2 = vld [vmem:[#allocation3] sm:$0xff]  ;;  %v9020_v35 = vld [vmem:[#allocation3 + $0xc8] sm:$0xff] }
 0x260   :  { %2768 = vmatprep.mubr.f32.mxu0 %v10332_v5  ;;  %2881 = vmatprep.mubr.f32.mxu1 %v10335_v30  ;;  %v265_v5 = vld [vmem:[%s13752_s4 + $0x168] sm:$0xff]  ;;  %v248_v30 = vld [vmem:[%s13752_s4 + $0xe0] sm:$0xff]  ;;  %v3002_v36 = vadd.f32 %v9020_v35, %v3001_v43 }
 0x261   :  { %8611 = vmatpush3.msra.mxu0 %v234_v52  ;;  %8646 = vmatpush3.msra.mxu1 %v266_v12  ;;  %v9012_v10 = vld [vmem:[#allocation3 + $0x20] sm:$0xff] }
 0x262   :  { %2769 = vmatmul.mubr.f32.gmra.mxu0 %v10340_v18  ;;  %2882 = vmatmul.mubr.f32.gmra.mxu1 %v10343_v47  ;;  %v9008_v18 = vld [vmem:[#allocation3 + $0x38] sm:$0xff]  ;;  %v232_v47 = vld [vmem:[%s13752_s4 + $0x60] sm:$0xff]  ;;  %v2956_v52 = vadd.f32 %v9012_v10, %v9011_v2 }
 0x263   :  { %8612 = vmatprep.subr.mxu0 %v249_v15  ;;  %8647 = vmatprep.subr.mxu1 %v281_v42  ;;  %v2983_v31 = vadd.f32 %v9008_v18, %v9007_v3  ;;  %v9013_v12 = vld [vmem:[#allocation3 + $0x80] sm:$0xff]  ;;  %v10602_v3 = vld [vmem:[%s13752_s4 + $0xd8] sm:$0xff] }
 0x264   :  { %8613 = vmatpush3.msra.mxu0 %v233_v46  ;;  %8648 = vmatpush3.msra.mxu1 %v265_v5  ;;  %v9014_v15 = vld [vmem:[#allocation3 + $0xa0] sm:$0xff]  ;;  %v9015_v46 = vld [vmem:[#allocation3 + $0x10] sm:$0xff]  ;;  %v9021_v2 = vld [vmem:[#allocation3 + $0x58] sm:$0xff] }
 0x265   :  { %v2992_v42 = vadd.f32 %v9014_v15, %v9013_v12  ;;  %8614 = vmatprep.subr.mxu0 %v248_v30  ;;  %8649 = vmatprep.subr.mxu1 %v280_v49  ;;  %v9016_v5 = vld [vmem:[#allocation3 + $0x30] sm:$0xff]  ;;  %v10607_v30 = vld [vmem:[%s13752_s4 + $0x1d8] sm:$0xff]  ;;  %v2984_v10 = vadd.f32 %v9021_v2, %v2983_v31  ;;  %v9023_v15 = vld [vmem:[#allocation3 + $0x40] sm:$0xff] }
 0x266   :  { %v2974_v44 = vadd.f32 %v9016_v5, %v9015_v46  ;;  %2774 = vmatprep.mubr.f32.mxu0 %v10358_v20  ;;  %2887 = vmatprep.mubr.f32.mxu1 %v10361_v45  ;;  %v10612_v49 = vld [vmem:[%s13752_s4 + $0x58] sm:$0xff]  ;;  %v9019_v45 = vld [vmem:[#allocation3 + $0x48] sm:$0xff]  ;;  %v2957_v43 = vadd.f32 %v9023_v15, %v2956_v52  ;;  %v9024_v46 = vld [vmem:[#allocation3 + $0xc0] sm:$0xff] }
 0x267   :  { %8615 = vmatpush3.msra.mxu0 %v232_v47  ;;  %8650 = vmatpush3.msra.mxu1 %v264_v25  ;;  %v10617_v20 = vld [vmem:[%s13752_s4 + $0x158] sm:$0xff]  ;;  %v2966_v18 = vadd.f32 %v9019_v45, %v2965_v32  ;;  %v10624_v47 = vld [vmem:[%s13752_s4 + $0xd0] sm:$0xff]  ;;  %v2993_v31 = vadd.f32 %v9024_v46, %v2992_v42  ;;  %v9027_v42 = vld [vmem:[#allocation3 + $0x68] sm:$0xff] }
 0x268   :  { %2775 = vmatmul.mubr.f32.gmra.mxu0 %v10366_v13  ;;  %2888 = vmatmul.mubr.f32.gmra.mxu1 %v10369_v23  ;;  %v10629_v25 = vld [vmem:[%s13752_s4 + $0x1d0] sm:$0xff]  ;;  %v9022_v12 = vld [vmem:[#allocation3 + $0xd8] sm:$0xff]  ;;  %v10652_v2 = vld [vmem:[%s13752_s4 + $0xc8] sm:$0xff] }
 0x269   :  { %v3020_v32 = vadd.f32 %v9022_v12, %v3019_v27  ;;  %8616 = vmatprep.subr.mxu0 %v10602_v3  ;;  %8651 = vmatprep.subr.mxu1 %v10607_v30  ;;  %v9025_v13 = vld [vmem:[#allocation3 + $0x50] sm:$0xff]  ;;  %v9029_v45 = vld [vmem:[#allocation3 + $0x78] sm:$0xff]  ;;  %v10657_v12 = vld [vmem:[%s13752_s4 + $0x1c8] sm:$0xff] }
 0x26a   :  { %v2975_v23 = vadd.f32 %v9025_v13, %v2974_v44  ;;  %v9026_v5 = vld [vmem:[#allocation3 + $0xd0] sm:$0xff]  ;;  %8617 = vmatpush3.msra.mxu0 %v10612_v49  ;;  %8652 = vmatpush3.msra.mxu1 %v10617_v20  ;;  %v2967_v44 = vadd.f32 %v9027_v42, %v2966_v18  ;;  %v2985_v35 = vadd.f32 %v9029_v45, %v2984_v10  ;;  %v9030_v15 = vld [vmem:[#allocation3 + $0xf8] sm:$0xff]  ;;  %v9031_v46 = vld [vmem:[#allocation3 + $0x60] sm:$0xff] }
 0x26b   :  { %v3011_v16 = vadd.f32 %v9026_v5, %v3010_v11  ;;  %v10638_v27 = vld [vmem:[%s13752_s4 + $0x50] sm:$0xff]  ;;  %8618 = vmatprep.subr.mxu0 %v10624_v47  ;;  %8653 = vmatprep.subr.mxu1 %v10629_v25  ;;  %v3003_v11 = vadd.f32 %v9028_v40, %v3002_v36  ;;  %13988 = vst [vmem:[#allocation78_spill] sm:$0xff] %v10657_v12  ;;  %v9032_v13 = vld [vmem:[#allocation3 + $0xe0] sm:$0xff] }
 0x26c   :  { %v10643_v52 = vld [vmem:[%s13752_s4 + $0x150] sm:$0xff]  ;;  %2780 = vmatprep.mubr.f32.mxu0 %v10380_v51  ;;  %2893 = vmatprep.mubr.f32.mxu1 %v10383_v48  ;;  %v3021_v18 = vadd.f32 %v9030_v15, %v3020_v32  ;;  %v2958_v36 = vadd.f32 %v9031_v46, %v2957_v43  ;;  %v2994_v10 = vadd.f32 %v9032_v13, %v2993_v31  ;;  %v10664_v51 = vld [vmem:[%s13752_s4 + $0x48] sm:$0xff]  ;;  %v10676_v31 = vld [vmem:[%s13752_s4 + $0xc0] sm:$0xff]  ;;  %v2986_v45 = vrot.slane %v2985_v35, 4 }
 0x26d   :  { %8619 = vmatpush3.msra.mxu0 %v10638_v27  ;;  %8654 = vmatpush3.msra.mxu1 %v10643_v52  ;;  %13989 = vst [vmem:[#allocation79_spill] sm:$0xff] %v10664_v51  ;;  %v10669_v48 = vld [vmem:[%s13752_s4 + $0x148] sm:$0xff]  ;;  %v9033_v5 = vld [vmem:[#allocation3 + $0x70] sm:$0xff]  ;;  %13991 = vst [vmem:[#allocation81_spill] sm:$0xff] %v10676_v31 }
 0x26e   :  { %13990 = vst [vmem:[#allocation80_spill] sm:$0xff] %v10669_v48  ;;  %v2976_v32 = vadd.f32 %v9033_v5, %v2975_v23  ;;  %v9034_v42 = vld [vmem:[#allocation3 + $0xf0] sm:$0xff]  ;;  %2781 = vmatmul.mubr.f32.gmra.mxu0 %v10386_v55  ;;  %2894 = vmatmul.mubr.f32.gmra.mxu1 %v10389_v22  ;;  %v10681_v40 = vld [vmem:[%s13752_s4 + $0x1c0] sm:$0xff]  ;;  %v2968_v23 = vrot.slane %v2967_v44, 4  ;;  %v3022_v15 = vrot.slane %v3021_v18, 4  ;;  %v2959_v46 = vrot.slane %v2958_v36, 4 }
 0x26f   :  { %v3012_v43 = vadd.f32 %v9034_v42, %v3011_v16  ;;  %13992 = vst [vmem:[#allocation82_spill] sm:$0xff] %v10681_v40  ;;  %8620 = vmatprep.subr.mxu0 %v10652_v2  ;;  %8655 = vmatprep.subr.mxu1 %v10657_v12  ;;  %v3004_v16 = vrot.slane %v3003_v11, 4  ;;  %v10690_v22 = vld [vmem:[%s13752_s4 + $0x40] sm:$0xff]  ;;  %v2995_v13 = vrot.slane %v2994_v10, 4 }
 0x270   :  { %8621 = vmatpush3.msra.mxu0 %v10664_v51  ;;  %8656 = vmatpush3.msra.mxu1 %v10669_v48  ;;  %13993 = vst [vmem:[#allocation83_spill] sm:$0xff] %v10690_v22  ;;  %v10695_v55 = vld [vmem:[%s13752_s4 + $0x140] sm:$0xff]  ;;  %v2977_v5 = vrot.slane %v2976_v32, 4  ;;  %v2969_v50 = vadd.f32 %v2968_v23, %v2967_v44  ;;  %v3023_v48 = vadd.f32 %v3022_v15, %v3021_v18 }
 0x271   :  { %13994 = vst [vmem:[#allocation84_spill] sm:$0xff] %v10695_v55  ;;  %8622 = vmatprep.subr.mxu0 %v10676_v31  ;;  %8657 = vmatprep.subr.mxu1 %v10681_v40  ;;  %v3013_v42 = vrot.slane %v3012_v43, 4  ;;  %v3005_v40 = vadd.f32 %v3004_v16, %v3003_v11  ;;  %v2987_v31 = vadd.f32 %v2986_v45, %v2985_v35  ;;  %v10747_v11 = vld [vmem:[%s13752_s4 + $0x130] sm:$0xff] }
 0x272   :  { %2786 = vmatprep.mubr.f32.mxu0 %v10406_v60  ;;  %2899 = vmatprep.mubr.f32.mxu1 %v10409_v9  ;;  %v10716_v60 = vld [vmem:[%s13752_s4 + $0x38] sm:$0xff]  ;;  %v2960_v51 = vadd.f32 %v2959_v46, %v2958_v36  ;;  %v2996_v12 = vadd.f32 %v2995_v13, %v2994_v10  ;;  %13996 = vst [vmem:[#allocation86_spill] sm:$0xff] %v10747_v11  ;;  %v2970_v35 = vrot.slane %v2969_v50, 2  ;;  %v10756_v10 = vld [vmem:[%s13752_s4 + $0xa8] sm:$0xff]  ;;  %v10780_v46 = vld [vmem:[%s13752_s4 + $0xa0] sm:$0xff] }
 0x273   :  { %8623 = vmatpush3.msra.mxu0 %v10690_v22  ;;  %8658 = vmatpush3.msra.mxu1 %v10695_v55  ;;  %v10721_v9 = vld [vmem:[%s13752_s4 + $0x138] sm:$0xff]  ;;  %v10728_v55 = vld [vmem:[%s13752_s4 + $0xb0] sm:$0xff]  ;;  %v3014_v44 = vadd.f32 %v3013_v42, %v3012_v43  ;;  %v3006_v18 = vrot.slane %v3005_v40, 2  ;;  %v2988_v36 = vrot.slane %v2987_v31, 2  ;;  %13997 = vst [vmem:[#allocation87_spill] sm:$0xff] %v10756_v10  ;;  %v3024_v43 = vrot.slane %v3023_v48, 2 }
 0x274   :  { %2787 = vmatmul.mubr.f32.gmra.mxu0 %v10414_v57  ;;  %2900 = vmatmul.mubr.f32.gmra.mxu1 %v10417_v41  ;;  %v10733_v22 = vld [vmem:[%s13752_s4 + $0x1b0] sm:$0xff]  ;;  %v2978_v57 = vadd.f32 %v2977_v5, %v2976_v32  ;;  %v10761_v32 = vld [vmem:[%s13752_s4 + $0x1a8] sm:$0xff]  ;;  %v2961_v23 = vrot.slane %v2960_v51, 2  ;;  %v2997_v16 = vrot.slane %v2996_v12, 2  ;;  %v10785_v13 = vld [vmem:[%s13752_s4 + $0x1a0] sm:$0xff]  ;;  %v10787_v5 = vpop.f32.mrf.mxu0  ;;  %v2971_v42 = vadd.f32 %v2970_v35, %v2969_v50 }
 0x275   :  { %8624 = vmatprep.subr.mxu0 %v10704_v37  ;;  %8659 = vmatprep.subr.mxu1 %v10709_v4  ;;  %v10742_v41 = vld [vmem:[%s13752_s4 + $0x30] sm:$0xff]  ;;  %v3015_v15 = vrot.slane %v3014_v44, 2  ;;  %13998 = vst [vmem:[#allocation88_spill] sm:$0xff] %v10787_v5  ;;  %v10801_v5 = vld [vmem:[%s13752_s4 + $0x120] sm:$0xff] }
 0x276   :  { %8625 = vmatpush3.msra.mxu0 %v10716_v60  ;;  %8660 = vmatpush3.msra.mxu1 %v10721_v9  ;;  %13995 = vst [vmem:[#allocation85_spill] sm:$0xff] %v10742_v41  ;;  %v2979_v45 = vrot.slane %v2978_v57, 2  ;;  %14000 = vst [vmem:[#allocation90_spill] sm:$0xff] %v10801_v5  ;;  %v2962_v50 = vadd.f32 %v2961_v23, %v2960_v51  ;;  %v10841_v23 = vld [vmem:[%s13752_s4 + $0x90] sm:$0xff] }
 0x277   :  { %8626 = vmatprep.subr.mxu0 %v10728_v55  ;;  %8661 = vmatprep.subr.mxu1 %v10733_v22 }
 0x278   :  { %2792 = vmatprep.mubr.f32.mxu0 %v10432_v21  ;;  %2905 = vmatprep.mubr.f32.mxu1 %v10435_v19  ;;  %v10768_v21 = vld [vmem:[%s13752_s4 + $0x28] sm:$0xff]  ;;  %v2980_v35 = vadd.f32 %v2979_v45, %v2978_v57 }
 0x279   :  { %8627 = vmatpush3.msra.mxu0 %v10742_v41  ;;  %8662 = vmatpush3.msra.mxu1 %v10747_v11  ;;  %v10773_v19 = vld [vmem:[%s13752_s4 + $0x128] sm:$0xff]  ;;  %v2989_v11 = vadd.f32 %v2988_v36, %v2987_v31  ;;  %v10803_v41 = vpop.f32.mrf.mxu1 }
 0x27a   :  { %2793 = vmatmul.mubr.f32.gmra.mxu0 %v10440_v58  ;;  %2906 = vmatmul.mubr.f32.gmra.mxu1 %v10443_v62  ;;  %v3007_v58 = vadd.f32 %v3006_v18, %v3005_v40  ;;  %v10796_v62 = vld [vmem:[%s13752_s4 + $0x20] sm:$0xff]  ;;  %14001 = vst [vmem:[#allocation91_spill] sm:$0xff] %v10803_v41  ;;  %v2998_v40 = vadd.f32 %v2997_v16, %v2996_v12  ;;  %v10818_v12 = vld [vmem:[%s13752_s4 + $0x198] sm:$0xff]  ;;  %v10846_v16 = vld [vmem:[%s13752_s4 + $0x190] sm:$0xff] }
 0x27b   :  { %8628 = vmatprep.subr.mxu0 %v10756_v10  ;;  %8663 = vmatprep.subr.mxu1 %v10761_v32  ;;  %13999 = vst [vmem:[#allocation89_spill] sm:$0xff] %v10796_v62  ;;  %v3025_v10 = vadd.f32 %v3024_v43, %v3023_v48  ;;  %v3016_v18 = vadd.f32 %v3015_v15, %v3014_v44  ;;  %v10813_v48 = vld [vmem:[%s13752_s4 + $0x98] sm:$0xff]  ;;  %14003 = vst [vmem:[#allocation93_spill] sm:$0xff] %v10818_v12  ;;  %v2990_v45 = vrot.slane %v2989_v11, 1  ;;  %v10855_v41 = vld [vmem:[%s13752_s4 + $0x10] sm:$0xff] }
 0x27c   :  { %8629 = vmatpush3.msra.mxu0 %v10768_v21  ;;  %8664 = vmatpush3.msra.mxu1 %v10773_v19  ;;  %v1918_v31 = vpop.f32.mrf.mxu0  ;;  %14002 = vst [vmem:[#allocation92_spill] sm:$0xff] %v10813_v48  ;;  %v2031_v51 = vpop.f32.mrf.mxu1  ;;  %v3008_v57 = vrot.slane %v3007_v58, 1 }
 0x27d   :  { %8630 = vmatprep.subr.mxu0 %v10780_v46  ;;  %8665 = vmatprep.subr.mxu1 %v10785_v13  ;;  %v1919_v36 = vadd.f32 %v1918_v31, %v10281_v39  ;;  %v10827_v39 = vld [vmem:[%s13752_s4 + $0x18] sm:$0xff]  ;;  %v3026_v15 = vrot.slane %v3025_v10, 1  ;;  %v2963_v31 = vrot.slane %v2962_v50, 1 }
 0x27e   :  { %2798 = vmatprep.mubr.f32.mxu0 %v10458_v34  ;;  %2911 = vmatprep.mubr.f32.mxu1 %v10461_v38  ;;  %v10820_v43 = vpop.f32.mrf.mxu0  ;;  %14005 = vst [vmem:[#allocation95_spill] sm:$0xff] %v10827_v39  ;;  %v10832_v34 = vld [vmem:[%s13752_s4 + $0x118] sm:$0xff]  ;;  %v2972_v38 = vrot.slane %v2971_v42, 1 }
 0x27f   :  { %14004 = vst [vmem:[#allocation94_spill] sm:$0xff] %v10820_v43  ;;  %8631 = vmatpush3.msra.mxu0 %v10796_v62  ;;  %8666 = vmatpush3.msra.mxu1 %v10801_v5  ;;  %14006 = vst [vmem:[#allocation96_spill] sm:$0xff] %v10832_v34  ;;  %v10834_v44 = vadd.f32 %v2031_v51, %v1919_v36  ;;  %v2981_v36 = vrot.slane %v2980_v35, 1  ;;  %v10860_v43 = vld [vmem:[%s13752_s4 + $0x110] sm:$0xff]  ;;  %v10865_v5 = vpop.f32.mrf.mxu1  ;;  %v10874_v62 = vld [vmem:[%s13752_s4 + $0x88] sm:$0xff] }
 0x280   :  { %2799 = vmatmul.mubr.f32.gmra.mxu0 %v10464_v17  ;;  %2912 = vmatmul.mubr.f32.gmra.mxu1 %v10467_v7  ;;  %v2999_v17 = vrot.slane %v2998_v40, 1  ;;  %v3017_v7 = vrot.slane %v3016_v18, 1  ;;  %14007 = vst [vmem:[#allocation97_spill] sm:$0xff] %v10865_v5 }
 0x281   :  { %8632 = vmatprep.subr.mxu0 %v10813_v48  ;;  %8667 = vmatprep.subr.mxu1 %v10818_v12  ;;  %v1924_v51 = vpop.f32.mrf.mxu0  ;;  %v2973_v48 = vadd.f32 %v2972_v38, %v2971_v42  ;;  %v2991_v42 = vadd.f32 %v2990_v45, %v2989_v11  ;;  %v2964_v38 = vadd.f32 %v2963_v31, %v2962_v50  ;;  %v10903_v50 = vld [vmem:[%s13752_s4 + $0x180] sm:$0xff] }
 0x282   :  { %8633 = vmatpush3.msra.mxu0 %v10827_v39  ;;  %8668 = vmatpush3.msra.mxu1 %v10832_v34  ;;  %v1925_v12 = vadd.f32 %v1924_v51, %v10295_v1  ;;  %v3009_v39 = vadd.f32 %v3008_v57, %v3007_v58  ;;  %v10879_v1 = vld [vmem:[%s13752_s4 + $0x188] sm:$0xff]  ;;  %v3027_v58 = vadd.f32 %v3026_v15, %v3025_v10  ;;  %v10898_v10 = vld [vmem:[%s13752_s4 + $0x80] sm:$0xff] }
 0x283   :  { %8634 = vmatprep.subr.mxu0 %v10841_v23  ;;  %8669 = vmatprep.subr.mxu1 %v10846_v16  ;;  %v10867_v34 = vpop.f32.mrf.mxu0  ;;  %v3000_v57 = vadd.f32 %v2999_v17, %v2998_v40  ;;  %v2982_v51 = vadd.f32 %v2981_v36, %v2980_v35  ;;  %v3018_v5 = vadd.f32 %v3017_v7, %v3016_v18  ;;  %v10922_v18 = vld [vmem:[%s13752_s4 + $0x100] sm:$0xff] }
 0x284   :  { %2804 = vmatprep.mubr.f32.mxu0 %v10479_v61  ;;  %2917 = vmatprep.mubr.f32.mxu1 %v10482_v14  ;;  %v10886_v61 = vld [vmem:[%s13752_s4 + $0x8] sm:$0xff] }
 0x285   :  { %8635 = vmatpush3.msra.mxu0 %v10855_v41  ;;  %8670 = vmatpush3.msra.mxu1 %v10860_v43  ;;  %v10891_v14 = vld [vmem:[%s13752_s4 + $0x108] sm:$0xff]  ;;  %v2037_v11 = vpop.f32.mrf.mxu1 }
 0x286   :  { %2805 = vmatmul.mubr.f32.gmra.mxu0 %v10486_v8  ;;  %2918 = vmatmul.mubr.f32.gmra.mxu1 %v10489_v29  ;;  %v10905_v45 = vadd.f32 %v2037_v11, %v1925_v12  ;;  %v10912_v8 = vld [vmem:[%s13752_s4] sm:$0xff]  ;;  %v3038_v29 = vsel %vm3036_vm4, %v3009_v39, %v2973_v48  ;;  %v3040_v12 = vsel %vm3036_vm4, %v3027_v58, %v2991_v42  ;;  %v14011_v42 = vmov 0.0  }
 0x287   :  { %8636 = vmatprep.subr.mxu0 %v10874_v62  ;;  %8671 = vmatprep.subr.mxu1 %v10879_v1  ;;  %v1930_v40 = vpop.f32.mrf.mxu0  ;;  %v10915_v35 = vpop.f32.mrf.mxu1  ;;  %v3037_v48 = vsel %vm3036_vm4, %v3000_v57, %v2964_v38  ;;  %v3039_v39 = vsel %vm3036_vm4, %v3018_v5, %v2982_v51 }
 0x288   :  { %14008 = vst [vmem:[#allocation98_spill] sm:$0xff] %v10915_v35  ;;  %8637 = vmatpush3.msra.mxu0 %v10886_v61  ;;  %8672 = vmatpush3.msra.mxu1 %v10891_v14  ;;  %v1931_v15 = vadd.f32 %v1930_v40, %v10311_v54 }
 0x289   :  { %8638 = vmatprep.subr.mxu0 %v10898_v10  ;;  %8673 = vmatprep.subr.mxu1 %v10903_v50  ;;  %v10930_v31 = vpop.f32.mrf.mxu0 }
 0x28a   :  { %14009 = vst [vmem:[#allocation99_spill] sm:$0xff] %v10930_v31  ;;  %8639 = vmatpush3.msra.mxu0 %v10912_v8  ;;  %3109 = vmatprep.mubr.f32.mxu0 %v3038_v29 }
 0x28b   :  { %8674 = vmatpush3.msra.mxu1 %v10922_v18  ;;  %3179 = vmatprep.mubr.f32.mxu1 %v3040_v12  ;;  %v2043_v17 = vpop.f32.mrf.mxu1 }
 0x28c   :  { %3110 = vmatmul.mubr.f32.vlgmr.msra.gmra.mxu0 %v3037_v48  ;;  %3180 = vmatmul.mubr.f32.vlgmr.msra.gmra.mxu1 %v3039_v39  ;;  %v10934_v54 = vadd.f32 %v2043_v17, %v1931_v15  ;;  %v14016_v17 = vld [vmem:[#allocation55_spill] sm:$0xff] }
 0x28d   :  { %v1936_v36 = vpop.f32.mrf.mxu0  ;;  %v10936_v7 = vpop.f32.mrf.mxu1  ;;  %8963 = vmatprep.subr.mxu0 %v14011_v42  ;;  %8970 = vmatprep.subr.mxu1 %v14011_v42 }
 0x28e   :  { %14010 = vst [vmem:[#allocation100_spill] sm:$0xff] %v10936_v7  ;;  %v1937_v5 = vadd.f32 %v1936_v36, %v10337_v59  ;;  %8967 = vmatprep.mubr.msk.f32.mxu0 %vm9517_vm5, %v14011_v42  ;;  %8972 = vmatprep.mubr.msk.f32.mxu1 %vm9517_vm5, %v14011_v42  ;;  %vm3503_vm5 = vcmask 130112  }
 0x28f   :  { %v10941_v58 = vpop.f32.mrf.mxu0 }
 0x290   :  { %14012 = vst [vmem:[#allocation101_spill] sm:$0xff] %v10941_v58 }
 0x291   :  { %v2049_v38 = vpop.f32.mrf.mxu1 }
 0x292   :  { %v10943_v57 = vadd.f32 %v2049_v38, %v1937_v5 }
 0x293   :  { %v1942_v51 = vpop.f32.mrf.mxu0  ;;  %v10945_v11 = vpop.f32.mrf.mxu1 }
 0x294   :  { %14013 = vst [vmem:[#allocation102_spill] sm:$0xff] %v10945_v11  ;;  %v1943_v29 = vadd.f32 %v1942_v51, %v10363_v28  ;;  %v14019_v11 = vld [vmem:[#allocation58_spill] sm:$0xff] }
 0x295   :  { %v10948_v40 = vpop.f32.mrf.mxu0 }
 0x296   :  { %14014 = vst [vmem:[#allocation103_spill] sm:$0xff] %v10948_v40 }
 0x297   :  { %v2055_v12 = vpop.f32.mrf.mxu1 }
 0x298   :  { %v10950_v15 = vadd.f32 %v2055_v12, %v1943_v29 }
 0x299   :  { %v1948_v48 = vpop.f32.mrf.mxu0  ;;  %v10952_v39 = vpop.f32.mrf.mxu1 }
 0x29a   :  { %14015 = vst [vmem:[#allocation104_spill] sm:$0xff] %v10952_v39  ;;  %v1949_v59 = vadd.f32 %v1948_v48, %v14016_v17  ;;  %v14022_v39 = vld [vmem:[#allocation61_spill] sm:$0xff] }
 0x29b   :  { %v10955_v36 = vpop.f32.mrf.mxu0 }
 0x29c   :  { %14017 = vst [vmem:[#allocation55_spill] sm:$0xff] %v10955_v36 }
 0x29d   :  { %v2061_v7 = vpop.f32.mrf.mxu1 }
 0x29e   :  { %v10957_v5 = vadd.f32 %v2061_v7, %v1949_v59 }
 0x29f   :  { %v1954_v38 = vpop.f32.mrf.mxu0  ;;  %v10959_v35 = vpop.f32.mrf.mxu1 }
 0x2a0   :  { %14018 = vst [vmem:[#allocation105_spill] sm:$0xff] %v10959_v35  ;;  %v1955_v28 = vadd.f32 %v1954_v38, %v14019_v11 }
 0x2a1   :  { %v10962_v51 = vpop.f32.mrf.mxu0 }
 0x2a2   :  { %14020 = vst [vmem:[#allocation58_spill] sm:$0xff] %v10962_v51 }
 0x2a3   :  { %v2067_v40 = vpop.f32.mrf.mxu1 }
 0x2a4   :  { %v10964_v29 = vadd.f32 %v2067_v40, %v1955_v28 }
 0x2a5   :  { %v1960_v12 = vpop.f32.mrf.mxu0  ;;  %v10966_v58 = vpop.f32.mrf.mxu1 }
 0x2a6   :  { %14021 = vst [vmem:[#allocation106_spill] sm:$0xff] %v10966_v58  ;;  %v1961_v48 = vadd.f32 %v1960_v12, %v14022_v39  ;;  %v3188_v39 = vld [vmem:[%s13753_s5 + $0x8] sm:$0xff] }
 0x2a7   :  { %v10971_v7 = vpop.f32.mrf.mxu0  ;;  %8964 = vmatpush3.msra.mxu0 %v3188_v39 }
 0x2a8   :  { %8965 = vmatprep.subr.mxu0 %v14011_v42 }
 0x2a9   :  { %v2073_v17 = vpop.f32.mrf.mxu1 }
 0x2aa   :  { %v10969_v36 = vadd.f32 %v2073_v17, %v1961_v48 }
 0x2ab   :  { %v10973_v59 = vpop.f32.mrf.mxu1 }
 0x2ac   :  { %14023 = vst [vmem:[#allocation61_spill] sm:$0xff] %v10973_v59 }
 0x2cc   :  { %v2538_v35 = vpop.f32.mrf.mxu0  ;;  %v2651_v31 = vpop.f32.mrf.mxu1 }
 0x2cd   :  { %v2652_v11 = vadd.f32 %v2651_v31, %v2538_v35  ;;  %v3187_v35 = vld [vmem:[%s13753_s5] sm:$0xff] }
 0x2ce   :  { %v10975_v38 = vpop.f32.mrf.mxu0  ;;  %v10977_v51 = vpop.f32.mrf.mxu1  ;;  %8966 = vmatpush3.msra.mxu0 %v3187_v35 }
 0x2cf   :  { %14024 = vst [vmem:[#allocation107_spill] sm:$0xff] %v10977_v51  ;;  %v10980_v40 = vadd.f32 %v2652_v11, %v10474_v0 }
 0x2d1   :  { %14025 = vst [vmem:[#allocation108_spill] sm:$0xff] %v10980_v40 }
 0x2d2   :  { %v2544_v28 = vpop.f32.mrf.mxu0  ;;  %v2657_v12 = vpop.f32.mrf.mxu1 }
 0x2d3   :  { %v2658_v48 = vadd.f32 %v2657_v12, %v2544_v28 }
 0x2d4   :  { %v10989_v31 = vpop.f32.mrf.mxu0  ;;  %v10991_v17 = vpop.f32.mrf.mxu1 }
 0x2d5   :  { %14026 = vst [vmem:[#allocation109_spill] sm:$0xff] %v10989_v31  ;;  %14027 = vst [vmem:[#allocation110_spill] sm:$0xff] %v10991_v17  ;;  %v10995_v0 = vadd.f32 %v2658_v48, %v10499_v33 }
 0x2d7   :  { %14028 = vst [vmem:[#allocation111_spill] sm:$0xff] %v10995_v0 }
 0x2d8   :  { %v2550_v11 = vpop.f32.mrf.mxu0  ;;  %v2663_v39 = vpop.f32.mrf.mxu1 }
 0x2d9   :  { %v2664_v28 = vadd.f32 %v2663_v39, %v2550_v11 }
 0x2da   :  { %v10998_v12 = vpop.f32.mrf.mxu0  ;;  %v11000_v40 = vpop.f32.mrf.mxu1 }
 0x2db   :  { %14029 = vst [vmem:[#allocation112_spill] sm:$0xff] %v10998_v12  ;;  %v11003_v59 = vadd.f32 %v2664_v28, %v10506_v63 }
 0x2dd   :  { %14030 = vst [vmem:[#allocation113_spill] sm:$0xff] %v11003_v59 }
 0x2de   :  { %v2556_v58 = vpop.f32.mrf.mxu0  ;;  %v2669_v35 = vpop.f32.mrf.mxu1 }
 0x2df   :  { %v2670_v17 = vadd.f32 %v2669_v35, %v2556_v58 }
 0x2e0   :  { %v11005_v31 = vpop.f32.mrf.mxu0  ;;  %v11007_v51 = vpop.f32.mrf.mxu1 }
 0x2e1   :  { %14031 = vst [vmem:[#allocation114_spill] sm:$0xff] %v11005_v31  ;;  %v11010_v33 = vadd.f32 %v2670_v17, %v10513_v26 }
 0x2e3   :  { %14032 = vst [vmem:[#allocation115_spill] sm:$0xff] %v11010_v33 }
 0x2e4   :  { %v2562_v48 = vpop.f32.mrf.mxu0  ;;  %v2675_v0 = vpop.f32.mrf.mxu1 }
 0x2e5   :  { %v2676_v11 = vadd.f32 %v2675_v0, %v2562_v48 }
 0x2e6   :  { %v11012_v39 = vpop.f32.mrf.mxu0  ;;  %v11014_v12 = vpop.f32.mrf.mxu1 }
 0x2e7   :  { %14033 = vst [vmem:[#allocation116_spill] sm:$0xff] %v11012_v39  ;;  %v11017_v63 = vadd.f32 %v2676_v11, %v10520_v24 }
 0x2e9   :  { %14034 = vst [vmem:[#allocation117_spill] sm:$0xff] %v11017_v63 }
 0x2ea   :  { %v2568_v28 = vpop.f32.mrf.mxu0  ;;  %v2681_v59 = vpop.f32.mrf.mxu1 }
 0x2eb   :  { %v2682_v58 = vadd.f32 %v2681_v59, %v2568_v28 }
 0x2ec   :  { %v11019_v35 = vpop.f32.mrf.mxu0  ;;  %v11021_v31 = vpop.f32.mrf.mxu1 }
 0x2ed   :  { %14035 = vst [vmem:[#allocation118_spill] sm:$0xff] %v11021_v31  ;;  %v11024_v26 = vadd.f32 %v2682_v58, %v10527_v53 }
 0x2ef   :  { %14036 = vst [vmem:[#allocation119_spill] sm:$0xff] %v11024_v26 }
 0x2f0   :  { %v2574_v17 = vpop.f32.mrf.mxu0  ;;  %v2687_v33 = vpop.f32.mrf.mxu1 }
 0x2f1   :  { %v2688_v0 = vadd.f32 %v2687_v33, %v2574_v17 }
 0x2f2   :  { %v11026_v48 = vpop.f32.mrf.mxu0  ;;  %v11028_v39 = vpop.f32.mrf.mxu1 }
 0x2f3   :  { %14037 = vst [vmem:[#allocation120_spill] sm:$0xff] %v11026_v48  ;;  %14038 = vst [vmem:[#allocation121_spill] sm:$0xff] %v11028_v39  ;;  %v11031_v24 = vadd.f32 %v2688_v0, %v10534_v6 }
 0x2f5   :  { %14039 = vst [vmem:[#allocation122_spill] sm:$0xff] %v11031_v24 }
 0x2f6   :  { %v2580_v11 = vpop.f32.mrf.mxu0  ;;  %v2693_v63 = vpop.f32.mrf.mxu1 }
 0x2f7   :  { %v2694_v59 = vadd.f32 %v2693_v63, %v2580_v11 }
 0x2f8   :  { %v11036_v31 = vpop.f32.mrf.mxu0  ;;  %v11038_v53 = vpop.f32.mrf.mxu1 }
 0x2f9   :  { %v11034_v28 = vadd.f32 %v2694_v59, %v10546_v56  ;;  %14041 = vst [vmem:[#allocation124_spill] sm:$0xff] %v11036_v31  ;;  %14042 = vst [vmem:[#allocation125_spill] sm:$0xff] %v11038_v53 }
 0x2fb   :  { %14040 = vst [vmem:[#allocation123_spill] sm:$0xff] %v11034_v28 }
 0x31c   :  { %v2764_v58 = vpop.f32.mrf.mxu0  ;;  %v2877_v26 = vpop.f32.mrf.mxu1 }
 0x31d   :  { %v2878_v33 = vadd.f32 %v2877_v26, %v2764_v58 }
 0x31e   :  { %v11040_v17 = vpop.f32.mrf.mxu0  ;;  %v11042_v48 = vpop.f32.mrf.mxu1 }
 0x31f   :  { %v11045_v6 = vadd.f32 %v2878_v33, %v10834_v44 }
 0x321   :  { %14043 = vst [vmem:[#allocation126_spill] sm:$0xff] %v11045_v6 }
 0x322   :  { %v2770_v0 = vpop.f32.mrf.mxu0  ;;  %v2883_v24 = vpop.f32.mrf.mxu1 }
 0x323   :  { %v2884_v63 = vadd.f32 %v2883_v24, %v2770_v0 }
 0x324   :  { %v11047_v11 = vpop.f32.mrf.mxu0  ;;  %v11049_v56 = vpop.f32.mrf.mxu1 }
 0x325   :  { %v11052_v59 = vadd.f32 %v2884_v63, %v10905_v45 }
 0x327   :  { %14044 = vst [vmem:[#allocation127_spill] sm:$0xff] %v11052_v59 }
 0x328   :  { %v2776_v28 = vpop.f32.mrf.mxu0  ;;  %v2889_v53 = vpop.f32.mrf.mxu1 }
 0x329   :  { %v2890_v26 = vadd.f32 %v2889_v53, %v2776_v28 }
 0x32a   :  { %v11054_v58 = vpop.f32.mrf.mxu0  ;;  %v11056_v31 = vpop.f32.mrf.mxu1 }
 0x32b   :  { %14045 = vst [vmem:[#allocation128_spill] sm:$0xff] %v11054_v58  ;;  %14046 = vst [vmem:[#allocation129_spill] sm:$0xff] %v11056_v31  ;;  %v11059_v44 = vadd.f32 %v2890_v26, %v10934_v54 }
 0x32d   :  { %14047 = vst [vmem:[#allocation130_spill] sm:$0xff] %v11059_v44 }
 0x32e   :  { %v2782_v33 = vpop.f32.mrf.mxu0  ;;  %v2895_v6 = vpop.f32.mrf.mxu1 }
 0x32f   :  { %v2896_v24 = vadd.f32 %v2895_v6, %v2782_v33 }
 0x330   :  { %v11061_v0 = vpop.f32.mrf.mxu0  ;;  %v11063_v39 = vpop.f32.mrf.mxu1 }
 0x331   :  { %14048 = vst [vmem:[#allocation131_spill] sm:$0xff] %v11061_v0  ;;  %14049 = vst [vmem:[#allocation132_spill] sm:$0xff] %v11063_v39  ;;  %v11066_v45 = vadd.f32 %v2896_v24, %v10943_v57 }
 0x333   :  { %14050 = vst [vmem:[#allocation133_spill] sm:$0xff] %v11066_v45 }
 0x334   :  { %v2788_v63 = vpop.f32.mrf.mxu0  ;;  %v2901_v59 = vpop.f32.mrf.mxu1 }
 0x335   :  { %v2902_v28 = vadd.f32 %v2901_v59, %v2788_v63 }
 0x336   :  { %v11068_v53 = vpop.f32.mrf.mxu0  ;;  %v11070_v58 = vpop.f32.mrf.mxu1 }
 0x337   :  { %14051 = vst [vmem:[#allocation134_spill] sm:$0xff] %v11068_v53  ;;  %14052 = vst [vmem:[#allocation135_spill] sm:$0xff] %v11070_v58  ;;  %v11073_v54 = vadd.f32 %v2902_v28, %v10950_v15 }
 0x339   :  { %14053 = vst [vmem:[#allocation136_spill] sm:$0xff] %v11073_v54 }
 0x33a   :  { %v2794_v26 = vpop.f32.mrf.mxu0  ;;  %v2907_v44 = vpop.f32.mrf.mxu1 }
 0x33b   :  { %v2908_v6 = vadd.f32 %v2907_v44, %v2794_v26 }
 0x33c   :  { %v11075_v33 = vpop.f32.mrf.mxu0  ;;  %v11077_v0 = vpop.f32.mrf.mxu1 }
 0x33d   :  { %14054 = vst [vmem:[#allocation137_spill] sm:$0xff] %v11075_v33  ;;  %14055 = vst [vmem:[#allocation138_spill] sm:$0xff] %v11077_v0  ;;  %v11080_v57 = vadd.f32 %v2908_v6, %v10957_v5 }
 0x33f   :  { %14056 = vst [vmem:[#allocation139_spill] sm:$0xff] %v11080_v57 }
 0x340   :  { %v2800_v24 = vpop.f32.mrf.mxu0  ;;  %v2913_v45 = vpop.f32.mrf.mxu1 }
 0x341   :  { %v2914_v59 = vadd.f32 %v2913_v45, %v2800_v24 }
 0x342   :  { %v11082_v63 = vpop.f32.mrf.mxu0  ;;  %v11084_v53 = vpop.f32.mrf.mxu1 }
 0x343   :  { %14057 = vst [vmem:[#allocation140_spill] sm:$0xff] %v11082_v63  ;;  %14058 = vst [vmem:[#allocation141_spill] sm:$0xff] %v11084_v53  ;;  %v11087_v15 = vadd.f32 %v2914_v59, %v10964_v29  ;;  %v8584_v59 = vld [vmem:[#allocation11] ss:$0 sm:$0xff] }
 0x345   :  { %14059 = vst [vmem:[#allocation142_spill] sm:$0xff] %v11087_v15 }
 0x346   :  { %v2806_v28 = vpop.f32.mrf.mxu0  ;;  %v2919_v54 = vpop.f32.mrf.mxu1 }
 0x347   :  { %v2920_v44 = vadd.f32 %v2919_v54, %v2806_v28  ;;  %v3271_v54 = vld [vmem:[#allocation12] sm:$0xf] }
 0x348   :  { %v11089_v26 = vpop.f32.mrf.mxu0  ;;  %v11091_v33 = vpop.f32.mrf.mxu1  ;;  %8971 = vmatpush3.msk.msra.mxu1 %vm3283_vm7, %v3271_v54  ;;  %vm3516_vm7 = vcmask 123904  }
 0x349   :  { %14060 = vst [vmem:[#allocation143_spill] sm:$0xff] %v11089_v26  ;;  %14061 = vst [vmem:[#allocation144_spill] sm:$0xff] %v11091_v33  ;;  %v11094_v5 = vadd.f32 %v2920_v44, %v10969_v36 }
 0x34b   :  { %14062 = vst [vmem:[#allocation145_spill] sm:$0xff] %v11094_v5 }
 0x34c   :  { %v8640_v6 = vpop.f32.mrf.mxu0  ;;  %v8675_v57 = vpop.f32.mrf.mxu1 }
 0x34e   :  { %v8641_v45 = vpop.f32.mrf.mxu0  ;;  %v8676_v24 = vpop.f32.mrf.mxu1 }
 0x34f   :  { %v8642_v63 = vadd.f32 %v8641_v45, %v8640_v6  ;;  %v8677_v0 = vadd.f32 %v8676_v24, %v8675_v57  ;;  %v8586_v57 = vld [vmem:[#allocation14] ss:$0 sm:$0xff] }
 0x351   :  { %v3182_v53 = vadd.f32 %v8677_v0, %v8642_v63 }
 0x353   :  { %v3186_v29 = vmul.f32 0.0009765625, %v3182_v53 }
 0x355   :  { %8968 = vmatmul.mubr.msk.f32.vlgmr.msra.gmra.mxu0 %vm3196_vm6, %v3186_v29  ;;  %v14063_v29 = vlaneseq }
 0x356   :  { %3589 = vmatprep.mubr.f32.mxu0 %v14011_v42 }
 0x357   :  { %v11100_v54 = vshrl.u32 %v14063_v29, 7 }
 0x415   :  { %v3266_v28 = vpop.f32.mrf.mxu0 }
 0x416   :  { %v3267_v36 = vadd.f32 %v8584_v59, %v3266_v28  ;;  %v11103_v59 = vsub.s32 0, %v11100_v54  ;;  %v11106_v28 = vsub.s32 1, %v11100_v54 }
 0x417   :  { %v8969_v44 = vpop.f32.mrf.mxu0 }
 0x418   :  { %v3270_v5 = vmax.f32 %v3267_v36, 0.0  ;;  %14064 = vst [vmem:[#allocation146_spill] sm:$0xff] %v11103_v59  ;;  %14065 = vst [vmem:[#allocation147_spill] sm:$0xff] %v11106_v28 }
 0x41a   :  { %8973 = vmatmul.mubr.msk.f32.vlgmr.msra.gmra.mxu1 %vm3279_vm8, %v3270_v5 }
 0x41b   :  { %3660 = vmatprep.mubr.f32.mxu1 %v14011_v42 }
 0x4da   :  { %v3353_v0 = vpop.f32.mrf.mxu1 }
 0x4db   :  { %v3354_v63 = vadd.f32 %v8586_v57, %v3353_v0  ;;  %v9518_v57 = vmov 1966171168  }
 0x4dc   :  { %v8974_v53 = vpop.f32.mrf.mxu1  ;;  %v3365_v0 = vunpack.c.l.s4 %v9518_v57 }
 0x4dd   :  { %v8589_v6 = vmul.f32 -1.442695, %v3354_v63 }
 0x4de   :  { %v3366_v63 = vunpack.c.0.s8 %v3365_v0 }
 0x4df   :  { %8995 = vpow2.f32 %v8589_v6 }
 0x4e0   :  { %v11115_v53 = vsub.s32 %v3366_v63, %v11100_v54 }
 0x4ec   :  { %v8996_v45 = vpop.eup %8995 }
 0x4ed   :  { %v3360_v24 = vadd.f32 1.0, %v8996_v45 }
 0x4ef   :  { %8997 = vrcp.f32 %v3360_v24 }
 0x4fc   :  { %v11108_v5 = vpop.eup %8997 }
 0x4fd   :  { %v3400_v36 = vrot.slane %v11108_v5, %v11106_v28  ;;  %v3389_v44 = vrot.slane %v11108_v5, %v11103_v59  ;;  %v3370_v6 = vrot.slane %v11108_v5, %v11115_v53 }
 0x4ff   :  { %3402 = vbcast.lane.b32.xlu1 %v3400_v36, 256  ;;  %3391 = vbcast.lane.b32.xlu0 %v3389_v44, 256  ;;  %v3371_v45 = vcombine.high %v3370_v6, %v3370_v6  ;;  %v3378_v15 = vrot.slane %v3370_v6, %v11115_v53 }
 0x501   :  { %v3385_v24 = vrot.slane %v3371_v45, %v11115_v53  ;;  %v3411_v26 = vrot.slane %v3378_v15, %v11103_v59 }
 0x503   :  { %3406 = vbcast.lane.b32.xlu1 %v3400_v36, 264  ;;  %3395 = vbcast.lane.b32.xlu0 %v3389_v44, 264  ;;  %v3415_v33 = vrot.slane %v3385_v24, %v11103_v59  ;;  %v9519_v24 = vmov 0  }
 0x504   :  { %8993 = vset.pattern.permute.xlu0 %v9519_v24  ;;  %8994 = vset.pattern.permute.xlu1 %v9519_v24 }
 0x507   :  { %3451 = vbcast.lane.b32.xlu1 %v3389_v44, 256 }
 0x571   :  { %v3403_v28 = vpop.permute.xlu1 %3402  ;;  %v3392_v58 = vpop.permute.xlu0 %3391 }
 0x572   :  { %vm3420_vm9 = vcmp.le.f32.partialorder %v3415_v33, %v3403_v28  ;;  %vm3418_vm10 = vcmp.le.f32.partialorder %v3411_v26, %v3392_v58 }
 0x573   :  { %v8590_v57 = vsel %vm3418_vm10, 1.0, %v14011_v42  ;;  %v8592_v31 = vsel %vm3420_vm9, 1.0, %v14011_v42 }
 0x574   :  { %v3430_v0 = vsel %vm3196_vm6, %v8590_v57, 0.0  ;;  %v3436_v15 = vsel %vm3196_vm6, %v8592_v31, 0.0 }
 0x575   :  { %v3407_v63 = vpop.permute.xlu1 %3406  ;;  %v3396_v39 = vpop.permute.xlu0 %3395  ;;  %3431 = vadd.xlane.f32.xlu0 %v3430_v0 }
 0x576   :  { %vm3421_vm11 = vcmp.le.f32.partialorder %v3415_v33, %v3407_v63  ;;  %vm3419_vm12 = vcmp.le.f32.partialorder %v3411_v26, %v3396_v39 }
 0x577   :  { %v8591_v6 = vsel %vm3419_vm12, 1.0, %v14011_v42  ;;  %v8593_v58 = vsel %vm3421_vm11, 1.0, %v14011_v42 }
 0x578   :  { %v3433_v45 = vsel %vm3196_vm6, %v8591_v6, 0.0  ;;  %v3439_v28 = vsel %vm3196_vm6, %v8593_v58, 0.0 }
 0x579   :  { %3434 = vadd.xlane.f32.xlu1 %v3433_v45  ;;  %3437 = vadd.xlane.f32.xlu0 %v3436_v15  ;;  %v3452_v39 = vpop.permute.xlu1 %3451 }
 0x57d   :  { %3440 = vadd.xlane.f32.xlu0 %v3439_v28 }
 0x58a   :  { %3462 = vbcast.lane.b32.xlu1 %v3400_v36, 256 }
 0x58e   :  { %3466 = vbcast.lane.b32.xlu1 %v3400_v36, 264 }
 0x593   :  { %3455 = vbcast.lane.b32.xlu0 %v3389_v44, 264  ;;  %v3493_v44 = vand.u32 127, %v14063_v29 }
 0x595   :  { %v3498_v28 = vadd.s32 4294967288, %v3493_v44 }
 0x5fe   :  { %v3432_v33 = vpop.xlane.xlu0 %3431 }
 0x5ff   :  { %vm3442_vm13 = vcmp.ge.f32.partialorder %v3432_v33, 4.0 }
 0x600   :  { %v3472_v26 = vsel %vm3442_vm13, %v3452_v39, inf  ;;  %v3501_v39 = vsub.s32 %v3498_v28, %v11100_v54  ;;  %v11137_v28 = vld [vmem:[#allocation9 + $0x38] sm:$0xff] }
 0x601   :  { %3481 = vperm.xlu0 %8993, %v3472_v26   ;;  %v3496_v26 = vsub.s32 %v3493_v44, %v11100_v54  ;;  %14067 = vst [vmem:[#allocation149_spill] sm:$0xff] %v11137_v28  ;;  %3624 = vmatprep.subr.mxu1 %v11137_v28  ;;  %v11141_v44 = vld [vmem:[#allocation9 + $0x20] sm:$0xff] }
 0x602   :  { %v3435_v57 = vpop.xlane.xlu1 %3434  ;;  %v3438_v31 = vpop.xlane.xlu0 %3437 }
 0x603   :  { %vm3443_vm14 = vcmp.ge.f32.partialorder %v3435_v57, 4.0  ;;  %vm3444_vm2 = vcmp.ge.f32.partialorder %v3438_v31, 4.0 }
 0x606   :  { %v3463_v0 = vpop.permute.xlu1 %3462  ;;  %v3441_v63 = vpop.xlane.xlu0 %3440 }
 0x607   :  { %vm3445_vm15 = vcmp.ge.f32.partialorder %v3441_v63, 4.0  ;;  %v3474_v36 = vsel %vm3444_vm2, %v3463_v0, inf }
 0x60a   :  { %v3467_v6 = vpop.permute.xlu1 %3466  ;;  %v3456_v45 = vpop.permute.xlu0 %3455 }
 0x60b   :  { %v3475_v15 = vsel %vm3445_vm15, %v3467_v6, inf  ;;  %v3473_v58 = vsel %vm3443_vm14, %v3456_v45, inf }
 0x60c   :  { %3490 = vperm.xlu0 %8993, %v3475_v15   ;;  %3484 = vperm.xlu1 %8994, %v3473_v58  }
 0x610   :  { %3487 = vperm.xlu1 %8994, %v3474_v36   ;;  %v11135_v36 = vld [vmem:[#allocation9 + $0x28] sm:$0xff] }
 0x611   :  { %14066 = vst [vmem:[#allocation148_spill] sm:$0xff] %v11135_v36  ;;  %3553 = vmatprep.subr.mxu0 %v11135_v36 }
 0x612   :  { %3554 = vmatpush1.msra.mxu0 %v11141_v44 }
 0x67c   :  { %v3482_v24 = vpop.permute.xlu0 %3481 }
 0x67d   :  { %v3497_v6 = vrot.slane %v3482_v24, %v3496_v26  ;;  %v11143_v24 = vld [vmem:[#allocation9 + $0x30] sm:$0xff] }
 0x67e   :  { %3625 = vmatpush1.msra.mxu1 %v11143_v24 }
 0x687   :  { %v3485_v33 = vpop.permute.xlu1 %3484  ;;  %v3491_v57 = vpop.permute.xlu0 %3490 }
 0x688   :  { %v3502_v63 = vrot.slane %v3485_v33, %v3501_v39  ;;  %v3512_v45 = vrot.slane %v3491_v57, %v3501_v39  ;;  %v11149_v39 = vld [vmem:[#allocation9 + $0x18] sm:$0xff]  ;;  %v11153_v33 = vld [vmem:[#allocation9] sm:$0xff] }
 0x689   :  { %3626 = vmatprep.subr.mxu1 %v11149_v39  ;;  %v11162_v57 = vld [vmem:[%s13752_s4 + $0xf8] sm:$0xff] }
 0x68a   :  { %v3504_v31 = vsel %vm3503_vm5, %v3502_v63, %v3497_v6  ;;  %v11168_v63 = vld [vmem:[%s13752_s4 + $0x1f8] sm:$0xff] }
 0x68b   :  { %v3488_v42 = vpop.permute.xlu1 %3487 }
 0x68c   :  { %v3508_v15 = vrot.slane %v3488_v42, %v3496_v26  ;;  %v11147_v42 = vld [vmem:[#allocation9 + $0x8] sm:$0xff]  ;;  %v11155_v26 = vld [vmem:[#allocation9 + $0x10] sm:$0xff] }
 0x68d   :  { %3555 = vmatprep.subr.mxu0 %v11147_v42  ;;  %3627 = vmatpush1.msra.mxu1 %v11155_v26 }
 0x68e   :  { %v3513_v0 = vsel %vm3503_vm5, %v3512_v45, %v3508_v15  ;;  %3556 = vmatpush1.msra.mxu0 %v11153_v33  ;;  %8718 = vmatprep.subr.mxu1 %v11168_v63 }
 0x68f   :  { %v3514_v58 = vsel %vm3036_vm4, %v3513_v0, %v3504_v31  ;;  %8683 = vmatprep.subr.mxu0 %v11162_v57  ;;  %v11177_v31 = vld [vmem:[%s13752_s4 + $0x78] sm:$0xff] }
 0x690   :  { %v3517_v29 = vsel %vm3516_vm7, %v3514_v58, inf  ;;  %v11183_v0 = vld [vmem:[%s13752_s4 + $0x178] sm:$0xff]  ;;  %v11195_v58 = vld [vmem:[%s13752_s4 + $0x1f0] sm:$0xff] }
 0x691   :  { %3518 = vmin.xlane.f32.xlu1 %v3517_v29  ;;  %v11201_v29 = vld [vmem:[%s13752_s4 + $0x70] sm:$0xff] }
 0x692   :  { %14068 = vst [vmem:[#allocation150_spill] sm:$0xff] %v11201_v29 }
 0x71a   :  { %v3519_v6 = vpop.xlane.xlu1 %3518 }
 0x71b   :  { %v3520_v45 = vsub.f32 %v11108_v5, %v3519_v6  ;;  %v11189_v5 = vld [vmem:[%s13752_s4 + $0xf0] sm:$0xff] }
 0x71c   :  { %v11207_v6 = vld [vmem:[%s13752_s4 + $0x170] sm:$0xff] }
 0x71d   :  { %v3521_v15 = vmax.f32 %v3520_v45, 0.0  ;;  %14069 = vst [vmem:[#allocation151_spill] sm:$0xff] %v11207_v6  ;;  %v11213_v45 = vld [vmem:[%s13752_s4 + $0xe8] sm:$0xff] }
 0x71e   :  { %14070 = vst [vmem:[#allocation152_spill] sm:$0xff] %v11213_v45 }
 0x71f   :  { %8594 = vmatmul.mubr.msk.f32.vlgmr.msra.gmra.mxu0 %vm3196_vm6, %v3521_v15  ;;  %8595 = vmatmul.mubr.msk.f32.vlgmr.msra.gmra.mxu1 %vm3196_vm6, %v3521_v15  ;;  %v11219_v15 = vld [vmem:[%s13752_s4 + $0x1e8] sm:$0xff] }
 0x720   :  { %8684 = vmatpush3.msra.mxu0 %v11177_v31  ;;  %8719 = vmatpush3.msra.mxu1 %v11183_v0  ;;  %14071 = vst [vmem:[#allocation153_spill] sm:$0xff] %v11219_v15 }
 0x721   :  { %8685 = vmatprep.subr.mxu0 %v11189_v5  ;;  %8720 = vmatprep.subr.mxu1 %v11195_v58 }
 0x722   :  { %8686 = vmatpush3.msra.mxu0 %v11201_v29  ;;  %8721 = vmatpush3.msra.mxu1 %v11207_v6  ;;  %v11225_v29 = vld [vmem:[%s13752_s4 + $0x68] sm:$0xff] }
 0x723   :  { %8687 = vmatprep.subr.mxu0 %v11213_v45  ;;  %8722 = vmatprep.subr.mxu1 %v11219_v15  ;;  %14072 = vst [vmem:[#allocation154_spill] sm:$0xff] %v11225_v29  ;;  %v11231_v6 = vld [vmem:[%s13752_s4 + $0x168] sm:$0xff]  ;;  %v11237_v45 = vld [vmem:[%s13752_s4 + $0xe0] sm:$0xff] }
 0x724   :  { %8688 = vmatpush3.msra.mxu0 %v11225_v29  ;;  %14073 = vst [vmem:[#allocation155_spill] sm:$0xff] %v11231_v6  ;;  %8723 = vmatpush3.msra.mxu1 %v11231_v6  ;;  %v11243_v15 = vld [vmem:[%s13752_s4 + $0x1e0] sm:$0xff] }
 0x725   :  { %8689 = vmatprep.subr.mxu0 %v11237_v45  ;;  %8724 = vmatprep.subr.mxu1 %v11243_v15  ;;  %v11249_v29 = vld [vmem:[%s13752_s4 + $0x60] sm:$0xff] }
 0x726   :  { %14074 = vst [vmem:[#allocation156_spill] sm:$0xff] %v11249_v29  ;;  %8690 = vmatpush3.msra.mxu0 %v11249_v29  ;;  %v11255_v6 = vld [vmem:[%s13752_s4 + $0x160] sm:$0xff]  ;;  %v14076_v29 = vld [vmem:[#allocation78_spill] sm:$0xff] }
 0x727   :  { %14075 = vst [vmem:[#allocation157_spill] sm:$0xff] %v11255_v6  ;;  %8725 = vmatpush3.msra.mxu1 %v11255_v6  ;;  %8691 = vmatprep.subr.mxu0 %v10602_v3  ;;  %v14077_v6 = vld [vmem:[#allocation79_spill] sm:$0xff]  ;;  %v14078_v3 = vld [vmem:[#allocation80_spill] sm:$0xff] }
 0x728   :  { %8726 = vmatprep.subr.mxu1 %v10607_v30  ;;  %8692 = vmatpush3.msra.mxu0 %v10612_v49  ;;  %v14079_v30 = vld [vmem:[#allocation81_spill] sm:$0xff]  ;;  %v14080_v49 = vld [vmem:[#allocation82_spill] sm:$0xff] }
 0x729   :  { %8727 = vmatpush3.msra.mxu1 %v10617_v20  ;;  %8693 = vmatprep.subr.mxu0 %v10624_v47  ;;  %v14081_v20 = vld [vmem:[#allocation83_spill] sm:$0xff]  ;;  %v14082_v47 = vld [vmem:[#allocation84_spill] sm:$0xff] }
 0x72a   :  { %8728 = vmatprep.subr.mxu1 %v10629_v25  ;;  %8694 = vmatpush3.msra.mxu0 %v10638_v27  ;;  %v14083_v25 = vld [vmem:[#allocation85_spill] sm:$0xff]  ;;  %v14084_v27 = vld [vmem:[#allocation86_spill] sm:$0xff] }
 0x72b   :  { %8729 = vmatpush3.msra.mxu1 %v10643_v52  ;;  %8695 = vmatprep.subr.mxu0 %v10652_v2  ;;  %v14085_v52 = vld [vmem:[#allocation87_spill] sm:$0xff]  ;;  %v14088_v2 = vld [vmem:[#allocation92_spill] sm:$0xff] }
 0x72c   :  { %8730 = vmatprep.subr.mxu1 %v14076_v29  ;;  %8696 = vmatpush3.msra.mxu0 %v14077_v6  ;;  %v14104_v29 = vld [vmem:[#allocation41_spill] sm:$0xff]  ;;  %v14105_v6 = vld [vmem:[#allocation42_spill] sm:$0xff] }
 0x72d   :  { %8731 = vmatpush3.msra.mxu1 %v14078_v3  ;;  %8697 = vmatprep.subr.mxu0 %v14079_v30  ;;  %v1392_v3 = vadd.f32 %v14105_v6, %v14104_v29  ;;  %v14106_v30 = vld [vmem:[#allocation43_spill] sm:$0xff] }
 0x72e   :  { %8732 = vmatprep.subr.mxu1 %v14080_v49  ;;  %8698 = vmatpush3.msra.mxu0 %v14081_v20  ;;  %v14107_v49 = vld [vmem:[#allocation44_spill] sm:$0xff]  ;;  %v14121_v6 = vld [vmem:[#allocation51_spill] sm:$0xff] }
 0x72f   :  { %8733 = vmatpush3.msra.mxu1 %v14082_v47  ;;  %8699 = vmatprep.subr.mxu0 %v10704_v37  ;;  %v14087_v37 = vld [vmem:[#allocation90_spill] sm:$0xff]  ;;  %v1398_v20 = vadd.f32 %v14107_v49, %v14106_v30  ;;  %v14108_v47 = vld [vmem:[#allocation45_spill] sm:$0xff]  ;;  %v14122_v30 = vld [vmem:[#allocation52_spill] sm:$0xff] }
 0x730   :  { %8734 = vmatprep.subr.mxu1 %v10709_v4  ;;  %8700 = vmatpush3.msra.mxu0 %v10716_v60  ;;  %v14086_v4 = vld [vmem:[#allocation89_spill] sm:$0xff]  ;;  %v14091_v60 = vld [vmem:[#allocation96_spill] sm:$0xff]  ;;  %v1600_v49 = vadd.f32 %v14122_v30, %v14121_v6 }
 0x731   :  { %8735 = vmatpush3.msra.mxu1 %v10721_v9  ;;  %8701 = vmatprep.subr.mxu0 %v10728_v55  ;;  %v14090_v55 = vld [vmem:[#allocation95_spill] sm:$0xff]  ;;  %v14092_v9 = vld [vmem:[#allocation29_spill] sm:$0xff] }
 0x732   :  { %8736 = vmatprep.subr.mxu1 %v10733_v22  ;;  %8702 = vmatpush3.msra.mxu0 %v14083_v25  ;;  %v14089_v22 = vld [vmem:[#allocation93_spill] sm:$0xff]  ;;  %v14109_v25 = vld [vmem:[#allocation46_spill] sm:$0xff] }
 0x733   :  { %8737 = vmatpush3.msra.mxu1 %v14084_v27  ;;  %8703 = vmatprep.subr.mxu0 %v14085_v52  ;;  %v1582_v27 = vadd.f32 %v14109_v25, %v14108_v47  ;;  %v14110_v52 = vld [vmem:[#allocation47_spill] sm:$0xff]  ;;  %v14123_v47 = vld [vmem:[#allocation53_spill] sm:$0xff] }
 0x734   :  { %8738 = vmatprep.subr.mxu1 %v10761_v32  ;;  %8704 = vmatpush3.msra.mxu0 %v10768_v21  ;;  %v14094_v21 = vld [vmem:[#allocation30_spill] sm:$0xff]  ;;  %v14135_v30 = vld [vmem:[#allocation69_spill] sm:$0xff] }
 0x735   :  { %8739 = vmatpush3.msra.mxu1 %v10773_v19  ;;  %8705 = vmatprep.subr.mxu0 %v10780_v46  ;;  %v14095_v19 = vld [vmem:[#allocation32_spill] sm:$0xff] }
 0x736   :  { %8740 = vmatprep.subr.mxu1 %v10785_v13  ;;  %8706 = vmatpush3.msra.mxu0 %v14086_v4  ;;  %v1362_v46 = vadd.f32 %v14095_v19, %v14094_v21  ;;  %v14096_v13 = vld [vmem:[#allocation33_spill] sm:$0xff]  ;;  %v14111_v4 = vld [vmem:[#allocation48_spill] sm:$0xff]  ;;  %v14115_v21 = vld [vmem:[#allocation70_spill] sm:$0xff] }
 0x737   :  { %8741 = vmatpush3.msra.mxu1 %v14087_v37  ;;  %8707 = vmatprep.subr.mxu0 %v14088_v2  ;;  %v1588_v37 = vadd.f32 %v14111_v4, %v14110_v52  ;;  %v14112_v2 = vld [vmem:[#allocation64_spill] sm:$0xff] }
 0x738   :  { %8742 = vmatprep.subr.mxu1 %v14089_v22  ;;  %8708 = vmatpush3.msra.mxu0 %v14090_v55  ;;  %v14113_v55 = vld [vmem:[#allocation66_spill] sm:$0xff] }
 0x739   :  { %8743 = vmatpush3.msra.mxu1 %v14091_v60  ;;  %8709 = vmatprep.subr.mxu0 %v10841_v23  ;;  %v14098_v23 = vld [vmem:[#allocation34_spill] sm:$0xff]  ;;  %v1701_v60 = vadd.f32 %v14113_v55, %v1362_v46  ;;  %v14125_v46 = vld [vmem:[#allocation88_spill] sm:$0xff] }
 0x73a   :  { %8744 = vmatprep.subr.mxu1 %v10846_v16  ;;  %8710 = vmatpush3.msra.mxu0 %v10855_v41  ;;  %v14093_v41 = vld [vmem:[#allocation31_spill] sm:$0xff]  ;;  %v14099_v16 = vld [vmem:[#allocation36_spill] sm:$0xff]  ;;  %v1737_v52 = vadd.f32 %v14125_v46, %v1398_v20 }
 0x73b   :  { %8745 = vmatpush3.msra.mxu1 %v10860_v43  ;;  %8711 = vmatprep.subr.mxu0 %v10874_v62  ;;  %v1356_v32 = vadd.f32 %v14093_v41, %v14092_v9  ;;  %v14097_v62 = vld [vmem:[#allocation35_spill] sm:$0xff]  ;;  %v14114_v9 = vld [vmem:[#allocation68_spill] sm:$0xff] }
 0x73c   :  { %8746 = vmatprep.subr.mxu1 %v10879_v1  ;;  %8712 = vmatpush3.msra.mxu0 %v10886_v61  ;;  %v1368_v43 = vadd.f32 %v14097_v62, %v14096_v13  ;;  %v1374_v1 = vadd.f32 %v14099_v16, %v14098_v23  ;;  %v14100_v61 = vld [vmem:[#allocation37_spill] sm:$0xff]  ;;  %v14117_v62 = vld [vmem:[#allocation50_spill] sm:$0xff]  ;;  %v14118_v16 = vld [vmem:[#allocation72_spill] sm:$0xff] }
 0x73d   :  { %8747 = vmatpush3.msra.mxu1 %v10891_v14  ;;  %8713 = vmatprep.subr.mxu0 %v10898_v10  ;;  %v14101_v14 = vld [vmem:[#allocation38_spill] sm:$0xff]  ;;  %v1695_v22 = vadd.f32 %v14112_v2, %v1356_v32  ;;  %v14116_v13 = vld [vmem:[#allocation49_spill] sm:$0xff]  ;;  %v14136_v20 = vld [vmem:[#allocation71_spill] sm:$0xff] }
 0x73e   :  { %8748 = vmatprep.subr.mxu1 %v10903_v50  ;;  %8714 = vmatpush3.msra.mxu0 %v10912_v8  ;;  %v1380_v10 = vadd.f32 %v14101_v14, %v14100_v61  ;;  %v14102_v50 = vld [vmem:[#allocation39_spill] sm:$0xff]  ;;  %v14103_v8 = vld [vmem:[#allocation40_spill] sm:$0xff]  ;;  %v1707_v41 = vadd.f32 %v14114_v9, %v1368_v43  ;;  %v1713_v19 = vadd.f32 %v14115_v21, %v1374_v1  ;;  %v14119_v14 = vld [vmem:[#allocation74_spill] sm:$0xff] }
 0x73f   :  { %8749 = vmatpush3.msra.mxu1 %v10922_v18  ;;  %4000 = vmatprep.subr.mxu0 %v11135_v36  ;;  %v1386_v18 = vadd.f32 %v14103_v8, %v14102_v50  ;;  %v1594_v23 = vadd.f32 %v14117_v62, %v14116_v13  ;;  %v14120_v8 = vld [vmem:[#allocation76_spill] sm:$0xff]  ;;  %v14124_v32 = vld [vmem:[#allocation54_spill] sm:$0xff]  ;;  %v14128_v2 = vld [vmem:[#allocation57_spill] sm:$0xff] }
 0x740   :  { %4071 = vmatprep.subr.mxu1 %v11137_v28  ;;  %v1719_v61 = vadd.f32 %v14118_v16, %v1380_v10  ;;  %v1731_v29 = vadd.f32 %v14120_v8, %v1392_v3  ;;  %v1606_v25 = vadd.f32 %v14124_v32, %v14123_v47  ;;  %v14126_v43 = vld [vmem:[#allocation94_spill] sm:$0xff]  ;;  %v14127_v1 = vld [vmem:[#allocation56_spill] sm:$0xff]  ;;  %v14129_v9 = vld [vmem:[#allocation59_spill] sm:$0xff]  ;;  %v1927_v3 = vadd.f32 %v10867_v34, %v1588_v37 }
 0x741   :  { %v1725_v50 = vadd.f32 %v14119_v14, %v1386_v18  ;;  %v1921_v4 = vadd.f32 %v14126_v43, %v1582_v27  ;;  %v1612_v55 = vadd.f32 %v14128_v2, %v14127_v1  ;;  %v14130_v21 = vld [vmem:[#allocation60_spill] sm:$0xff]  ;;  %v14131_v13 = vld [vmem:[#allocation62_spill] sm:$0xff]  ;;  %v14132_v18 = vld [vmem:[#allocation63_spill] sm:$0xff]  ;;  %v1820_v47 = vadd.f32 %v14135_v30, %v1707_v41 }
 0x742   :  { %v1618_v10 = vadd.f32 %v14130_v21, %v14129_v9  ;;  %v1624_v62 = vadd.f32 %v14132_v18, %v14131_v13  ;;  %v14133_v16 = vld [vmem:[#allocation65_spill] sm:$0xff]  ;;  %v14134_v8 = vld [vmem:[#allocation67_spill] sm:$0xff]  ;;  %v1826_v32 = vadd.f32 %v14136_v20, %v1713_v19  ;;  %v14145_v30 = vld [vmem:[#allocation98_spill] sm:$0xff] }
 0x743   :  { %v1808_v14 = vadd.f32 %v14133_v16, %v1695_v22  ;;  %v1814_v6 = vadd.f32 %v14134_v8, %v1701_v60  ;;  %v14137_v27 = vld [vmem:[#allocation73_spill] sm:$0xff]  ;;  %v14138_v43 = vld [vmem:[#allocation75_spill] sm:$0xff]  ;;  %v2040_v19 = vadd.f32 %v14145_v30, %v1927_v3  ;;  %v14154_v30 = vld [vmem:[#allocation116_spill] sm:$0xff] }
 0x744   :  { %v1832_v46 = vadd.f32 %v14137_v27, %v1719_v61  ;;  %v1838_v1 = vadd.f32 %v14138_v43, %v1725_v50  ;;  %v14139_v2 = vld [vmem:[#allocation77_spill] sm:$0xff]  ;;  %v14140_v9 = vld [vmem:[#allocation99_spill] sm:$0xff]  ;;  %v14147_v27 = vld [vmem:[#allocation58_spill] sm:$0xff] }
 0x745   :  { %v1844_v28 = vadd.f32 %v14139_v2, %v1731_v29  ;;  %v1933_v21 = vadd.f32 %v14140_v9, %v1594_v23  ;;  %v14141_v18 = vld [vmem:[#allocation91_spill] sm:$0xff]  ;;  %v14142_v37 = vld [vmem:[#allocation97_spill] sm:$0xff]  ;;  %v1957_v50 = vadd.f32 %v14147_v27, %v1618_v10  ;;  %v1963_v29 = vadd.f32 %v10971_v7, %v1624_v62  ;;  %v14155_v62 = vld [vmem:[#allocation102_spill] sm:$0xff] }
 0x746   :  { %v1850_v34 = vadd.f32 %v14141_v18, %v1737_v52  ;;  %v2034_v22 = vadd.f32 %v14142_v37, %v1921_v4  ;;  %v14143_v16 = vld [vmem:[#allocation101_spill] sm:$0xff]  ;;  %v14144_v8 = vld [vmem:[#allocation103_spill] sm:$0xff]  ;;  %v14150_v18 = vld [vmem:[#allocation110_spill] sm:$0xff]  ;;  %v2678_v7 = vadd.f32 %v11014_v12, %v14154_v30 }
 0x747   :  { %v1939_v60 = vadd.f32 %v14143_v16, %v1600_v49  ;;  %v1945_v41 = vadd.f32 %v14144_v8, %v1606_v25  ;;  %v14146_v20 = vld [vmem:[#allocation55_spill] sm:$0xff]  ;;  %v14149_v52 = vld [vmem:[#allocation109_spill] sm:$0xff]  ;;  %v14151_v16 = vld [vmem:[#allocation100_spill] sm:$0xff] }
 0x748   :  { %v1951_v61 = vadd.f32 %v14146_v20, %v1612_v55  ;;  %v14148_v2 = vld [vmem:[#allocation107_spill] sm:$0xff]  ;;  %v2660_v4 = vadd.f32 %v14150_v18, %v14149_v52  ;;  %v2046_v25 = vadd.f32 %v14151_v16, %v1933_v21  ;;  %v14152_v8 = vld [vmem:[#allocation112_spill] sm:$0xff]  ;;  %v14153_v55 = vld [vmem:[#allocation114_spill] sm:$0xff] }
 0x749   :  { %v2654_v9 = vadd.f32 %v14148_v2, %v10975_v38  ;;  %v2666_v3 = vadd.f32 %v11000_v40, %v14152_v8  ;;  %v2672_v10 = vadd.f32 %v11007_v51, %v14153_v55  ;;  %v2052_v20 = vadd.f32 %v14155_v62, %v1939_v60  ;;  %v14156_v27 = vld [vmem:[#allocation104_spill] sm:$0xff]  ;;  %v14158_v21 = vld [vmem:[#allocation106_spill] sm:$0xff]  ;;  %v14159_v52 = vld [vmem:[#allocation61_spill] sm:$0xff] }
 0x74a   :  { %v2058_v38 = vadd.f32 %v14156_v27, %v1945_v41  ;;  %v2076_v40 = vadd.f32 %v14159_v52, %v1963_v29  ;;  %v2880_v51 = vadd.f32 %v11042_v48, %v11040_v17  ;;  %v2929_v16 = vadd.f32 %v2660_v4, %v1814_v6  ;;  %v14162_v30 = vld [vmem:[#allocation121_spill] sm:$0xff]  ;;  %v14163_v17 = vld [vmem:[#allocation124_spill] sm:$0xff]  ;;  %v14173_v52 = vld [vmem:[#allocation138_spill] sm:$0xff] }
 0x74b   :  { %v2925_v18 = vadd.f32 %v2654_v9, %v1808_v14  ;;  %v3717_v60 = vsub.s32 3, %v11100_v54  ;;  %v2933_v8 = vadd.f32 %v2666_v3, %v1820_v47  ;;  %v2937_v41 = vadd.f32 %v2672_v10, %v1826_v32  ;;  %v14164_v14 = vld [vmem:[#allocation125_spill] sm:$0xff]  ;;  %v14165_v4 = vld [vmem:[#allocation128_spill] sm:$0xff] }
 0x74c   :  { %v2941_v55 = vadd.f32 %v2678_v7, %v1832_v46  ;;  %v2696_v6 = vadd.f32 %v14164_v14, %v14163_v17  ;;  %v2927_v9 = vadd.f32 %v2880_v51, %v2034_v22  ;;  %v14166_v47 = vld [vmem:[#allocation129_spill] sm:$0xff]  ;;  %v14167_v46 = vld [vmem:[#allocation131_spill] sm:$0xff]  ;;  %v14168_v3 = vld [vmem:[#allocation132_spill] sm:$0xff] }
 0x74d   :  { %v2892_v32 = vadd.f32 %v14166_v47, %v14165_v4  ;;  %v2898_v10 = vadd.f32 %v14168_v3, %v14167_v46  ;;  %v14175_v22 = vld [vmem:[#allocation141_spill] sm:$0xff] }
 0x74e   :  { %v2953_v47 = vadd.f32 %v2696_v6, %v1850_v34  ;;  %v14179_v34 = vld [vmem:[#allocation144_spill] sm:$0xff]  ;;  %v14181_v6 = vld [vmem:[#allocation127_spill] sm:$0xff] }
 0x74f   :  { %v2939_v3 = vadd.f32 %v2898_v10, %v2052_v20  ;;  %v14183_v10 = vld [vmem:[#allocation113_spill] sm:$0xff] }
 0x7df   :  { %v3591_v36 = vpop.f32.mrf.mxu0  ;;  %v3662_v13 = vpop.f32.mrf.mxu1 }
 0x7e1   :  { %v3593_v43 = vpop.f32.mrf.mxu0  ;;  %v3664_v23 = vpop.f32.mrf.mxu1 }
 0x7e2   :  { %v3671_v37 = vcombine.low %v3591_v36, %v3593_v43  ;;  %v3672_v49 = vcombine.low %v3662_v13, %v3664_v23  ;;  %v14157_v13 = vld [vmem:[#allocation105_spill] sm:$0xff]  ;;  %v2070_v23 = vadd.f32 %v14158_v21, %v1957_v50  ;;  %v14161_v50 = vld [vmem:[#allocation120_spill] sm:$0xff] }
 0x7e3   :  { %v2064_v43 = vadd.f32 %v14157_v13, %v1951_v61  ;;  %v14160_v61 = vld [vmem:[#allocation118_spill] sm:$0xff]  ;;  %v2690_v29 = vadd.f32 %v14162_v30, %v14161_v50  ;;  %v3713_v13 = vsub.s32 2, %v11100_v54  ;;  %v14172_v21 = vld [vmem:[#allocation137_spill] sm:$0xff] }
 0x7e4   :  { %v3679_v2 = vrot.slane %v3671_v37, %v11115_v53  ;;  %v3686_v36 = vrot.slane %v3672_v49, %v11115_v53  ;;  %v2886_v37 = vadd.f32 %v11049_v56, %v11047_v11  ;;  %v2684_v49 = vadd.f32 %v14160_v61, %v11019_v35  ;;  %v14169_v11 = vld [vmem:[#allocation134_spill] sm:$0xff]  ;;  %v14170_v56 = vld [vmem:[#allocation135_spill] sm:$0xff]  ;;  %v14174_v61 = vld [vmem:[#allocation140_spill] sm:$0xff] }
 0x7e5   :  { %v2904_v7 = vadd.f32 %v14170_v56, %v14169_v11  ;;  %v14171_v35 = vld [vmem:[#allocation147_spill] sm:$0xff]  ;;  %v2916_v51 = vadd.f32 %v14175_v22, %v14174_v61  ;;  %v2949_v17 = vadd.f32 %v2690_v29, %v1844_v28  ;;  %v14176_v61 = vld [vmem:[#allocation108_spill] sm:$0xff] }
 0x7e6   :  { %v3687_v12 = vcombine.low %v3679_v2, %v3686_v36  ;;  %v3688_v62 = vcombine.high %v3679_v2, %v3686_v36  ;;  %v2931_v36 = vadd.f32 %v2886_v37, %v2040_v19  ;;  %v2945_v30 = vadd.f32 %v2684_v49, %v1838_v1  ;;  %v14177_v28 = vld [vmem:[#allocation111_spill] sm:$0xff] }
 0x7e7   :  { %v2935_v37 = vadd.f32 %v2892_v32, %v2046_v25  ;;  %v2943_v11 = vadd.f32 %v2904_v7, %v2058_v38 }
 0x7e8   :  { %v3695_v48 = vrot.slane %v3687_v12, %v11115_v53  ;;  %v2910_v12 = vadd.f32 %v14173_v52, %v14172_v21  ;;  %v3702_v14 = vrot.slane %v3688_v62, %v11115_v53  ;;  %v2951_v52 = vadd.f32 %v2916_v51, %v2070_v23  ;;  %v14180_v62 = vld [vmem:[#allocation126_spill] sm:$0xff] }
 0x7ea   :  { %v3710_v27 = vrot.slane %v3695_v48, %v14171_v35  ;;  %v3718_v2 = vrot.slane %v3695_v48, %v3717_v60  ;;  %v3706_v50 = vrot.slane %v3695_v48, %v11103_v59  ;;  %v3714_v56 = vrot.slane %v3695_v48, %v3713_v13 }
 0x7eb   :  { %v2947_v21 = vadd.f32 %v2910_v12, %v2064_v43  ;;  %v3722_v20 = vrot.slane %v3702_v14, %v11103_v59  ;;  %v3734_v38 = vrot.slane %v3702_v14, %v3717_v60  ;;  %v3730_v22 = vrot.slane %v3702_v14, %v3713_v13 }
 0x7ec   :  { %v11410_v4 = vmul.f32 %v3710_v27, %v2925_v18  ;;  %v11412_v46 = vmul.f32 %v3718_v2, %v2927_v9  ;;  %v11414_v54 = vmul.f32 %v3710_v27, %v2929_v16  ;;  %v11416_v19 = vmul.f32 %v3718_v2, %v2931_v36  ;;  %v14178_v18 = vld [vmem:[#allocation143_spill] sm:$0xff] }
 0x7ed   :  { %v11419_v1 = vmul.f32 %v3706_v50, %v14176_v61  ;;  %v11422_v53 = vmul.f32 %v3706_v50, %v14177_v28  ;;  %v2922_v49 = vadd.f32 %v14179_v34, %v14178_v18  ;;  %v3726_v16 = vrot.slane %v3702_v14, %v14171_v35  ;;  %v14184_v61 = vld [vmem:[#allocation115_spill] sm:$0xff] }
 0x7ee   :  { %v11427_v29 = vmul.f32 %v3710_v27, %v2933_v8  ;;  %v3788_v25 = vadd.f32 %v11414_v54, %v11410_v4  ;;  %v11432_v43 = vmul.f32 %v3718_v2, %v2935_v37  ;;  %v3814_v23 = vadd.f32 %v11416_v19, %v11412_v46 }
 0x7ef   :  { %v11437_v48 = vmul.f32 %v3714_v56, %v14180_v62  ;;  %v11440_v9 = vmul.f32 %v3714_v56, %v14181_v6  ;;  %v11442_v32 = vmul.f32 %v3710_v27, %v2937_v41  ;;  %v11446_v7 = vmul.f32 %v3706_v50, %v14183_v10  ;;  %v14190_v10 = vld [vmem:[#allocation119_spill] sm:$0xff] }
 0x7f0   :  { %v3789_v8 = vadd.f32 %v3788_v25, %v11427_v29  ;;  %v11448_v35 = vmul.f32 %v3718_v2, %v2939_v3  ;;  %v3815_v60 = vadd.f32 %v3814_v23, %v11432_v43  ;;  %v3775_v36 = vadd.f32 %v11422_v53, %v11419_v1  ;;  %v14185_v3 = vld [vmem:[#allocation130_spill] sm:$0xff] }
 0x7f1   :  { %14182 = vst [vmem:[#allocation78_spill] sm:$0xff] %v11440_v9  ;;  %v2955_v12 = vadd.f32 %v2922_v49, %v2076_v40  ;;  %v11453_v51 = vmul.f32 %v3726_v16, %v2941_v55  ;;  %v11456_v41 = vmul.f32 %v3734_v38, %v2943_v11  ;;  %v11460_v28 = vmul.f32 %v3706_v50, %v14184_v61  ;;  %v14187_v11 = vld [vmem:[#allocation117_spill] sm:$0xff] }
 0x7f2   :  { %v3790_v37 = vadd.f32 %v3789_v8, %v11442_v32  ;;  %v3816_v27 = vadd.f32 %v3815_v60, %v11448_v35  ;;  %v3776_v2 = vadd.f32 %v3775_v36, %v11446_v7  ;;  %v11464_v18 = vmul.f32 %v3714_v56, %v14185_v3  ;;  %v14193_v3 = vld [vmem:[#allocation122_spill] sm:$0xff] }
 0x7f3   :  { %v11466_v34 = vmul.f32 %v3726_v16, %v2945_v30  ;;  %v3801_v55 = vadd.f32 %v11440_v9, %v11437_v48  ;;  %v11471_v13 = vmul.f32 %v3734_v38, %v2947_v21  ;;  %v11475_v49 = vmul.f32 %v3722_v20, %v14187_v11  ;;  %v14188_v30 = vld [vmem:[#allocation133_spill] sm:$0xff] }
 0x7f4   :  { %14186 = vst [vmem:[#allocation79_spill] sm:$0xff] %v11464_v18  ;;  %v3791_v40 = vadd.f32 %v3790_v37, %v11453_v51  ;;  %v3817_v14 = vadd.f32 %v3816_v27, %v11456_v41  ;;  %v3777_v50 = vadd.f32 %v3776_v2, %v11460_v28  ;;  %v11478_v25 = vmul.f32 %v3726_v16, %v2949_v17  ;;  %v14191_v27 = vld [vmem:[#allocation136_spill] sm:$0xff] }
 0x7f5   :  { %v11482_v62 = vmul.f32 %v3714_v56, %v14188_v30  ;;  %v3802_v6 = vadd.f32 %v3801_v55, %v11464_v18  ;;  %v11485_v8 = vmul.f32 %v3734_v38, %v2951_v52  ;;  %v11489_v60 = vmul.f32 %v3722_v20, %v14190_v10 }
 0x7f6   :  { %v3792_v23 = vadd.f32 %v3791_v40, %v11466_v34  ;;  %v3818_v21 = vadd.f32 %v3817_v14, %v11471_v13  ;;  %v3778_v36 = vadd.f32 %v3777_v50, %v11475_v49  ;;  %v11492_v37 = vmul.f32 %v3726_v16, %v2953_v47  ;;  %v14195_v47 = vld [vmem:[#allocation139_spill] sm:$0xff] }
 0x7f7   :  { %14189 = vst [vmem:[#allocation80_spill] sm:$0xff] %v11482_v62  ;;  %v11496_v61 = vmul.f32 %v3730_v22, %v14191_v27  ;;  %v3803_v56 = vadd.f32 %v3802_v6, %v11482_v62  ;;  %v11499_v2 = vmul.f32 %v3734_v38, %v2955_v12  ;;  %v11503_v40 = vmul.f32 %v3722_v20, %v14193_v3  ;;  %v14199_v6 = vld [vmem:[#allocation142_spill] sm:$0xff]  ;;  %v14200_v3 = vld [vmem:[#allocation145_spill] sm:$0xff] }
 0x7f8   :  { %v3793_v17 = vadd.f32 %v3792_v23, %v11478_v25  ;;  %v3819_v52 = vadd.f32 %v3818_v21, %v11485_v8  ;;  %v3779_v55 = vadd.f32 %v3778_v36, %v11489_v60  ;;  %v11508_v16 = vmul.f32 %v3730_v22, %v14195_v47  ;;  %v14197_v23 = vld [vmem:[#allocation123_spill] sm:$0xff] }
 0x7f9   :  { %14192 = vst [vmem:[#allocation81_spill] sm:$0xff] %v11496_v61  ;;  %14194 = vst [vmem:[#allocation82_spill] sm:$0xff] %v11503_v40  ;;  %v3804_v11 = vadd.f32 %v3803_v56, %v11496_v61  ;;  %v11513_v30 = vmul.f32 %v3722_v20, %v14197_v23  ;;  %v11517_v21 = vmul.f32 %v3730_v22, %v14199_v6 }
 0x7fa   :  { %v3794_v14 = vadd.f32 %v3793_v17, %v11492_v37  ;;  %14196 = vst [vmem:[#allocation83_spill] sm:$0xff] %v11508_v16  ;;  %v3820_v50 = vadd.f32 %v3819_v52, %v11499_v2  ;;  %v3780_v38 = vadd.f32 %v3779_v55, %v11503_v40  ;;  %v11522_v47 = vmul.f32 %v3730_v22, %v14200_v3 }
 0x7fb   :  { %14198 = vst [vmem:[#allocation84_spill] sm:$0xff] %v11513_v30  ;;  %v3805_v10 = vadd.f32 %v3804_v11, %v11508_v16 }
 0x7fc   :  { %v3795_v12 = vrot.slane %v3794_v14, 4  ;;  %v3821_v36 = vrot.slane %v3820_v50, 4  ;;  %v3781_v17 = vadd.f32 %v3780_v38, %v11513_v30 }
 0x7fd   :  { %v3806_v56 = vadd.f32 %v3805_v10, %v11517_v21 }
 0x7fe   :  { %v3796_v27 = vadd.f32 %v3795_v12, %v3794_v14  ;;  %v3822_v52 = vadd.f32 %v3821_v36, %v3820_v50  ;;  %v3782_v20 = vrot.slane %v3781_v17, 4 }
 0x7ff   :  { %v3807_v55 = vadd.f32 %v3806_v56, %v11522_v47 }
 0x800   :  { %v3797_v23 = vrot.slane %v3796_v27, 2  ;;  %v3823_v61 = vrot.slane %v3822_v52, 2  ;;  %v3783_v62 = vadd.f32 %v3782_v20, %v3781_v17  ;;  %v14201_v17 = vmov 0.0   ;;  %v14205_v20 = vld [vmem:[#allocation153_spill] sm:$0xff] }
 0x801   :  { %v3808_v18 = vrot.slane %v3807_v55, 4 }
 0x802   :  { %v3798_v6 = vadd.f32 %v3797_v23, %v3796_v27  ;;  %v3824_v40 = vadd.f32 %v3823_v61, %v3822_v52  ;;  %v3784_v11 = vrot.slane %v3783_v62, 2  ;;  %v14204_v52 = vld [vmem:[#allocation152_spill] sm:$0xff]  ;;  %v14206_v23 = vld [vmem:[#allocation154_spill] sm:$0xff] }
 0x803   :  { %v3809_v9 = vadd.f32 %v3808_v18, %v3807_v55  ;;  %v14207_v55 = vld [vmem:[#allocation155_spill] sm:$0xff] }
 0x804   :  { %v3799_v16 = vrot.slane %v3798_v6, 1  ;;  %v3825_v38 = vrot.slane %v3824_v40, 1  ;;  %v3785_v14 = vadd.f32 %v3784_v11, %v3783_v62  ;;  %v9056_v11 = vld [vmem:[%s13752_s4 + $0x1d0] sm:$0xff] }
 0x805   :  { %v3810_v22 = vrot.slane %v3809_v9, 2 }
 0x806   :  { %v3800_v12 = vadd.f32 %v3799_v16, %v3798_v6  ;;  %v3826_v3 = vadd.f32 %v3825_v38, %v3824_v40  ;;  %v3786_v30 = vrot.slane %v3785_v14, 1  ;;  %v9055_v6 = vld [vmem:[%s13752_s4 + $0xd0] sm:$0xff] }
 0x807   :  { %v3811_v50 = vadd.f32 %v3810_v22, %v3809_v9  ;;  %v9057_v38 = vld [vmem:[%s13752_s4 + $0x50] sm:$0xff]  ;;  %v9060_v22 = vld [vmem:[%s13752_s4 + $0x1c8] sm:$0xff] }
 0x808   :  { %3891 = vmatprep.mubr.f32.mxu0 %v3800_v12  ;;  %3961 = vmatprep.mubr.f32.mxu1 %v3826_v3  ;;  %v3787_v10 = vadd.f32 %v3786_v30, %v3785_v14  ;;  %v9058_v14 = vld [vmem:[%s13752_s4 + $0x150] sm:$0xff]  ;;  %v9059_v12 = vld [vmem:[%s13752_s4 + $0xc8] sm:$0xff] }
 0x809   :  { %v3812_v36 = vrot.slane %v3811_v50, 1  ;;  %v9061_v3 = vld [vmem:[%s13752_s4 + $0x48] sm:$0xff] }
 0x80a   :  { %3892 = vmatmul.mubr.f32.vlgmr.msra.gmra.mxu0 %v3787_v10  ;;  %v9063_v10 = vld [vmem:[%s13752_s4 + $0xc0] sm:$0xff] }
 0x80b   :  { %v3813_v56 = vadd.f32 %v3812_v36, %v3811_v50  ;;  %4001 = vmatpush1.msra.mxu0 %v11141_v44  ;;  %4036 = vmatprep.mubr.f32.mxu0 %v14201_v17  ;;  %v9062_v50 = vld [vmem:[%s13752_s4 + $0x148] sm:$0xff]  ;;  %v9064_v36 = vld [vmem:[%s13752_s4 + $0x1c0] sm:$0xff] }
 0x80c   :  { %4002 = vmatprep.subr.mxu0 %v11147_v42 }
 0x80d   :  { %3962 = vmatmul.mubr.f32.vlgmr.msra.gmra.mxu1 %v3813_v56  ;;  %4003 = vmatpush1.msra.mxu0 %v11153_v33  ;;  %v9065_v56 = vld [vmem:[%s13752_s4 + $0x40] sm:$0xff] }
 0x80e   :  { %4072 = vmatpush1.msra.mxu1 %v11143_v24  ;;  %4107 = vmatprep.mubr.f32.mxu1 %v14201_v17 }
 0x80f   :  { %4073 = vmatprep.subr.mxu1 %v11149_v39  ;;  %8753 = vmatprep.subr.mxu0 %v11162_v57  ;;  %v14202_v57 = vld [vmem:[#allocation150_spill] sm:$0xff] }
 0x810   :  { %4074 = vmatpush1.msra.mxu1 %v11155_v26 }
 0x811   :  { %8788 = vmatprep.subr.mxu1 %v11168_v63  ;;  %v14203_v63 = vld [vmem:[#allocation151_spill] sm:$0xff] }
 0x8ca   :  { %v8715_v9 = vpop.f32.mrf.mxu0 }
 0x8cc   :  { %v8716_v18 = vpop.f32.mrf.mxu0 }
 0x8cd   :  { %v8750_v62 = vpop.f32.mrf.mxu1  ;;  %v8717_v61 = vadd.f32 %v8716_v18, %v8715_v9  ;;  %v9066_v9 = vld [vmem:[%s13752_s4 + $0x140] sm:$0xff]  ;;  %v9067_v18 = vld [vmem:[%s13752_s4 + $0xb8] sm:$0xff] }
 0x8cf   :  { %v8751_v40 = vpop.f32.mrf.mxu1 }
 0x8d0   :  { %v8752_v16 = vadd.f32 %v8751_v40, %v8750_v62  ;;  %v9068_v62 = vld [vmem:[%s13752_s4 + $0x1b8] sm:$0xff] }
 0x8d1   :  { %v9070_v40 = vld [vmem:[%s13752_s4 + $0x138] sm:$0xff] }
 0x8d2   :  { %v3964_v30 = vadd.f32 %v8752_v16, %v8717_v61  ;;  %v9069_v61 = vld [vmem:[%s13752_s4 + $0x38] sm:$0xff]  ;;  %v9071_v16 = vld [vmem:[%s13752_s4 + $0xb0] sm:$0xff] }
 0x8d4   :  { %v3968_v27 = vmul.f32 0.00048828125, %v3964_v30  ;;  %v9072_v30 = vld [vmem:[%s13752_s4 + $0x1b0] sm:$0xff] }
 0x8d6   :  { %8596 = vmatmul.mubr.msk.f32.vlgmr.msra.gmra.mxu0 %vm3196_vm6, %v3968_v27  ;;  %8597 = vmatmul.mubr.msk.f32.vlgmr.msra.gmra.mxu1 %vm3196_vm6, %v3968_v27  ;;  %v9073_v27 = vld [vmem:[%s13752_s4 + $0x30] sm:$0xff] }
 0x8d7   :  { %8754 = vmatpush3.msra.mxu0 %v11177_v31  ;;  %8789 = vmatpush3.msra.mxu1 %v11183_v0  ;;  %v14208_v31 = vld [vmem:[#allocation156_spill] sm:$0xff]  ;;  %v14209_v0 = vld [vmem:[#allocation157_spill] sm:$0xff] }
 0x8d8   :  { %8755 = vmatprep.subr.mxu0 %v11189_v5  ;;  %8790 = vmatprep.subr.mxu1 %v11195_v58  ;;  %v9051_v5 = vld [vmem:[%s13752_s4 + $0xd8] sm:$0xff] }
 0x8d9   :  { %8756 = vmatpush3.msra.mxu0 %v14202_v57  ;;  %8791 = vmatpush3.msra.mxu1 %v14203_v63  ;;  %v9052_v58 = vld [vmem:[%s13752_s4 + $0x1d8] sm:$0xff]  ;;  %v9074_v57 = vld [vmem:[%s13752_s4 + $0x130] sm:$0xff]  ;;  %v9075_v63 = vld [vmem:[%s13752_s4 + $0xa8] sm:$0xff] }
 0x8da   :  { %8757 = vmatprep.subr.mxu0 %v14204_v52  ;;  %8792 = vmatprep.subr.mxu1 %v14205_v20  ;;  %v9076_v52 = vld [vmem:[%s13752_s4 + $0x1a8] sm:$0xff] }
 0x8db   :  { %8758 = vmatpush3.msra.mxu0 %v14206_v23  ;;  %8793 = vmatpush3.msra.mxu1 %v14207_v55  ;;  %v9077_v20 = vld [vmem:[%s13752_s4 + $0x28] sm:$0xff]  ;;  %v9079_v55 = vld [vmem:[%s13752_s4 + $0xa0] sm:$0xff] }
 0x8dc   :  { %8759 = vmatprep.subr.mxu0 %v11237_v45  ;;  %8794 = vmatprep.subr.mxu1 %v11243_v15  ;;  %v9053_v45 = vld [vmem:[%s13752_s4 + $0x58] sm:$0xff]  ;;  %v9078_v23 = vld [vmem:[%s13752_s4 + $0x128] sm:$0xff] }
 0x8dd   :  { %8760 = vmatpush3.msra.mxu0 %v14208_v31  ;;  %8795 = vmatpush3.msra.mxu1 %v14209_v0  ;;  %v9054_v15 = vld [vmem:[%s13752_s4 + $0x158] sm:$0xff]  ;;  %v9080_v31 = vld [vmem:[%s13752_s4 + $0x1a0] sm:$0xff] }
 0x8de   :  { %8761 = vmatprep.subr.mxu0 %v9051_v5  ;;  %8796 = vmatprep.subr.mxu1 %v9052_v58  ;;  %v9081_v0 = vld [vmem:[%s13752_s4 + $0x20] sm:$0xff]  ;;  %v9083_v58 = vld [vmem:[%s13752_s4 + $0x98] sm:$0xff] }
 0x8df   :  { %8762 = vmatpush3.msra.mxu0 %v9053_v45  ;;  %8797 = vmatpush3.msra.mxu1 %v9054_v15  ;;  %v9082_v5 = vld [vmem:[%s13752_s4 + $0x120] sm:$0xff]  ;;  %v9084_v45 = vld [vmem:[%s13752_s4 + $0x198] sm:$0xff] }
 0x8e0   :  { %8763 = vmatprep.subr.mxu0 %v9055_v6  ;;  %8798 = vmatprep.subr.mxu1 %v9056_v11  ;;  %v9085_v15 = vld [vmem:[%s13752_s4 + $0x18] sm:$0xff]  ;;  %v9087_v11 = vld [vmem:[%s13752_s4 + $0x90] sm:$0xff] }
 0x8e1   :  { %8764 = vmatpush3.msra.mxu0 %v9057_v38  ;;  %8799 = vmatpush3.msra.mxu1 %v9058_v14  ;;  %v9086_v6 = vld [vmem:[%s13752_s4 + $0x118] sm:$0xff]  ;;  %v9088_v38 = vld [vmem:[%s13752_s4 + $0x190] sm:$0xff] }
 0x8e2   :  { %8765 = vmatprep.subr.mxu0 %v9059_v12  ;;  %8800 = vmatprep.subr.mxu1 %v9060_v22  ;;  %v9089_v14 = vld [vmem:[%s13752_s4 + $0x10] sm:$0xff]  ;;  %v9091_v22 = vld [vmem:[%s13752_s4 + $0x88] sm:$0xff] }
 0x8e3   :  { %8766 = vmatpush3.msra.mxu0 %v9061_v3  ;;  %8801 = vmatpush3.msra.mxu1 %v9062_v50  ;;  %v9090_v12 = vld [vmem:[%s13752_s4 + $0x110] sm:$0xff]  ;;  %v9092_v3 = vld [vmem:[%s13752_s4 + $0x188] sm:$0xff] }
 0x8e4   :  { %8767 = vmatprep.subr.mxu0 %v9063_v10  ;;  %8802 = vmatprep.subr.mxu1 %v9064_v36  ;;  %v9093_v50 = vld [vmem:[%s13752_s4 + $0x8] sm:$0xff]  ;;  %v9095_v36 = vld [vmem:[%s13752_s4 + $0x80] sm:$0xff] }
 0x8e5   :  { %8768 = vmatpush3.msra.mxu0 %v9065_v56  ;;  %8803 = vmatpush3.msra.mxu1 %v9066_v9  ;;  %v9094_v10 = vld [vmem:[%s13752_s4 + $0x108] sm:$0xff]  ;;  %v9096_v56 = vld [vmem:[%s13752_s4 + $0x180] sm:$0xff] }
 0x8e6   :  { %8769 = vmatprep.subr.mxu0 %v9067_v18  ;;  %8804 = vmatprep.subr.mxu1 %v9068_v62  ;;  %v9097_v9 = vld [vmem:[%s13752_s4] sm:$0xff]  ;;  %v14210_v62 = vld [vmem:[#allocation148_spill] sm:$0xff] }
 0x8e7   :  { %8770 = vmatpush3.msra.mxu0 %v9069_v61  ;;  %8805 = vmatpush3.msra.mxu1 %v9070_v40  ;;  %v9098_v18 = vld [vmem:[%s13752_s4 + $0x100] sm:$0xff]  ;;  %v14211_v61 = vld [vmem:[#allocation149_spill] sm:$0xff] }
 0x8e8   :  { %8771 = vmatprep.subr.mxu0 %v9071_v16  ;;  %8806 = vmatprep.subr.mxu1 %v9072_v30 }
 0x8e9   :  { %8772 = vmatpush3.msra.mxu0 %v9073_v27  ;;  %8807 = vmatpush3.msra.mxu1 %v9074_v57 }
 0x8ea   :  { %8773 = vmatprep.subr.mxu0 %v9075_v63  ;;  %8808 = vmatprep.subr.mxu1 %v9076_v52 }
 0x8eb   :  { %8774 = vmatpush3.msra.mxu0 %v9077_v20  ;;  %8809 = vmatpush3.msra.mxu1 %v9078_v23 }
 0x8ec   :  { %8775 = vmatprep.subr.mxu0 %v9079_v55  ;;  %8810 = vmatprep.subr.mxu1 %v9080_v31 }
 0x8ed   :  { %8776 = vmatpush3.msra.mxu0 %v9081_v0  ;;  %8811 = vmatpush3.msra.mxu1 %v9082_v5 }
 0x8ee   :  { %8777 = vmatprep.subr.mxu0 %v9083_v58  ;;  %8812 = vmatprep.subr.mxu1 %v9084_v45 }
 0x8ef   :  { %8778 = vmatpush3.msra.mxu0 %v9085_v15  ;;  %8813 = vmatpush3.msra.mxu1 %v9086_v6 }
 0x8f0   :  { %8779 = vmatprep.subr.mxu0 %v9087_v11  ;;  %8814 = vmatprep.subr.mxu1 %v9088_v38 }
 0x8f1   :  { %8780 = vmatpush3.msra.mxu0 %v9089_v14  ;;  %8815 = vmatpush3.msra.mxu1 %v9090_v12 }
 0x8f2   :  { %8781 = vmatprep.subr.mxu0 %v9091_v22  ;;  %8816 = vmatprep.subr.mxu1 %v9092_v3 }
 0x8f3   :  { %8782 = vmatpush3.msra.mxu0 %v9093_v50  ;;  %8817 = vmatpush3.msra.mxu1 %v9094_v10 }
 0x8f4   :  { %8783 = vmatprep.subr.mxu0 %v9095_v36  ;;  %8818 = vmatprep.subr.mxu1 %v9096_v56 }
 0x8f5   :  { %8784 = vmatpush3.msra.mxu0 %v9097_v9  ;;  %8819 = vmatpush3.msra.mxu1 %v9098_v18 }
 0x8f6   :  { %4422 = vmatprep.subr.mxu0 %v14210_v62  ;;  %4493 = vmatprep.subr.mxu1 %v14211_v61 }
 0x996   :  { %v4038_v40 = vpop.f32.mrf.mxu0  ;;  %v4109_v16 = vpop.f32.mrf.mxu1 }
 0x997   :  { %v11699_v57 = vrot.slane %v4038_v40, %v11103_v59  ;;  %v11716_v0 = vrot.slane %v4109_v16, %v11103_v59 }
 0x998   :  { %v4040_v30 = vpop.f32.mrf.mxu0  ;;  %v4111_v27 = vpop.f32.mrf.mxu1 }
 0x999   :  { %v4121_v63 = vrot.slane %v4040_v30, %v11103_v59  ;;  %v4129_v52 = vrot.slane %v4111_v27, %v11103_v59  ;;  %v11737_v45 = vsub.f32 %v11446_v7, %v11699_v57  ;;  %v11755_v7 = vsub.f32 %v11460_v28, %v11699_v57 }
 0x99b   :  { %v11704_v20 = vsub.f32 %v11410_v4, %v4121_v63  ;;  %v11707_v23 = vsub.f32 %v11414_v54, %v4121_v63  ;;  %v11710_v55 = vsub.f32 %v11427_v29, %v4121_v63  ;;  %v11713_v31 = vsub.f32 %v11442_v32, %v4121_v63 }
 0x99c   :  { %v11724_v4 = vsub.f32 %v11419_v1, %v11699_v57  ;;  %v11727_v54 = vsub.f32 %v11453_v51, %v4121_v63  ;;  %v11733_v32 = vsub.f32 %v11422_v53, %v11699_v57  ;;  %v11740_v6 = vsub.f32 %v11412_v46, %v4129_v52 }
 0x99d   :  { %v4163_v5 = vmul.f32 %v11704_v20, %v11704_v20  ;;  %v4167_v58 = vmul.f32 %v11707_v23, %v11707_v23  ;;  %v4171_v29 = vmul.f32 %v11710_v55, %v11710_v55  ;;  %v11743_v1 = vsub.f32 %v11416_v19, %v4129_v52 }
 0x99e   :  { %v11746_v51 = vsub.f32 %v11432_v43, %v4129_v52  ;;  %v11749_v11 = vsub.f32 %v11466_v34, %v4121_v63  ;;  %v4175_v53 = vmul.f32 %v11713_v31, %v11713_v31  ;;  %v11759_v46 = vsub.f32 %v11475_v49, %v11699_v57 }
 0x99f   :  { %v4207_v15 = vadd.f32 %v4167_v58, %v4163_v5  ;;  %v11762_v19 = vsub.f32 %v11448_v35, %v4129_v52  ;;  %v4165_v43 = vmul.f32 %v11740_v6, %v11740_v6  ;;  %v4169_v34 = vmul.f32 %v11743_v1, %v11743_v1 }
 0x9a0   :  { %v11769_v14 = vsub.f32 %v11478_v25, %v4121_v63  ;;  %v11772_v28 = vsub.f32 %v11492_v37, %v4121_v63  ;;  %v11775_v12 = vsub.f32 %v11456_v41, %v4129_v52  ;;  %v11779_v49 = vsub.f32 %v11489_v60, %v11699_v57 }
 0x9a1   :  { %v4208_v38 = vadd.f32 %v4207_v15, %v4171_v29  ;;  %v4179_v35 = vmul.f32 %v11727_v54, %v11727_v54  ;;  %v4173_v3 = vmul.f32 %v11746_v51, %v11746_v51  ;;  %v4233_v50 = vadd.f32 %v4169_v34, %v4165_v43  ;;  %v14215_v15 = vld [vmem:[#allocation78_spill] sm:$0xff] }
 0x9a2   :  { %v11786_v25 = vsub.f32 %v11471_v13, %v4129_v52  ;;  %v11789_v37 = vsub.f32 %v11485_v8, %v4129_v52  ;;  %v4162_v41 = vmul.f32 %v11724_v4, %v11724_v4  ;;  %v4166_v60 = vmul.f32 %v11733_v32, %v11733_v32 }
 0x9a3   :  { %v4209_v22 = vadd.f32 %v4208_v38, %v4175_v53  ;;  %v4183_v10 = vmul.f32 %v11749_v11, %v11749_v11  ;;  %v4177_v56 = vmul.f32 %v11762_v19, %v11762_v19  ;;  %v4234_v9 = vadd.f32 %v4233_v50, %v4173_v3 }
 0x9a4   :  { %14212 = vst [vmem:[#allocation85_spill] sm:$0xff] %v11786_v25  ;;  %14213 = vst [vmem:[#allocation86_spill] sm:$0xff] %v11789_v37  ;;  %v4187_v13 = vmul.f32 %v11769_v14, %v11769_v14  ;;  %v4191_v8 = vmul.f32 %v11772_v28, %v11772_v28  ;;  %v4181_v18 = vmul.f32 %v11775_v12, %v11775_v12 }
 0x9a5   :  { %v4210_v36 = vadd.f32 %v4209_v22, %v4179_v35  ;;  %v4170_v40 = vmul.f32 %v11737_v45, %v11737_v45  ;;  %v4235_v30 = vadd.f32 %v4234_v9, %v4177_v56  ;;  %v4194_v27 = vadd.f32 %v4166_v60, %v4162_v41  ;;  %v14216_v35 = vld [vmem:[#allocation82_spill] sm:$0xff]  ;;  %v14218_v9 = vld [vmem:[#allocation84_spill] sm:$0xff] }
 0x9a6   :  { %v11809_v63 = vsub.f32 %v11437_v48, %v11716_v0  ;;  %v11812_v5 = vsub.f32 %v11499_v2, %v4129_v52  ;;  %v4185_v58 = vmul.f32 %v11786_v25, %v11786_v25  ;;  %v4189_v29 = vmul.f32 %v11789_v37, %v11789_v37  ;;  %v14217_v52 = vld [vmem:[#allocation79_spill] sm:$0xff] }
 0x9a7   :  { %v4211_v16 = vadd.f32 %v4210_v36, %v4183_v10  ;;  %v11820_v53 = vsub.f32 %v14215_v15, %v11716_v0  ;;  %v4236_v43 = vadd.f32 %v4235_v30, %v4181_v18  ;;  %v4174_v34 = vmul.f32 %v11755_v7, %v11755_v7  ;;  %v14219_v18 = vld [vmem:[#allocation80_spill] sm:$0xff] }
 0x9a8   :  { %14214 = vst [vmem:[#allocation87_spill] sm:$0xff] %v11812_v5  ;;  %v4195_v48 = vadd.f32 %v4194_v27, %v4170_v40  ;;  %v11826_v2 = vsub.f32 %v14216_v35, %v11699_v57  ;;  %v11830_v22 = vsub.f32 %v14217_v52, %v11716_v0  ;;  %v4164_v3 = vmul.f32 %v11809_v63, %v11809_v63 }
 0x9a9   :  { %v4212_v38 = vadd.f32 %v4211_v16, %v4187_v13  ;;  %v4168_v50 = vmul.f32 %v11820_v53, %v11820_v53  ;;  %v4237_v60 = vadd.f32 %v4236_v43, %v4185_v58  ;;  %v4178_v10 = vmul.f32 %v11759_v46, %v11759_v46  ;;  %v14220_v58 = vld [vmem:[#allocation81_spill] sm:$0xff] }
 0x9aa   :  { %v4196_v36 = vadd.f32 %v4195_v48, %v4174_v34  ;;  %v4193_v56 = vmul.f32 %v11812_v5, %v11812_v5  ;;  %v11842_v13 = vsub.f32 %v14218_v9, %v11699_v57  ;;  %v11846_v40 = vsub.f32 %v14219_v18, %v11716_v0 }
 0x9ab   :  { %v4213_v41 = vadd.f32 %v4212_v38, %v4191_v8  ;;  %v4238_v30 = vadd.f32 %v4237_v60, %v4189_v29  ;;  %v4182_v8 = vmul.f32 %v11779_v49, %v11779_v49  ;;  %v11852_v15 = vsub.f32 %v14220_v58, %v11716_v0  ;;  %v14221_v29 = vld [vmem:[#allocation83_spill] sm:$0xff] }
 0x9ac   :  { %v4197_v27 = vadd.f32 %v4196_v36, %v4178_v10  ;;  %v4172_v38 = vmul.f32 %v11830_v22, %v11830_v22  ;;  %v4220_v43 = vadd.f32 %v4168_v50, %v4164_v3  ;;  %v4186_v48 = vmul.f32 %v11826_v2, %v11826_v2 }
 0x9ad   :  { %v4214_v16 = vrot.slane %v4213_v41, 4  ;;  %v4239_v34 = vadd.f32 %v4238_v30, %v4193_v56  ;;  %v11860_v52 = vsub.f32 %v14221_v29, %v11716_v0  ;;  %v4176_v60 = vmul.f32 %v11846_v40, %v11846_v40 }
 0x9ae   :  { %v4198_v35 = vadd.f32 %v4197_v27, %v4182_v8  ;;  %v4221_v10 = vadd.f32 %v4220_v43, %v4172_v38  ;;  %v4190_v18 = vmul.f32 %v11842_v13, %v11842_v13  ;;  %v11868_v50 = vsub.f32 %v11517_v21, %v11716_v0 }
 0x9af   :  { %v4215_v57 = vadd.f32 %v4214_v16, %v4213_v41  ;;  %v4240_v9 = vrot.slane %v4239_v34, 4  ;;  %v4180_v41 = vmul.f32 %v11852_v15, %v11852_v15  ;;  %v11874_v27 = vsub.f32 %v11522_v47, %v11716_v0 }
 0x9b0   :  { %v4199_v3 = vadd.f32 %v4198_v35, %v4186_v48  ;;  %v4222_v56 = vadd.f32 %v4221_v10, %v4176_v60  ;;  %v4184_v58 = vmul.f32 %v11860_v52, %v11860_v52  ;;  %v4188_v21 = vmul.f32 %v11868_v50, %v11868_v50 }
 0x9b1   :  { %v4216_v36 = vrot.slane %v4215_v57, 2  ;;  %v4241_v30 = vadd.f32 %v4240_v9, %v4239_v34  ;;  %v4192_v34 = vmul.f32 %v11874_v27, %v11874_v27 }
 0x9b2   :  { %v4200_v8 = vadd.f32 %v4199_v3, %v4190_v18  ;;  %v4223_v38 = vadd.f32 %v4222_v56, %v4180_v41 }
 0x9b3   :  { %v4217_v16 = vadd.f32 %v4216_v36, %v4215_v57  ;;  %v4242_v48 = vrot.slane %v4241_v30, 2 }
 0x9b4   :  { %v4201_v35 = vrot.slane %v4200_v8, 4  ;;  %v4224_v29 = vadd.f32 %v4223_v38, %v4184_v58 }
 0x9b5   :  { %v4218_v43 = vrot.slane %v4217_v16, 1  ;;  %v4243_v60 = vadd.f32 %v4242_v48, %v4241_v30 }
 0x9b6   :  { %v4202_v57 = vadd.f32 %v4201_v35, %v4200_v8  ;;  %v4225_v10 = vadd.f32 %v4224_v29, %v4188_v21  ;;  %v4387_v21 = vld [vmem:[#allocation15] sm:$0x1] }
 0x9b7   :  { %v4219_v5 = vadd.f32 %v4218_v43, %v4217_v16  ;;  %v4244_v47 = vrot.slane %v4243_v60, 1 }
 0x9b8   :  { %v4203_v0 = vrot.slane %v4202_v57, 2  ;;  %v4226_v36 = vadd.f32 %v4225_v10, %v4192_v34  ;;  %v5616_v34 = vld [vmem:[#allocation8 + $0xde8] sm:$0xff]  ;;  %v5487_v10 = vld [vmem:[#allocation8 + $0x9e0] sm:$0xff] }
 0x9b9   :  { %4310 = vmatprep.mubr.f32.mxu0 %v4219_v5  ;;  %v4245_v9 = vadd.f32 %v4244_v47, %v4243_v60  ;;  %v5615_v47 = vld [vmem:[#allocation8 + $0xde0] sm:$0xff] }
 0x9ba   :  { %v4204_v18 = vadd.f32 %v4203_v0, %v4202_v57  ;;  %v4227_v3 = vrot.slane %v4226_v36, 4  ;;  %v5488_v57 = vld [vmem:[#allocation8 + $0x9e8] sm:$0xff] }
 0x9bb   :  { %4380 = vmatprep.mubr.f32.mxu1 %v4245_v9  ;;  %v5608_v0 = vld [vmem:[#allocation8 + $0xda8] sm:$0xff] }
 0x9bc   :  { %v4205_v41 = vrot.slane %v4204_v18, 1  ;;  %v4228_v56 = vadd.f32 %v4227_v3, %v4226_v36  ;;  %v5607_v36 = vld [vmem:[#allocation8 + $0xda0] sm:$0xff]  ;;  %v5476_v9 = vld [vmem:[#allocation8 + $0x988] sm:$0xff] }
 0x9bd   :  { %v5475_v3 = vld [vmem:[#allocation8 + $0x980] sm:$0xff] }
 0x9be   :  { %v4206_v37 = vadd.f32 %v4205_v41, %v4204_v18  ;;  %v4229_v25 = vrot.slane %v4228_v56, 2  ;;  %v5604_v18 = vld [vmem:[#allocation8 + $0xd88] sm:$0xff]  ;;  %v5603_v41 = vld [vmem:[#allocation8 + $0xd80] sm:$0xff] }
 0x9c0   :  { %4311 = vmatmul.mubr.f32.vlgmr.msra.gmra.mxu0 %v4206_v37  ;;  %v4230_v16 = vadd.f32 %v4229_v25, %v4228_v56  ;;  %v5472_v56 = vld [vmem:[#allocation8 + $0x968] sm:$0xff] }
 0x9c1   :  { %4423 = vmatpush1.msra.mxu0 %v11141_v44  ;;  %4458 = vmatprep.mubr.f32.mxu0 %v14201_v17 }
 0x9c2   :  { %4424 = vmatprep.subr.mxu0 %v11147_v42  ;;  %v4231_v5 = vrot.slane %v4230_v16, 1 }
 0x9c3   :  { %4425 = vmatpush1.msra.mxu0 %v11153_v33 }
 0x9c4   :  { %4568 = vmatprep.subr.mxu0 %v14210_v62  ;;  %v4232_v30 = vadd.f32 %v4231_v5, %v4230_v16  ;;  %v5600_v16 = vld [vmem:[#allocation8 + $0xd68] sm:$0xff]  ;;  %v5471_v5 = vld [vmem:[#allocation8 + $0x960] sm:$0xff] }
 0x9c6   :  { %4381 = vmatmul.mubr.f32.vlgmr.msra.gmra.mxu1 %v4232_v30  ;;  %v5599_v30 = vld [vmem:[#allocation8 + $0xd60] sm:$0xff] }
 0x9c7   :  { %4494 = vmatpush1.msra.mxu1 %v11143_v24  ;;  %4529 = vmatprep.mubr.f32.mxu1 %v14201_v17 }
 0x9c8   :  { %4495 = vmatprep.subr.mxu1 %v11149_v39 }
 0x9c9   :  { %4496 = vmatpush1.msra.mxu1 %v11155_v26 }
 0x9ca   :  { %4639 = vmatprep.subr.mxu1 %v14211_v61  ;;  %v4536_v61 = vld [vmem:[#allocation17] sm:$0x1] }
 0xa80   :  { %v8785_v25 = vpop.f32.mrf.mxu0 }
 0xa82   :  { %v8786_v37 = vpop.f32.mrf.mxu0 }
 0xa83   :  { %v8787_v58 = vadd.f32 %v8786_v37, %v8785_v25  ;;  %v5468_v25 = vld [vmem:[#allocation8 + $0x948] sm:$0xff] }
 0xa84   :  { %v5596_v37 = vld [vmem:[#allocation8 + $0xd48] sm:$0xff] }
 0xa86   :  { %v8820_v8 = vpop.f32.mrf.mxu1 }
 0xa88   :  { %v8821_v38 = vpop.f32.mrf.mxu1 }
 0xa89   :  { %v8822_v43 = vadd.f32 %v8821_v38, %v8820_v8  ;;  %v5467_v8 = vld [vmem:[#allocation8 + $0x940] sm:$0xff]  ;;  %v5464_v38 = vld [vmem:[#allocation8 + $0x928] sm:$0xff] }
 0xa8b   :  { %v4383_v48 = vadd.f32 %v8822_v43, %v8787_v58  ;;  %v5595_v58 = vld [vmem:[#allocation8 + $0xd40] sm:$0xff]  ;;  %v5592_v43 = vld [vmem:[#allocation8 + $0xd28] sm:$0xff] }
 0xa8d   :  { %v4386_v62 = vmul.f32 0.00048828125, %v4383_v48  ;;  %v5463_v48 = vld [vmem:[#allocation8 + $0x920] sm:$0xff] }
 0xa8f   :  { %v4388_v35 = vadd.f32 1e-05, %v4386_v62  ;;  %v5591_v62 = vld [vmem:[#allocation8 + $0xd20] sm:$0xff] }
 0xa91   :  { %8999 = vrsqrt.f32 %v4388_v35  ;;  %v5460_v35 = vld [vmem:[#allocation8 + $0x908] sm:$0xff] }
 0xa9e   :  { %v9000_v29 = vpop.eup %8999 }
 0xa9f   :  { %v4390_v60 = vmul.f32 %v9000_v29, %v4387_v21  ;;  %v5588_v21 = vld [vmem:[#allocation8 + $0xd08] sm:$0xff]  ;;  %v5459_v29 = vld [vmem:[#allocation8 + $0x900] sm:$0xff] }
 0xaa1   :  { %8598 = vmatmul.mubr.msk.f32.vlgmr.msra.gmra.mxu0 %vm3196_vm6, %v4390_v60  ;;  %8599 = vmatmul.mubr.msk.f32.vlgmr.msra.gmra.mxu1 %vm3196_vm6, %v4390_v60  ;;  %v5587_v60 = vld [vmem:[#allocation8 + $0xd00] sm:$0xff] }
 0xaa2   :  { %4569 = vmatpush1.msra.mxu0 %v11141_v44  ;;  %4640 = vmatpush1.msra.mxu1 %v11143_v24  ;;  %v5484_v44 = vld [vmem:[#allocation8 + $0x9c8] sm:$0xff] }
 0xaa3   :  { %4570 = vmatprep.subr.mxu0 %v11147_v42  ;;  %4641 = vmatprep.subr.mxu1 %v11149_v39  ;;  %v5612_v24 = vld [vmem:[#allocation8 + $0xdc8] sm:$0xff]  ;;  %v5483_v42 = vld [vmem:[#allocation8 + $0x9c0] sm:$0xff] }
 0xaa4   :  { %4571 = vmatpush1.msra.mxu0 %v11153_v33  ;;  %4604 = vmatprep.mubr.f32.mxu0 %v14201_v17  ;;  %v5611_v39 = vld [vmem:[#allocation8 + $0xdc0] sm:$0xff]  ;;  %v5480_v33 = vld [vmem:[#allocation8 + $0x9a8] sm:$0xff] }
 0xaa5   :  { %4642 = vmatpush1.msra.mxu1 %v11155_v26  ;;  %4675 = vmatprep.mubr.f32.mxu1 %v14201_v17  ;;  %v5479_v26 = vld [vmem:[#allocation8 + $0x9a0] sm:$0xff] }
 0xaa6   :  { %8600 = vmatmul.mubr.msk.f32.vlgmr.msra.gmra.mxu0 %vm3196_vm6, %v4536_v61  ;;  %8601 = vmatmul.mubr.msk.f32.vlgmr.msra.gmra.mxu1 %vm3196_vm6, %v4536_v61  ;;  %v5456_v61 = vld [vmem:[#allocation8 + $0x8e8] sm:$0xff] }
 0xaa7   :  { %5683 = vmatprep.subr.mxu0 %v5488_v57  ;;  %5796 = vmatprep.subr.mxu1 %v5616_v34  ;;  %v5584_v57 = vld [vmem:[#allocation8 + $0xce8] sm:$0xff]  ;;  %v5455_v34 = vld [vmem:[#allocation8 + $0x8e0] sm:$0xff] }
 0xaa8   :  { %5684 = vmatpush1.msra.mxu0 %v5487_v10  ;;  %5797 = vmatpush1.msra.mxu1 %v5615_v47  ;;  %v5583_v10 = vld [vmem:[#allocation8 + $0xce0] sm:$0xff]  ;;  %v5452_v47 = vld [vmem:[#allocation8 + $0x8c8] sm:$0xff] }
 0xaa9   :  { %5685 = vmatprep.subr.mxu0 %v5484_v44  ;;  %5798 = vmatprep.subr.mxu1 %v5612_v24  ;;  %v5580_v44 = vld [vmem:[#allocation8 + $0xcc8] sm:$0xff]  ;;  %v5451_v24 = vld [vmem:[#allocation8 + $0x8c0] sm:$0xff] }
 0xaaa   :  { %5686 = vmatpush1.msra.mxu0 %v5483_v42  ;;  %5799 = vmatpush1.msra.mxu1 %v5611_v39  ;;  %v5579_v42 = vld [vmem:[#allocation8 + $0xcc0] sm:$0xff]  ;;  %v5448_v39 = vld [vmem:[#allocation8 + $0x8a8] sm:$0xff] }
 0xaab   :  { %5687 = vmatprep.subr.mxu0 %v5480_v33  ;;  %5800 = vmatprep.subr.mxu1 %v5608_v0  ;;  %v5576_v33 = vld [vmem:[#allocation8 + $0xca8] sm:$0xff]  ;;  %v5447_v0 = vld [vmem:[#allocation8 + $0x8a0] sm:$0xff] }
 0xaac   :  { %5688 = vmatpush1.msra.mxu0 %v5479_v26  ;;  %5801 = vmatpush1.msra.mxu1 %v5607_v36  ;;  %v5575_v26 = vld [vmem:[#allocation8 + $0xca0] sm:$0xff]  ;;  %v5444_v36 = vld [vmem:[#allocation8 + $0x888] sm:$0xff] }
 0xaad   :  { %5689 = vmatprep.subr.mxu0 %v5476_v9  ;;  %5802 = vmatprep.subr.mxu1 %v5604_v18  ;;  %v5572_v9 = vld [vmem:[#allocation8 + $0xc88] sm:$0xff]  ;;  %v5443_v18 = vld [vmem:[#allocation8 + $0x880] sm:$0xff] }
 0xaae   :  { %5690 = vmatpush1.msra.mxu0 %v5475_v3  ;;  %5803 = vmatpush1.msra.mxu1 %v5603_v41  ;;  %v5571_v3 = vld [vmem:[#allocation8 + $0xc80] sm:$0xff]  ;;  %v5440_v41 = vld [vmem:[#allocation8 + $0x868] sm:$0xff] }
 0xaaf   :  { %5691 = vmatprep.subr.mxu0 %v5472_v56  ;;  %5804 = vmatprep.subr.mxu1 %v5600_v16  ;;  %v5568_v56 = vld [vmem:[#allocation8 + $0xc68] sm:$0xff]  ;;  %v5439_v16 = vld [vmem:[#allocation8 + $0x860] sm:$0xff] }
 0xab0   :  { %5692 = vmatpush1.msra.mxu0 %v5471_v5  ;;  %5805 = vmatpush1.msra.mxu1 %v5599_v30  ;;  %v5567_v5 = vld [vmem:[#allocation8 + $0xc60] sm:$0xff]  ;;  %v5436_v30 = vld [vmem:[#allocation8 + $0x848] sm:$0xff] }
 0xab1   :  { %5693 = vmatprep.subr.mxu0 %v5468_v25  ;;  %5806 = vmatprep.subr.mxu1 %v5596_v37  ;;  %v5564_v25 = vld [vmem:[#allocation8 + $0xc48] sm:$0xff]  ;;  %v5435_v37 = vld [vmem:[#allocation8 + $0x840] sm:$0xff] }
 0xab2   :  { %5694 = vmatpush1.msra.mxu0 %v5467_v8  ;;  %5807 = vmatpush1.msra.mxu1 %v5595_v58  ;;  %v5563_v8 = vld [vmem:[#allocation8 + $0xc40] sm:$0xff]  ;;  %v5432_v58 = vld [vmem:[#allocation8 + $0x828] sm:$0xff] }
 0xab3   :  { %5695 = vmatprep.subr.mxu0 %v5464_v38  ;;  %5808 = vmatprep.subr.mxu1 %v5592_v43  ;;  %v5560_v38 = vld [vmem:[#allocation8 + $0xc28] sm:$0xff]  ;;  %v5431_v43 = vld [vmem:[#allocation8 + $0x820] sm:$0xff] }
 0xab4   :  { %5696 = vmatpush1.msra.mxu0 %v5463_v48  ;;  %5809 = vmatpush1.msra.mxu1 %v5591_v62  ;;  %v5559_v48 = vld [vmem:[#allocation8 + $0xc20] sm:$0xff]  ;;  %v5428_v62 = vld [vmem:[#allocation8 + $0x808] sm:$0xff] }
 0xab5   :  { %5697 = vmatprep.subr.mxu0 %v5460_v35  ;;  %5810 = vmatprep.subr.mxu1 %v5588_v21  ;;  %v5556_v35 = vld [vmem:[#allocation8 + $0xc08] sm:$0xff]  ;;  %v5427_v21 = vld [vmem:[#allocation8 + $0x800] sm:$0xff] }
 0xab6   :  { %5698 = vmatpush1.msra.mxu0 %v5459_v29  ;;  %5811 = vmatpush1.msra.mxu1 %v5587_v60  ;;  %v5555_v29 = vld [vmem:[#allocation8 + $0xc00] sm:$0xff]  ;;  %v5552_v60 = vld [vmem:[#allocation8 + $0xbe8] sm:$0xff] }
 0xab7   :  { %5699 = vmatprep.subr.mxu0 %v5456_v61  ;;  %5812 = vmatprep.subr.mxu1 %v5584_v57  ;;  %v5680_v61 = vld [vmem:[#allocation8 + $0xfe8] sm:$0xff]  ;;  %v5551_v57 = vld [vmem:[#allocation8 + $0xbe0] sm:$0xff] }
 0xab8   :  { %5700 = vmatpush1.msra.mxu0 %v5455_v34  ;;  %5813 = vmatpush1.msra.mxu1 %v5583_v10  ;;  %v5679_v34 = vld [vmem:[#allocation8 + $0xfe0] sm:$0xff]  ;;  %v5548_v10 = vld [vmem:[#allocation8 + $0xbc8] sm:$0xff] }
 0xab9   :  { %5701 = vmatprep.subr.mxu0 %v5452_v47  ;;  %5814 = vmatprep.subr.mxu1 %v5580_v44  ;;  %v5676_v47 = vld [vmem:[#allocation8 + $0xfc8] sm:$0xff]  ;;  %v5547_v44 = vld [vmem:[#allocation8 + $0xbc0] sm:$0xff] }
 0xaba   :  { %5702 = vmatpush1.msra.mxu0 %v5451_v24  ;;  %5815 = vmatpush1.msra.mxu1 %v5579_v42  ;;  %v5675_v24 = vld [vmem:[#allocation8 + $0xfc0] sm:$0xff]  ;;  %v5544_v42 = vld [vmem:[#allocation8 + $0xba8] sm:$0xff] }
 0xabb   :  { %5703 = vmatprep.subr.mxu0 %v5448_v39  ;;  %5816 = vmatprep.subr.mxu1 %v5576_v33  ;;  %v5672_v39 = vld [vmem:[#allocation8 + $0xfa8] sm:$0xff]  ;;  %v5543_v33 = vld [vmem:[#allocation8 + $0xba0] sm:$0xff] }
 0xabc   :  { %5704 = vmatpush1.msra.mxu0 %v5447_v0  ;;  %5817 = vmatpush1.msra.mxu1 %v5575_v26  ;;  %v5671_v0 = vld [vmem:[#allocation8 + $0xfa0] sm:$0xff]  ;;  %v5540_v26 = vld [vmem:[#allocation8 + $0xb88] sm:$0xff] }
 0xabd   :  { %5705 = vmatprep.subr.mxu0 %v5444_v36  ;;  %5818 = vmatprep.subr.mxu1 %v5572_v9  ;;  %v5668_v36 = vld [vmem:[#allocation8 + $0xf88] sm:$0xff]  ;;  %v5539_v9 = vld [vmem:[#allocation8 + $0xb80] sm:$0xff] }
 0xabe   :  { %5706 = vmatpush1.msra.mxu0 %v5443_v18  ;;  %5819 = vmatpush1.msra.mxu1 %v5571_v3  ;;  %v5667_v18 = vld [vmem:[#allocation8 + $0xf80] sm:$0xff]  ;;  %v5536_v3 = vld [vmem:[#allocation8 + $0xb68] sm:$0xff] }
 0xabf   :  { %5707 = vmatprep.subr.mxu0 %v5440_v41  ;;  %5820 = vmatprep.subr.mxu1 %v5568_v56  ;;  %v5664_v41 = vld [vmem:[#allocation8 + $0xf68] sm:$0xff]  ;;  %v5535_v56 = vld [vmem:[#allocation8 + $0xb60] sm:$0xff] }
 0xac0   :  { %5708 = vmatpush1.msra.mxu0 %v5439_v16  ;;  %5821 = vmatpush1.msra.mxu1 %v5567_v5  ;;  %v5663_v16 = vld [vmem:[#allocation8 + $0xf60] sm:$0xff]  ;;  %v5532_v5 = vld [vmem:[#allocation8 + $0xb48] sm:$0xff] }
 0xac1   :  { %5709 = vmatprep.subr.mxu0 %v5436_v30  ;;  %5822 = vmatprep.subr.mxu1 %v5564_v25  ;;  %v5660_v30 = vld [vmem:[#allocation8 + $0xf48] sm:$0xff]  ;;  %v5531_v25 = vld [vmem:[#allocation8 + $0xb40] sm:$0xff] }
 0xac2   :  { %5710 = vmatpush1.msra.mxu0 %v5435_v37  ;;  %5823 = vmatpush1.msra.mxu1 %v5563_v8  ;;  %v5659_v37 = vld [vmem:[#allocation8 + $0xf40] sm:$0xff]  ;;  %v5528_v8 = vld [vmem:[#allocation8 + $0xb28] sm:$0xff] }
 0xac3   :  { %5711 = vmatprep.subr.mxu0 %v5432_v58  ;;  %5824 = vmatprep.subr.mxu1 %v5560_v38  ;;  %v5656_v58 = vld [vmem:[#allocation8 + $0xf28] sm:$0xff]  ;;  %v5527_v38 = vld [vmem:[#allocation8 + $0xb20] sm:$0xff] }
 0xac4   :  { %5712 = vmatpush1.msra.mxu0 %v5431_v43  ;;  %5825 = vmatpush1.msra.mxu1 %v5559_v48  ;;  %v5655_v43 = vld [vmem:[#allocation8 + $0xf20] sm:$0xff]  ;;  %v5524_v48 = vld [vmem:[#allocation8 + $0xb08] sm:$0xff] }
 0xac5   :  { %5713 = vmatprep.subr.mxu0 %v5428_v62  ;;  %5826 = vmatprep.subr.mxu1 %v5556_v35  ;;  %v5652_v62 = vld [vmem:[#allocation8 + $0xf08] sm:$0xff]  ;;  %v5523_v35 = vld [vmem:[#allocation8 + $0xb00] sm:$0xff] }
 0xac6   :  { %5714 = vmatpush1.msra.mxu0 %v5427_v21  ;;  %5827 = vmatpush1.msra.mxu1 %v5555_v29  ;;  %v5651_v21 = vld [vmem:[#allocation8 + $0xf00] sm:$0xff]  ;;  %v5520_v29 = vld [vmem:[#allocation8 + $0xae8] sm:$0xff] }
 0xac7   :  { %5715 = vmatprep.subr.mxu0 %v5552_v60  ;;  %5828 = vmatprep.subr.mxu1 %v5680_v61  ;;  %v5648_v60 = vld [vmem:[#allocation8 + $0xee8] sm:$0xff]  ;;  %v5519_v61 = vld [vmem:[#allocation8 + $0xae0] sm:$0xff] }
 0xac8   :  { %5716 = vmatpush2.msra.mxu0 %v5551_v57  ;;  %5829 = vmatpush2.msra.mxu1 %v5679_v34  ;;  %v5647_v57 = vld [vmem:[#allocation8 + $0xee0] sm:$0xff]  ;;  %v5516_v34 = vld [vmem:[#allocation8 + $0xac8] sm:$0xff] }
 0xac9   :  { %5717 = vmatprep.subr.mxu0 %v5548_v10  ;;  %5830 = vmatprep.subr.mxu1 %v5676_v47  ;;  %v5644_v10 = vld [vmem:[#allocation8 + $0xec8] sm:$0xff]  ;;  %v5515_v47 = vld [vmem:[#allocation8 + $0xac0] sm:$0xff] }
 0xaca   :  { %5718 = vmatpush2.msra.mxu0 %v5547_v44  ;;  %5831 = vmatpush2.msra.mxu1 %v5675_v24  ;;  %v5643_v44 = vld [vmem:[#allocation8 + $0xec0] sm:$0xff]  ;;  %v5512_v24 = vld [vmem:[#allocation8 + $0xaa8] sm:$0xff] }
 0xacb   :  { %5719 = vmatprep.subr.mxu0 %v5544_v42  ;;  %5832 = vmatprep.subr.mxu1 %v5672_v39  ;;  %v5640_v42 = vld [vmem:[#allocation8 + $0xea8] sm:$0xff]  ;;  %v5511_v39 = vld [vmem:[#allocation8 + $0xaa0] sm:$0xff] }
 0xacc   :  { %5720 = vmatpush2.msra.mxu0 %v5543_v33  ;;  %5833 = vmatpush2.msra.mxu1 %v5671_v0  ;;  %v5639_v33 = vld [vmem:[#allocation8 + $0xea0] sm:$0xff]  ;;  %v5508_v0 = vld [vmem:[#allocation8 + $0xa88] sm:$0xff] }
 0xacd   :  { %5721 = vmatprep.subr.mxu0 %v5540_v26  ;;  %5834 = vmatprep.subr.mxu1 %v5668_v36  ;;  %v5636_v26 = vld [vmem:[#allocation8 + $0xe88] sm:$0xff]  ;;  %v5507_v36 = vld [vmem:[#allocation8 + $0xa80] sm:$0xff] }
 0xace   :  { %5722 = vmatpush2.msra.mxu0 %v5539_v9  ;;  %5835 = vmatpush2.msra.mxu1 %v5667_v18  ;;  %v5635_v9 = vld [vmem:[#allocation8 + $0xe80] sm:$0xff]  ;;  %v5504_v18 = vld [vmem:[#allocation8 + $0xa68] sm:$0xff] }
 0xacf   :  { %5723 = vmatprep.subr.mxu0 %v5536_v3  ;;  %5836 = vmatprep.subr.mxu1 %v5664_v41  ;;  %v5632_v3 = vld [vmem:[#allocation8 + $0xe68] sm:$0xff]  ;;  %v5503_v41 = vld [vmem:[#allocation8 + $0xa60] sm:$0xff] }
 0xad0   :  { %5724 = vmatpush2.msra.mxu0 %v5535_v56  ;;  %5837 = vmatpush2.msra.mxu1 %v5663_v16  ;;  %v5631_v56 = vld [vmem:[#allocation8 + $0xe60] sm:$0xff]  ;;  %v5500_v16 = vld [vmem:[#allocation8 + $0xa48] sm:$0xff] }
 0xad1   :  { %5725 = vmatprep.subr.mxu0 %v5532_v5  ;;  %5838 = vmatprep.subr.mxu1 %v5660_v30  ;;  %v5628_v5 = vld [vmem:[#allocation8 + $0xe48] sm:$0xff]  ;;  %v5499_v30 = vld [vmem:[#allocation8 + $0xa40] sm:$0xff] }
 0xad2   :  { %5726 = vmatpush2.msra.mxu0 %v5531_v25  ;;  %5839 = vmatpush2.msra.mxu1 %v5659_v37  ;;  %v5627_v25 = vld [vmem:[#allocation8 + $0xe40] sm:$0xff]  ;;  %v5496_v37 = vld [vmem:[#allocation8 + $0xa28] sm:$0xff] }
 0xad3   :  { %5727 = vmatprep.subr.mxu0 %v5528_v8  ;;  %5840 = vmatprep.subr.mxu1 %v5656_v58  ;;  %v5624_v8 = vld [vmem:[#allocation8 + $0xe28] sm:$0xff]  ;;  %v5495_v58 = vld [vmem:[#allocation8 + $0xa20] sm:$0xff] }
 0xad4   :  { %5728 = vmatpush2.msra.mxu0 %v5527_v38  ;;  %5841 = vmatpush2.msra.mxu1 %v5655_v43  ;;  %v5623_v38 = vld [vmem:[#allocation8 + $0xe20] sm:$0xff]  ;;  %v5492_v43 = vld [vmem:[#allocation8 + $0xa08] sm:$0xff] }
 0xad5   :  { %5729 = vmatprep.subr.mxu0 %v5524_v48  ;;  %5842 = vmatprep.subr.mxu1 %v5652_v62  ;;  %v5620_v48 = vld [vmem:[#allocation8 + $0xe08] sm:$0xff]  ;;  %v5491_v62 = vld [vmem:[#allocation8 + $0xa00] sm:$0xff] }
 0xad6   :  { %5730 = vmatpush2.msra.mxu0 %v5523_v35  ;;  %5843 = vmatpush2.msra.mxu1 %v5651_v21  ;;  %v5619_v35 = vld [vmem:[#allocation8 + $0xe00] sm:$0xff]  ;;  %v5490_v21 = vld [vmem:[#allocation8 + $0x9f8] sm:$0xff] }
 0xad7   :  { %5731 = vmatprep.subr.mxu0 %v5520_v29  ;;  %5844 = vmatprep.subr.mxu1 %v5648_v60  ;;  %v5618_v29 = vld [vmem:[#allocation8 + $0xdf8] sm:$0xff] }
 0xad8   :  { %5732 = vmatpush2.msra.mxu0 %v5519_v61  ;;  %5845 = vmatpush2.msra.mxu1 %v5647_v57 }
 0xad9   :  { %5733 = vmatprep.subr.mxu0 %v5516_v34  ;;  %5846 = vmatprep.subr.mxu1 %v5644_v10 }
 0xada   :  { %5734 = vmatpush2.msra.mxu0 %v5515_v47  ;;  %5847 = vmatpush2.msra.mxu1 %v5643_v44 }
 0xadb   :  { %5735 = vmatprep.subr.mxu0 %v5512_v24  ;;  %5848 = vmatprep.subr.mxu1 %v5640_v42 }
 0xadc   :  { %5736 = vmatpush2.msra.mxu0 %v5511_v39  ;;  %5849 = vmatpush2.msra.mxu1 %v5639_v33 }
 0xadd   :  { %5737 = vmatprep.subr.mxu0 %v5508_v0  ;;  %5850 = vmatprep.subr.mxu1 %v5636_v26 }
 0xade   :  { %5738 = vmatpush2.msra.mxu0 %v5507_v36  ;;  %5851 = vmatpush2.msra.mxu1 %v5635_v9 }
 0xadf   :  { %5739 = vmatprep.subr.mxu0 %v5504_v18  ;;  %5852 = vmatprep.subr.mxu1 %v5632_v3 }
 0xae0   :  { %5740 = vmatpush2.msra.mxu0 %v5503_v41  ;;  %5853 = vmatpush2.msra.mxu1 %v5631_v56 }
 0xae1   :  { %5741 = vmatprep.subr.mxu0 %v5500_v16  ;;  %5854 = vmatprep.subr.mxu1 %v5628_v5 }
 0xae2   :  { %5742 = vmatpush2.msra.mxu0 %v5499_v30  ;;  %5855 = vmatpush2.msra.mxu1 %v5627_v25 }
 0xae3   :  { %5743 = vmatprep.subr.mxu0 %v5496_v37  ;;  %5856 = vmatprep.subr.mxu1 %v5624_v8 }
 0xae4   :  { %5744 = vmatpush2.msra.mxu0 %v5495_v58  ;;  %5857 = vmatpush2.msra.mxu1 %v5623_v38 }
 0xae5   :  { %5745 = vmatprep.subr.mxu0 %v5492_v43  ;;  %5858 = vmatprep.subr.mxu1 %v5620_v48 }
 0xae6   :  { %5746 = vmatpush2.msra.mxu0 %v5491_v62  ;;  %5859 = vmatpush2.msra.mxu1 %v5619_v35 }
 0xae7   :  { %5909 = vmatprep.subr.mxu0 %v5490_v21  ;;  %6022 = vmatprep.subr.mxu1 %v5618_v29 }
 0xb61   :  { %v4460_v60 = vpop.f32.mrf.mxu0  ;;  %v4531_v61 = vpop.f32.mrf.mxu1 }
 0xb62   :  { %v4685_v57 = vrot.slane %v4460_v60, %v11103_v59  ;;  %v4693_v34 = vrot.slane %v4531_v61, %v11103_v59 }
 0xb63   :  { %v4462_v10 = vpop.f32.mrf.mxu0  ;;  %v4533_v47 = vpop.f32.mrf.mxu1 }
 0xb64   :  { %v4698_v44 = vmul.f32 %v4685_v57, %v11724_v4  ;;  %v4702_v24 = vmul.f32 %v4685_v57, %v11733_v32  ;;  %v4706_v42 = vmul.f32 %v4685_v57, %v11737_v45  ;;  %v4710_v39 = vmul.f32 %v4685_v57, %v11755_v7 }
 0xb65   :  { %v4714_v33 = vmul.f32 %v4685_v57, %v11759_v46  ;;  %v4718_v0 = vmul.f32 %v4685_v57, %v11779_v49  ;;  %v4722_v26 = vmul.f32 %v4685_v57, %v11826_v2  ;;  %v4726_v36 = vmul.f32 %v4685_v57, %v11842_v13 }
 0xb66   :  { %v11915_v9 = vmul.f32 %v4693_v34, %v11809_v63  ;;  %v11918_v18 = vmul.f32 %v4693_v34, %v11820_v53  ;;  %v4606_v4 = vpop.f32.mrf.mxu0  ;;  %v4677_v32 = vpop.f32.mrf.mxu1  ;;  %v11921_v45 = vmul.f32 %v4693_v34, %v11830_v22  ;;  %v11924_v7 = vmul.f32 %v4693_v34, %v11846_v40 }
 0xb67   :  { %v11927_v46 = vmul.f32 %v4693_v34, %v11852_v15  ;;  %v11930_v49 = vmul.f32 %v4693_v34, %v11860_v52  ;;  %v11933_v63 = vmul.f32 %v4693_v34, %v11868_v50  ;;  %v11936_v53 = vmul.f32 %v4693_v34, %v11874_v27 }
 0xb68   :  { %v4689_v2 = vrot.slane %v4462_v10, %v11103_v59  ;;  %v4697_v22 = vrot.slane %v4533_v47, %v11103_v59  ;;  %v4608_v13 = vpop.f32.mrf.mxu0  ;;  %v4679_v3 = vpop.f32.mrf.mxu1  ;;  %v4733_v40 = vrot.slane %v4606_v4, %v11103_v59  ;;  %v11942_v15 = vrot.slane %v4677_v32, %v11103_v59 }
 0xb69   :  { %v11945_v52 = vrot.slane %v4608_v13, %v11103_v59  ;;  %v11948_v50 = vrot.slane %v4679_v3, %v11103_v59  ;;  %v6899_v59 = vld [vmem:[#allocation8 + $0x1578] sm:$0xff] }
 0xb6a   :  { %v11951_v27 = vmul.f32 %v4689_v2, %v11704_v20  ;;  %v11954_v41 = vmul.f32 %v4689_v2, %v11707_v23  ;;  %v11957_v56 = vmul.f32 %v4689_v2, %v11710_v55  ;;  %v11960_v16 = vmul.f32 %v4689_v2, %v11713_v31 }
 0xb6b   :  { %v11963_v5 = vmul.f32 %v4689_v2, %v11727_v54  ;;  %v11966_v30 = vmul.f32 %v4689_v2, %v11749_v11  ;;  %v11969_v25 = vmul.f32 %v4689_v2, %v11769_v14  ;;  %v11972_v20 = vmul.f32 %v4689_v2, %v11772_v28  ;;  %v14222_v14 = vld [vmem:[#allocation85_spill] sm:$0xff]  ;;  %v14223_v28 = vld [vmem:[#allocation86_spill] sm:$0xff] }
 0xb6c   :  { %v11975_v23 = vmul.f32 %v4697_v22, %v11740_v6  ;;  %v11978_v55 = vmul.f32 %v4697_v22, %v11743_v1  ;;  %v11981_v31 = vmul.f32 %v4697_v22, %v11746_v51  ;;  %v11984_v54 = vmul.f32 %v4697_v22, %v11762_v19  ;;  %v14224_v6 = vld [vmem:[#allocation87_spill] sm:$0xff] }
 0xb6d   :  { %v11987_v11 = vmul.f32 %v4697_v22, %v11775_v12  ;;  %v11990_v37 = vmul.f32 %v4697_v22, %v14222_v14  ;;  %v11993_v8 = vmul.f32 %v4697_v22, %v14223_v28  ;;  %v11996_v58 = vmul.f32 %v4697_v22, %v14224_v6 }
 0xb6e   :  { %v4746_v1 = vadd.f32 %v4733_v40, %v4698_v44  ;;  %v4750_v38 = vadd.f32 %v4733_v40, %v4702_v24  ;;  %v4754_v43 = vadd.f32 %v4733_v40, %v4706_v42  ;;  %v4758_v51 = vadd.f32 %v4733_v40, %v4710_v39 }
 0xb6f   :  { %v4762_v48 = vadd.f32 %v4733_v40, %v4714_v33  ;;  %v4766_v62 = vadd.f32 %v4733_v40, %v4718_v0  ;;  %v4770_v19 = vadd.f32 %v4733_v40, %v4722_v26  ;;  %v4774_v35 = vadd.f32 %v4733_v40, %v4726_v36 }
 0xb70   :  { %v4778_v21 = vmax.f32 %v4746_v1, 0.0  ;;  %v4782_v12 = vmax.f32 %v4750_v38, 0.0  ;;  %v4786_v29 = vmax.f32 %v4754_v43, 0.0  ;;  %v4790_v60 = vmax.f32 %v4758_v51, 0.0 }
 0xb71   :  { %v4794_v61 = vmax.f32 %v4762_v48, 0.0  ;;  %v4798_v57 = vmax.f32 %v4766_v62, 0.0  ;;  %v4802_v34 = vmax.f32 %v4770_v19, 0.0  ;;  %v4806_v10 = vmax.f32 %v4774_v35, 0.0 }
 0xb72   :  { %v4842_v47 = vrot.slane %v4778_v21, 7  ;;  %v4846_v4 = vrot.slane %v4782_v12, 7  ;;  %v4854_v32 = vrot.slane %v4786_v29, 7  ;;  %v4862_v2 = vrot.slane %v4790_v60, 7 }
 0xb73   :  { %v4870_v44 = vrot.slane %v4794_v61, 7  ;;  %v4874_v24 = vrot.slane %v4798_v57, 7  ;;  %v4882_v42 = vrot.slane %v4802_v34, 7  ;;  %v4890_v39 = vrot.slane %v4806_v10, 7 }
 0xb74   :  { %v11999_v33 = vsel %vm331_vm0, %v4842_v47, %v4846_v4  ;;  %v12002_v0 = vsel %vm331_vm0, %v4846_v4, %v4854_v32  ;;  %v12005_v26 = vsel %vm331_vm0, %v4854_v32, %v4862_v2  ;;  %4938 = vst [vmem:[#allocation2] sm:$0xfe] %v4842_v47  ;;  %4954 = vst [vmem:[#allocation2 + $0x80] sm:$0x1] %v4862_v2 }
 0xb75   :  { %v4748_v36 = vadd.f32 %v11942_v15, %v11915_v9  ;;  %v12010_v22 = vsel %vm331_vm0, %v4870_v44, %v4874_v24  ;;  %v12013_v13 = vsel %vm331_vm0, %v4874_v24, %v4882_v42  ;;  %v12016_v3 = vsel %vm331_vm0, %v4882_v42, %v4890_v39  ;;  %4942 = vst [vmem:[#allocation2 + $0x20] sm:$0xff] %v11999_v33 }
 0xb76   :  { %4946 = vst [vmem:[#allocation2 + $0x40] sm:$0xff] %v12002_v0  ;;  %4950 = vst [vmem:[#allocation2 + $0x60] sm:$0xff] %v12005_v26  ;;  %v4752_v9 = vadd.f32 %v11942_v15, %v11918_v18  ;;  %v4756_v40 = vadd.f32 %v11942_v15, %v11921_v45  ;;  %v4760_v14 = vadd.f32 %v11942_v15, %v11924_v7 }
 0xb77   :  { %4958 = vst [vmem:[#allocation2 + $0xa0] sm:$0xfe] %v4870_v44  ;;  %4974 = vst [vmem:[#allocation2 + $0x120] sm:$0x1] %v4890_v39  ;;  %v4764_v28 = vadd.f32 %v11942_v15, %v11927_v46  ;;  %v4768_v6 = vadd.f32 %v11942_v15, %v11930_v49  ;;  %v4772_v18 = vadd.f32 %v11942_v15, %v11933_v63  ;;  %v4780_v38 = vmax.f32 %v4748_v36, 0.0 }
 0xb78   :  { %4962 = vst [vmem:[#allocation2 + $0xc0] sm:$0xff] %v12010_v22  ;;  %4966 = vst [vmem:[#allocation2 + $0xe0] sm:$0xff] %v12013_v13  ;;  %v4776_v1 = vadd.f32 %v11942_v15, %v11936_v53  ;;  %v4784_v43 = vmax.f32 %v4752_v9, 0.0  ;;  %v4788_v51 = vmax.f32 %v4756_v40, 0.0  ;;  %v4792_v48 = vmax.f32 %v4760_v14, 0.0 }
 0xb79   :  { %4970 = vst [vmem:[#allocation2 + $0x100] sm:$0xff] %v12016_v3  ;;  %v4796_v45 = vmax.f32 %v4764_v28, 0.0  ;;  %v4800_v62 = vmax.f32 %v4768_v6, 0.0  ;;  %v4804_v19 = vmax.f32 %v4772_v18, 0.0  ;;  %v4844_v35 = vrot.slane %v4780_v38, 7 }
 0xb7a   :  { %v4808_v7 = vmax.f32 %v4776_v1, 0.0  ;;  %v4850_v21 = vrot.slane %v4784_v43, 7  ;;  %v4858_v46 = vrot.slane %v4788_v51, 7  ;;  %v4866_v12 = vrot.slane %v4792_v48, 7 }
 0xb7b   :  { %v4872_v29 = vrot.slane %v4796_v45, 7  ;;  %v4878_v49 = vrot.slane %v4800_v62, 7  ;;  %v4886_v63 = vrot.slane %v4804_v19, 7  ;;  %4940 = vst [vmem:[#allocation2 + $0x10] sm:$0xfe] %v4844_v35  ;;  %v4747_v53 = vadd.f32 %v11945_v52, %v11951_v27 }
 0xb7c   :  { %v12039_v60 = vsel %vm331_vm0, %v4844_v35, %v4850_v21  ;;  %v4894_v61 = vrot.slane %v4808_v7, 7  ;;  %v12044_v15 = vsel %vm331_vm0, %v4850_v21, %v4858_v46  ;;  %v12047_v57 = vsel %vm331_vm0, %v4858_v46, %v4866_v12  ;;  %4956 = vst [vmem:[#allocation2 + $0x90] sm:$0x1] %v4866_v12 }
 0xb7d   :  { %v12050_v34 = vsel %vm331_vm0, %v4872_v29, %v4878_v49  ;;  %4944 = vst [vmem:[#allocation2 + $0x30] sm:$0xff] %v12039_v60  ;;  %4960 = vst [vmem:[#allocation2 + $0xb0] sm:$0xfe] %v4872_v29  ;;  %v4751_v10 = vadd.f32 %v11945_v52, %v11954_v41  ;;  %v12056_v47 = vsel %vm331_vm0, %v4878_v49, %v4886_v63 }
 0xb7e   :  { %v12059_v27 = vsel %vm331_vm0, %v4886_v63, %v4894_v61  ;;  %4948 = vst [vmem:[#allocation2 + $0x50] sm:$0xff] %v12044_v15  ;;  %4952 = vst [vmem:[#allocation2 + $0x70] sm:$0xff] %v12047_v57  ;;  %v4755_v4 = vadd.f32 %v11945_v52, %v11957_v56  ;;  %v4759_v32 = vadd.f32 %v11945_v52, %v11960_v16  ;;  %v4779_v56 = vmax.f32 %v4747_v53, 0.0 }
 0xb7f   :  { %4964 = vst [vmem:[#allocation2 + $0xd0] sm:$0xff] %v12050_v34  ;;  %4976 = vst [vmem:[#allocation2 + $0x130] sm:$0x1] %v4894_v61  ;;  %v4763_v41 = vadd.f32 %v11945_v52, %v11963_v5  ;;  %v4767_v2 = vadd.f32 %v11945_v52, %v11966_v30  ;;  %v4771_v44 = vadd.f32 %v11945_v52, %v11969_v25  ;;  %v4783_v42 = vmax.f32 %v4751_v10, 0.0 }
 0xb80   :  { %4968 = vst [vmem:[#allocation2 + $0xf0] sm:$0xff] %v12056_v47  ;;  %4972 = vst [vmem:[#allocation2 + $0x110] sm:$0xff] %v12059_v27  ;;  %v4775_v24 = vadd.f32 %v11945_v52, %v11972_v20  ;;  %v4787_v39 = vmax.f32 %v4755_v4, 0.0  ;;  %v4791_v16 = vmax.f32 %v4759_v32, 0.0  ;;  %v4843_v28 = vrot.slane %v4779_v56, 7 }
 0xb81   :  { %v4795_v36 = vmax.f32 %v4763_v41, 0.0  ;;  %v4799_v9 = vmax.f32 %v4767_v2, 0.0  ;;  %v4803_v40 = vmax.f32 %v4771_v44, 0.0  ;;  %v4848_v6 = vrot.slane %v4783_v42, 7  ;;  %v5266_v2 = vld [vmem:[#allocation2] sm:$0xfe] }
 0xb82   :  { %v4807_v14 = vmax.f32 %v4775_v24, 0.0  ;;  %v4856_v5 = vrot.slane %v4787_v39, 7  ;;  %v4864_v18 = vrot.slane %v4791_v16, 7  ;;  %4939 = vst [vmem:[#allocation2 + $0x8] sm:$0xfe] %v4843_v28  ;;  %v4749_v51 = vadd.f32 %v11948_v50, %v11975_v23 }
 0xb83   :  { %v4871_v1 = vrot.slane %v4795_v36, 7  ;;  %v4876_v30 = vrot.slane %v4799_v9, 7  ;;  %v4884_v38 = vrot.slane %v4803_v40, 7  ;;  %v12079_v25 = vsel %vm331_vm0, %v4843_v28, %v4848_v6  ;;  %v6593_v17 = vld [vmem:[#allocation2 + $0x90] sm:$0x3] }
 0xb84   :  { %v4892_v43 = vrot.slane %v4807_v14, 7  ;;  %v12082_v52 = vsel %vm331_vm0, %v4848_v6, %v4856_v5  ;;  %v12085_v20 = vsel %vm331_vm0, %v4856_v5, %v4864_v18  ;;  %4955 = vst [vmem:[#allocation2 + $0x88] sm:$0x1] %v4864_v18  ;;  %4943 = vst [vmem:[#allocation2 + $0x28] sm:$0xff] %v12079_v25  ;;  %v4753_v23 = vadd.f32 %v11948_v50, %v11978_v55  ;;  %v5268_v6 = vld [vmem:[#allocation2 + $0x10] sm:$0xfe] }
 0xb85   :  { %v12090_v48 = vsel %vm331_vm0, %v4871_v1, %v4876_v30  ;;  %v12093_v45 = vsel %vm331_vm0, %v4876_v30, %v4884_v38  ;;  %4947 = vst [vmem:[#allocation2 + $0x48] sm:$0xff] %v12082_v52  ;;  %4951 = vst [vmem:[#allocation2 + $0x68] sm:$0xff] %v12085_v20  ;;  %v4757_v19 = vadd.f32 %v11948_v50, %v11981_v31  ;;  %v4781_v12 = vmax.f32 %v4749_v51, 0.0  ;;  %v5489_v5 = vld [vmem:[#allocation8 + $0x9f0] sm:$0xff]  ;;  %v5486_v30 = vld [vmem:[#allocation8 + $0x9d8] sm:$0xff] }
 0xb86   :  { %v12096_v62 = vsel %vm331_vm0, %v4884_v38, %v4892_v43  ;;  %4959 = vst [vmem:[#allocation2 + $0xa8] sm:$0xfe] %v4871_v1  ;;  %4975 = vst [vmem:[#allocation2 + $0x128] sm:$0x1] %v4892_v43  ;;  %v4761_v7 = vadd.f32 %v11948_v50, %v11984_v54  ;;  %v4765_v35 = vadd.f32 %v11948_v50, %v11987_v11  ;;  %v4785_v29 = vmax.f32 %v4753_v23, 0.0  ;;  %v5482_v23 = vld [vmem:[#allocation8 + $0x9b8] sm:$0xff] }
 0xb87   :  { %4963 = vst [vmem:[#allocation2 + $0xc8] sm:$0xff] %v12090_v48  ;;  %4967 = vst [vmem:[#allocation2 + $0xe8] sm:$0xff] %v12093_v45  ;;  %v4769_v21 = vadd.f32 %v11948_v50, %v11990_v37  ;;  %v4773_v55 = vadd.f32 %v11948_v50, %v11993_v8  ;;  %v4777_v46 = vadd.f32 %v11948_v50, %v11996_v58  ;;  %v4789_v49 = vmax.f32 %v4757_v19, 0.0 }
 0xb88   :  { %4971 = vst [vmem:[#allocation2 + $0x108] sm:$0xff] %v12096_v62  ;;  %v4793_v63 = vmax.f32 %v4761_v7, 0.0  ;;  %v4797_v31 = vmax.f32 %v4765_v35, 0.0  ;;  %v4845_v10 = vrot.slane %v4781_v12, 7  ;;  %v4852_v4 = vrot.slane %v4785_v29, 7  ;;  %v5617_v29 = vld [vmem:[#allocation8 + $0xdf0] sm:$0xff] }
 0xb89   :  { %v4801_v61 = vmax.f32 %v4769_v21, 0.0  ;;  %v4805_v53 = vmax.f32 %v4773_v55, 0.0  ;;  %v4809_v54 = vmax.f32 %v4777_v46, 0.0  ;;  %v4860_v11 = vrot.slane %v4789_v49, 7  ;;  %v5267_v50 = vld [vmem:[#allocation2 + $0x8] sm:$0xfe] }
 0xb8a   :  { %v4868_v32 = vrot.slane %v4793_v63, 7  ;;  %v4873_v41 = vrot.slane %v4797_v31, 7  ;;  %v4853_v8 = vsel %vm331_vm0, %v4845_v10, %v4852_v4  ;;  %4941 = vst [vmem:[#allocation2 + $0x18] sm:$0xfe] %v4845_v10  ;;  %v5326_v58 = vrot.slane %v12079_v25, 1  ;;  %v5485_v25 = vld [vmem:[#allocation8 + $0x9d0] sm:$0xff] }
 0xb8b   :  { %v4880_v37 = vrot.slane %v4801_v61, 7  ;;  %v4888_v44 = vrot.slane %v4805_v53, 7  ;;  %v4896_v24 = vrot.slane %v4809_v54, 7  ;;  %v12121_v56 = vsel %vm331_vm0, %v4852_v4, %v4860_v11  ;;  %4945 = vst [vmem:[#allocation2 + $0x38] sm:$0xff] %v4853_v8  ;;  %v5481_v21 = vld [vmem:[#allocation8 + $0x9b0] sm:$0xff]  ;;  %v5614_v63 = vld [vmem:[#allocation8 + $0xdd8] sm:$0xff] }
 0xb8c   :  { %v12124_v42 = vsel %vm331_vm0, %v4860_v11, %v4868_v32  ;;  %4957 = vst [vmem:[#allocation2 + $0x98] sm:$0x1] %v4868_v32  ;;  %4961 = vst [vmem:[#allocation2 + $0xb8] sm:$0xfe] %v4873_v41  ;;  %v5325_v16 = vrot.slane %v5267_v50, 1  ;;  %v5322_v40 = vrot.slane %v5266_v2, 1 }
 0xb8d   :  { %v12127_v39 = vsel %vm331_vm0, %v4873_v41, %v4880_v37  ;;  %v12130_v36 = vsel %vm331_vm0, %v4880_v37, %v4888_v44  ;;  %v12133_v9 = vsel %vm331_vm0, %v4888_v44, %v4896_v24  ;;  %4949 = vst [vmem:[#allocation2 + $0x58] sm:$0xff] %v12121_v56  ;;  %4953 = vst [vmem:[#allocation2 + $0x78] sm:$0xff] %v12124_v42  ;;  %v5323_v28 = vrot.slane %v11999_v33, 1  ;;  %v5478_v61 = vld [vmem:[#allocation8 + $0x998] sm:$0xff]  ;;  %v5613_v54 = vld [vmem:[#allocation8 + $0xdd0] sm:$0xff] }
 0xb8e   :  { %4965 = vst [vmem:[#allocation2 + $0xd8] sm:$0xff] %v12127_v39  ;;  %4977 = vst [vmem:[#allocation2 + $0x138] sm:$0x1] %v4896_v24  ;;  %v12141_v14 = vsel %vm812_vm1, %v5325_v16, %v5326_v58  ;;  %v5336_v18 = vrot.slane %v12082_v52, 1  ;;  %v5334_v38 = vrot.slane %v12002_v0, 1  ;;  %v5328_v33 = vrot.slane %v5268_v6, 1 }
 0xb8f   :  { %4969 = vst [vmem:[#allocation2 + $0xf8] sm:$0xff] %v12130_v36  ;;  %4973 = vst [vmem:[#allocation2 + $0x118] sm:$0xff] %v12133_v9  ;;  %5747 = vmatprep.mubr.f32.mxu0 %v12141_v14  ;;  %v12147_v1 = vsel %vm812_vm1, %v5322_v40, %v5323_v28  ;;  %v5344_v52 = vrot.slane %v12085_v20, 1  ;;  %v5332_v7 = vrot.slane %v4853_v8, 1  ;;  %v5340_v35 = vrot.slane %v12121_v56, 1  ;;  %v5477_v4 = vld [vmem:[#allocation8 + $0x990] sm:$0xff] }
 0xb90   :  { %5748 = vmatmul.mubr.f32.vlgmr.msra.gmra.mxu0 %v12147_v1  ;;  %v12152_v43 = vsel %vm812_vm1, %v5326_v58, %v5336_v18  ;;  %v5329_v55 = vrot.slane %v12039_v60, 1  ;;  %v12161_v46 = vsel %vm812_vm1, %v5323_v28, %v5334_v38  ;;  %v5338_v60 = vrot.slane %v12044_v15, 1  ;;  %v5610_v15 = vld [vmem:[#allocation8 + $0xdb8] sm:$0xff]  ;;  %v5609_v11 = vld [vmem:[#allocation8 + $0xdb0] sm:$0xff]  ;;  %v5271_v41 = vld [vmem:[#allocation2 + $0x88] sm:$0x1] }
 0xb91   :  { %v5269_v51 = vld [vmem:[#allocation2 + $0x18] sm:$0xfe]  ;;  %5910 = vmatpush1.msra.mxu0 %v5489_v5  ;;  %5753 = vmatprep.mubr.f32.mxu0 %v12152_v43  ;;  %v12175_v31 = vsel %vm812_vm1, %v5336_v18, %v5344_v52  ;;  %v12179_v53 = vsel %vm812_vm1, %v5332_v7, %v5340_v35  ;;  %v5348_v10 = vrot.slane %v12124_v42, 1  ;;  %v5342_v32 = vrot.slane %v12005_v26, 1  ;;  %v5605_v58 = vld [vmem:[#allocation8 + $0xd90] sm:$0xff] }
 0xb92   :  { %v5331_v19 = vrot.slane %v5269_v51, 1  ;;  %5911 = vmatprep.subr.mxu0 %v5486_v30  ;;  %v12169_v49 = vsel %vm812_vm1, %v5328_v33, %v5329_v55  ;;  %v12186_v2 = vsel %vm812_vm1, %v5329_v55, %v5338_v60  ;;  %v5606_v8 = vld [vmem:[#allocation8 + $0xd98] sm:$0xff]  ;;  %v5346_v24 = vrot.slane %v12047_v57, 1  ;;  %v5473_v56 = vld [vmem:[#allocation8 + $0x970] sm:$0xff]  ;;  %v5270_v28 = vld [vmem:[#allocation2 + $0x80] sm:$0x1] }
 0xb93   :  { %5912 = vmatpush1.msra.mxu0 %v5485_v25  ;;  %v5273_v37 = vld [vmem:[#allocation2 + $0x98] sm:$0x1]  ;;  %v12191_v50 = vsel %vm812_vm1, %v5340_v35, %v5348_v10  ;;  %v5352_v42 = vrot.slane %v5271_v41, 1  ;;  %v12197_v57 = vsel %vm812_vm1, %v5334_v38, %v5342_v32  ;;  %v5601_v40 = vld [vmem:[#allocation8 + $0xd70] sm:$0xff]  ;;  %v5275_v25 = vld [vmem:[#allocation2 + $0xa8] sm:$0xfe] }
 0xb94   :  { %v12164_v12 = vsel %vm812_vm1, %v5331_v19, %v5332_v7  ;;  %5913 = vmatprep.subr.mxu0 %v5482_v23  ;;  %5754 = vmatmul.mubr.f32.gmra.mxu0 %v12161_v46  ;;  %v5474_v44 = vld [vmem:[#allocation8 + $0x978] sm:$0xff]  ;;  %v5356_v16 = vrot.slane %v5273_v37, 1  ;;  %v5272_v6 = vld [vmem:[#allocation2 + $0x90] sm:$0x1]  ;;  %v12201_v5 = vsel %vm812_vm1, %v5338_v60, %v5346_v24  ;;  %v5350_v19 = vrot.slane %v5270_v28, 1 }
 0xb95   :  { %5860 = vmatprep.mubr.f32.mxu1 %v12164_v12  ;;  %5914 = vmatpush1.msra.mxu0 %v5481_v21  ;;  %v5602_v26 = vld [vmem:[#allocation8 + $0xd78] sm:$0xff]  ;;  %v12207_v0 = vsel %vm812_vm1, %v5344_v52, %v5352_v42  ;;  %v5469_v33 = vld [vmem:[#allocation8 + $0x950] sm:$0xff]  ;;  %v5354_v7 = vrot.slane %v5272_v6, 1  ;;  %v5361_v20 = vrot.slane %v5275_v25, 1  ;;  %v5376_v42 = vrot.slane %v12130_v36, 1 }
 0xb96   :  { %5861 = vmatmul.mubr.f32.vlgmr.msra.gmra.mxu1 %v12169_v49  ;;  %5759 = vmatprep.mubr.f32.mxu0 %v12175_v31  ;;  %v5470_v18 = vld [vmem:[#allocation8 + $0x958] sm:$0xff]  ;;  %v12210_v38 = vsel %vm812_vm1, %v5348_v10, %v5356_v16  ;;  %v5597_v23 = vld [vmem:[#allocation8 + $0xd50] sm:$0xff]  ;;  %v5362_v10 = vrot.slane %v12090_v48, 1  ;;  %v5370_v25 = vrot.slane %v12013_v13, 1 }
 0xb97   :  { %6023 = vmatpush1.msra.mxu1 %v5617_v29  ;;  %5866 = vmatprep.mubr.f32.mxu1 %v12179_v53  ;;  %v5598_v30 = vld [vmem:[#allocation8 + $0xd58] sm:$0xff]  ;;  %v5465_v55 = vld [vmem:[#allocation8 + $0x930] sm:$0xff] }
 0xb98   :  { %6024 = vmatprep.subr.mxu1 %v5614_v63  ;;  %5915 = vmatprep.subr.mxu0 %v5478_v61  ;;  %v5277_v51 = vld [vmem:[#allocation2 + $0xb8] sm:$0xfe]  ;;  %v5593_v52 = vld [vmem:[#allocation8 + $0xd30] sm:$0xff]  ;;  %v5274_v63 = vld [vmem:[#allocation2 + $0xa0] sm:$0xfe]  ;;  %v12215_v61 = vsel %vm812_vm1, %v5342_v32, %v5350_v19  ;;  %v12225_v41 = vsel %vm812_vm1, %v5361_v20, %v5362_v10  ;;  %v5380_v19 = vrot.slane %v12096_v62, 1 }
 0xb99   :  { %6025 = vmatpush1.msra.mxu1 %v5613_v54  ;;  %5916 = vmatpush1.msra.mxu0 %v5477_v4  ;;  %v5466_v35 = vld [vmem:[#allocation8 + $0x938] sm:$0xff]  ;;  %v5367_v29 = vrot.slane %v5277_v51, 1  ;;  %v5276_v60 = vld [vmem:[#allocation2 + $0xb0] sm:$0xfe]  ;;  %v12218_v54 = vsel %vm812_vm1, %v5346_v24, %v5354_v7  ;;  %v5368_v4 = vrot.slane %v12127_v39, 1  ;;  %v5374_v51 = vrot.slane %v12056_v47, 1 }
 0xb9a   :  { %6026 = vmatprep.subr.mxu1 %v5610_v15  ;;  %5867 = vmatmul.mubr.f32.gmra.mxu1 %v12186_v2  ;;  %v5594_v21 = vld [vmem:[#allocation8 + $0xd38] sm:$0xff]  ;;  %v5461_v37 = vld [vmem:[#allocation8 + $0x910] sm:$0xff]  ;;  %v5364_v48 = vrot.slane %v5276_v60, 1  ;;  %v5384_v7 = vrot.slane %v12133_v9, 1  ;;  %v5279_v20 = vld [vmem:[#allocation2 + $0x128] sm:$0x1] }
 0xb9b   :  { %6027 = vmatpush1.msra.mxu1 %v5609_v11  ;;  %5872 = vmatprep.mubr.f32.mxu1 %v12191_v50  ;;  %v5462_v15 = vld [vmem:[#allocation8 + $0x918] sm:$0xff]  ;;  %v12228_v32 = vsel %vm812_vm1, %v5367_v29, %v5368_v4  ;;  %v5457_v16 = vld [vmem:[#allocation8 + $0x8f0] sm:$0xff]  ;;  %v12248_v36 = vsel %vm812_vm1, %v5368_v4, %v5376_v42  ;;  %v5382_v4 = vrot.slane %v12059_v27, 1 }
 0xb9c   :  { %6028 = vmatprep.subr.mxu1 %v5606_v8  ;;  %5917 = vmatprep.subr.mxu0 %v5474_v44  ;;  %v5590_v11 = vld [vmem:[#allocation8 + $0xd18] sm:$0xff]  ;;  %v5589_v8 = vld [vmem:[#allocation8 + $0xd10] sm:$0xff]  ;;  %v5358_v44 = vrot.slane %v5274_v63, 1 }
 0xb9d   :  { %6029 = vmatpush1.msra.mxu1 %v5605_v58  ;;  %5760 = vmatmul.mubr.f32.gmra.mxu0 %v12197_v57  ;;  %v5458_v39 = vld [vmem:[#allocation8 + $0x8f8] sm:$0xff]  ;;  %v5359_v58 = vrot.slane %v12010_v22, 1  ;;  %v5445_v63 = vld [vmem:[#allocation8 + $0x890] sm:$0xff]  ;;  %v12278_v27 = vsel %vm812_vm1, %v5374_v51, %v5382_v4 }
 0xb9e   :  { %6030 = vmatprep.subr.mxu1 %v5602_v26  ;;  %5873 = vmatmul.mubr.f32.gmra.mxu1 %v12201_v5  ;;  %v5586_v24 = vld [vmem:[#allocation8 + $0xcf8] sm:$0xff]  ;;  %v5365_v26 = vrot.slane %v12050_v34, 1  ;;  %v5573_v60 = vld [vmem:[#allocation8 + $0xc90] sm:$0xff] }
 0xb9f   :  { %5918 = vmatpush1.msra.mxu0 %v5473_v56  ;;  %6031 = vmatpush1.msra.mxu1 %v5601_v40  ;;  %v5372_v56 = vrot.slane %v12093_v45, 1  ;;  %v5585_v40 = vld [vmem:[#allocation8 + $0xcf0] sm:$0xff]  ;;  %v12237_v28 = vsel %vm812_vm1, %v5358_v44, %v5359_v58  ;;  %v5454_v22 = vld [vmem:[#allocation8 + $0x8d8] sm:$0xff]  ;;  %v12257_v13 = vsel %vm812_vm1, %v5359_v58, %v5370_v25 }
 0xba0   :  { %5765 = vmatprep.mubr.f32.mxu0 %v12207_v0  ;;  %5878 = vmatprep.mubr.f32.mxu1 %v12210_v38  ;;  %v12240_v6 = vsel %vm812_vm1, %v5364_v48, %v5365_v26  ;;  %v5582_v34 = vld [vmem:[#allocation8 + $0xcd8] sm:$0xff]  ;;  %v12260_v47 = vsel %vm812_vm1, %v5365_v26, %v5374_v51  ;;  %v5569_v48 = vld [vmem:[#allocation8 + $0xc70] sm:$0xff] }
 0xba1   :  { %5919 = vmatprep.subr.mxu0 %v5470_v18  ;;  %6032 = vmatprep.subr.mxu1 %v5598_v30  ;;  %v12245_v45 = vsel %vm812_vm1, %v5362_v10, %v5372_v56  ;;  %v5453_v18 = vld [vmem:[#allocation8 + $0x8d0] sm:$0xff]  ;;  %v5574_v62 = vld [vmem:[#allocation8 + $0xc98] sm:$0xff]  ;;  %v12265_v29 = vsel %vm812_vm1, %v5372_v56, %v5380_v19  ;;  %v5378_v10 = vrot.slane %v12016_v3, 1 }
 0xba2   :  { %5920 = vmatpush1.msra.mxu0 %v5469_v33  ;;  %6033 = vmatpush1.msra.mxu1 %v5597_v23  ;;  %v5581_v30 = vld [vmem:[#allocation8 + $0xcd0] sm:$0xff]  ;;  %v5450_v33 = vld [vmem:[#allocation8 + $0x8b8] sm:$0xff] }
 0xba3   :  { %5921 = vmatprep.subr.mxu0 %v5466_v35  ;;  %6034 = vmatprep.subr.mxu1 %v5594_v21  ;;  %v5578_v23 = vld [vmem:[#allocation8 + $0xcb8] sm:$0xff]  ;;  %v5449_v35 = vld [vmem:[#allocation8 + $0x8b0] sm:$0xff]  ;;  %v12275_v3 = vsel %vm812_vm1, %v5370_v25, %v5378_v10 }
 0xba4   :  { %5766 = vmatmul.mubr.f32.gmra.mxu0 %v12215_v61  ;;  %5879 = vmatmul.mubr.f32.gmra.mxu1 %v12218_v54  ;;  %v5577_v21 = vld [vmem:[#allocation8 + $0xcb0] sm:$0xff]  ;;  %v5281_v9 = vld [vmem:[#allocation2 + $0x138] sm:$0x1] }
 0xba5   :  { %5922 = vmatpush1.msra.mxu0 %v5465_v55  ;;  %6035 = vmatpush1.msra.mxu1 %v5593_v52  ;;  %v5446_v55 = vld [vmem:[#allocation8 + $0x898] sm:$0xff]  ;;  %v12268_v52 = vsel %vm812_vm1, %v5376_v42, %v5384_v7  ;;  %v5392_v44 = vrot.slane %v5281_v9, 1  ;;  %v5433_v25 = vld [vmem:[#allocation8 + $0x830] sm:$0xff] }
 0xba6   :  { %5771 = vmatprep.mubr.f32.mxu0 %v12225_v41  ;;  %5884 = vmatprep.mubr.f32.mxu1 %v12228_v32  ;;  %v5438_v58 = vld [vmem:[#allocation8 + $0x858] sm:$0xff]  ;;  %v5561_v51 = vld [vmem:[#allocation8 + $0xc30] sm:$0xff] }
 0xba7   :  { %5923 = vmatprep.subr.mxu0 %v5462_v15  ;;  %6036 = vmatprep.subr.mxu1 %v5590_v11  ;;  %v5442_v15 = vld [vmem:[#allocation8 + $0x878] sm:$0xff]  ;;  %v12286_v42 = vsel %vm812_vm1, %v5384_v7, %v5392_v44  ;;  %v5681_v9 = vld [vmem:[#allocation8 + $0xff0] sm:$0xff] }
 0xba8   :  { %5924 = vmatpush1.msra.mxu0 %v5461_v37  ;;  %6037 = vmatpush1.msra.mxu1 %v5589_v8  ;;  %v5570_v11 = vld [vmem:[#allocation8 + $0xc78] sm:$0xff]  ;;  %v5441_v37 = vld [vmem:[#allocation8 + $0x870] sm:$0xff]  ;;  %v5388_v8 = vrot.slane %v5279_v20, 1 }
 0xba9   :  { %5925 = vmatprep.subr.mxu0 %v5458_v39  ;;  %6038 = vmatprep.subr.mxu1 %v5586_v24  ;;  %v5278_v39 = vld [vmem:[#allocation2 + $0x120] sm:$0x1]  ;;  %v5280_v24 = vld [vmem:[#allocation2 + $0x130] sm:$0x1]  ;;  %v5566_v26 = vld [vmem:[#allocation8 + $0xc58] sm:$0xff] }
 0xbaa   :  { %5772 = vmatmul.mubr.f32.gmra.mxu0 %v12237_v28  ;;  %5885 = vmatmul.mubr.f32.gmra.mxu1 %v12240_v6  ;;  %v12283_v56 = vsel %vm812_vm1, %v5380_v19, %v5388_v8  ;;  %v5430_v19 = vld [vmem:[#allocation8 + $0x818] sm:$0xff]  ;;  %v5553_v20 = vld [vmem:[#allocation8 + $0xbf0] sm:$0xff] }
 0xbab   :  { %5926 = vmatpush1.msra.mxu0 %v5457_v16  ;;  %6039 = vmatpush1.msra.mxu1 %v5585_v40  ;;  %v5437_v16 = vld [vmem:[#allocation8 + $0x850] sm:$0xff]  ;;  %v5558_v7 = vld [vmem:[#allocation8 + $0xc18] sm:$0xff] }
 0xbac   :  { %5777 = vmatprep.mubr.f32.mxu0 %v12245_v45  ;;  %5890 = vmatprep.mubr.f32.mxu1 %v12248_v36  ;;  %v5565_v40 = vld [vmem:[#allocation8 + $0xc50] sm:$0xff]  ;;  %v5670_v8 = vld [vmem:[#allocation8 + $0xf98] sm:$0xff] }
 0xbad   :  { %5927 = vmatprep.subr.mxu0 %v5454_v22  ;;  %6040 = vmatprep.subr.mxu1 %v5582_v34  ;;  %v5386_v22 = vrot.slane %v5278_v39, 1  ;;  %v5390_v34 = vrot.slane %v5280_v24, 1  ;;  %v5541_v44 = vld [vmem:[#allocation8 + $0xb90] sm:$0xff]  ;;  %v5538_v39 = vld [vmem:[#allocation8 + $0xb78] sm:$0xff] }
 0xbae   :  { %5928 = vmatpush1.msra.mxu0 %v5453_v18  ;;  %6041 = vmatpush1.msra.mxu1 %v5581_v30  ;;  %v5434_v18 = vld [vmem:[#allocation8 + $0x838] sm:$0xff] }
 0xbaf   :  { %5929 = vmatprep.subr.mxu0 %v5450_v33  ;;  %6042 = vmatprep.subr.mxu1 %v5578_v23  ;;  %v5562_v30 = vld [vmem:[#allocation8 + $0xc38] sm:$0xff]  ;;  %v12291_v33 = vsel %vm812_vm1, %v5378_v10, %v5386_v22  ;;  %v12294_v23 = vsel %vm812_vm1, %v5382_v4, %v5390_v34  ;;  %v5549_v10 = vld [vmem:[#allocation8 + $0xbd0] sm:$0xff] }
 0xbb0   :  { %5778 = vmatmul.mubr.f32.gmra.mxu0 %v12257_v13  ;;  %5891 = vmatmul.mubr.f32.gmra.mxu1 %v12260_v47  ;;  %v5677_v4 = vld [vmem:[#allocation8 + $0xfd0] sm:$0xff]  ;;  %v5666_v24 = vld [vmem:[#allocation8 + $0xf78] sm:$0xff] }
 0xbb1   :  { %5930 = vmatpush1.msra.mxu0 %v5449_v35  ;;  %6043 = vmatpush1.msra.mxu1 %v5577_v21  ;;  %v5429_v35 = vld [vmem:[#allocation8 + $0x810] sm:$0xff] }
 0xbb2   :  { %5783 = vmatprep.mubr.f32.mxu0 %v12265_v29  ;;  %5896 = vmatprep.mubr.f32.mxu1 %v12268_v52  ;;  %v5557_v21 = vld [vmem:[#allocation8 + $0xc10] sm:$0xff] }
 0xbb3   :  { %5931 = vmatprep.subr.mxu0 %v5446_v55  ;;  %6044 = vmatprep.subr.mxu1 %v5574_v62  ;;  %v5554_v55 = vld [vmem:[#allocation8 + $0xbf8] sm:$0xff]  ;;  %v5533_v22 = vld [vmem:[#allocation8 + $0xb50] sm:$0xff] }
 0xbb4   :  { %5932 = vmatpush1.msra.mxu0 %v5445_v63  ;;  %6045 = vmatpush1.msra.mxu1 %v5573_v60  ;;  %v5682_v62 = vld [vmem:[#allocation8 + $0xff8] sm:$0xff]  ;;  %v5661_v34 = vld [vmem:[#allocation8 + $0xf50] sm:$0xff] }
 0xbb5   :  { %5933 = vmatprep.subr.mxu0 %v5442_v15  ;;  %6046 = vmatprep.subr.mxu1 %v5570_v11  ;;  %v5550_v63 = vld [vmem:[#allocation8 + $0xbd8] sm:$0xff] }
 0xbb6   :  { %5784 = vmatmul.mubr.f32.gmra.mxu0 %v12275_v3  ;;  %5897 = vmatmul.mubr.f32.gmra.mxu1 %v12278_v27  ;;  %v5678_v60 = vld [vmem:[#allocation8 + $0xfd8] sm:$0xff] }
 0xbb7   :  { %5934 = vmatpush1.msra.mxu0 %v5441_v37  ;;  %6047 = vmatpush1.msra.mxu1 %v5569_v48  ;;  %v5546_v15 = vld [vmem:[#allocation8 + $0xbb8] sm:$0xff]  ;;  %v5673_v37 = vld [vmem:[#allocation8 + $0xfb0] sm:$0xff] }
 0xbb8   :  { %5789 = vmatprep.mubr.f32.mxu0 %v12283_v56  ;;  %5902 = vmatprep.mubr.f32.mxu1 %v12286_v42  ;;  %v5674_v11 = vld [vmem:[#allocation8 + $0xfb8] sm:$0xff]  ;;  %v5669_v48 = vld [vmem:[#allocation8 + $0xf90] sm:$0xff] }
 0xbb9   :  { %5935 = vmatprep.subr.mxu0 %v5438_v58  ;;  %6048 = vmatprep.subr.mxu1 %v5566_v26  ;;  %v5537_v58 = vld [vmem:[#allocation8 + $0xb70] sm:$0xff] }
 0xbba   :  { %5936 = vmatpush1.msra.mxu0 %v5437_v16  ;;  %6049 = vmatpush1.msra.mxu1 %v5565_v40  ;;  %v5665_v26 = vld [vmem:[#allocation8 + $0xf70] sm:$0xff]  ;;  %v5534_v16 = vld [vmem:[#allocation8 + $0xb58] sm:$0xff] }
 0xbbb   :  { %5937 = vmatprep.subr.mxu0 %v5434_v18  ;;  %6050 = vmatprep.subr.mxu1 %v5562_v30  ;;  %v5662_v40 = vld [vmem:[#allocation8 + $0xf58] sm:$0xff] }
 0xbbc   :  { %5790 = vmatmul.mubr.f32.gmra.mxu0 %v12291_v33  ;;  %5903 = vmatmul.mubr.f32.gmra.mxu1 %v12294_v23  ;;  %v5530_v18 = vld [vmem:[#allocation8 + $0xb38] sm:$0xff] }
 0xbbd   :  { %5938 = vmatpush1.msra.mxu0 %v5433_v25  ;;  %6051 = vmatpush1.msra.mxu1 %v5561_v51  ;;  %v5658_v30 = vld [vmem:[#allocation8 + $0xf38] sm:$0xff]  ;;  %v5529_v25 = vld [vmem:[#allocation8 + $0xb30] sm:$0xff] }
 0xbbe   :  { %5939 = vmatprep.subr.mxu0 %v5430_v19  ;;  %5973 = vmatprep.mubr.f32.mxu0 %v12141_v14  ;;  %v5545_v14 = vld [vmem:[#allocation8 + $0xbb0] sm:$0xff]  ;;  %v5526_v19 = vld [vmem:[#allocation8 + $0xb18] sm:$0xff] }
 0xbbf   :  { %6052 = vmatprep.subr.mxu1 %v5558_v7  ;;  %6086 = vmatprep.mubr.f32.mxu1 %v12164_v12  ;;  %v5542_v12 = vld [vmem:[#allocation8 + $0xb98] sm:$0xff]  ;;  %v5657_v51 = vld [vmem:[#allocation8 + $0xf30] sm:$0xff] }
 0xbc0   :  { %5940 = vmatpush1.msra.mxu0 %v5429_v35  ;;  %6053 = vmatpush1.msra.mxu1 %v5557_v21  ;;  %v5654_v7 = vld [vmem:[#allocation8 + $0xf18] sm:$0xff]  ;;  %v5525_v35 = vld [vmem:[#allocation8 + $0xb10] sm:$0xff] }
 0xbc1   :  { %5941 = vmatprep.subr.mxu0 %v5554_v55  ;;  %6054 = vmatprep.subr.mxu1 %v5682_v62  ;;  %v5653_v21 = vld [vmem:[#allocation8 + $0xf10] sm:$0xff]  ;;  %v5522_v55 = vld [vmem:[#allocation8 + $0xaf8] sm:$0xff] }
 0xbc2   :  { %5942 = vmatpush2.msra.mxu0 %v5553_v20  ;;  %6055 = vmatpush2.msra.mxu1 %v5681_v9  ;;  %v5650_v62 = vld [vmem:[#allocation8 + $0xef8] sm:$0xff]  ;;  %v5521_v20 = vld [vmem:[#allocation8 + $0xaf0] sm:$0xff] }
 0xbc3   :  { %5943 = vmatprep.subr.mxu0 %v5550_v63  ;;  %6056 = vmatprep.subr.mxu1 %v5678_v60  ;;  %v5649_v9 = vld [vmem:[#allocation8 + $0xef0] sm:$0xff]  ;;  %v5518_v63 = vld [vmem:[#allocation8 + $0xad8] sm:$0xff] }
 0xbc4   :  { %5944 = vmatpush2.msra.mxu0 %v5549_v10  ;;  %6057 = vmatpush2.msra.mxu1 %v5677_v4  ;;  %v5646_v60 = vld [vmem:[#allocation8 + $0xed8] sm:$0xff]  ;;  %v5517_v10 = vld [vmem:[#allocation8 + $0xad0] sm:$0xff] }
 0xbc5   :  { %5945 = vmatprep.subr.mxu0 %v5546_v15  ;;  %6058 = vmatprep.subr.mxu1 %v5674_v11  ;;  %v5645_v4 = vld [vmem:[#allocation8 + $0xed0] sm:$0xff]  ;;  %v5514_v15 = vld [vmem:[#allocation8 + $0xab8] sm:$0xff] }
 0xbc6   :  { %5946 = vmatpush2.msra.mxu0 %v5545_v14  ;;  %6059 = vmatpush2.msra.mxu1 %v5673_v37  ;;  %v5642_v11 = vld [vmem:[#allocation8 + $0xeb8] sm:$0xff]  ;;  %v5513_v14 = vld [vmem:[#allocation8 + $0xab0] sm:$0xff] }
 0xbc7   :  { %5947 = vmatprep.subr.mxu0 %v5542_v12  ;;  %6060 = vmatprep.subr.mxu1 %v5670_v8  ;;  %v5641_v37 = vld [vmem:[#allocation8 + $0xeb0] sm:$0xff]  ;;  %v5510_v12 = vld [vmem:[#allocation8 + $0xa98] sm:$0xff] }
 0xbc8   :  { %5948 = vmatpush2.msra.mxu0 %v5541_v44  ;;  %6061 = vmatpush2.msra.mxu1 %v5669_v48  ;;  %v5638_v8 = vld [vmem:[#allocation8 + $0xe98] sm:$0xff]  ;;  %v5509_v44 = vld [vmem:[#allocation8 + $0xa90] sm:$0xff] }
 0xbc9   :  { %5949 = vmatprep.subr.mxu0 %v5538_v39  ;;  %6062 = vmatprep.subr.mxu1 %v5666_v24  ;;  %v5637_v48 = vld [vmem:[#allocation8 + $0xe90] sm:$0xff]  ;;  %v5506_v39 = vld [vmem:[#allocation8 + $0xa78] sm:$0xff] }
 0xbca   :  { %5950 = vmatpush2.msra.mxu0 %v5537_v58  ;;  %6063 = vmatpush2.msra.mxu1 %v5665_v26  ;;  %v5634_v24 = vld [vmem:[#allocation8 + $0xe78] sm:$0xff]  ;;  %v5505_v58 = vld [vmem:[#allocation8 + $0xa70] sm:$0xff] }
 0xbcb   :  { %5951 = vmatprep.subr.mxu0 %v5534_v16  ;;  %6064 = vmatprep.subr.mxu1 %v5662_v40  ;;  %v5633_v26 = vld [vmem:[#allocation8 + $0xe70] sm:$0xff]  ;;  %v5502_v16 = vld [vmem:[#allocation8 + $0xa58] sm:$0xff] }
 0xbcc   :  { %5952 = vmatpush2.msra.mxu0 %v5533_v22  ;;  %6065 = vmatpush2.msra.mxu1 %v5661_v34  ;;  %v5630_v40 = vld [vmem:[#allocation8 + $0xe58] sm:$0xff]  ;;  %v5501_v22 = vld [vmem:[#allocation8 + $0xa50] sm:$0xff] }
 0xbcd   :  { %5953 = vmatprep.subr.mxu0 %v5530_v18  ;;  %6066 = vmatprep.subr.mxu1 %v5658_v30  ;;  %v5629_v34 = vld [vmem:[#allocation8 + $0xe50] sm:$0xff]  ;;  %v5498_v18 = vld [vmem:[#allocation8 + $0xa38] sm:$0xff] }
 0xbce   :  { %5954 = vmatpush2.msra.mxu0 %v5529_v25  ;;  %6067 = vmatpush2.msra.mxu1 %v5657_v51  ;;  %v5626_v30 = vld [vmem:[#allocation8 + $0xe38] sm:$0xff]  ;;  %v5497_v25 = vld [vmem:[#allocation8 + $0xa30] sm:$0xff] }
 0xbcf   :  { %5955 = vmatprep.subr.mxu0 %v5526_v19  ;;  %6068 = vmatprep.subr.mxu1 %v5654_v7  ;;  %v5625_v51 = vld [vmem:[#allocation8 + $0xe30] sm:$0xff]  ;;  %v5494_v19 = vld [vmem:[#allocation8 + $0xa18] sm:$0xff] }
 0xbd0   :  { %5956 = vmatpush2.msra.mxu0 %v5525_v35  ;;  %6069 = vmatpush2.msra.mxu1 %v5653_v21  ;;  %v5622_v7 = vld [vmem:[#allocation8 + $0xe18] sm:$0xff]  ;;  %v5493_v35 = vld [vmem:[#allocation8 + $0xa10] sm:$0xff] }
 0xbd1   :  { %5957 = vmatprep.subr.mxu0 %v5522_v55  ;;  %6070 = vmatprep.subr.mxu1 %v5650_v62  ;;  %v5621_v21 = vld [vmem:[#allocation8 + $0xe10] sm:$0xff]  ;;  %v5071_v55 = vld [vmem:[#allocation8 + $0x1e8] sm:$0xff] }
 0xbd2   :  { %5958 = vmatpush2.msra.mxu0 %v5521_v20  ;;  %6071 = vmatpush2.msra.mxu1 %v5649_v9  ;;  %v5199_v62 = vld [vmem:[#allocation8 + $0x5e8] sm:$0xff]  ;;  %v5070_v20 = vld [vmem:[#allocation8 + $0x1e0] sm:$0xff] }
 0xbd3   :  { %5959 = vmatprep.subr.mxu0 %v5518_v63  ;;  %6072 = vmatprep.subr.mxu1 %v5646_v60  ;;  %v5198_v9 = vld [vmem:[#allocation8 + $0x5e0] sm:$0xff]  ;;  %v5067_v63 = vld [vmem:[#allocation8 + $0x1c8] sm:$0xff] }
 0xbd4   :  { %5960 = vmatpush2.msra.mxu0 %v5517_v10  ;;  %6073 = vmatpush2.msra.mxu1 %v5645_v4  ;;  %v5195_v60 = vld [vmem:[#allocation8 + $0x5c8] sm:$0xff]  ;;  %v5066_v10 = vld [vmem:[#allocation8 + $0x1c0] sm:$0xff] }
 0xbd5   :  { %5961 = vmatprep.subr.mxu0 %v5514_v15  ;;  %6074 = vmatprep.subr.mxu1 %v5642_v11  ;;  %v5194_v4 = vld [vmem:[#allocation8 + $0x5c0] sm:$0xff]  ;;  %v5063_v15 = vld [vmem:[#allocation8 + $0x1a8] sm:$0xff] }
 0xbd6   :  { %5962 = vmatpush2.msra.mxu0 %v5513_v14  ;;  %6075 = vmatpush2.msra.mxu1 %v5641_v37  ;;  %v5190_v11 = vld [vmem:[#allocation8 + $0x5a0] sm:$0xff] }
 0xbd7   :  { %5963 = vmatprep.subr.mxu0 %v5510_v12  ;;  %6076 = vmatprep.subr.mxu1 %v5638_v8  ;;  %v5058_v14 = vld [vmem:[#allocation8 + $0x180] sm:$0xff]  ;;  %v5055_v12 = vld [vmem:[#allocation8 + $0x168] sm:$0xff] }
 0xbd8   :  { %5964 = vmatpush2.msra.mxu0 %v5509_v44  ;;  %6077 = vmatpush2.msra.mxu1 %v5637_v48  ;;  %v5186_v37 = vld [vmem:[#allocation8 + $0x580] sm:$0xff] }
 0xbd9   :  { %5965 = vmatprep.subr.mxu0 %v5506_v39  ;;  %6078 = vmatprep.subr.mxu1 %v5634_v24  ;;  %v5182_v8 = vld [vmem:[#allocation8 + $0x560] sm:$0xff]  ;;  %v5047_v39 = vld [vmem:[#allocation8 + $0x128] sm:$0xff] }
 0xbda   :  { %5966 = vmatpush2.msra.mxu0 %v5505_v58  ;;  %6079 = vmatpush2.msra.mxu1 %v5633_v26  ;;  %v5050_v44 = vld [vmem:[#allocation8 + $0x140] sm:$0xff] }
 0xbdb   :  { %5967 = vmatprep.subr.mxu0 %v5502_v16  ;;  %6080 = vmatprep.subr.mxu1 %v5630_v40  ;;  %v5178_v48 = vld [vmem:[#allocation8 + $0x540] sm:$0xff]  ;;  %v5039_v16 = vld [vmem:[#allocation8 + $0xe8] sm:$0xff] }
 0xbdc   :  { %5968 = vmatpush2.msra.mxu0 %v5501_v22  ;;  %6081 = vmatpush2.msra.mxu1 %v5629_v34  ;;  %v5174_v24 = vld [vmem:[#allocation8 + $0x520] sm:$0xff] }
 0xbdd   :  { %5969 = vmatprep.subr.mxu0 %v5498_v18  ;;  %6082 = vmatprep.subr.mxu1 %v5626_v30  ;;  %v5042_v58 = vld [vmem:[#allocation8 + $0x100] sm:$0xff]  ;;  %v5031_v18 = vld [vmem:[#allocation8 + $0xa8] sm:$0xff] }
 0xbde   :  { %5970 = vmatpush2.msra.mxu0 %v5497_v25  ;;  %6083 = vmatpush2.msra.mxu1 %v5625_v51  ;;  %v5170_v26 = vld [vmem:[#allocation8 + $0x500] sm:$0xff] }
 0xbdf   :  { %5971 = vmatprep.subr.mxu0 %v5494_v19  ;;  %6084 = vmatprep.subr.mxu1 %v5622_v7  ;;  %v5166_v40 = vld [vmem:[#allocation8 + $0x4e0] sm:$0xff]  ;;  %v5023_v19 = vld [vmem:[#allocation8 + $0x68] sm:$0xff] }
 0xbe0   :  { %5972 = vmatpush2.msra.mxu0 %v5493_v35  ;;  %6085 = vmatpush2.msra.mxu1 %v5621_v21  ;;  %v5034_v22 = vld [vmem:[#allocation8 + $0xc0] sm:$0xff] }
 0xbe1   :  { %5974 = vmatmul.mubr.f32.vlgmr.msra.gmra.mxu0 %v12147_v1  ;;  %6087 = vmatmul.mubr.f32.vlgmr.msra.gmra.mxu1 %v12169_v49  ;;  %v5191_v1 = vld [vmem:[#allocation8 + $0x5a8] sm:$0xff]  ;;  %v5062_v49 = vld [vmem:[#allocation8 + $0x1a0] sm:$0xff] }
 0xbe2   :  { %6135 = vmatprep.subr.mxu0 %v5071_v55  ;;  %6248 = vmatprep.subr.mxu1 %v5199_v62  ;;  %v5162_v34 = vld [vmem:[#allocation8 + $0x4c0] sm:$0xff]  ;;  %v5015_v55 = vld [vmem:[#allocation8 + $0x28] sm:$0xff] }
 0xbe3   :  { %5979 = vmatprep.mubr.f32.mxu0 %v12152_v43  ;;  %6092 = vmatprep.mubr.f32.mxu1 %v12179_v53  ;;  %v5059_v43 = vld [vmem:[#allocation8 + $0x188] sm:$0xff]  ;;  %v5158_v30 = vld [vmem:[#allocation8 + $0x4a0] sm:$0xff] }
 0xbe4   :  { %6136 = vmatpush1.msra.mxu0 %v5070_v20  ;;  %6249 = vmatpush1.msra.mxu1 %v5198_v9  ;;  %v5187_v53 = vld [vmem:[#allocation8 + $0x588] sm:$0xff]  ;;  %v5026_v25 = vld [vmem:[#allocation8 + $0x80] sm:$0xff]  ;;  %v12333_v9 = vld [vmem:[#allocation2 + $0x18] sm:$0xff] }
 0xbe5   :  { %6137 = vmatprep.subr.mxu0 %v5067_v63  ;;  %6250 = vmatprep.subr.mxu1 %v5195_v60  ;;  %v5154_v51 = vld [vmem:[#allocation8 + $0x480] sm:$0xff]  ;;  %v5139_v20 = vld [vmem:[#allocation8 + $0x408] sm:$0xff] }
 0xbe6   :  { %6138 = vmatpush1.msra.mxu0 %v5066_v10  ;;  %6251 = vmatpush1.msra.mxu1 %v5194_v4  ;;  %v5150_v7 = vld [vmem:[#allocation8 + $0x460] sm:$0xff]  ;;  %v5263_v10 = vld [vmem:[#allocation8 + $0x7e8] sm:$0xff] }
 0xbe7   :  { %5980 = vmatmul.mubr.f32.gmra.mxu0 %v12161_v46  ;;  %6093 = vmatmul.mubr.f32.gmra.mxu1 %v12186_v2  ;;  %v5183_v46 = vld [vmem:[#allocation8 + $0x568] sm:$0xff]  ;;  %v5054_v2 = vld [vmem:[#allocation8 + $0x160] sm:$0xff] }
 0xbe8   :  { %6139 = vmatprep.subr.mxu0 %v5063_v15  ;;  %6252 = vmatprep.subr.mxu1 %v5191_v1  ;;  %v5018_v35 = vld [vmem:[#allocation8 + $0x40] sm:$0xff]  ;;  %v5131_v15 = vld [vmem:[#allocation8 + $0x3c8] sm:$0xff] }
 0xbe9   :  { %5985 = vmatprep.mubr.f32.mxu0 %v12175_v31  ;;  %6098 = vmatprep.mubr.f32.mxu1 %v12191_v50  ;;  %v5051_v31 = vld [vmem:[#allocation8 + $0x148] sm:$0xff]  ;;  %v5146_v21 = vld [vmem:[#allocation8 + $0x440] sm:$0xff] }
 0xbea   :  { %6140 = vmatpush1.msra.mxu0 %v5062_v49  ;;  %6253 = vmatpush1.msra.mxu1 %v5190_v11  ;;  %v5179_v50 = vld [vmem:[#allocation8 + $0x548] sm:$0xff]  ;;  %v5142_v62 = vld [vmem:[#allocation8 + $0x420] sm:$0xff] }
 0xbeb   :  { %6141 = vmatprep.subr.mxu0 %v5059_v43  ;;  %6254 = vmatprep.subr.mxu1 %v5187_v53  ;;  %v5010_v63 = vld [vmem:[#allocation8] sm:$0xff]  ;;  %v5259_v1 = vld [vmem:[#allocation8 + $0x7c8] sm:$0xff] }
 0xbec   :  { %6142 = vmatpush1.msra.mxu0 %v5058_v14  ;;  %6255 = vmatpush1.msra.mxu1 %v5186_v37  ;;  %v5138_v60 = vld [vmem:[#allocation8 + $0x400] sm:$0xff]  ;;  %v5127_v43 = vld [vmem:[#allocation8 + $0x3a8] sm:$0xff] }
 0xbed   :  { %5986 = vmatmul.mubr.f32.gmra.mxu0 %v12197_v57  ;;  %6099 = vmatmul.mubr.f32.gmra.mxu1 %v12201_v5  ;;  %v5175_v57 = vld [vmem:[#allocation8 + $0x528] sm:$0xff]  ;;  %v5046_v5 = vld [vmem:[#allocation8 + $0x120] sm:$0xff] }
 0xbee   :  { %6143 = vmatprep.subr.mxu0 %v5055_v12  ;;  %6256 = vmatprep.subr.mxu1 %v5183_v46  ;;  %v5262_v4 = vld [vmem:[#allocation8 + $0x7e0] sm:$0xff]  ;;  %v5255_v53 = vld [vmem:[#allocation8 + $0x7a8] sm:$0xff] }
 0xbef   :  { %5991 = vmatprep.mubr.f32.mxu0 %v12207_v0  ;;  %6104 = vmatprep.mubr.f32.mxu1 %v12210_v38  ;;  %v5043_v0 = vld [vmem:[#allocation8 + $0x108] sm:$0xff]  ;;  %v5130_v49 = vld [vmem:[#allocation8 + $0x3c0] sm:$0xff] }
 0xbf0   :  { %6144 = vmatpush1.msra.mxu0 %v5054_v2  ;;  %6257 = vmatpush1.msra.mxu1 %v5182_v8  ;;  %v5171_v38 = vld [vmem:[#allocation8 + $0x508] sm:$0xff]  ;;  %v5258_v11 = vld [vmem:[#allocation8 + $0x7c0] sm:$0xff] }
 0xbf1   :  { %6145 = vmatprep.subr.mxu0 %v5051_v31  ;;  %6258 = vmatprep.subr.mxu1 %v5179_v50  ;;  %v5126_v14 = vld [vmem:[#allocation8 + $0x3a0] sm:$0xff]  ;;  %v5123_v12 = vld [vmem:[#allocation8 + $0x388] sm:$0xff] }
 0xbf2   :  { %6146 = vmatpush1.msra.mxu0 %v5050_v44  ;;  %6259 = vmatpush1.msra.mxu1 %v5178_v48  ;;  %v5254_v37 = vld [vmem:[#allocation8 + $0x7a0] sm:$0xff]  ;;  %v5251_v46 = vld [vmem:[#allocation8 + $0x788] sm:$0xff] }
 0xbf3   :  { %5992 = vmatmul.mubr.f32.gmra.mxu0 %v12215_v61  ;;  %6105 = vmatmul.mubr.f32.gmra.mxu1 %v12218_v54  ;;  %v5167_v61 = vld [vmem:[#allocation8 + $0x4e8] sm:$0xff]  ;;  %v5038_v54 = vld [vmem:[#allocation8 + $0xe0] sm:$0xff] }
 0xbf4   :  { %6147 = vmatprep.subr.mxu0 %v5047_v39  ;;  %6260 = vmatprep.subr.mxu1 %v5175_v57  ;;  %v5122_v2 = vld [vmem:[#allocation8 + $0x380] sm:$0xff]  ;;  %v5119_v31 = vld [vmem:[#allocation8 + $0x368] sm:$0xff] }
 0xbf5   :  { %5997 = vmatprep.mubr.f32.mxu0 %v12225_v41  ;;  %6110 = vmatprep.mubr.f32.mxu1 %v12228_v32  ;;  %v5035_v41 = vld [vmem:[#allocation8 + $0xc8] sm:$0xff]  ;;  %v5250_v8 = vld [vmem:[#allocation8 + $0x780] sm:$0xff] }
 0xbf6   :  { %6148 = vmatpush1.msra.mxu0 %v5046_v5  ;;  %6261 = vmatpush1.msra.mxu1 %v5174_v24  ;;  %v5163_v32 = vld [vmem:[#allocation8 + $0x4c8] sm:$0xff]  ;;  %v5118_v44 = vld [vmem:[#allocation8 + $0x360] sm:$0xff] }
 0xbf7   :  { %6149 = vmatprep.subr.mxu0 %v5043_v0  ;;  %6262 = vmatprep.subr.mxu1 %v5171_v38  ;;  %v5247_v50 = vld [vmem:[#allocation8 + $0x768] sm:$0xff]  ;;  %v5246_v48 = vld [vmem:[#allocation8 + $0x760] sm:$0xff] }
 0xbf8   :  { %6150 = vmatpush1.msra.mxu0 %v5042_v58  ;;  %6263 = vmatpush1.msra.mxu1 %v5170_v26  ;;  %v5115_v39 = vld [vmem:[#allocation8 + $0x348] sm:$0xff]  ;;  %v5114_v5 = vld [vmem:[#allocation8 + $0x340] sm:$0xff] }
 0xbf9   :  { %5998 = vmatmul.mubr.f32.gmra.mxu0 %v12237_v28  ;;  %6111 = vmatmul.mubr.f32.gmra.mxu1 %v12240_v6  ;;  %v5159_v28 = vld [vmem:[#allocation8 + $0x4a8] sm:$0xff]  ;;  %v5030_v6 = vld [vmem:[#allocation8 + $0xa0] sm:$0xff] }
 0xbfa   :  { %6151 = vmatprep.subr.mxu0 %v5039_v16  ;;  %6264 = vmatprep.subr.mxu1 %v5167_v61  ;;  %v5243_v57 = vld [vmem:[#allocation8 + $0x748] sm:$0xff]  ;;  %v5242_v24 = vld [vmem:[#allocation8 + $0x740] sm:$0xff] }
 0xbfb   :  { %6003 = vmatprep.mubr.f32.mxu0 %v12245_v45  ;;  %6116 = vmatprep.mubr.f32.mxu1 %v12248_v36  ;;  %v5027_v45 = vld [vmem:[#allocation8 + $0x88] sm:$0xff]  ;;  %v5110_v58 = vld [vmem:[#allocation8 + $0x320] sm:$0xff] }
 0xbfc   :  { %6152 = vmatpush1.msra.mxu0 %v5038_v54  ;;  %6265 = vmatpush1.msra.mxu1 %v5166_v40  ;;  %v5155_v36 = vld [vmem:[#allocation8 + $0x488] sm:$0xff]  ;;  %v5238_v26 = vld [vmem:[#allocation8 + $0x720] sm:$0xff] }
 0xbfd   :  { %6153 = vmatprep.subr.mxu0 %v5035_v41  ;;  %6266 = vmatprep.subr.mxu1 %v5163_v32  ;;  %v5111_v0 = vld [vmem:[#allocation8 + $0x328] sm:$0xff]  ;;  %v5106_v54 = vld [vmem:[#allocation8 + $0x300] sm:$0xff] }
 0xbfe   :  { %6154 = vmatpush1.msra.mxu0 %v5034_v22  ;;  %6267 = vmatpush1.msra.mxu1 %v5162_v34  ;;  %v5239_v38 = vld [vmem:[#allocation8 + $0x728] sm:$0xff]  ;;  %v5234_v40 = vld [vmem:[#allocation8 + $0x700] sm:$0xff] }
 0xbff   :  { %6004 = vmatmul.mubr.f32.gmra.mxu0 %v12257_v13  ;;  %6117 = vmatmul.mubr.f32.gmra.mxu1 %v12260_v47  ;;  %v5151_v13 = vld [vmem:[#allocation8 + $0x468] sm:$0xff]  ;;  %v5022_v47 = vld [vmem:[#allocation8 + $0x60] sm:$0xff] }
 0xc00   :  { %6155 = vmatprep.subr.mxu0 %v5031_v18  ;;  %6268 = vmatprep.subr.mxu1 %v5159_v28  ;;  %v5107_v16 = vld [vmem:[#allocation8 + $0x308] sm:$0xff]  ;;  %v5102_v22 = vld [vmem:[#allocation8 + $0x2e0] sm:$0xff] }
 0xc01   :  { %6009 = vmatprep.mubr.f32.mxu0 %v12265_v29  ;;  %6122 = vmatprep.mubr.f32.mxu1 %v12268_v52  ;;  %v5019_v29 = vld [vmem:[#allocation8 + $0x48] sm:$0xff]  ;;  %v5230_v34 = vld [vmem:[#allocation8 + $0x6e0] sm:$0xff] }
 0xc02   :  { %6156 = vmatpush1.msra.mxu0 %v5030_v6  ;;  %6269 = vmatpush1.msra.mxu1 %v5158_v30  ;;  %v5147_v52 = vld [vmem:[#allocation8 + $0x448] sm:$0xff]  ;;  %v5098_v6 = vld [vmem:[#allocation8 + $0x2c0] sm:$0xff] }
 0xc03   :  { %6157 = vmatprep.subr.mxu0 %v5027_v45  ;;  %6270 = vmatprep.subr.mxu1 %v5155_v36  ;;  %v5235_v61 = vld [vmem:[#allocation8 + $0x708] sm:$0xff]  ;;  %v5226_v30 = vld [vmem:[#allocation8 + $0x6c0] sm:$0xff] }
 0xc04   :  { %6158 = vmatpush1.msra.mxu0 %v5026_v25  ;;  %6271 = vmatpush1.msra.mxu1 %v5154_v51  ;;  %v5103_v41 = vld [vmem:[#allocation8 + $0x2e8] sm:$0xff]  ;;  %v5094_v25 = vld [vmem:[#allocation8 + $0x2a0] sm:$0xff] }
 0xc05   :  { %6010 = vmatmul.mubr.f32.gmra.mxu0 %v12275_v3  ;;  %6123 = vmatmul.mubr.f32.gmra.mxu1 %v12278_v27  ;;  %v5143_v3 = vld [vmem:[#allocation8 + $0x428] sm:$0xff]  ;;  %v5014_v27 = vld [vmem:[#allocation8 + $0x20] sm:$0xff] }
 0xc06   :  { %6159 = vmatprep.subr.mxu0 %v5023_v19  ;;  %6272 = vmatprep.subr.mxu1 %v5151_v13  ;;  %v5231_v32 = vld [vmem:[#allocation8 + $0x6e8] sm:$0xff]  ;;  %v5222_v51 = vld [vmem:[#allocation8 + $0x6a0] sm:$0xff] }
 0xc07   :  { %6015 = vmatprep.mubr.f32.mxu0 %v12283_v56  ;;  %6128 = vmatprep.mubr.f32.mxu1 %v12286_v42  ;;  %v12330_v56 = vld [vmem:[#allocation2 + $0x8] sm:$0xff] }
 0xc08   :  { %6160 = vmatpush1.msra.mxu0 %v5022_v47  ;;  %6273 = vmatpush1.msra.mxu1 %v5150_v7  ;;  %v5011_v42 = vld [vmem:[#allocation8 + $0x8] sm:$0xff]  ;;  %v5090_v47 = vld [vmem:[#allocation8 + $0x280] sm:$0xff] }
 0xc09   :  { %6161 = vmatprep.subr.mxu0 %v5019_v29  ;;  %6274 = vmatprep.subr.mxu1 %v5147_v52  ;;  %v5099_v18 = vld [vmem:[#allocation8 + $0x2c8] sm:$0xff]  ;;  %v5218_v7 = vld [vmem:[#allocation8 + $0x680] sm:$0xff] }
 0xc0a   :  { %6162 = vmatpush1.msra.mxu0 %v5018_v35  ;;  %6275 = vmatpush1.msra.mxu1 %v5146_v21  ;;  %v5227_v28 = vld [vmem:[#allocation8 + $0x6c8] sm:$0xff]  ;;  %v5086_v35 = vld [vmem:[#allocation8 + $0x260] sm:$0xff] }
 0xc0b   :  { %6016 = vmatmul.mubr.f32.gmra.mxu0 %v12291_v33  ;;  %6129 = vmatmul.mubr.f32.gmra.mxu1 %v12294_v23  ;;  %v5135_v33 = vld [vmem:[#allocation8 + $0x3e8] sm:$0xff]  ;;  %v5134_v23 = vld [vmem:[#allocation8 + $0x3e0] sm:$0xff] }
 0xc0c   :  { %6163 = vmatprep.subr.mxu0 %v5015_v55  ;;  %6276 = vmatprep.subr.mxu1 %v5143_v3  ;;  %v5095_v45 = vld [vmem:[#allocation8 + $0x2a8] sm:$0xff]  ;;  %v5214_v21 = vld [vmem:[#allocation8 + $0x660] sm:$0xff] }
 0xc0d   :  { %6164 = vmatpush1.msra.mxu0 %v5014_v27  ;;  %6199 = vmatprep.mubr.f32.mxu0 %v12330_v56  ;;  %v5223_v36 = vld [vmem:[#allocation8 + $0x6a8] sm:$0xff]  ;;  %v5082_v27 = vld [vmem:[#allocation8 + $0x240] sm:$0xff] }
 0xc0e   :  { %6277 = vmatpush1.msra.mxu1 %v5142_v62  ;;  %6312 = vmatprep.mubr.f32.mxu1 %v12333_v9  ;;  %v5091_v19 = vld [vmem:[#allocation8 + $0x288] sm:$0xff]  ;;  %v5210_v62 = vld [vmem:[#allocation8 + $0x640] sm:$0xff] }
 0xc0f   :  { %6165 = vmatprep.subr.mxu0 %v5011_v42  ;;  %6278 = vmatprep.subr.mxu1 %v5139_v20  ;;  %v5219_v13 = vld [vmem:[#allocation8 + $0x688] sm:$0xff] }
 0xc10   :  { %6166 = vmatpush1.msra.mxu0 %v5010_v63  ;;  %6279 = vmatpush1.msra.mxu1 %v5138_v60  ;;  %v5087_v29 = vld [vmem:[#allocation8 + $0x268] sm:$0xff]  ;;  %v5078_v63 = vld [vmem:[#allocation8 + $0x220] sm:$0xff] }
 0xc11   :  { %6167 = vmatprep.subr.mxu0 %v5135_v33  ;;  %6280 = vmatprep.subr.mxu1 %v5263_v10  ;;  %v5215_v52 = vld [vmem:[#allocation8 + $0x668] sm:$0xff]  ;;  %v5206_v60 = vld [vmem:[#allocation8 + $0x620] sm:$0xff] }
 0xc12   :  { %6168 = vmatpush2.msra.mxu0 %v5134_v23  ;;  %6281 = vmatpush2.msra.mxu1 %v5262_v4  ;;  %v5083_v55 = vld [vmem:[#allocation8 + $0x248] sm:$0xff]  ;;  %v5074_v23 = vld [vmem:[#allocation8 + $0x200] sm:$0xff] }
 0xc13   :  { %6169 = vmatprep.subr.mxu0 %v5131_v15  ;;  %6282 = vmatprep.subr.mxu1 %v5259_v1  ;;  %v5211_v3 = vld [vmem:[#allocation8 + $0x648] sm:$0xff]  ;;  %v5202_v4 = vld [vmem:[#allocation8 + $0x600] sm:$0xff]  ;;  %v5073_v15 = vld [vmem:[#allocation8 + $0x1f8] sm:$0xff] }
 0xc14   :  { %6170 = vmatpush2.msra.mxu0 %v5130_v49  ;;  %6283 = vmatpush2.msra.mxu1 %v5258_v11  ;;  %v5079_v42 = vld [vmem:[#allocation8 + $0x228] sm:$0xff]  ;;  %v5201_v1 = vld [vmem:[#allocation8 + $0x5f8] sm:$0xff]  ;;  %v12336_v49 = vld [vmem:[#allocation2] sm:$0xff] }
 0xc15   :  { %6171 = vmatprep.subr.mxu0 %v5127_v43  ;;  %6284 = vmatprep.subr.mxu1 %v5255_v53  ;;  %v5207_v20 = vld [vmem:[#allocation8 + $0x628] sm:$0xff]  ;;  %v12338_v11 = vld [vmem:[#allocation2 + $0x10] sm:$0xff] }
 0xc16   :  { %6172 = vmatpush2.msra.mxu0 %v5126_v14  ;;  %6285 = vmatpush2.msra.mxu1 %v5254_v37  ;;  %v5075_v33 = vld [vmem:[#allocation8 + $0x208] sm:$0xff]  ;;  %v5072_v43 = vld [vmem:[#allocation8 + $0x1f0] sm:$0xff]  ;;  %v5069_v14 = vld [vmem:[#allocation8 + $0x1d8] sm:$0xff] }
 0xc17   :  { %6173 = vmatprep.subr.mxu0 %v5123_v12  ;;  %6286 = vmatprep.subr.mxu1 %v5251_v46  ;;  %v5203_v10 = vld [vmem:[#allocation8 + $0x608] sm:$0xff]  ;;  %v5200_v53 = vld [vmem:[#allocation8 + $0x5f0] sm:$0xff]  ;;  %v5197_v37 = vld [vmem:[#allocation8 + $0x5d8] sm:$0xff] }
 0xc18   :  { %6174 = vmatpush2.msra.mxu0 %v5122_v2  ;;  %6287 = vmatpush2.msra.mxu1 %v5250_v8  ;;  %v12342_v12 = vld [vmem:[#allocation2 + $0x28] sm:$0xff]  ;;  %v12345_v46 = vld [vmem:[#allocation2 + $0x38] sm:$0xff]  ;;  %v5068_v2 = vld [vmem:[#allocation8 + $0x1d0] sm:$0xff] }
 0xc19   :  { %6175 = vmatprep.subr.mxu0 %v5119_v31  ;;  %6288 = vmatprep.subr.mxu1 %v5247_v50  ;;  %v5196_v8 = vld [vmem:[#allocation8 + $0x5d0] sm:$0xff]  ;;  %v5065_v31 = vld [vmem:[#allocation8 + $0x1b8] sm:$0xff] }
 0xc1a   :  { %6176 = vmatpush2.msra.mxu0 %v5118_v44  ;;  %6289 = vmatpush2.msra.mxu1 %v5246_v48  ;;  %v5193_v50 = vld [vmem:[#allocation8 + $0x5b8] sm:$0xff]  ;;  %v12348_v44 = vld [vmem:[#allocation2 + $0x20] sm:$0xff]  ;;  %v12351_v48 = vld [vmem:[#allocation2 + $0x30] sm:$0xff] }
 0xc1b   :  { %6177 = vmatprep.subr.mxu0 %v5115_v39  ;;  %6290 = vmatprep.subr.mxu1 %v5243_v57  ;;  %v5064_v39 = vld [vmem:[#allocation8 + $0x1b0] sm:$0xff] }
 0xc1c   :  { %6178 = vmatpush2.msra.mxu0 %v5114_v5  ;;  %6291 = vmatpush2.msra.mxu1 %v5242_v24  ;;  %v5192_v57 = vld [vmem:[#allocation8 + $0x5b0] sm:$0xff]  ;;  %v5061_v5 = vld [vmem:[#allocation8 + $0x198] sm:$0xff] }
 0xc1d   :  { %6179 = vmatprep.subr.mxu0 %v5111_v0  ;;  %6292 = vmatprep.subr.mxu1 %v5239_v38  ;;  %v5189_v24 = vld [vmem:[#allocation8 + $0x598] sm:$0xff]  ;;  %v12354_v0 = vld [vmem:[#allocation2 + $0x48] sm:$0xff] }
 0xc1e   :  { %6180 = vmatpush2.msra.mxu0 %v5110_v58  ;;  %6293 = vmatpush2.msra.mxu1 %v5238_v26  ;;  %v12357_v38 = vld [vmem:[#allocation2 + $0x58] sm:$0xff]  ;;  %v5060_v58 = vld [vmem:[#allocation8 + $0x190] sm:$0xff] }
 0xc1f   :  { %6181 = vmatprep.subr.mxu0 %v5107_v16  ;;  %6294 = vmatprep.subr.mxu1 %v5235_v61  ;;  %v5188_v26 = vld [vmem:[#allocation8 + $0x590] sm:$0xff]  ;;  %v5057_v16 = vld [vmem:[#allocation8 + $0x178] sm:$0xff] }
 0xc20   :  { %6182 = vmatpush2.msra.mxu0 %v5106_v54  ;;  %6295 = vmatpush2.msra.mxu1 %v5234_v40  ;;  %v5185_v61 = vld [vmem:[#allocation8 + $0x578] sm:$0xff]  ;;  %v12360_v54 = vld [vmem:[#allocation2 + $0x40] sm:$0xff]  ;;  %v12363_v40 = vld [vmem:[#allocation2 + $0x50] sm:$0xff] }
 0xc21   :  { %6183 = vmatprep.subr.mxu0 %v5103_v41  ;;  %6296 = vmatprep.subr.mxu1 %v5231_v32  ;;  %v5056_v41 = vld [vmem:[#allocation8 + $0x170] sm:$0xff] }
 0xc22   :  { %6184 = vmatpush2.msra.mxu0 %v5102_v22  ;;  %6297 = vmatpush2.msra.mxu1 %v5230_v34  ;;  %v5184_v32 = vld [vmem:[#allocation8 + $0x570] sm:$0xff]  ;;  %v5053_v22 = vld [vmem:[#allocation8 + $0x158] sm:$0xff] }
 0xc23   :  { %6185 = vmatprep.subr.mxu0 %v5099_v18  ;;  %6298 = vmatprep.subr.mxu1 %v5227_v28  ;;  %v5181_v34 = vld [vmem:[#allocation8 + $0x558] sm:$0xff]  ;;  %v12366_v18 = vld [vmem:[#allocation2 + $0x68] sm:$0xff] }
 0xc24   :  { %6186 = vmatpush2.msra.mxu0 %v5098_v6  ;;  %6299 = vmatpush2.msra.mxu1 %v5226_v30  ;;  %v12369_v28 = vld [vmem:[#allocation2 + $0x78] sm:$0xff]  ;;  %v5052_v6 = vld [vmem:[#allocation8 + $0x150] sm:$0xff] }
 0xc25   :  { %6187 = vmatprep.subr.mxu0 %v5095_v45  ;;  %6300 = vmatprep.subr.mxu1 %v5223_v36  ;;  %v5180_v30 = vld [vmem:[#allocation8 + $0x550] sm:$0xff]  ;;  %v5049_v45 = vld [vmem:[#allocation8 + $0x138] sm:$0xff] }
 0xc26   :  { %6188 = vmatpush2.msra.mxu0 %v5094_v25  ;;  %6301 = vmatpush2.msra.mxu1 %v5222_v51  ;;  %v5177_v36 = vld [vmem:[#allocation8 + $0x538] sm:$0xff]  ;;  %v12372_v25 = vld [vmem:[#allocation2 + $0x60] sm:$0xff]  ;;  %v12375_v51 = vld [vmem:[#allocation2 + $0x70] sm:$0xff] }
 0xc27   :  { %6189 = vmatprep.subr.mxu0 %v5091_v19  ;;  %6302 = vmatprep.subr.mxu1 %v5219_v13  ;;  %v12378_v19 = vld [vmem:[#allocation2 + $0xa8] sm:$0xff]  ;;  %v5048_v13 = vld [vmem:[#allocation8 + $0x130] sm:$0xff] }
 0xc28   :  { %6190 = vmatpush2.msra.mxu0 %v5090_v47  ;;  %6303 = vmatpush2.msra.mxu1 %v5218_v7  ;;  %v5176_v47 = vld [vmem:[#allocation8 + $0x530] sm:$0xff]  ;;  %v12380_v7 = vld [vmem:[#allocation2 + $0xb8] sm:$0xff] }
 0xc29   :  { %6191 = vmatprep.subr.mxu0 %v5087_v29  ;;  %6304 = vmatprep.subr.mxu1 %v5215_v52  ;;  %v5045_v29 = vld [vmem:[#allocation8 + $0x118] sm:$0xff] }
 0xc2a   :  { %6192 = vmatpush2.msra.mxu0 %v5086_v35  ;;  %6305 = vmatpush2.msra.mxu1 %v5214_v21  ;;  %v5173_v52 = vld [vmem:[#allocation8 + $0x518] sm:$0xff]  ;;  %v5044_v35 = vld [vmem:[#allocation8 + $0x110] sm:$0xff] }
 0xc2b   :  { %6193 = vmatprep.subr.mxu0 %v5083_v55  ;;  %6306 = vmatprep.subr.mxu1 %v5211_v3  ;;  %v5172_v21 = vld [vmem:[#allocation8 + $0x510] sm:$0xff]  ;;  %v5041_v55 = vld [vmem:[#allocation8 + $0xf8] sm:$0xff] }
 0xc2c   :  { %6194 = vmatpush2.msra.mxu0 %v5082_v27  ;;  %6307 = vmatpush2.msra.mxu1 %v5210_v62  ;;  %v5169_v3 = vld [vmem:[#allocation8 + $0x4f8] sm:$0xff]  ;;  %v12384_v27 = vld [vmem:[#allocation2 + $0xa0] sm:$0xff]  ;;  %v12386_v62 = vld [vmem:[#allocation2 + $0xb0] sm:$0xff] }
 0xc2d   :  { %6195 = vmatprep.subr.mxu0 %v5079_v42  ;;  %6308 = vmatprep.subr.mxu1 %v5207_v20  ;;  %v5040_v42 = vld [vmem:[#allocation8 + $0xf0] sm:$0xff] }
 0xc2e   :  { %6196 = vmatpush2.msra.mxu0 %v5078_v63  ;;  %6309 = vmatpush2.msra.mxu1 %v5206_v60  ;;  %v5168_v20 = vld [vmem:[#allocation8 + $0x4f0] sm:$0xff]  ;;  %v5037_v63 = vld [vmem:[#allocation8 + $0xd8] sm:$0xff] }
 0xc2f   :  { %6197 = vmatprep.subr.mxu0 %v5075_v33  ;;  %6310 = vmatprep.subr.mxu1 %v5203_v10  ;;  %v5165_v60 = vld [vmem:[#allocation8 + $0x4d8] sm:$0xff]  ;;  %v12390_v33 = vld [vmem:[#allocation2 + $0xc8] sm:$0xff] }
 0xc30   :  { %6198 = vmatpush2.msra.mxu0 %v5074_v23  ;;  %6311 = vmatpush2.msra.mxu1 %v5202_v4  ;;  %v12393_v10 = vld [vmem:[#allocation2 + $0xd8] sm:$0xff]  ;;  %v5036_v23 = vld [vmem:[#allocation8 + $0xd0] sm:$0xff] }
 0xc31   :  { %6200 = vmatmul.mubr.f32.vlgmr.msra.gmra.mxu0 %v12336_v49  ;;  %6313 = vmatmul.mubr.f32.vlgmr.msra.gmra.mxu1 %v12338_v11  ;;  %v5164_v4 = vld [vmem:[#allocation8 + $0x4d0] sm:$0xff] }
 0xc32   :  { %6361 = vmatprep.subr.mxu0 %v5073_v15  ;;  %6474 = vmatprep.subr.mxu1 %v5201_v1  ;;  %v5033_v15 = vld [vmem:[#allocation8 + $0xb8] sm:$0xff] }
 0xc33   :  { %6205 = vmatprep.mubr.f32.mxu0 %v12342_v12  ;;  %6318 = vmatprep.mubr.f32.mxu1 %v12345_v46  ;;  %v5161_v1 = vld [vmem:[#allocation8 + $0x4b8] sm:$0xff] }
 0xc34   :  { %6362 = vmatpush1.msra.mxu0 %v5072_v43  ;;  %6475 = vmatpush1.msra.mxu1 %v5200_v53  ;;  %v12396_v43 = vld [vmem:[#allocation2 + $0xc0] sm:$0xff]  ;;  %v12399_v53 = vld [vmem:[#allocation2 + $0xd0] sm:$0xff] }
 0xc35   :  { %6363 = vmatprep.subr.mxu0 %v5069_v14  ;;  %6476 = vmatprep.subr.mxu1 %v5197_v37  ;;  %v5032_v14 = vld [vmem:[#allocation8 + $0xb0] sm:$0xff] }
 0xc36   :  { %6364 = vmatpush1.msra.mxu0 %v5068_v2  ;;  %6477 = vmatpush1.msra.mxu1 %v5196_v8  ;;  %v5160_v37 = vld [vmem:[#allocation8 + $0x4b0] sm:$0xff]  ;;  %v5029_v2 = vld [vmem:[#allocation8 + $0x98] sm:$0xff] }
 0xc37   :  { %6206 = vmatmul.mubr.f32.gmra.mxu0 %v12348_v44  ;;  %6319 = vmatmul.mubr.f32.gmra.mxu1 %v12351_v48  ;;  %v5157_v8 = vld [vmem:[#allocation8 + $0x498] sm:$0xff] }
 0xc38   :  { %6365 = vmatprep.subr.mxu0 %v5065_v31  ;;  %6478 = vmatprep.subr.mxu1 %v5193_v50  ;;  %v12402_v50 = vld [vmem:[#allocation2 + $0xe8] sm:$0xff] }
 0xc39   :  { %6211 = vmatprep.mubr.f32.mxu0 %v12354_v0  ;;  %6324 = vmatprep.mubr.f32.mxu1 %v12357_v38 }
 0xc3a   :  { %6366 = vmatpush1.msra.mxu0 %v5064_v39  ;;  %6479 = vmatpush1.msra.mxu1 %v5192_v57  ;;  %v12405_v39 = vld [vmem:[#allocation2 + $0xf8] sm:$0xff]  ;;  %v5028_v57 = vld [vmem:[#allocation8 + $0x90] sm:$0xff] }
 0xc3b   :  { %6367 = vmatprep.subr.mxu0 %v5061_v5  ;;  %6480 = vmatprep.subr.mxu1 %v5189_v24  ;;  %v5156_v5 = vld [vmem:[#allocation8 + $0x490] sm:$0xff] }
 0xc3c   :  { %6368 = vmatpush1.msra.mxu0 %v5060_v58  ;;  %6481 = vmatpush1.msra.mxu1 %v5188_v26  ;;  %v5025_v58 = vld [vmem:[#allocation8 + $0x78] sm:$0xff] }
 0xc3d   :  { %6212 = vmatmul.mubr.f32.gmra.mxu0 %v12360_v54  ;;  %6325 = vmatmul.mubr.f32.gmra.mxu1 %v12363_v40  ;;  %v5153_v26 = vld [vmem:[#allocation8 + $0x478] sm:$0xff] }
 0xc3e   :  { %6369 = vmatprep.subr.mxu0 %v5057_v16  ;;  %6482 = vmatprep.subr.mxu1 %v5185_v61  ;;  %v12408_v16 = vld [vmem:[#allocation2 + $0xe0] sm:$0xff]  ;;  %v12411_v61 = vld [vmem:[#allocation2 + $0xf0] sm:$0xff] }
 0xc3f   :  { %6217 = vmatprep.mubr.f32.mxu0 %v12366_v18  ;;  %6330 = vmatprep.mubr.f32.mxu1 %v12369_v28 }
 0xc40   :  { %6370 = vmatpush1.msra.mxu0 %v5056_v41  ;;  %6483 = vmatpush1.msra.mxu1 %v5184_v32  ;;  %v5024_v41 = vld [vmem:[#allocation8 + $0x70] sm:$0xff] }
 0xc41   :  { %6371 = vmatprep.subr.mxu0 %v5053_v22  ;;  %6484 = vmatprep.subr.mxu1 %v5181_v34  ;;  %v5152_v32 = vld [vmem:[#allocation8 + $0x470] sm:$0xff]  ;;  %v5021_v34 = vld [vmem:[#allocation8 + $0x58] sm:$0xff] }
 0xc42   :  { %6372 = vmatpush1.msra.mxu0 %v5052_v6  ;;  %6485 = vmatpush1.msra.mxu1 %v5180_v30  ;;  %v5149_v6 = vld [vmem:[#allocation8 + $0x458] sm:$0xff] }
 0xc43   :  { %6218 = vmatmul.mubr.f32.gmra.mxu0 %v12372_v25  ;;  %6331 = vmatmul.mubr.f32.gmra.mxu1 %v12375_v51 }
 0xc44   :  { %6373 = vmatprep.subr.mxu0 %v5049_v45  ;;  %6486 = vmatprep.subr.mxu1 %v5177_v36  ;;  %v12414_v45 = vld [vmem:[#allocation2 + $0x108] sm:$0xff]  ;;  %v12417_v36 = vld [vmem:[#allocation2 + $0x118] sm:$0xff] }
 0xc45   :  { %6223 = vmatprep.mubr.f32.mxu0 %v12378_v19  ;;  %6336 = vmatprep.mubr.f32.mxu1 %v12380_v7 }
 0xc46   :  { %6374 = vmatpush1.msra.mxu0 %v5048_v13  ;;  %6487 = vmatpush1.msra.mxu1 %v5176_v47  ;;  %v5020_v13 = vld [vmem:[#allocation8 + $0x50] sm:$0xff] }
 0xc47   :  { %6375 = vmatprep.subr.mxu0 %v5045_v29  ;;  %6488 = vmatprep.subr.mxu1 %v5173_v52  ;;  %v5148_v47 = vld [vmem:[#allocation8 + $0x450] sm:$0xff] }
 0xc48   :  { %6376 = vmatpush1.msra.mxu0 %v5044_v35  ;;  %6489 = vmatpush1.msra.mxu1 %v5172_v21  ;;  %v5017_v35 = vld [vmem:[#allocation8 + $0x38] sm:$0xff] }
 0xc49   :  { %6224 = vmatmul.mubr.f32.gmra.mxu0 %v12384_v27  ;;  %6337 = vmatmul.mubr.f32.gmra.mxu1 %v12386_v62  ;;  %v5145_v21 = vld [vmem:[#allocation8 + $0x438] sm:$0xff] }
 0xc4a   :  { %6377 = vmatprep.subr.mxu0 %v5041_v55  ;;  %6490 = vmatprep.subr.mxu1 %v5169_v3 }
 0xc4b   :  { %6229 = vmatprep.mubr.f32.mxu0 %v12390_v33  ;;  %6342 = vmatprep.mubr.f32.mxu1 %v12393_v10 }
 0xc4c   :  { %6378 = vmatpush1.msra.mxu0 %v5040_v42  ;;  %6491 = vmatpush1.msra.mxu1 %v5168_v20  ;;  %v5016_v42 = vld [vmem:[#allocation8 + $0x30] sm:$0xff] }
 0xc4d   :  { %6379 = vmatprep.subr.mxu0 %v5037_v63  ;;  %6492 = vmatprep.subr.mxu1 %v5165_v60  ;;  %v12424_v63 = vld [vmem:[#allocation2 + $0x100] sm:$0xff]  ;;  %v12427_v60 = vld [vmem:[#allocation2 + $0x110] sm:$0xff] }
 0xc4e   :  { %6380 = vmatpush1.msra.mxu0 %v5036_v23  ;;  %6493 = vmatpush1.msra.mxu1 %v5164_v4  ;;  %v5144_v23 = vld [vmem:[#allocation8 + $0x430] sm:$0xff] }
 0xc4f   :  { %6230 = vmatmul.mubr.f32.gmra.mxu0 %v12396_v43  ;;  %6343 = vmatmul.mubr.f32.gmra.mxu1 %v12399_v53 }
 0xc50   :  { %6381 = vmatprep.subr.mxu0 %v5033_v15  ;;  %6494 = vmatprep.subr.mxu1 %v5161_v1  ;;  %v5749_v31 = vpop.f32.mrf.mxu0  ;;  %v5013_v15 = vld [vmem:[#allocation8 + $0x18] sm:$0xff] }
 0xc51   :  { %6235 = vmatprep.mubr.f32.mxu0 %v12402_v50  ;;  %6348 = vmatprep.mubr.f32.mxu1 %v12405_v39  ;;  %v5141_v1 = vld [vmem:[#allocation8 + $0x418] sm:$0xff] }
 0xc52   :  { %6382 = vmatpush1.msra.mxu0 %v5032_v14  ;;  %6495 = vmatpush1.msra.mxu1 %v5160_v37  ;;  %v5751_v24 = vpop.f32.mrf.mxu0  ;;  %v5012_v37 = vld [vmem:[#allocation8 + $0x10] sm:$0xff] }
 0xc53   :  { %6383 = vmatprep.subr.mxu0 %v5029_v2  ;;  %6496 = vmatprep.subr.mxu1 %v5157_v8  ;;  %v5140_v2 = vld [vmem:[#allocation8 + $0x410] sm:$0xff] }
 0xc54   :  { %6384 = vmatpush1.msra.mxu0 %v5028_v57  ;;  %6497 = vmatpush1.msra.mxu1 %v5156_v5  ;;  %v5755_v22 = vpop.f32.mrf.mxu0  ;;  %v5137_v57 = vld [vmem:[#allocation8 + $0x3f8] sm:$0xff] }
 0xc55   :  { %6236 = vmatmul.mubr.f32.gmra.mxu0 %v12408_v16  ;;  %6349 = vmatmul.mubr.f32.gmra.mxu1 %v12411_v61  ;;  %v5265_v5 = vld [vmem:[#allocation8 + $0x7f8] sm:$0xff] }
 0xc56   :  { %6385 = vmatprep.subr.mxu0 %v5025_v58  ;;  %6498 = vmatprep.subr.mxu1 %v5153_v26  ;;  %v5862_v30 = vpop.f32.mrf.mxu1  ;;  %v5757_v3 = vpop.f32.mrf.mxu0  ;;  %v5136_v58 = vld [vmem:[#allocation8 + $0x3f0] sm:$0xff] }
 0xc57   :  { %6241 = vmatprep.mubr.f32.mxu0 %v12414_v45  ;;  %6354 = vmatprep.mubr.f32.mxu1 %v12417_v36  ;;  %v12420_v29 = vadd.f32 %v5862_v30, %v5749_v31  ;;  %v5264_v26 = vld [vmem:[#allocation8 + $0x7f0] sm:$0xff] }
 0xc58   :  { %6386 = vmatpush1.msra.mxu0 %v5024_v41  ;;  %6499 = vmatpush1.msra.mxu1 %v5152_v32  ;;  %v5864_v52 = vpop.f32.mrf.mxu1  ;;  %v5260_v30 = vld [vmem:[#allocation8 + $0x7d0] sm:$0xff] }
 0xc59   :  { %6387 = vmatprep.subr.mxu0 %v5021_v34  ;;  %6500 = vmatprep.subr.mxu1 %v5149_v6  ;;  %v12422_v55 = vadd.f32 %v5864_v52, %v5751_v24  ;;  %v5132_v6 = vld [vmem:[#allocation8 + $0x3d0] sm:$0xff] }
 0xc5a   :  { %6388 = vmatpush1.msra.mxu0 %v5020_v13  ;;  %6501 = vmatpush1.msra.mxu1 %v5148_v47  ;;  %v5868_v20 = vpop.f32.mrf.mxu1  ;;  %v5129_v13 = vld [vmem:[#allocation8 + $0x3b8] sm:$0xff]  ;;  %v5128_v52 = vld [vmem:[#allocation8 + $0x3b0] sm:$0xff] }
 0xc5b   :  { %6242 = vmatmul.mubr.f32.gmra.mxu0 %v12424_v63  ;;  %6355 = vmatmul.mubr.f32.gmra.mxu1 %v12427_v60  ;;  %v12430_v4 = vadd.f32 %v5868_v20, %v5755_v22  ;;  %v5261_v22 = vld [vmem:[#allocation8 + $0x7d8] sm:$0xff] }
 0xc5c   :  { %6389 = vmatprep.subr.mxu0 %v5017_v35  ;;  %6502 = vmatprep.subr.mxu1 %v5145_v21  ;;  %v5870_v14 = vpop.f32.mrf.mxu1  ;;  %v5257_v47 = vld [vmem:[#allocation8 + $0x7b8] sm:$0xff]  ;;  %v5256_v35 = vld [vmem:[#allocation8 + $0x7b0] sm:$0xff] }
 0xc5d   :  { %6390 = vmatpush1.msra.mxu0 %v5016_v42  ;;  %6425 = vmatprep.mubr.f32.mxu0 %v12330_v56  ;;  %v12433_v8 = vadd.f32 %v5870_v14, %v5757_v3  ;;  %v5761_v31 = vpop.f32.mrf.mxu0  ;;  %v5133_v56 = vld [vmem:[#allocation8 + $0x3d8] sm:$0xff] }
 0xc5e   :  { %6503 = vmatpush1.msra.mxu1 %v5144_v23  ;;  %6538 = vmatprep.mubr.f32.mxu1 %v12333_v9  ;;  %v5874_v24 = vpop.f32.mrf.mxu1  ;;  %v5125_v21 = vld [vmem:[#allocation8 + $0x398] sm:$0xff]  ;;  %v5124_v23 = vld [vmem:[#allocation8 + $0x390] sm:$0xff] }
 0xc5f   :  { %6391 = vmatprep.subr.mxu0 %v5013_v15  ;;  %6504 = vmatprep.subr.mxu1 %v5141_v1  ;;  %v12436_v41 = vadd.f32 %v5874_v24, %v5761_v31  ;;  %v5763_v32 = vpop.f32.mrf.mxu0  ;;  %v5253_v3 = vld [vmem:[#allocation8 + $0x798] sm:$0xff]  ;;  %v5252_v15 = vld [vmem:[#allocation8 + $0x790] sm:$0xff] }
 0xc60   :  { %6392 = vmatpush1.msra.mxu0 %v5012_v37  ;;  %6505 = vmatpush1.msra.mxu1 %v5140_v2  ;;  %v5876_v34 = vpop.f32.mrf.mxu1  ;;  %v5121_v14 = vld [vmem:[#allocation8 + $0x378] sm:$0xff] }
 0xc61   :  { %6393 = vmatprep.subr.mxu0 %v5137_v57  ;;  %6506 = vmatprep.subr.mxu1 %v5265_v5  ;;  %v12438_v9 = vadd.f32 %v5876_v34, %v5763_v32  ;;  %v5249_v37 = vld [vmem:[#allocation8 + $0x778] sm:$0xff]  ;;  %v5120_v57 = vld [vmem:[#allocation8 + $0x370] sm:$0xff] }
 0xc62   :  { %6394 = vmatpush2.msra.mxu0 %v5136_v58  ;;  %6507 = vmatpush2.msra.mxu1 %v5264_v26  ;;  %v5248_v5 = vld [vmem:[#allocation8 + $0x770] sm:$0xff]  ;;  %v5117_v58 = vld [vmem:[#allocation8 + $0x358] sm:$0xff] }
 0xc63   :  { %6395 = vmatprep.subr.mxu0 %v5133_v56  ;;  %6508 = vmatprep.subr.mxu1 %v5261_v22  ;;  %v5245_v26 = vld [vmem:[#allocation8 + $0x758] sm:$0xff]  ;;  %v5116_v32 = vld [vmem:[#allocation8 + $0x350] sm:$0xff] }
 0xc64   :  { %6396 = vmatpush2.msra.mxu0 %v5132_v6  ;;  %6509 = vmatpush2.msra.mxu1 %v5260_v30  ;;  %v5767_v42 = vpop.f32.mrf.mxu0  ;;  %v5880_v20 = vpop.f32.mrf.mxu1  ;;  %v5244_v56 = vld [vmem:[#allocation8 + $0x750] sm:$0xff]  ;;  %v5113_v22 = vld [vmem:[#allocation8 + $0x338] sm:$0xff] }
 0xc65   :  { %6397 = vmatprep.subr.mxu0 %v5129_v13  ;;  %6510 = vmatprep.subr.mxu1 %v5257_v47  ;;  %v12440_v1 = vadd.f32 %v5880_v20, %v5767_v42  ;;  %v5241_v34 = vld [vmem:[#allocation8 + $0x738] sm:$0xff]  ;;  %v5112_v13 = vld [vmem:[#allocation8 + $0x330] sm:$0xff] }
 0xc66   :  { %6398 = vmatpush2.msra.mxu0 %v5128_v52  ;;  %6511 = vmatpush2.msra.mxu1 %v5256_v35  ;;  %v5769_v2 = vpop.f32.mrf.mxu0  ;;  %v5882_v31 = vpop.f32.mrf.mxu1  ;;  %v5240_v47 = vld [vmem:[#allocation8 + $0x730] sm:$0xff]  ;;  %v5109_v35 = vld [vmem:[#allocation8 + $0x318] sm:$0xff] }
 0xc67   :  { %6399 = vmatprep.subr.mxu0 %v5125_v21  ;;  %6512 = vmatprep.subr.mxu1 %v5253_v3  ;;  %v12442_v24 = vadd.f32 %v5882_v31, %v5769_v2  ;;  %v5237_v21 = vld [vmem:[#allocation8 + $0x718] sm:$0xff]  ;;  %v5108_v20 = vld [vmem:[#allocation8 + $0x310] sm:$0xff] }
 0xc68   :  { %6400 = vmatpush2.msra.mxu0 %v5124_v23  ;;  %6513 = vmatpush2.msra.mxu1 %v5252_v15  ;;  %v5236_v23 = vld [vmem:[#allocation8 + $0x710] sm:$0xff] }
 0xc69   :  { %6401 = vmatprep.subr.mxu0 %v5121_v14  ;;  %6514 = vmatprep.subr.mxu1 %v5249_v37  ;;  %v5105_v14 = vld [vmem:[#allocation8 + $0x2f8] sm:$0xff]  ;;  %v5104_v2 = vld [vmem:[#allocation8 + $0x2f0] sm:$0xff] }
 0xc6a   :  { %6402 = vmatpush2.msra.mxu0 %v5120_v57  ;;  %6515 = vmatpush2.msra.mxu1 %v5248_v5  ;;  %v5773_v6 = vpop.f32.mrf.mxu0  ;;  %v5886_v30 = vpop.f32.mrf.mxu1  ;;  %v5233_v37 = vld [vmem:[#allocation8 + $0x6f8] sm:$0xff]  ;;  %v5232_v31 = vld [vmem:[#allocation8 + $0x6f0] sm:$0xff] }
 0xc6b   :  { %6403 = vmatprep.subr.mxu0 %v5117_v58  ;;  %6516 = vmatprep.subr.mxu1 %v5245_v26  ;;  %v12444_v52 = vadd.f32 %v5886_v30, %v5773_v6  ;;  %v5101_v57 = vld [vmem:[#allocation8 + $0x2d8] sm:$0xff] }
 0xc6c   :  { %6404 = vmatpush2.msra.mxu0 %v5116_v32  ;;  %6517 = vmatpush2.msra.mxu1 %v5244_v56  ;;  %v5775_v3 = vpop.f32.mrf.mxu0  ;;  %v5888_v42 = vpop.f32.mrf.mxu1  ;;  %v5229_v5 = vld [vmem:[#allocation8 + $0x6d8] sm:$0xff]  ;;  %v5100_v32 = vld [vmem:[#allocation8 + $0x2d0] sm:$0xff] }
 0xc6d   :  { %6405 = vmatprep.subr.mxu0 %v5113_v22  ;;  %6518 = vmatprep.subr.mxu1 %v5241_v34  ;;  %v12446_v15 = vadd.f32 %v5888_v42, %v5775_v3  ;;  %v5228_v56 = vld [vmem:[#allocation8 + $0x6d0] sm:$0xff]  ;;  %v5097_v34 = vld [vmem:[#allocation8 + $0x2b8] sm:$0xff] }
 0xc6e   :  { %6406 = vmatpush2.msra.mxu0 %v5112_v13  ;;  %6519 = vmatpush2.msra.mxu1 %v5240_v47  ;;  %v5225_v6 = vld [vmem:[#allocation8 + $0x6b8] sm:$0xff]  ;;  %v5096_v47 = vld [vmem:[#allocation8 + $0x2b0] sm:$0xff] }
 0xc6f   :  { %6407 = vmatprep.subr.mxu0 %v5109_v35  ;;  %6520 = vmatprep.subr.mxu1 %v5237_v21  ;;  %v5224_v35 = vld [vmem:[#allocation8 + $0x6b0] sm:$0xff]  ;;  %v5093_v3 = vld [vmem:[#allocation8 + $0x298] sm:$0xff] }
 0xc70   :  { %6408 = vmatpush2.msra.mxu0 %v5108_v20  ;;  %6521 = vmatpush2.msra.mxu1 %v5236_v23  ;;  %v5779_v58 = vpop.f32.mrf.mxu0  ;;  %v5892_v26 = vpop.f32.mrf.mxu1  ;;  %v5221_v42 = vld [vmem:[#allocation8 + $0x698] sm:$0xff]  ;;  %v5092_v20 = vld [vmem:[#allocation8 + $0x290] sm:$0xff] }
 0xc71   :  { %6409 = vmatprep.subr.mxu0 %v5105_v14  ;;  %6522 = vmatprep.subr.mxu1 %v5233_v37  ;;  %v12448_v22 = vadd.f32 %v5892_v26, %v5779_v58  ;;  %v5220_v23 = vld [vmem:[#allocation8 + $0x690] sm:$0xff]  ;;  %v5089_v14 = vld [vmem:[#allocation8 + $0x278] sm:$0xff] }
 0xc72   :  { %6410 = vmatpush2.msra.mxu0 %v5104_v2  ;;  %6523 = vmatpush2.msra.mxu1 %v5232_v31  ;;  %v5781_v30 = vpop.f32.mrf.mxu0  ;;  %v5894_v13 = vpop.f32.mrf.mxu1  ;;  %v5217_v37 = vld [vmem:[#allocation8 + $0x678] sm:$0xff] }
 0xc73   :  { %6411 = vmatprep.subr.mxu0 %v5101_v57  ;;  %6524 = vmatprep.subr.mxu1 %v5229_v5  ;;  %v12450_v21 = vadd.f32 %v5894_v13, %v5781_v30  ;;  %v5088_v57 = vld [vmem:[#allocation8 + $0x270] sm:$0xff]  ;;  %v5085_v26 = vld [vmem:[#allocation8 + $0x258] sm:$0xff] }
 0xc74   :  { %6412 = vmatpush2.msra.mxu0 %v5100_v32  ;;  %6525 = vmatpush2.msra.mxu1 %v5228_v56  ;;  %v5216_v5 = vld [vmem:[#allocation8 + $0x670] sm:$0xff]  ;;  %v5213_v32 = vld [vmem:[#allocation8 + $0x658] sm:$0xff] }
 0xc75   :  { %6413 = vmatprep.subr.mxu0 %v5097_v34  ;;  %6526 = vmatprep.subr.mxu1 %v5225_v6  ;;  %v5084_v6 = vld [vmem:[#allocation8 + $0x250] sm:$0xff] }
 0xc76   :  { %6414 = vmatpush2.msra.mxu0 %v5096_v47  ;;  %6527 = vmatpush2.msra.mxu1 %v5224_v35  ;;  %v5785_v2 = vpop.f32.mrf.mxu0  ;;  %v5898_v31 = vpop.f32.mrf.mxu1  ;;  %v5212_v30 = vld [vmem:[#allocation8 + $0x650] sm:$0xff]  ;;  %v5081_v47 = vld [vmem:[#allocation8 + $0x238] sm:$0xff] }
 0xc77   :  { %6415 = vmatprep.subr.mxu0 %v5093_v3  ;;  %6528 = vmatprep.subr.mxu1 %v5221_v42  ;;  %v12452_v58 = vadd.f32 %v5898_v31, %v5785_v2  ;;  %v5209_v35 = vld [vmem:[#allocation8 + $0x638] sm:$0xff]  ;;  %v5080_v3 = vld [vmem:[#allocation8 + $0x230] sm:$0xff] }
 0xc78   :  { %6416 = vmatpush2.msra.mxu0 %v5092_v20  ;;  %6529 = vmatpush2.msra.mxu1 %v5220_v23  ;;  %v5787_v56 = vpop.f32.mrf.mxu0  ;;  %v5900_v34 = vpop.f32.mrf.mxu1  ;;  %v5208_v42 = vld [vmem:[#allocation8 + $0x630] sm:$0xff]  ;;  %v5077_v20 = vld [vmem:[#allocation8 + $0x218] sm:$0xff] }
 0xc79   :  { %6417 = vmatprep.subr.mxu0 %v5089_v14  ;;  %6530 = vmatprep.subr.mxu1 %v5217_v37  ;;  %v12454_v13 = vadd.f32 %v5900_v34, %v5787_v56  ;;  %v5205_v23 = vld [vmem:[#allocation8 + $0x618] sm:$0xff]  ;;  %v5076_v14 = vld [vmem:[#allocation8 + $0x210] sm:$0xff] }
 0xc7a   :  { %6418 = vmatpush2.msra.mxu0 %v5088_v57  ;;  %6531 = vmatpush2.msra.mxu1 %v5216_v5  ;;  %v5204_v37 = vld [vmem:[#allocation8 + $0x610] sm:$0xff] }
 0xc7b   :  { %6419 = vmatprep.subr.mxu0 %v5085_v26  ;;  %6532 = vmatprep.subr.mxu1 %v5213_v32  ;;  %v6785_v26 = vld [vmem:[#allocation8 + $0x11e8] sm:$0xff] }
 0xc7c   :  { %6420 = vmatpush2.msra.mxu0 %v5084_v6  ;;  %6533 = vmatpush2.msra.mxu1 %v5212_v30  ;;  %v5791_v2 = vpop.f32.mrf.mxu0  ;;  %v5904_v31 = vpop.f32.mrf.mxu1  ;;  %v6913_v32 = vld [vmem:[#allocation8 + $0x15e8] sm:$0xff]  ;;  %v6784_v6 = vld [vmem:[#allocation8 + $0x11e0] sm:$0xff] }
 0xc7d   :  { %6421 = vmatprep.subr.mxu0 %v5081_v47  ;;  %6534 = vmatprep.subr.mxu1 %v5209_v35  ;;  %v12456_v56 = vadd.f32 %v5904_v31, %v5791_v2  ;;  %v6912_v30 = vld [vmem:[#allocation8 + $0x15e0] sm:$0xff]  ;;  %v6781_v47 = vld [vmem:[#allocation8 + $0x11c8] sm:$0xff] }
 0xc7e   :  { %6422 = vmatpush2.msra.mxu0 %v5080_v3  ;;  %6535 = vmatpush2.msra.mxu1 %v5208_v42  ;;  %v5793_v57 = vpop.f32.mrf.mxu0  ;;  %v5906_v5 = vpop.f32.mrf.mxu1  ;;  %v6909_v35 = vld [vmem:[#allocation8 + $0x15c8] sm:$0xff]  ;;  %v6780_v3 = vld [vmem:[#allocation8 + $0x11c0] sm:$0xff] }
 0xc7f   :  { %6423 = vmatprep.subr.mxu0 %v5077_v20  ;;  %6536 = vmatprep.subr.mxu1 %v5205_v23  ;;  %v12458_v34 = vadd.f32 %v5906_v5, %v5793_v57  ;;  %v6908_v42 = vld [vmem:[#allocation8 + $0x15c0] sm:$0xff]  ;;  %v6777_v20 = vld [vmem:[#allocation8 + $0x11a8] sm:$0xff] }
 0xc80   :  { %6424 = vmatpush2.msra.mxu0 %v5076_v14  ;;  %6537 = vmatpush2.msra.mxu1 %v5204_v37  ;;  %v6904_v23 = vld [vmem:[#allocation8 + $0x15a0] sm:$0xff]  ;;  %v6773_v2 = vld [vmem:[#allocation8 + $0x1188] sm:$0xff] }
 0xc81   :  { %6426 = vmatmul.mubr.f32.vlgmr.msra.gmra.mxu0 %v12336_v49  ;;  %6539 = vmatmul.mubr.f32.vlgmr.msra.gmra.mxu1 %v12338_v11  ;;  %v6905_v49 = vld [vmem:[#allocation8 + $0x15a8] sm:$0xff]  ;;  %v6776_v11 = vld [vmem:[#allocation8 + $0x11a0] sm:$0xff] }
 0xc82   :  { %6980 = vmatprep.subr.mxu0 %v6785_v26  ;;  %7093 = vmatprep.subr.mxu1 %v6913_v32  ;;  %v6901_v31 = vld [vmem:[#allocation8 + $0x1588] sm:$0xff]  ;;  %v6772_v14 = vld [vmem:[#allocation8 + $0x1180] sm:$0xff] }
 0xc83   :  { %6431 = vmatprep.mubr.f32.mxu0 %v12342_v12  ;;  %6544 = vmatprep.mubr.f32.mxu1 %v12345_v46  ;;  %v6900_v37 = vld [vmem:[#allocation8 + $0x1580] sm:$0xff]  ;;  %v6769_v57 = vld [vmem:[#allocation8 + $0x1168] sm:$0xff] }
 0xc84   :  { %6981 = vmatpush1.msra.mxu0 %v6784_v6  ;;  %7094 = vmatpush1.msra.mxu1 %v6912_v30  ;;  %v6896_v5 = vld [vmem:[#allocation8 + $0x1560] sm:$0xff]  ;;  %v6761_v6 = vld [vmem:[#allocation8 + $0x1128] sm:$0xff] }
 0xc85   :  { %6982 = vmatprep.subr.mxu0 %v6781_v47  ;;  %7095 = vmatprep.subr.mxu1 %v6909_v35  ;;  %v6764_v26 = vld [vmem:[#allocation8 + $0x1140] sm:$0xff] }
 0xc86   :  { %6983 = vmatpush1.msra.mxu0 %v6780_v3  ;;  %7096 = vmatpush1.msra.mxu1 %v6908_v42  ;;  %v6892_v32 = vld [vmem:[#allocation8 + $0x1540] sm:$0xff]  ;;  %v6753_v3 = vld [vmem:[#allocation8 + $0x10e8] sm:$0xff] }
 0xc87   :  { %6432 = vmatmul.mubr.f32.gmra.mxu0 %v12348_v44  ;;  %6545 = vmatmul.mubr.f32.gmra.mxu1 %v12351_v48  ;;  %v6897_v44 = vld [vmem:[#allocation8 + $0x1568] sm:$0xff]  ;;  %v6768_v48 = vld [vmem:[#allocation8 + $0x1160] sm:$0xff] }
 0xc88   :  { %6984 = vmatprep.subr.mxu0 %v6777_v20  ;;  %7097 = vmatprep.subr.mxu1 %v6905_v49  ;;  %v6888_v30 = vld [vmem:[#allocation8 + $0x1520] sm:$0xff] }
 0xc89   :  { %6437 = vmatprep.mubr.f32.mxu0 %v12354_v0  ;;  %6550 = vmatprep.mubr.f32.mxu1 %v12357_v38  ;;  %v6765_v0 = vld [vmem:[#allocation8 + $0x1148] sm:$0xff]  ;;  %v6756_v47 = vld [vmem:[#allocation8 + $0x1100] sm:$0xff] }
 0xc8a   :  { %6985 = vmatpush1.msra.mxu0 %v6776_v11  ;;  %7098 = vmatpush1.msra.mxu1 %v6904_v23  ;;  %v6893_v38 = vld [vmem:[#allocation8 + $0x1548] sm:$0xff]  ;;  %v6884_v35 = vld [vmem:[#allocation8 + $0x1500] sm:$0xff] }
 0xc8b   :  { %6986 = vmatprep.subr.mxu0 %v6773_v2  ;;  %7099 = vmatprep.subr.mxu1 %v6901_v31  ;;  %v6880_v42 = vld [vmem:[#allocation8 + $0x14e0] sm:$0xff]  ;;  %v6745_v11 = vld [vmem:[#allocation8 + $0x10a8] sm:$0xff] }
 0xc8c   :  { %6987 = vmatpush1.msra.mxu0 %v6772_v14  ;;  %7100 = vmatpush1.msra.mxu1 %v6900_v37  ;;  %v6748_v20 = vld [vmem:[#allocation8 + $0x10c0] sm:$0xff] }
 0xc8d   :  { %6438 = vmatmul.mubr.f32.gmra.mxu0 %v12360_v54  ;;  %6551 = vmatmul.mubr.f32.gmra.mxu1 %v12363_v40  ;;  %v6889_v54 = vld [vmem:[#allocation8 + $0x1528] sm:$0xff]  ;;  %v6760_v40 = vld [vmem:[#allocation8 + $0x1120] sm:$0xff] }
 0xc8e   :  { %6988 = vmatprep.subr.mxu0 %v6769_v57  ;;  %7101 = vmatprep.subr.mxu1 %v6897_v44  ;;  %v6876_v49 = vld [vmem:[#allocation8 + $0x14c0] sm:$0xff] }
 0xc8f   :  { %6443 = vmatprep.mubr.f32.mxu0 %v12366_v18  ;;  %6556 = vmatprep.mubr.f32.mxu1 %v12369_v28  ;;  %v6757_v18 = vld [vmem:[#allocation8 + $0x1108] sm:$0xff]  ;;  %v6872_v23 = vld [vmem:[#allocation8 + $0x14a0] sm:$0xff] }
 0xc90   :  { %6989 = vmatpush1.msra.mxu0 %v6768_v48  ;;  %7102 = vmatpush1.msra.mxu1 %v6896_v5  ;;  %v6885_v28 = vld [vmem:[#allocation8 + $0x1508] sm:$0xff]  ;;  %v6740_v2 = vld [vmem:[#allocation8 + $0x1080] sm:$0xff] }
 0xc91   :  { %6990 = vmatprep.subr.mxu0 %v6765_v0  ;;  %7103 = vmatprep.subr.mxu1 %v6893_v38  ;;  %v6868_v31 = vld [vmem:[#allocation8 + $0x1480] sm:$0xff]  ;;  %v6588_v0 = vld [vmem:[#allocation2 + $0x8] sm:$0xfc] }
 0xc92   :  { %6991 = vmatpush1.msra.mxu0 %v6764_v26  ;;  %7104 = vmatpush1.msra.mxu1 %v6892_v32  ;;  %v6733_v38 = vld [vmem:[#allocation8 + $0x1048] sm:$0xff]  ;;  %v6590_v32 = vld [vmem:[#allocation2 + $0x18] sm:$0xfc] }
 0xc93   :  { %6444 = vmatmul.mubr.f32.gmra.mxu0 %v12372_v25  ;;  %6557 = vmatmul.mubr.f32.gmra.mxu1 %v12375_v51  ;;  %v6881_v25 = vld [vmem:[#allocation8 + $0x14e8] sm:$0xff]  ;;  %v6752_v51 = vld [vmem:[#allocation8 + $0x10e0] sm:$0xff] }
 0xc94   :  { %6992 = vmatprep.subr.mxu0 %v6761_v6  ;;  %7105 = vmatprep.subr.mxu1 %v6889_v54  ;;  %v6861_v26 = vld [vmem:[#allocation8 + $0x1448] sm:$0xff]  ;;  %v6732_v6 = vld [vmem:[#allocation8 + $0x1040] sm:$0xff] }
 0xc95   :  { %6449 = vmatprep.mubr.f32.mxu0 %v12378_v19  ;;  %6562 = vmatprep.mubr.f32.mxu1 %v12380_v7  ;;  %v6749_v19 = vld [vmem:[#allocation8 + $0x10c8] sm:$0xff]  ;;  %v6860_v54 = vld [vmem:[#allocation8 + $0x1440] sm:$0xff] }
 0xc96   :  { %6993 = vmatpush1.msra.mxu0 %v6760_v40  ;;  %7106 = vmatpush1.msra.mxu1 %v6888_v30  ;;  %v6877_v7 = vld [vmem:[#allocation8 + $0x14c8] sm:$0xff] }
 0xc97   :  { %6994 = vmatprep.subr.mxu0 %v6757_v18  ;;  %7107 = vmatprep.subr.mxu1 %v6885_v28  ;;  %v6729_v18 = vld [vmem:[#allocation8 + $0x1028] sm:$0xff] }
 0xc98   :  { %6995 = vmatpush1.msra.mxu0 %v6756_v47  ;;  %7108 = vmatpush1.msra.mxu1 %v6884_v35  ;;  %v6857_v28 = vld [vmem:[#allocation8 + $0x1428] sm:$0xff]  ;;  %v6628_v47 = vrot.slane %v6590_v32, 2 }
 0xc99   :  { %6450 = vmatmul.mubr.f32.gmra.mxu0 %v12384_v27  ;;  %6563 = vmatmul.mubr.f32.gmra.mxu1 %v12386_v62  ;;  %v6873_v27 = vld [vmem:[#allocation8 + $0x14a8] sm:$0xff]  ;;  %v6744_v62 = vld [vmem:[#allocation8 + $0x10a0] sm:$0xff] }
 0xc9a   :  { %6996 = vmatprep.subr.mxu0 %v6753_v3  ;;  %7109 = vmatprep.subr.mxu1 %v6881_v25 }
 0xc9b   :  { %6455 = vmatprep.mubr.f32.mxu0 %v12390_v33  ;;  %6568 = vmatprep.mubr.f32.mxu1 %v12393_v10  ;;  %v6741_v33 = vld [vmem:[#allocation8 + $0x1088] sm:$0xff] }
 0xc9c   :  { %6997 = vmatpush1.msra.mxu0 %v6752_v51  ;;  %7110 = vmatpush1.msra.mxu1 %v6880_v42  ;;  %v6869_v10 = vld [vmem:[#allocation8 + $0x1488] sm:$0xff]  ;;  %v6856_v51 = vld [vmem:[#allocation8 + $0x1420] sm:$0xff]  ;;  %v6629_v42 = vrot.slane %v12345_v46, 2  ;;  %v9130_v46 = vld [vmem:[#allocation2 + $0x78] sm:$0xff] }
 0xc9d   :  { %6998 = vmatprep.subr.mxu0 %v6749_v19  ;;  %7111 = vmatprep.subr.mxu1 %v6877_v7  ;;  %v6725_v7 = vld [vmem:[#allocation8 + $0x1008] sm:$0xff] }
 0xc9e   :  { %6999 = vmatpush1.msra.mxu0 %v6748_v20  ;;  %7112 = vmatpush1.msra.mxu1 %v6876_v49  ;;  %v6853_v20 = vld [vmem:[#allocation8 + $0x1408] sm:$0xff]  ;;  %v6852_v49 = vld [vmem:[#allocation8 + $0x1400] sm:$0xff] }
 0xc9f   :  { %6456 = vmatmul.mubr.f32.gmra.mxu0 %v12396_v43  ;;  %6569 = vmatmul.mubr.f32.gmra.mxu1 %v12399_v53  ;;  %v6737_v43 = vld [vmem:[#allocation8 + $0x1068] sm:$0xff] }
 0xca0   :  { %7000 = vmatprep.subr.mxu0 %v6745_v11  ;;  %7113 = vmatprep.subr.mxu1 %v6873_v27  ;;  %v6865_v53 = vld [vmem:[#allocation8 + $0x1468] sm:$0xff] }
 0xca1   :  { %6461 = vmatprep.mubr.f32.mxu0 %v12402_v50  ;;  %6574 = vmatprep.mubr.f32.mxu1 %v12405_v39  ;;  %v5975_v14 = vpop.f32.mrf.mxu0  ;;  %v6088_v37 = vpop.f32.mrf.mxu1  ;;  %v6736_v50 = vld [vmem:[#allocation8 + $0x1060] sm:$0xff] }
 0xca2   :  { %7001 = vmatpush1.msra.mxu0 %v6744_v62  ;;  %7114 = vmatpush1.msra.mxu1 %v6872_v23  ;;  %v12484_v57 = vadd.f32 %v6088_v37, %v5975_v14  ;;  %v6864_v39 = vld [vmem:[#allocation8 + $0x1460] sm:$0xff]  ;;  %v6849_v62 = vld [vmem:[#allocation8 + $0x13e8] sm:$0xff] }
 0xca3   :  { %7002 = vmatprep.subr.mxu0 %v6741_v33  ;;  %7115 = vmatprep.subr.mxu1 %v6869_v10  ;;  %v5977_v44 = vpop.f32.mrf.mxu0  ;;  %v6090_v48 = vpop.f32.mrf.mxu1  ;;  %v6977_v23 = vld [vmem:[#allocation8 + $0x17e8] sm:$0xff]  ;;  %v6848_v10 = vld [vmem:[#allocation8 + $0x13e0] sm:$0xff] }
 0xca4   :  { %14225 = vst [vmem:[#allocation89_spill] sm:$0xff] %v12484_v57  ;;  %7003 = vmatpush1.msra.mxu0 %v6740_v2  ;;  %7116 = vmatpush1.msra.mxu1 %v6868_v31  ;;  %v12486_v5 = vadd.f32 %v6090_v48, %v5977_v44  ;;  %v6976_v2 = vld [vmem:[#allocation8 + $0x17e0] sm:$0xff]  ;;  %v6845_v37 = vld [vmem:[#allocation8 + $0x13c8] sm:$0xff] }
 0xca5   :  { %6462 = vmatmul.mubr.f32.gmra.mxu0 %v12408_v16  ;;  %6575 = vmatmul.mubr.f32.gmra.mxu1 %v12411_v61  ;;  %v6622_v16 = vrot.slane %v6588_v0, 2  ;;  %v6844_v44 = vld [vmem:[#allocation8 + $0x13c0] sm:$0xff] }
 0xca6   :  { %14226 = vst [vmem:[#allocation90_spill] sm:$0xff] %v12486_v5  ;;  %7004 = vmatprep.subr.mxu0 %v6737_v43  ;;  %7117 = vmatprep.subr.mxu1 %v6865_v53  ;;  %v6973_v43 = vld [vmem:[#allocation8 + $0x17c8] sm:$0xff]  ;;  %v6972_v48 = vld [vmem:[#allocation8 + $0x17c0] sm:$0xff] }
 0xca7   :  { %6467 = vmatprep.mubr.f32.mxu0 %v12414_v45  ;;  %6580 = vmatprep.mubr.f32.mxu1 %v12417_v36  ;;  %v5981_v40 = vpop.f32.mrf.mxu0  ;;  %v6094_v30 = vpop.f32.mrf.mxu1  ;;  %v6728_v45 = vld [vmem:[#allocation8 + $0x1020] sm:$0xff]  ;;  %v6623_v36 = vrot.slane %v12342_v12, 2  ;;  %v6910_v12 = vld [vmem:[#allocation8 + $0x15d0] sm:$0xff] }
 0xca8   :  { %7005 = vmatpush1.msra.mxu0 %v6736_v50  ;;  %7118 = vmatpush1.msra.mxu1 %v6864_v39  ;;  %v12492_v61 = vadd.f32 %v6094_v30, %v5981_v40  ;;  %v6841_v50 = vld [vmem:[#allocation8 + $0x13a8] sm:$0xff]  ;;  %v6840_v0 = vld [vmem:[#allocation8 + $0x13a0] sm:$0xff] }
 0xca9   :  { %7006 = vmatprep.subr.mxu0 %v6733_v38  ;;  %7119 = vmatprep.subr.mxu1 %v6861_v26  ;;  %v5983_v35 = vpop.f32.mrf.mxu0  ;;  %v6096_v3 = vpop.f32.mrf.mxu1  ;;  %v12503_v19 = vsel %vm2110_vm3, %v6622_v16, %v6623_v36  ;;  %v6969_v39 = vld [vmem:[#allocation8 + $0x17a8] sm:$0xff]  ;;  %v6968_v38 = vld [vmem:[#allocation8 + $0x17a0] sm:$0xff] }
 0xcaa   :  { %14227 = vst [vmem:[#allocation92_spill] sm:$0xff] %v12492_v61  ;;  %7007 = vmatpush1.msra.mxu0 %v6732_v6  ;;  %7120 = vmatpush1.msra.mxu1 %v6860_v54  ;;  %v12495_v25 = vadd.f32 %v6096_v3, %v5983_v35  ;;  %v6837_v6 = vld [vmem:[#allocation8 + $0x1388] sm:$0xff]  ;;  %v6836_v30 = vld [vmem:[#allocation8 + $0x1380] sm:$0xff]  ;;  %v6870_v61 = vld [vmem:[#allocation8 + $0x1490] sm:$0xff] }
 0xcab   :  { %6468 = vmatmul.mubr.f32.gmra.mxu0 %v12424_v63  ;;  %6581 = vmatmul.mubr.f32.gmra.mxu1 %v12427_v60  ;;  %v12509_v63 = vsel %vm2110_vm3, %v6628_v47, %v6629_v42  ;;  %v6724_v60 = vld [vmem:[#allocation8 + $0x1000] sm:$0xff]  ;;  %v6965_v54 = vld [vmem:[#allocation8 + $0x1788] sm:$0xff] }
 0xcac   :  { %14228 = vst [vmem:[#allocation93_spill] sm:$0xff] %v12495_v25  ;;  %7008 = vmatprep.subr.mxu0 %v6729_v18  ;;  %7121 = vmatprep.subr.mxu1 %v6857_v28  ;;  %v6964_v16 = vld [vmem:[#allocation8 + $0x1780] sm:$0xff]  ;;  %v6833_v47 = vld [vmem:[#allocation8 + $0x1368] sm:$0xff]  ;;  %v6742_v25 = vld [vmem:[#allocation8 + $0x1090] sm:$0xff] }
 0xcad   :  { %7009 = vmatpush1.msra.mxu0 %v6728_v45  ;;  %7044 = vmatprep.mubr.f32.mxu0 %v12503_v19  ;;  %v5987_v11 = vpop.f32.mrf.mxu0  ;;  %v6100_v27 = vpop.f32.mrf.mxu1  ;;  %v6961_v35 = vld [vmem:[#allocation8 + $0x1768] sm:$0xff]  ;;  %v6832_v45 = vld [vmem:[#allocation8 + $0x1360] sm:$0xff] }
 0xcae   :  { %7122 = vmatpush1.msra.mxu1 %v6856_v51  ;;  %7157 = vmatprep.mubr.f32.mxu1 %v12509_v63  ;;  %v12512_v33 = vadd.f32 %v6100_v27, %v5987_v11  ;;  %v6960_v51 = vld [vmem:[#allocation8 + $0x1760] sm:$0xff] }
 0xcaf   :  { %7010 = vmatprep.subr.mxu0 %v6725_v7  ;;  %7123 = vmatprep.subr.mxu1 %v6853_v20  ;;  %v5989_v31 = vpop.f32.mrf.mxu0  ;;  %v6102_v14 = vpop.f32.mrf.mxu1  ;;  %v6829_v7 = vld [vmem:[#allocation8 + $0x1348] sm:$0xff] }
 0xcb0   :  { %14229 = vst [vmem:[#allocation95_spill] sm:$0xff] %v12512_v33  ;;  %7011 = vmatpush1.msra.mxu0 %v6724_v60  ;;  %7124 = vmatpush1.msra.mxu1 %v6852_v49  ;;  %v12514_v53 = vadd.f32 %v6102_v14, %v5989_v31  ;;  %v6957_v20 = vld [vmem:[#allocation8 + $0x1748] sm:$0xff]  ;;  %v6828_v60 = vld [vmem:[#allocation8 + $0x1340] sm:$0xff] }
 0xcb1   :  { %7012 = vmatprep.subr.mxu0 %v6849_v62  ;;  %7125 = vmatprep.subr.mxu1 %v6977_v23  ;;  %v6956_v49 = vld [vmem:[#allocation8 + $0x1740] sm:$0xff]  ;;  %v6825_v62 = vld [vmem:[#allocation8 + $0x1328] sm:$0xff] }
 0xcb2   :  { %14230 = vst [vmem:[#allocation96_spill] sm:$0xff] %v12514_v53  ;;  %7013 = vmatpush2.msra.mxu0 %v6848_v10  ;;  %7126 = vmatpush2.msra.mxu1 %v6976_v2  ;;  %v6953_v23 = vld [vmem:[#allocation8 + $0x1728] sm:$0xff]  ;;  %v6824_v2 = vld [vmem:[#allocation8 + $0x1320] sm:$0xff] }
 0xcb3   :  { %7014 = vmatprep.subr.mxu0 %v6845_v37  ;;  %7127 = vmatprep.subr.mxu1 %v6973_v43  ;;  %v5993_v26 = vpop.f32.mrf.mxu0  ;;  %v6106_v32 = vpop.f32.mrf.mxu1  ;;  %v6952_v31 = vld [vmem:[#allocation8 + $0x1720] sm:$0xff]  ;;  %v6821_v43 = vld [vmem:[#allocation8 + $0x1308] sm:$0xff] }
 0xcb4   :  { %7015 = vmatpush2.msra.mxu0 %v6844_v44  ;;  %7128 = vmatpush2.msra.mxu1 %v6972_v48  ;;  %v12516_v40 = vadd.f32 %v6106_v32, %v5993_v26  ;;  %v6949_v44 = vld [vmem:[#allocation8 + $0x1708] sm:$0xff]  ;;  %v6816_v26 = vld [vmem:[#allocation8 + $0x12e0] sm:$0xff] }
 0xcb5   :  { %7016 = vmatprep.subr.mxu0 %v6841_v50  ;;  %7129 = vmatprep.subr.mxu1 %v6969_v39  ;;  %v5995_v18 = vpop.f32.mrf.mxu0  ;;  %v6108_v28 = vpop.f32.mrf.mxu1  ;;  %v6820_v50 = vld [vmem:[#allocation8 + $0x1300] sm:$0xff]  ;;  %v6600_v53 = vld [vmem:[#allocation2 + $0x128] sm:$0x3] }
 0xcb6   :  { %14231 = vst [vmem:[#allocation29_spill] sm:$0xff] %v12516_v40  ;;  %7017 = vmatpush2.msra.mxu0 %v6840_v0  ;;  %7130 = vmatpush2.msra.mxu1 %v6968_v38  ;;  %v12518_v3 = vadd.f32 %v6108_v28, %v5995_v18  ;;  %v6948_v39 = vld [vmem:[#allocation8 + $0x1700] sm:$0xff]  ;;  %v6817_v0 = vld [vmem:[#allocation8 + $0x12e8] sm:$0xff]  ;;  %v6875_v40 = vld [vmem:[#allocation8 + $0x14b8] sm:$0xff] }
 0xcb7   :  { %7018 = vmatprep.subr.mxu0 %v6837_v6  ;;  %7131 = vmatprep.subr.mxu1 %v6965_v54  ;;  %v6945_v38 = vld [vmem:[#allocation8 + $0x16e8] sm:$0xff]  ;;  %v6944_v32 = vld [vmem:[#allocation8 + $0x16e0] sm:$0xff] }
 0xcb8   :  { %14232 = vst [vmem:[#allocation31_spill] sm:$0xff] %v12518_v3  ;;  %7019 = vmatpush2.msra.mxu0 %v6836_v30  ;;  %7132 = vmatpush2.msra.mxu1 %v6964_v16  ;;  %v6813_v30 = vld [vmem:[#allocation8 + $0x12c8] sm:$0xff]  ;;  %v6812_v28 = vld [vmem:[#allocation8 + $0x12c0] sm:$0xff] }
 0xcb9   :  { %7020 = vmatprep.subr.mxu0 %v6833_v47  ;;  %7133 = vmatprep.subr.mxu1 %v6961_v35  ;;  %v5999_v11 = vpop.f32.mrf.mxu0  ;;  %v6112_v27 = vpop.f32.mrf.mxu1  ;;  %v6941_v16 = vld [vmem:[#allocation8 + $0x16c8] sm:$0xff]  ;;  %v6940_v47 = vld [vmem:[#allocation8 + $0x16c0] sm:$0xff] }
 0xcba   :  { %7021 = vmatpush2.msra.mxu0 %v6832_v45  ;;  %7134 = vmatpush2.msra.mxu1 %v6960_v51  ;;  %v12520_v10 = vadd.f32 %v6112_v27, %v5999_v11  ;;  %v6809_v51 = vld [vmem:[#allocation8 + $0x12a8] sm:$0xff] }
 0xcbb   :  { %7022 = vmatprep.subr.mxu0 %v6829_v7  ;;  %7135 = vmatprep.subr.mxu1 %v6957_v20  ;;  %v6001_v14 = vpop.f32.mrf.mxu0  ;;  %v6114_v37 = vpop.f32.mrf.mxu1  ;;  %v6937_v7 = vld [vmem:[#allocation8 + $0x16a8] sm:$0xff] }
 0xcbc   :  { %14233 = vst [vmem:[#allocation30_spill] sm:$0xff] %v12520_v10  ;;  %7023 = vmatpush2.msra.mxu0 %v6828_v60  ;;  %7136 = vmatpush2.msra.mxu1 %v6956_v49  ;;  %v12522_v48 = vadd.f32 %v6114_v37, %v6001_v14  ;;  %v6808_v60 = vld [vmem:[#allocation8 + $0x12a0] sm:$0xff]  ;;  %v6805_v11 = vld [vmem:[#allocation8 + $0x1288] sm:$0xff]  ;;  %v6878_v10 = vld [vmem:[#allocation8 + $0x14d0] sm:$0xff] }
 0xcbd   :  { %7024 = vmatprep.subr.mxu0 %v6825_v62  ;;  %7137 = vmatprep.subr.mxu1 %v6953_v23  ;;  %v6936_v49 = vld [vmem:[#allocation8 + $0x16a0] sm:$0xff]  ;;  %v6933_v27 = vld [vmem:[#allocation8 + $0x1688] sm:$0xff] }
 0xcbe   :  { %14234 = vst [vmem:[#allocation32_spill] sm:$0xff] %v12522_v48  ;;  %7025 = vmatpush2.msra.mxu0 %v6824_v2  ;;  %7138 = vmatpush2.msra.mxu1 %v6952_v31  ;;  %v6804_v62 = vld [vmem:[#allocation8 + $0x1280] sm:$0xff]  ;;  %v6801_v14 = vld [vmem:[#allocation8 + $0x1268] sm:$0xff] }
 0xcbf   :  { %7026 = vmatprep.subr.mxu0 %v6821_v43  ;;  %7139 = vmatprep.subr.mxu1 %v6949_v44  ;;  %v6005_v6 = vpop.f32.mrf.mxu0  ;;  %v6118_v54 = vpop.f32.mrf.mxu1  ;;  %v6932_v23 = vld [vmem:[#allocation8 + $0x1680] sm:$0xff]  ;;  %v6929_v37 = vld [vmem:[#allocation8 + $0x1668] sm:$0xff] }
 0xcc0   :  { %7027 = vmatpush2.msra.mxu0 %v6820_v50  ;;  %7140 = vmatpush2.msra.mxu1 %v6948_v39  ;;  %v12524_v18 = vadd.f32 %v6118_v54, %v6005_v6  ;;  %v6800_v44 = vld [vmem:[#allocation8 + $0x1260] sm:$0xff] }
 0xcc1   :  { %7028 = vmatprep.subr.mxu0 %v6817_v0  ;;  %7141 = vmatprep.subr.mxu1 %v6945_v38  ;;  %v6007_v35 = vpop.f32.mrf.mxu0  ;;  %v6120_v45 = vpop.f32.mrf.mxu1  ;;  %v6928_v50 = vld [vmem:[#allocation8 + $0x1660] sm:$0xff]  ;;  %v6797_v38 = vld [vmem:[#allocation8 + $0x1248] sm:$0xff] }
 0xcc2   :  { %14235 = vst [vmem:[#allocation33_spill] sm:$0xff] %v12524_v18  ;;  %7029 = vmatpush2.msra.mxu0 %v6816_v26  ;;  %7142 = vmatpush2.msra.mxu1 %v6944_v32  ;;  %v12526_v20 = vadd.f32 %v6120_v45, %v6007_v35  ;;  %v6925_v26 = vld [vmem:[#allocation8 + $0x1648] sm:$0xff]  ;;  %v6587_v32 = vld [vmem:[#allocation2] sm:$0xfc] }
 0xcc3   :  { %7030 = vmatprep.subr.mxu0 %v6813_v30  ;;  %7143 = vmatprep.subr.mxu1 %v6941_v16  ;;  %v6796_v54 = vld [vmem:[#allocation8 + $0x1240] sm:$0xff]  ;;  %v6589_v16 = vld [vmem:[#allocation2 + $0x10] sm:$0xfc] }
 0xcc4   :  { %14236 = vst [vmem:[#allocation35_spill] sm:$0xff] %v12526_v20  ;;  %7031 = vmatpush2.msra.mxu0 %v6812_v28  ;;  %7144 = vmatpush2.msra.mxu1 %v6940_v47  ;;  %v6924_v30 = vld [vmem:[#allocation8 + $0x1640] sm:$0xff]  ;;  %v6793_v28 = vld [vmem:[#allocation8 + $0x1228] sm:$0xff] }
 0xcc5   :  { %7032 = vmatprep.subr.mxu0 %v6809_v51  ;;  %7145 = vmatprep.subr.mxu1 %v6937_v7  ;;  %v6011_v2 = vpop.f32.mrf.mxu0  ;;  %v6124_v31 = vpop.f32.mrf.mxu1  ;;  %v6921_v47 = vld [vmem:[#allocation8 + $0x1628] sm:$0xff]  ;;  %v6792_v35 = vld [vmem:[#allocation8 + $0x1220] sm:$0xff] }
 0xcc6   :  { %7033 = vmatpush2.msra.mxu0 %v6808_v60  ;;  %7146 = vmatpush2.msra.mxu1 %v6936_v49  ;;  %v12528_v43 = vadd.f32 %v6124_v31, %v6011_v2  ;;  %v6920_v45 = vld [vmem:[#allocation8 + $0x1620] sm:$0xff]  ;;  %v6789_v60 = vld [vmem:[#allocation8 + $0x1208] sm:$0xff] }
 0xcc7   :  { %7034 = vmatprep.subr.mxu0 %v6805_v11  ;;  %7147 = vmatprep.subr.mxu1 %v6933_v27  ;;  %v6013_v39 = vpop.f32.mrf.mxu0  ;;  %v6126_v0 = vpop.f32.mrf.mxu1  ;;  %v6917_v49 = vld [vmem:[#allocation8 + $0x1608] sm:$0xff]  ;;  %v6619_v11 = vrot.slane %v6587_v32, 2  ;;  %v6625_v27 = vrot.slane %v6589_v16, 2  ;;  %v6916_v2 = vld [vmem:[#allocation8 + $0x1600] sm:$0xff]  ;;  %v6915_v16 = vld [vmem:[#allocation8 + $0x15f8] sm:$0xff] }
 0xcc8   :  { %14237 = vst [vmem:[#allocation34_spill] sm:$0xff] %v12528_v43  ;;  %7035 = vmatpush2.msra.mxu0 %v6804_v62  ;;  %7148 = vmatpush2.msra.mxu1 %v6932_v23  ;;  %v12530_v6 = vadd.f32 %v6126_v0, %v6013_v39  ;;  %v6788_v23 = vld [vmem:[#allocation8 + $0x1200] sm:$0xff]  ;;  %v9125_v0 = vld [vmem:[#allocation2 + $0x48] sm:$0xff] }
 0xcc9   :  { %7036 = vmatprep.subr.mxu0 %v6801_v14  ;;  %7149 = vmatprep.subr.mxu1 %v6929_v37  ;;  %v9123_v31 = vld [vmem:[#allocation2 + $0x20] sm:$0xff] }
 0xcca   :  { %14238 = vst [vmem:[#allocation36_spill] sm:$0xff] %v12530_v6  ;;  %7037 = vmatpush2.msra.mxu0 %v6800_v44  ;;  %7150 = vmatpush2.msra.mxu1 %v6928_v50  ;;  %v6620_v14 = vrot.slane %v9123_v31, 2  ;;  %v9124_v50 = vld [vmem:[#allocation2 + $0x30] sm:$0xff]  ;;  %v6595_v6 = vld [vmem:[#allocation2 + $0xa0] sm:$0xfc] }
 0xccb   :  { %7038 = vmatprep.subr.mxu0 %v6797_v38  ;;  %7151 = vmatprep.subr.mxu1 %v6925_v26  ;;  %v6017_v51 = vpop.f32.mrf.mxu0  ;;  %v6130_v7 = vpop.f32.mrf.mxu1  ;;  %v6626_v39 = vrot.slane %v9124_v50, 2  ;;  %v6633_v38 = vrot.slane %v9125_v0, 2  ;;  %v9126_v26 = vld [vmem:[#allocation2 + $0x58] sm:$0xff]  ;;  %v6782_v31 = vld [vmem:[#allocation8 + $0x11d0] sm:$0xff] }
 0xccc   :  { %7039 = vmatpush2.msra.mxu0 %v6796_v54  ;;  %7152 = vmatpush2.msra.mxu1 %v6924_v30  ;;  %v12532_v62 = vadd.f32 %v6130_v7, %v6017_v51  ;;  %v6637_v54 = vrot.slane %v9126_v26, 2  ;;  %v6787_v30 = vld [vmem:[#allocation8 + $0x11f8] sm:$0xff] }
 0xccd   :  { %7040 = vmatprep.subr.mxu0 %v6793_v28  ;;  %7153 = vmatprep.subr.mxu1 %v6921_v47  ;;  %v6019_v37 = vpop.f32.mrf.mxu0  ;;  %v6132_v44 = vpop.f32.mrf.mxu1  ;;  %v12537_v28 = vsel %vm2110_vm3, %v6619_v11, %v6620_v14  ;;  %v12540_v47 = vsel %vm2110_vm3, %v6625_v27, %v6626_v39  ;;  %v12547_v51 = vsel %vm2110_vm3, %v6623_v36, %v6633_v38  ;;  %v9127_v11 = vld [vmem:[#allocation2 + $0x40] sm:$0xff]  ;;  %v9129_v36 = vld [vmem:[#allocation2 + $0x68] sm:$0xff]  ;;  %v6907_v50 = vld [vmem:[#allocation8 + $0x15b8] sm:$0xff] }
 0xcce   :  { %14239 = vst [vmem:[#allocation37_spill] sm:$0xff] %v12532_v62  ;;  %7041 = vmatpush2.msra.mxu0 %v6792_v35  ;;  %7154 = vmatpush2.msra.mxu1 %v6920_v45  ;;  %v12534_v32 = vadd.f32 %v6132_v44, %v6019_v37  ;;  %v6786_v35 = vld [vmem:[#allocation8 + $0x11f0] sm:$0xff]  ;;  %v12552_v7 = vsel %vm2110_vm3, %v6629_v42, %v6637_v54  ;;  %v6631_v27 = vrot.slane %v9127_v11, 2  ;;  %v6641_v37 = vrot.slane %v9129_v36, 2  ;;  %v6779_v42 = vld [vmem:[#allocation8 + $0x11b8] sm:$0xff] }
 0xccf   :  { %7042 = vmatprep.subr.mxu0 %v6789_v60  ;;  %7155 = vmatprep.subr.mxu1 %v6917_v49  ;;  %v6914_v45 = vld [vmem:[#allocation8 + $0x15f0] sm:$0xff]  ;;  %v6783_v60 = vld [vmem:[#allocation8 + $0x11d8] sm:$0xff]  ;;  %v6645_v44 = vrot.slane %v9130_v46, 2 }
 0xcd0   :  { %14240 = vst [vmem:[#allocation38_spill] sm:$0xff] %v12534_v32  ;;  %7043 = vmatpush2.msra.mxu0 %v6788_v23  ;;  %7156 = vmatpush2.msra.mxu1 %v6916_v2  ;;  %v6911_v49 = vld [vmem:[#allocation8 + $0x15d8] sm:$0xff]  ;;  %v9128_v23 = vld [vmem:[#allocation2 + $0x50] sm:$0xff]  ;;  %v12557_v0 = vsel %vm2110_vm3, %v6620_v14, %v6631_v27  ;;  %v6596_v32 = vld [vmem:[#allocation2 + $0xa8] sm:$0xfc] }
 0xcd1   :  { %7045 = vmatmul.mubr.f32.vlgmr.msra.gmra.mxu0 %v12537_v28  ;;  %7158 = vmatmul.mubr.f32.vlgmr.msra.gmra.mxu1 %v12540_v47  ;;  %v6635_v2 = vrot.slane %v9128_v23, 2  ;;  %v6775_v14 = vld [vmem:[#allocation8 + $0x1198] sm:$0xff]  ;;  %v6774_v36 = vld [vmem:[#allocation8 + $0x1190] sm:$0xff] }
 0xcd2   :  { %7206 = vmatprep.subr.mxu0 %v6787_v30  ;;  %7319 = vmatprep.subr.mxu1 %v6915_v16  ;;  %v6592_v30 = vld [vmem:[#allocation2 + $0x88] sm:$0x3]  ;;  %v6778_v16 = vld [vmem:[#allocation8 + $0x11b0] sm:$0xff]  ;;  %v6903_v11 = vld [vmem:[#allocation8 + $0x1598] sm:$0xff] }
 0xcd3   :  { %7050 = vmatprep.mubr.f32.mxu0 %v12547_v51  ;;  %7163 = vmatprep.mubr.f32.mxu1 %v12552_v7  ;;  %v12560_v26 = vsel %vm2110_vm3, %v6626_v39, %v6635_v2  ;;  %v9131_v39 = vld [vmem:[#allocation2 + $0x60] sm:$0xff]  ;;  %v6902_v46 = vld [vmem:[#allocation8 + $0x1590] sm:$0xff] }
 0xcd4   :  { %7207 = vmatpush1.msra.mxu0 %v6786_v35  ;;  %7320 = vmatpush1.msra.mxu1 %v6914_v45  ;;  %v6906_v35 = vld [vmem:[#allocation8 + $0x15b0] sm:$0xff]  ;;  %v6594_v45 = vld [vmem:[#allocation2 + $0x98] sm:$0x3]  ;;  %v6639_v23 = vrot.slane %v9131_v39, 2 }
 0xcd5   :  { %7208 = vmatprep.subr.mxu0 %v6783_v60  ;;  %7321 = vmatprep.subr.mxu1 %v6911_v49  ;;  %v12565_v60 = vsel %vm2110_vm3, %v6633_v38, %v6641_v37  ;;  %v12568_v49 = vsel %vm2110_vm3, %v6637_v54, %v6645_v44  ;;  %v6653_v38 = vrot.slane %v6594_v45, 2  ;;  %v6771_v54 = vld [vmem:[#allocation8 + $0x1178] sm:$0xff]  ;;  %v6894_v62 = vld [vmem:[#allocation8 + $0x1550] sm:$0xff] }
 0xcd6   :  { %7209 = vmatpush1.msra.mxu0 %v6782_v31  ;;  %7322 = vmatpush1.msra.mxu1 %v6910_v12  ;;  %v9132_v31 = vld [vmem:[#allocation2 + $0x70] sm:$0xff]  ;;  %v12573_v39 = vsel %vm2110_vm3, %v6631_v27, %v6639_v23  ;;  %v6767_v27 = vld [vmem:[#allocation8 + $0x1158] sm:$0xff] }
 0xcd7   :  { %7051 = vmatmul.mubr.f32.gmra.mxu0 %v12557_v0  ;;  %7164 = vmatmul.mubr.f32.gmra.mxu1 %v12560_v26  ;;  %v6643_v12 = vrot.slane %v9132_v31, 2 }
 0xcd8   :  { %7210 = vmatprep.subr.mxu0 %v6779_v42  ;;  %7323 = vmatprep.subr.mxu1 %v6907_v50  ;;  %v6649_v42 = vrot.slane %v6592_v30, 2  ;;  %v6591_v50 = vld [vmem:[#allocation2 + $0x80] sm:$0x3]  ;;  %v6770_v30 = vld [vmem:[#allocation8 + $0x1170] sm:$0xff] }
 0xcd9   :  { %7056 = vmatprep.mubr.f32.mxu0 %v12565_v60  ;;  %7169 = vmatprep.mubr.f32.mxu1 %v12568_v49  ;;  %v12576_v31 = vsel %vm2110_vm3, %v6635_v2, %v6643_v12  ;;  %v6647_v2 = vrot.slane %v6591_v50, 2  ;;  %v9133_v50 = vld [vmem:[#allocation2 + $0xc8] sm:$0xff] }
 0xcda   :  { %7211 = vmatpush1.msra.mxu0 %v6778_v16  ;;  %7324 = vmatpush1.msra.mxu1 %v6906_v35  ;;  %v6898_v16 = vld [vmem:[#allocation8 + $0x1570] sm:$0xff]  ;;  %v6598_v35 = vld [vmem:[#allocation2 + $0xb8] sm:$0xfc]  ;;  %v12581_v45 = vsel %vm2110_vm3, %v6641_v37, %v6649_v42  ;;  %v6659_v43 = vrot.slane %v9133_v50, 2 }
 0xcdb   :  { %7212 = vmatprep.subr.mxu0 %v6775_v14  ;;  %7325 = vmatprep.subr.mxu1 %v6903_v11  ;;  %v12584_v14 = vsel %vm2110_vm3, %v6645_v44, %v6653_v38  ;;  %v6895_v11 = vld [vmem:[#allocation8 + $0x1558] sm:$0xff]  ;;  %v6597_v42 = vld [vmem:[#allocation2 + $0xb0] sm:$0xfc] }
 0xcdc   :  { %7213 = vmatpush1.msra.mxu0 %v6774_v36  ;;  %7326 = vmatpush1.msra.mxu1 %v6902_v46  ;;  %v6651_v36 = vrot.slane %v6593_v17, 2  ;;  %v6766_v46 = vld [vmem:[#allocation8 + $0x1150] sm:$0xff]  ;;  %v6763_v37 = vld [vmem:[#allocation8 + $0x1138] sm:$0xff]  ;;  %v12589_v17 = vsel %vm2110_vm3, %v6639_v23, %v6647_v2  ;;  %v6661_v2 = vrot.slane %v6597_v42, 2 }
 0xcdd   :  { %7057 = vmatmul.mubr.f32.gmra.mxu0 %v12573_v39  ;;  %7170 = vmatmul.mubr.f32.gmra.mxu1 %v12576_v31  ;;  %v6891_v44 = vld [vmem:[#allocation8 + $0x1538] sm:$0xff]  ;;  %v9136_v50 = vld [vmem:[#allocation2 + $0xd0] sm:$0xff] }
 0xcde   :  { %7214 = vmatprep.subr.mxu0 %v6771_v54  ;;  %7327 = vmatprep.subr.mxu1 %v6899_v59  ;;  %v6658_v54 = vrot.slane %v6596_v32, 2  ;;  %v6664_v59 = vrot.slane %v6598_v35, 2  ;;  %v12592_v38 = vsel %vm2110_vm3, %v6643_v12, %v6651_v36  ;;  %v6762_v32 = vld [vmem:[#allocation8 + $0x1130] sm:$0xff]  ;;  %v6759_v12 = vld [vmem:[#allocation8 + $0x1118] sm:$0xff] }
 0xcdf   :  { %7062 = vmatprep.mubr.f32.mxu0 %v12581_v45  ;;  %7175 = vmatprep.mubr.f32.mxu1 %v12584_v14  ;;  %v6890_v35 = vld [vmem:[#allocation8 + $0x1530] sm:$0xff]  ;;  %v6883_v42 = vld [vmem:[#allocation8 + $0x14f8] sm:$0xff] }
 0xce0   :  { %7215 = vmatpush1.msra.mxu0 %v6770_v30  ;;  %7328 = vmatpush1.msra.mxu1 %v6898_v16  ;;  %v9134_v30 = vld [vmem:[#allocation2 + $0xd8] sm:$0xff]  ;;  %v6758_v36 = vld [vmem:[#allocation8 + $0x1110] sm:$0xff] }
 0xce1   :  { %7216 = vmatprep.subr.mxu0 %v6767_v27  ;;  %7329 = vmatprep.subr.mxu1 %v6895_v11  ;;  %v6665_v16 = vrot.slane %v9134_v30, 2  ;;  %v6887_v27 = vld [vmem:[#allocation8 + $0x1518] sm:$0xff]  ;;  %v6655_v11 = vrot.slane %v6595_v6, 2  ;;  %v9137_v30 = vld [vmem:[#allocation2 + $0xe8] sm:$0xff] }
 0xce2   :  { %7217 = vmatpush1.msra.mxu0 %v6766_v46  ;;  %7330 = vmatpush1.msra.mxu1 %v6894_v62  ;;  %v12597_v62 = vsel %vm2110_vm3, %v6658_v54, %v6659_v43  ;;  %v6886_v46 = vld [vmem:[#allocation8 + $0x1510] sm:$0xff]  ;;  %v6662_v54 = vrot.slane %v9136_v50, 2  ;;  %v6669_v20 = vrot.slane %v9137_v30, 2  ;;  %v6755_v6 = vld [vmem:[#allocation8 + $0x10f8] sm:$0xff] }
 0xce3   :  { %7063 = vmatmul.mubr.f32.gmra.mxu0 %v12589_v17  ;;  %7176 = vmatmul.mubr.f32.gmra.mxu1 %v12592_v38  ;;  %v12600_v23 = vsel %vm2110_vm3, %v6664_v59, %v6665_v16  ;;  %v9138_v59 = vld [vmem:[#allocation2 + $0xf8] sm:$0xff] }
 0xce4   :  { %7218 = vmatprep.subr.mxu0 %v6763_v37  ;;  %7331 = vmatprep.subr.mxu1 %v6891_v44  ;;  %v9135_v37 = vld [vmem:[#allocation2 + $0xc0] sm:$0xff]  ;;  %v6673_v18 = vrot.slane %v9138_v59, 2  ;;  %v6750_v59 = vld [vmem:[#allocation8 + $0x10d0] sm:$0xff] }
 0xce5   :  { %7068 = vmatprep.mubr.f32.mxu0 %v12597_v62  ;;  %7181 = vmatprep.mubr.f32.mxu1 %v12600_v23  ;;  %v6656_v44 = vrot.slane %v9135_v37, 2  ;;  %v6882_v37 = vld [vmem:[#allocation8 + $0x14f0] sm:$0xff] }
 0xce6   :  { %7219 = vmatpush1.msra.mxu0 %v6762_v32  ;;  %7332 = vmatpush1.msra.mxu1 %v6890_v35  ;;  %v12608_v32 = vsel %vm2110_vm3, %v6661_v2, %v6662_v54  ;;  %v6754_v35 = vld [vmem:[#allocation8 + $0x10f0] sm:$0xff] }
 0xce7   :  { %7220 = vmatprep.subr.mxu0 %v6759_v12  ;;  %7333 = vmatprep.subr.mxu1 %v6887_v27  ;;  %v12605_v48 = vsel %vm2110_vm3, %v6655_v11, %v6656_v44  ;;  %v12613_v12 = vsel %vm2110_vm3, %v6659_v43, %v6669_v20  ;;  %v12616_v27 = vsel %vm2110_vm3, %v6665_v16, %v6673_v18  ;;  %v6879_v11 = vld [vmem:[#allocation8 + $0x14d8] sm:$0xff]  ;;  %v9140_v2 = vld [vmem:[#allocation2 + $0xf0] sm:$0xff] }
 0xce8   :  { %7221 = vmatpush1.msra.mxu0 %v6758_v36  ;;  %7334 = vmatpush1.msra.mxu1 %v6886_v46  ;;  %v6751_v36 = vld [vmem:[#allocation8 + $0x10d8] sm:$0xff]  ;;  %v9139_v46 = vld [vmem:[#allocation2 + $0xe0] sm:$0xff]  ;;  %v6671_v30 = vrot.slane %v9140_v2, 2 }
 0xce9   :  { %7069 = vmatmul.mubr.f32.gmra.mxu0 %v12605_v48  ;;  %7182 = vmatmul.mubr.f32.gmra.mxu1 %v12608_v32  ;;  %v6667_v50 = vrot.slane %v9139_v46, 2  ;;  %v6747_v16 = vld [vmem:[#allocation8 + $0x10b8] sm:$0xff] }
 0xcea   :  { %7222 = vmatprep.subr.mxu0 %v6755_v6  ;;  %7335 = vmatprep.subr.mxu1 %v6883_v42  ;;  %v9141_v6 = vld [vmem:[#allocation2 + $0x108] sm:$0xff]  ;;  %v9142_v42 = vld [vmem:[#allocation2 + $0x118] sm:$0xff]  ;;  %v12624_v2 = vsel %vm2110_vm3, %v6662_v54, %v6671_v30 }
 0xceb   :  { %7074 = vmatprep.mubr.f32.mxu0 %v12613_v12  ;;  %7187 = vmatprep.mubr.f32.mxu1 %v12616_v27  ;;  %v6677_v43 = vrot.slane %v9141_v6, 2  ;;  %v6681_v3 = vrot.slane %v9142_v42, 2  ;;  %v12621_v46 = vsel %vm2110_vm3, %v6656_v44, %v6667_v50  ;;  %14242 = vst [vmem:[#allocation40_spill] sm:$0xff] %v12624_v2  ;;  %v9143_v6 = vld [vmem:[#allocation2 + $0x100] sm:$0xff]  ;;  %v6743_v54 = vld [vmem:[#allocation8 + $0x1098] sm:$0xff]  ;;  %v9144_v42 = vld [vmem:[#allocation2 + $0x110] sm:$0xff] }
 0xcec   :  { %7223 = vmatpush1.msra.mxu0 %v6754_v35  ;;  %7336 = vmatpush1.msra.mxu1 %v6882_v37  ;;  %14241 = vst [vmem:[#allocation39_spill] sm:$0xff] %v12621_v46  ;;  %v6746_v35 = vld [vmem:[#allocation8 + $0x10b0] sm:$0xff]  ;;  %v6679_v33 = vrot.slane %v9144_v42, 2  ;;  %v6739_v42 = vld [vmem:[#allocation8 + $0x1078] sm:$0xff] }
 0xced   :  { %7224 = vmatprep.subr.mxu0 %v6751_v36  ;;  %7337 = vmatprep.subr.mxu1 %v6879_v11  ;;  %v6874_v37 = vld [vmem:[#allocation8 + $0x14b0] sm:$0xff]  ;;  %v6675_v36 = vrot.slane %v9143_v6, 2  ;;  %v6602_v11 = vld [vmem:[#allocation2 + $0x138] sm:$0x3]  ;;  %v12632_v44 = vsel %vm2110_vm3, %v6673_v18, %v6681_v3 }
 0xcee   :  { %7225 = vmatpush1.msra.mxu0 %v6750_v59  ;;  %7338 = vmatpush1.msra.mxu1 %v6878_v10  ;;  %v12629_v10 = vsel %vm2110_vm3, %v6669_v20, %v6677_v43  ;;  %14244 = vst [vmem:[#allocation42_spill] sm:$0xff] %v12632_v44  ;;  %v6871_v59 = vld [vmem:[#allocation8 + $0x1498] sm:$0xff]  ;;  %v6689_v20 = vrot.slane %v6602_v11, 2 }
 0xcef   :  { %7075 = vmatmul.mubr.f32.gmra.mxu0 %v12621_v46  ;;  %7188 = vmatmul.mubr.f32.gmra.mxu1 %v12624_v2  ;;  %14243 = vst [vmem:[#allocation41_spill] sm:$0xff] %v12629_v10  ;;  %v12638_v57 = vsel %vm2110_vm3, %v6667_v50, %v6675_v36  ;;  %v6601_v2 = vld [vmem:[#allocation2 + $0x130] sm:$0x3] }
 0xcf0   :  { %7226 = vmatprep.subr.mxu0 %v6747_v16  ;;  %7339 = vmatprep.subr.mxu1 %v6875_v40  ;;  %v6685_v40 = vrot.slane %v6600_v53, 2  ;;  %v6599_v16 = vld [vmem:[#allocation2 + $0x120] sm:$0x3]  ;;  %v6866_v50 = vld [vmem:[#allocation8 + $0x1470] sm:$0xff] }
 0xcf1   :  { %7080 = vmatprep.mubr.f32.mxu0 %v12629_v10  ;;  %7193 = vmatprep.mubr.f32.mxu1 %v12632_v44  ;;  %v6201_v6 = vpop.f32.mrf.mxu0  ;;  %v6314_v5 = vpop.f32.mrf.mxu1  ;;  %v6867_v10 = vld [vmem:[#allocation8 + $0x1478] sm:$0xff]  ;;  %v6683_v11 = vrot.slane %v6599_v16, 2 }
 0xcf2   :  { %7227 = vmatpush1.msra.mxu0 %v6746_v35  ;;  %7340 = vmatpush1.msra.mxu1 %v6874_v37  ;;  %v6202_v18 = vadd.f32 %v6201_v6, %v12420_v29  ;;  %v12641_v35 = vsel %vm2110_vm3, %v6671_v30, %v6679_v33  ;;  %v6738_v29 = vld [vmem:[#allocation8 + $0x1070] sm:$0xff]  ;;  %v6687_v30 = vrot.slane %v6601_v2, 2  ;;  %v6731_v2 = vld [vmem:[#allocation8 + $0x1038] sm:$0xff] }
 0xcf3   :  { %7228 = vmatprep.subr.mxu0 %v6743_v54  ;;  %7341 = vmatprep.subr.mxu1 %v6871_v59  ;;  %v6203_v44 = vpop.f32.mrf.mxu0  ;;  %v6316_v46 = vpop.f32.mrf.mxu1  ;;  %v12649_v54 = vsel %vm2110_vm3, %v6677_v43, %v6685_v40 }
 0xcf4   :  { %7229 = vmatpush1.msra.mxu0 %v6742_v25  ;;  %7342 = vmatpush1.msra.mxu1 %v6870_v61  ;;  %v12643_v53 = vadd.f32 %v6314_v5, %v6202_v18  ;;  %v6204_v37 = vadd.f32 %v6203_v44, %v12422_v55  ;;  %v12652_v61 = vsel %vm2110_vm3, %v6681_v3, %v6689_v20  ;;  %v6735_v25 = vld [vmem:[#allocation8 + $0x1058] sm:$0xff]  ;;  %v6734_v55 = vld [vmem:[#allocation8 + $0x1050] sm:$0xff] }
 0xcf5   :  { %7081 = vmatmul.mubr.f32.gmra.mxu0 %v12638_v57  ;;  %7194 = vmatmul.mubr.f32.gmra.mxu1 %v12641_v35  ;;  %v6863_v5 = vld [vmem:[#allocation8 + $0x1458] sm:$0xff]  ;;  %v6862_v44 = vld [vmem:[#allocation8 + $0x1450] sm:$0xff]  ;;  %v12660_v3 = vsel %vm2110_vm3, %v6675_v36, %v6683_v11  ;;  %v12663_v20 = vsel %vm2110_vm3, %v6679_v33, %v6687_v30 }
 0xcf6   :  { %7230 = vmatprep.subr.mxu0 %v6739_v42  ;;  %7343 = vmatprep.subr.mxu1 %v6867_v10  ;;  %v12654_v59 = vadd.f32 %v6316_v46, %v6204_v37  ;;  %v6859_v46 = vld [vmem:[#allocation8 + $0x1438] sm:$0xff]  ;;  %v6730_v18 = vld [vmem:[#allocation8 + $0x1030] sm:$0xff] }
 0xcf7   :  { %7086 = vmatprep.mubr.f32.mxu0 %v12649_v54  ;;  %7199 = vmatprep.mubr.f32.mxu1 %v12652_v61  ;;  %v6207_v6 = vpop.f32.mrf.mxu0  ;;  %v6320_v16 = vpop.f32.mrf.mxu1  ;;  %v6727_v36 = vld [vmem:[#allocation8 + $0x1018] sm:$0xff]  ;;  %v6726_v33 = vld [vmem:[#allocation8 + $0x1010] sm:$0xff] }
 0xcf8   :  { %7231 = vmatpush1.msra.mxu0 %v6738_v29  ;;  %7344 = vmatpush1.msra.mxu1 %v6866_v50  ;;  %v6208_v43 = vadd.f32 %v6207_v6, %v12430_v4  ;;  %v6858_v4 = vld [vmem:[#allocation8 + $0x1430] sm:$0xff]  ;;  %v6855_v29 = vld [vmem:[#allocation8 + $0x1418] sm:$0xff] }
 0xcf9   :  { %7232 = vmatprep.subr.mxu0 %v6735_v25  ;;  %7345 = vmatprep.subr.mxu1 %v6863_v5  ;;  %v6209_v10 = vpop.f32.mrf.mxu0  ;;  %v6322_v40 = vpop.f32.mrf.mxu1  ;;  %v6854_v11 = vld [vmem:[#allocation8 + $0x1410] sm:$0xff]  ;;  %v6979_v30 = vld [vmem:[#allocation8 + $0x17f8] sm:$0xff] }
 0xcfa   :  { %7233 = vmatpush1.msra.mxu0 %v6734_v55  ;;  %7346 = vmatpush1.msra.mxu1 %v6862_v44  ;;  %v12665_v42 = vadd.f32 %v6320_v16, %v6208_v43  ;;  %v6210_v37 = vadd.f32 %v6209_v10, %v12433_v8  ;;  %v6851_v8 = vld [vmem:[#allocation8 + $0x13f8] sm:$0xff]  ;;  %v6850_v44 = vld [vmem:[#allocation8 + $0x13f0] sm:$0xff] }
 0xcfb   :  { %7087 = vmatmul.mubr.f32.gmra.mxu0 %v12660_v3  ;;  %7200 = vmatmul.mubr.f32.gmra.mxu1 %v12663_v20  ;;  %v6978_v6 = vld [vmem:[#allocation8 + $0x17f0] sm:$0xff] }
 0xcfc   :  { %7234 = vmatprep.subr.mxu0 %v6731_v2  ;;  %7347 = vmatprep.subr.mxu1 %v6859_v46  ;;  %v12670_v50 = vadd.f32 %v6322_v40, %v6210_v37  ;;  %v6975_v2 = vld [vmem:[#allocation8 + $0x17d8] sm:$0xff]  ;;  %v6974_v40 = vld [vmem:[#allocation8 + $0x17d0] sm:$0xff] }
 0xcfd   :  { %7235 = vmatpush1.msra.mxu0 %v6730_v18  ;;  %7270 = vmatprep.mubr.f32.mxu0 %v12503_v19  ;;  %v6213_v25 = vpop.f32.mrf.mxu0  ;;  %v6326_v5 = vpop.f32.mrf.mxu1  ;;  %v6847_v19 = vld [vmem:[#allocation8 + $0x13d8] sm:$0xff] }
 0xcfe   :  { %7348 = vmatpush1.msra.mxu1 %v6858_v4  ;;  %7383 = vmatprep.mubr.f32.mxu1 %v12509_v63  ;;  %v6214_v55 = vadd.f32 %v6213_v25, %v12436_v41  ;;  %v6846_v63 = vld [vmem:[#allocation8 + $0x13d0] sm:$0xff]  ;;  %v6843_v41 = vld [vmem:[#allocation8 + $0x13b8] sm:$0xff] }
 0xcff   :  { %7236 = vmatprep.subr.mxu0 %v6727_v36  ;;  %7349 = vmatprep.subr.mxu1 %v6855_v29  ;;  %v6215_v16 = vpop.f32.mrf.mxu0  ;;  %v6328_v43 = vpop.f32.mrf.mxu1  ;;  %v6971_v18 = vld [vmem:[#allocation8 + $0x17b8] sm:$0xff]  ;;  %v6842_v4 = vld [vmem:[#allocation8 + $0x13b0] sm:$0xff] }
 0xd00   :  { %7237 = vmatpush1.msra.mxu0 %v6726_v33  ;;  %7350 = vmatpush1.msra.mxu1 %v6854_v11  ;;  %v12675_v46 = vadd.f32 %v6326_v5, %v6214_v55  ;;  %v6216_v10 = vadd.f32 %v6215_v16, %v12438_v9  ;;  %v6970_v36 = vld [vmem:[#allocation8 + $0x17b0] sm:$0xff]  ;;  %v6839_v11 = vld [vmem:[#allocation8 + $0x1398] sm:$0xff] }
 0xd01   :  { %7238 = vmatprep.subr.mxu0 %v6851_v8  ;;  %7351 = vmatprep.subr.mxu1 %v6979_v30  ;;  %v6967_v9 = vld [vmem:[#allocation8 + $0x1798] sm:$0xff]  ;;  %v6838_v5 = vld [vmem:[#allocation8 + $0x1390] sm:$0xff] }
 0xd02   :  { %7239 = vmatpush2.msra.mxu0 %v6850_v44  ;;  %7352 = vmatpush2.msra.mxu1 %v6978_v6  ;;  %v12678_v37 = vadd.f32 %v6328_v43, %v6216_v10  ;;  %v6966_v8 = vld [vmem:[#allocation8 + $0x1790] sm:$0xff]  ;;  %v6835_v44 = vld [vmem:[#allocation8 + $0x1378] sm:$0xff] }
 0xd03   :  { %7240 = vmatprep.subr.mxu0 %v6847_v19  ;;  %7353 = vmatprep.subr.mxu1 %v6975_v2  ;;  %v6219_v29 = vpop.f32.mrf.mxu0  ;;  %v6332_v33 = vpop.f32.mrf.mxu1  ;;  %v6963_v6 = vld [vmem:[#allocation8 + $0x1778] sm:$0xff]  ;;  %v6834_v19 = vld [vmem:[#allocation8 + $0x1370] sm:$0xff] }
 0xd04   :  { %7241 = vmatpush2.msra.mxu0 %v6846_v63  ;;  %7354 = vmatpush2.msra.mxu1 %v6974_v40  ;;  %v6220_v25 = vadd.f32 %v6219_v29, %v12440_v1  ;;  %v6962_v2 = vld [vmem:[#allocation8 + $0x1770] sm:$0xff]  ;;  %v6831_v1 = vld [vmem:[#allocation8 + $0x1358] sm:$0xff] }
 0xd05   :  { %7242 = vmatprep.subr.mxu0 %v6843_v41  ;;  %7355 = vmatprep.subr.mxu1 %v6971_v18  ;;  %v6221_v30 = vpop.f32.mrf.mxu0  ;;  %v6334_v55 = vpop.f32.mrf.mxu1  ;;  %v6959_v10 = vld [vmem:[#allocation8 + $0x1758] sm:$0xff]  ;;  %v6830_v40 = vld [vmem:[#allocation8 + $0x1350] sm:$0xff] }
 0xd06   :  { %7243 = vmatpush2.msra.mxu0 %v6842_v4  ;;  %7356 = vmatpush2.msra.mxu1 %v6970_v36  ;;  %v12681_v16 = vadd.f32 %v6332_v33, %v6220_v25  ;;  %v6222_v43 = vadd.f32 %v6221_v30, %v12442_v24  ;;  %v6958_v41 = vld [vmem:[#allocation8 + $0x1750] sm:$0xff]  ;;  %v6827_v36 = vld [vmem:[#allocation8 + $0x1338] sm:$0xff] }
 0xd07   :  { %7244 = vmatprep.subr.mxu0 %v6839_v11  ;;  %7357 = vmatprep.subr.mxu1 %v6967_v9  ;;  %v6955_v24 = vld [vmem:[#allocation8 + $0x1738] sm:$0xff]  ;;  %v6826_v33 = vld [vmem:[#allocation8 + $0x1330] sm:$0xff] }
 0xd08   :  { %7245 = vmatpush2.msra.mxu0 %v6838_v5  ;;  %7358 = vmatpush2.msra.mxu1 %v6966_v8  ;;  %v12684_v63 = vadd.f32 %v6334_v55, %v6222_v43  ;;  %v6954_v11 = vld [vmem:[#allocation8 + $0x1730] sm:$0xff]  ;;  %v6823_v5 = vld [vmem:[#allocation8 + $0x1318] sm:$0xff] }
 0xd09   :  { %7246 = vmatprep.subr.mxu0 %v6835_v44  ;;  %7359 = vmatprep.subr.mxu1 %v6963_v6  ;;  %v6225_v18 = vpop.f32.mrf.mxu0  ;;  %v6338_v4 = vpop.f32.mrf.mxu1  ;;  %v6951_v8 = vld [vmem:[#allocation8 + $0x1718] sm:$0xff]  ;;  %v6822_v44 = vld [vmem:[#allocation8 + $0x1310] sm:$0xff] }
 0xd0a   :  { %7247 = vmatpush2.msra.mxu0 %v6834_v19  ;;  %7360 = vmatpush2.msra.mxu1 %v6962_v2  ;;  %v6226_v29 = vadd.f32 %v6225_v18, %v12444_v52  ;;  %v6950_v6 = vld [vmem:[#allocation8 + $0x1710] sm:$0xff]  ;;  %v6819_v52 = vld [vmem:[#allocation8 + $0x12f8] sm:$0xff] }
 0xd0b   :  { %7248 = vmatprep.subr.mxu0 %v6831_v1  ;;  %7361 = vmatprep.subr.mxu1 %v6959_v10  ;;  %v6227_v9 = vpop.f32.mrf.mxu0  ;;  %v6340_v25 = vpop.f32.mrf.mxu1  ;;  %v6947_v43 = vld [vmem:[#allocation8 + $0x16f8] sm:$0xff]  ;;  %v6818_v2 = vld [vmem:[#allocation8 + $0x12f0] sm:$0xff] }
 0xd0c   :  { %7249 = vmatpush2.msra.mxu0 %v6830_v40  ;;  %7362 = vmatpush2.msra.mxu1 %v6958_v41  ;;  %v12687_v30 = vadd.f32 %v6338_v4, %v6226_v29  ;;  %v6228_v55 = vadd.f32 %v6227_v9, %v12446_v15  ;;  %v6946_v1 = vld [vmem:[#allocation8 + $0x16f0] sm:$0xff]  ;;  %v6815_v41 = vld [vmem:[#allocation8 + $0x12d8] sm:$0xff] }
 0xd0d   :  { %7250 = vmatprep.subr.mxu0 %v6827_v36  ;;  %7363 = vmatprep.subr.mxu1 %v6955_v24  ;;  %v6943_v15 = vld [vmem:[#allocation8 + $0x16d8] sm:$0xff]  ;;  %v6814_v4 = vld [vmem:[#allocation8 + $0x12d0] sm:$0xff] }
 0xd0e   :  { %7251 = vmatpush2.msra.mxu0 %v6826_v33  ;;  %7364 = vmatpush2.msra.mxu1 %v6954_v11  ;;  %v12690_v19 = vadd.f32 %v6340_v25, %v6228_v55  ;;  %v6942_v36 = vld [vmem:[#allocation8 + $0x16d0] sm:$0xff]  ;;  %v6811_v33 = vld [vmem:[#allocation8 + $0x12b8] sm:$0xff] }
 0xd0f   :  { %7252 = vmatprep.subr.mxu0 %v6823_v5  ;;  %7365 = vmatprep.subr.mxu1 %v6951_v8  ;;  %v6231_v10 = vpop.f32.mrf.mxu0  ;;  %v6344_v40 = vpop.f32.mrf.mxu1  ;;  %v6939_v11 = vld [vmem:[#allocation8 + $0x16b8] sm:$0xff]  ;;  %v6810_v5 = vld [vmem:[#allocation8 + $0x12b0] sm:$0xff] }
 0xd10   :  { %7253 = vmatpush2.msra.mxu0 %v6822_v44  ;;  %7366 = vmatpush2.msra.mxu1 %v6950_v6  ;;  %v6232_v18 = vadd.f32 %v6231_v10, %v12448_v22  ;;  %v6938_v8 = vld [vmem:[#allocation8 + $0x16b0] sm:$0xff]  ;;  %v6807_v22 = vld [vmem:[#allocation8 + $0x1298] sm:$0xff] }
 0xd11   :  { %7254 = vmatprep.subr.mxu0 %v6819_v52  ;;  %7367 = vmatprep.subr.mxu1 %v6947_v43  ;;  %v6233_v24 = vpop.f32.mrf.mxu0  ;;  %v6346_v29 = vpop.f32.mrf.mxu1  ;;  %v6935_v55 = vld [vmem:[#allocation8 + $0x1698] sm:$0xff]  ;;  %v6806_v6 = vld [vmem:[#allocation8 + $0x1290] sm:$0xff] }
 0xd12   :  { %7255 = vmatpush2.msra.mxu0 %v6818_v2  ;;  %7368 = vmatpush2.msra.mxu1 %v6946_v1  ;;  %v12693_v9 = vadd.f32 %v6344_v40, %v6232_v18  ;;  %v6234_v25 = vadd.f32 %v6233_v24, %v12450_v21  ;;  %v6934_v52 = vld [vmem:[#allocation8 + $0x1690] sm:$0xff]  ;;  %v6803_v1 = vld [vmem:[#allocation8 + $0x1278] sm:$0xff] }
 0xd13   :  { %7256 = vmatprep.subr.mxu0 %v6815_v41  ;;  %7369 = vmatprep.subr.mxu1 %v6943_v15  ;;  %v6931_v21 = vld [vmem:[#allocation8 + $0x1678] sm:$0xff]  ;;  %v6802_v40 = vld [vmem:[#allocation8 + $0x1270] sm:$0xff] }
 0xd14   :  { %7257 = vmatpush2.msra.mxu0 %v6814_v4  ;;  %7370 = vmatpush2.msra.mxu1 %v6942_v36  ;;  %v12696_v44 = vadd.f32 %v6346_v29, %v6234_v25  ;;  %v6930_v41 = vld [vmem:[#allocation8 + $0x1670] sm:$0xff]  ;;  %v6799_v4 = vld [vmem:[#allocation8 + $0x1258] sm:$0xff] }
 0xd15   :  { %7258 = vmatprep.subr.mxu0 %v6811_v33  ;;  %7371 = vmatprep.subr.mxu1 %v6939_v11  ;;  %v6237_v43 = vpop.f32.mrf.mxu0  ;;  %v6350_v2 = vpop.f32.mrf.mxu1  ;;  %v6927_v36 = vld [vmem:[#allocation8 + $0x1658] sm:$0xff]  ;;  %v6798_v33 = vld [vmem:[#allocation8 + $0x1250] sm:$0xff] }
 0xd16   :  { %7259 = vmatpush2.msra.mxu0 %v6810_v5  ;;  %7372 = vmatpush2.msra.mxu1 %v6938_v8  ;;  %v6238_v10 = vadd.f32 %v6237_v43, %v12452_v58  ;;  %v6926_v11 = vld [vmem:[#allocation8 + $0x1650] sm:$0xff]  ;;  %v6795_v58 = vld [vmem:[#allocation8 + $0x1238] sm:$0xff] }
 0xd17   :  { %7260 = vmatprep.subr.mxu0 %v6807_v22  ;;  %7373 = vmatprep.subr.mxu1 %v6935_v55  ;;  %v6239_v15 = vpop.f32.mrf.mxu0  ;;  %v6352_v18 = vpop.f32.mrf.mxu1  ;;  %v6923_v25 = vld [vmem:[#allocation8 + $0x1638] sm:$0xff]  ;;  %v6794_v8 = vld [vmem:[#allocation8 + $0x1230] sm:$0xff] }
 0xd18   :  { %7261 = vmatpush2.msra.mxu0 %v6806_v6  ;;  %7374 = vmatpush2.msra.mxu1 %v6934_v52  ;;  %v12699_v24 = vadd.f32 %v6350_v2, %v6238_v10  ;;  %v6240_v29 = vadd.f32 %v6239_v15, %v12454_v13  ;;  %v6922_v22 = vld [vmem:[#allocation8 + $0x1630] sm:$0xff]  ;;  %v6791_v52 = vld [vmem:[#allocation8 + $0x1218] sm:$0xff] }
 0xd19   :  { %7262 = vmatprep.subr.mxu0 %v6803_v1  ;;  %7375 = vmatprep.subr.mxu1 %v6931_v21  ;;  %v6919_v13 = vld [vmem:[#allocation8 + $0x1618] sm:$0xff]  ;;  %v6790_v2 = vld [vmem:[#allocation8 + $0x1210] sm:$0xff] }
 0xd1a   :  { %7263 = vmatpush2.msra.mxu0 %v6802_v40  ;;  %7376 = vmatpush2.msra.mxu1 %v6930_v41  ;;  %v12702_v5 = vadd.f32 %v6352_v18, %v6240_v29  ;;  %v6918_v1 = vld [vmem:[#allocation8 + $0x1610] sm:$0xff] }
 0xd1b   :  { %7264 = vmatprep.subr.mxu0 %v6799_v4  ;;  %7377 = vmatprep.subr.mxu1 %v6927_v36  ;;  %v6243_v55 = vpop.f32.mrf.mxu0  ;;  %v6356_v6 = vpop.f32.mrf.mxu1  ;;  %v14266_v18 = vld [vmem:[#allocation41_spill] sm:$0xff]  ;;  %v14267_v4 = vld [vmem:[#allocation42_spill] sm:$0xff] }
 0xd1c   :  { %7265 = vmatpush2.msra.mxu0 %v6798_v33  ;;  %7378 = vmatpush2.msra.mxu1 %v6926_v11  ;;  %v6244_v43 = vadd.f32 %v6243_v55, %v12456_v56  ;;  %v12717_v56 = vld [vmem:[%s13752_s4 + $0xf8] sm:$0xff]  ;;  %v12857_v36 = vld [vmem:[%s13752_s4 + $0xd0] sm:$0xff] }
 0xd1d   :  { %7266 = vmatprep.subr.mxu0 %v6795_v58  ;;  %7379 = vmatprep.subr.mxu1 %v6923_v25  ;;  %v6245_v21 = vpop.f32.mrf.mxu0  ;;  %v6358_v41 = vpop.f32.mrf.mxu1  ;;  %14268 = vst [vmem:[#allocation88_spill] sm:$0xff] %v12857_v36  ;;  %v12863_v29 = vld [vmem:[%s13752_s4 + $0x1d0] sm:$0xff]  ;;  %v12885_v58 = vld [vmem:[%s13752_s4 + $0xc8] sm:$0xff] }
 0xd1e   :  { %7267 = vmatpush2.msra.mxu0 %v6794_v8  ;;  %7380 = vmatpush2.msra.mxu1 %v6922_v22  ;;  %v12705_v10 = vadd.f32 %v6356_v6, %v6244_v43  ;;  %v6246_v40 = vadd.f32 %v6245_v21, %v12458_v34  ;;  %v12723_v34 = vld [vmem:[%s13752_s4 + $0x1f8] sm:$0xff]  ;;  %14269 = vst [vmem:[#allocation94_spill] sm:$0xff] %v12863_v29  ;;  %v12869_v33 = vld [vmem:[%s13752_s4 + $0x50] sm:$0xff]  ;;  %14272 = vst [vmem:[#allocation59_spill] sm:$0xff] %v12885_v58 }
 0xd1f   :  { %7268 = vmatprep.subr.mxu0 %v6791_v52  ;;  %7381 = vmatprep.subr.mxu1 %v6919_v13  ;;  %14245 = vst [vmem:[#allocation43_spill] sm:$0xff] %v12723_v34  ;;  %14270 = vst [vmem:[#allocation56_spill] sm:$0xff] %v12869_v33  ;;  %v12875_v11 = vld [vmem:[%s13752_s4 + $0x150] sm:$0xff]  ;;  %v12891_v25 = vld [vmem:[%s13752_s4 + $0x1c8] sm:$0xff] }
 0xd20   :  { %7269 = vmatpush2.msra.mxu0 %v6790_v2  ;;  %7382 = vmatpush2.msra.mxu1 %v6918_v1  ;;  %v12708_v15 = vadd.f32 %v6358_v41, %v6246_v40  ;;  %14271 = vst [vmem:[#allocation57_spill] sm:$0xff] %v12875_v11  ;;  %14273 = vst [vmem:[#allocation60_spill] sm:$0xff] %v12891_v25  ;;  %v12935_v8 = vld [vmem:[%s13752_s4 + $0xb8] sm:$0xff]  ;;  %v14284_v43 = vld [vmem:[#allocation89_spill] sm:$0xff] }
 0xd21   :  { %7271 = vmatmul.mubr.f32.vlgmr.msra.gmra.mxu0 %v12537_v28  ;;  %7384 = vmatmul.mubr.f32.vlgmr.msra.gmra.mxu1 %v12540_v47  ;;  %v12729_v28 = vld [vmem:[%s13752_s4 + $0x78] sm:$0xff]  ;;  %14280 = vst [vmem:[#allocation73_spill] sm:$0xff] %v12935_v8  ;;  %v12960_v1 = vld [vmem:[%s13752_s4 + $0xb0] sm:$0xff] }
 0xd22   :  { %7276 = vmatprep.mubr.f32.mxu0 %v12547_v51  ;;  %7389 = vmatprep.mubr.f32.mxu1 %v12552_v7  ;;  %14246 = vst [vmem:[#allocation44_spill] sm:$0xff] %v12729_v28  ;;  %v12735_v47 = vld [vmem:[%s13752_s4 + $0x178] sm:$0xff]  ;;  %v12745_v51 = vld [vmem:[%s13752_s4 + $0xf0] sm:$0xff]  ;;  %14285 = vst [vmem:[#allocation91_spill] sm:$0xff] %v12960_v1 }
 0xd23   :  { %8823 = vmatprep.subr.mxu0 %v12717_v56  ;;  %8858 = vmatprep.subr.mxu1 %v12723_v34  ;;  %14247 = vst [vmem:[#allocation45_spill] sm:$0xff] %v12735_v47  ;;  %14248 = vst [vmem:[#allocation46_spill] sm:$0xff] %v12745_v51  ;;  %v12751_v7 = vld [vmem:[%s13752_s4 + $0x1f0] sm:$0xff]  ;;  %v12941_v22 = vld [vmem:[%s13752_s4 + $0x1b8] sm:$0xff] }
 0xd24   :  { %8824 = vmatpush3.msra.mxu0 %v12729_v28  ;;  %8859 = vmatpush3.msra.mxu1 %v12735_v47  ;;  %14249 = vst [vmem:[#allocation47_spill] sm:$0xff] %v12751_v7  ;;  %14281 = vst [vmem:[#allocation75_spill] sm:$0xff] %v12941_v22  ;;  %v12947_v52 = vld [vmem:[%s13752_s4 + $0x38] sm:$0xff]  ;;  %v12966_v21 = vld [vmem:[%s13752_s4 + $0x1b0] sm:$0xff] }
 0xd25   :  { %7277 = vmatmul.mubr.f32.gmra.mxu0 %v12557_v0  ;;  %7390 = vmatmul.mubr.f32.gmra.mxu1 %v12560_v26  ;;  %v12757_v0 = vld [vmem:[%s13752_s4 + $0x70] sm:$0xff]  ;;  %14282 = vst [vmem:[#allocation77_spill] sm:$0xff] %v12947_v52  ;;  %v12953_v13 = vld [vmem:[%s13752_s4 + $0x138] sm:$0xff]  ;;  %14286 = vst [vmem:[#allocation97_spill] sm:$0xff] %v12966_v21 }
 0xd26   :  { %7282 = vmatprep.mubr.f32.mxu0 %v12565_v60  ;;  %7395 = vmatprep.mubr.f32.mxu1 %v12568_v49  ;;  %14250 = vst [vmem:[#allocation48_spill] sm:$0xff] %v12757_v0  ;;  %v12763_v26 = vld [vmem:[%s13752_s4 + $0x170] sm:$0xff]  ;;  %v12773_v60 = vld [vmem:[%s13752_s4 + $0xe8] sm:$0xff]  ;;  %14283 = vst [vmem:[#allocation99_spill] sm:$0xff] %v12953_v13 }
 0xd27   :  { %8825 = vmatprep.subr.mxu0 %v12745_v51  ;;  %8860 = vmatprep.subr.mxu1 %v12751_v7  ;;  %14251 = vst [vmem:[#allocation64_spill] sm:$0xff] %v12763_v26  ;;  %14252 = vst [vmem:[#allocation66_spill] sm:$0xff] %v12773_v60  ;;  %v12779_v49 = vld [vmem:[%s13752_s4 + $0x1e8] sm:$0xff] }
 0xd28   :  { %8826 = vmatpush3.msra.mxu0 %v12757_v0  ;;  %8861 = vmatpush3.msra.mxu1 %v12763_v26  ;;  %14253 = vst [vmem:[#allocation68_spill] sm:$0xff] %v12779_v49 }
 0xd29   :  { %7283 = vmatmul.mubr.f32.gmra.mxu0 %v12573_v39  ;;  %7396 = vmatmul.mubr.f32.gmra.mxu1 %v12576_v31  ;;  %v12785_v39 = vld [vmem:[%s13752_s4 + $0x68] sm:$0xff] }
 0xd2a   :  { %7288 = vmatprep.mubr.f32.mxu0 %v12581_v45  ;;  %7401 = vmatprep.mubr.f32.mxu1 %v12584_v14  ;;  %14254 = vst [vmem:[#allocation70_spill] sm:$0xff] %v12785_v39  ;;  %v12791_v31 = vld [vmem:[%s13752_s4 + $0x168] sm:$0xff]  ;;  %v12801_v45 = vld [vmem:[%s13752_s4 + $0xe0] sm:$0xff] }
 0xd2b   :  { %8827 = vmatprep.subr.mxu0 %v12773_v60  ;;  %8862 = vmatprep.subr.mxu1 %v12779_v49  ;;  %14255 = vst [vmem:[#allocation49_spill] sm:$0xff] %v12791_v31  ;;  %14256 = vst [vmem:[#allocation50_spill] sm:$0xff] %v12801_v45  ;;  %v12807_v14 = vld [vmem:[%s13752_s4 + $0x1e0] sm:$0xff] }
 0xd2c   :  { %8828 = vmatpush3.msra.mxu0 %v12785_v39  ;;  %8863 = vmatpush3.msra.mxu1 %v12791_v31  ;;  %14257 = vst [vmem:[#allocation72_spill] sm:$0xff] %v12807_v14 }
 0xd2d   :  { %7289 = vmatmul.mubr.f32.gmra.mxu0 %v12589_v17  ;;  %7402 = vmatmul.mubr.f32.gmra.mxu1 %v12592_v38  ;;  %v12813_v17 = vld [vmem:[%s13752_s4 + $0x60] sm:$0xff] }
 0xd2e   :  { %7294 = vmatprep.mubr.f32.mxu0 %v12597_v62  ;;  %7407 = vmatprep.mubr.f32.mxu1 %v12600_v23  ;;  %14258 = vst [vmem:[#allocation74_spill] sm:$0xff] %v12813_v17  ;;  %v12819_v38 = vld [vmem:[%s13752_s4 + $0x160] sm:$0xff]  ;;  %v12829_v62 = vld [vmem:[%s13752_s4 + $0xd8] sm:$0xff] }
 0xd2f   :  { %8829 = vmatprep.subr.mxu0 %v12801_v45  ;;  %8864 = vmatprep.subr.mxu1 %v12807_v14  ;;  %14259 = vst [vmem:[#allocation76_spill] sm:$0xff] %v12819_v38  ;;  %14260 = vst [vmem:[#allocation51_spill] sm:$0xff] %v12829_v62  ;;  %v12835_v23 = vld [vmem:[%s13752_s4 + $0x1d8] sm:$0xff] }
 0xd30   :  { %8830 = vmatpush3.msra.mxu0 %v12813_v17  ;;  %8865 = vmatpush3.msra.mxu1 %v12819_v38  ;;  %14261 = vst [vmem:[#allocation52_spill] sm:$0xff] %v12835_v23 }
 0xd31   :  { %7295 = vmatmul.mubr.f32.gmra.mxu0 %v12605_v48  ;;  %7408 = vmatmul.mubr.f32.gmra.mxu1 %v12608_v32  ;;  %v12841_v48 = vld [vmem:[%s13752_s4 + $0x58] sm:$0xff] }
 0xd32   :  { %7300 = vmatprep.mubr.f32.mxu0 %v12613_v12  ;;  %7413 = vmatprep.mubr.f32.mxu1 %v12616_v27  ;;  %14262 = vst [vmem:[#allocation53_spill] sm:$0xff] %v12841_v48  ;;  %v12847_v32 = vld [vmem:[%s13752_s4 + $0x158] sm:$0xff]  ;;  %v14264_v12 = vld [vmem:[#allocation39_spill] sm:$0xff]  ;;  %v14265_v27 = vld [vmem:[#allocation40_spill] sm:$0xff] }
 0xd33   :  { %8831 = vmatprep.subr.mxu0 %v12829_v62  ;;  %8866 = vmatprep.subr.mxu1 %v12835_v23  ;;  %14263 = vst [vmem:[#allocation54_spill] sm:$0xff] %v12847_v32 }
 0xd34   :  { %8832 = vmatpush3.msra.mxu0 %v12841_v48  ;;  %8867 = vmatpush3.msra.mxu1 %v12847_v32 }
 0xd35   :  { %7301 = vmatmul.mubr.f32.gmra.mxu0 %v14264_v12  ;;  %7414 = vmatmul.mubr.f32.gmra.mxu1 %v14265_v27  ;;  %v12972_v12 = vld [vmem:[%s13752_s4 + $0x30] sm:$0xff] }
 0xd36   :  { %7306 = vmatprep.mubr.f32.mxu0 %v14266_v18  ;;  %7419 = vmatprep.mubr.f32.mxu1 %v14267_v4  ;;  %14287 = vst [vmem:[#allocation101_spill] sm:$0xff] %v12972_v12  ;;  %v12978_v27 = vld [vmem:[%s13752_s4 + $0x130] sm:$0xff]  ;;  %v14289_v4 = vld [vmem:[#allocation90_spill] sm:$0xff] }
 0xd37   :  { %8833 = vmatprep.subr.mxu0 %v12857_v36  ;;  %8868 = vmatprep.subr.mxu1 %v12863_v29  ;;  %14288 = vst [vmem:[#allocation103_spill] sm:$0xff] %v12978_v27 }
 0xd38   :  { %8834 = vmatpush3.msra.mxu0 %v12869_v33  ;;  %8869 = vmatpush3.msra.mxu1 %v12875_v11 }
 0xd39   :  { %7307 = vmatmul.mubr.f32.gmra.mxu0 %v12638_v57  ;;  %7420 = vmatmul.mubr.f32.gmra.mxu1 %v12641_v35  ;;  %v12897_v57 = vld [vmem:[%s13752_s4 + $0x48] sm:$0xff] }
 0xd3a   :  { %7312 = vmatprep.mubr.f32.mxu0 %v12649_v54  ;;  %7425 = vmatprep.mubr.f32.mxu1 %v12652_v61  ;;  %14274 = vst [vmem:[#allocation62_spill] sm:$0xff] %v12897_v57  ;;  %v12903_v35 = vld [vmem:[%s13752_s4 + $0x148] sm:$0xff]  ;;  %v12911_v54 = vld [vmem:[%s13752_s4 + $0xc0] sm:$0xff] }
 0xd3b   :  { %8835 = vmatprep.subr.mxu0 %v12885_v58  ;;  %8870 = vmatprep.subr.mxu1 %v12891_v25  ;;  %14275 = vst [vmem:[#allocation63_spill] sm:$0xff] %v12903_v35  ;;  %14276 = vst [vmem:[#allocation65_spill] sm:$0xff] %v12911_v54  ;;  %v12917_v61 = vld [vmem:[%s13752_s4 + $0x1c0] sm:$0xff] }
 0xd3c   :  { %8836 = vmatpush3.msra.mxu0 %v12897_v57  ;;  %8871 = vmatpush3.msra.mxu1 %v12903_v35  ;;  %14277 = vst [vmem:[#allocation67_spill] sm:$0xff] %v12917_v61  ;;  %v14322_v57 = vld [vmem:[#allocation30_spill] sm:$0xff] }
 0xd3d   :  { %7313 = vmatmul.mubr.f32.gmra.mxu0 %v12660_v3  ;;  %7426 = vmatmul.mubr.f32.gmra.mxu1 %v12663_v20  ;;  %v12923_v3 = vld [vmem:[%s13752_s4 + $0x40] sm:$0xff] }
 0xd3e   :  { %8837 = vmatprep.subr.mxu0 %v12911_v54  ;;  %8872 = vmatprep.subr.mxu1 %v12917_v61  ;;  %14278 = vst [vmem:[#allocation69_spill] sm:$0xff] %v12923_v3  ;;  %v12929_v20 = vld [vmem:[%s13752_s4 + $0x140] sm:$0xff] }
 0xd3f   :  { %8838 = vmatpush3.msra.mxu0 %v12923_v3  ;;  %14279 = vst [vmem:[#allocation71_spill] sm:$0xff] %v12929_v20  ;;  %8873 = vmatpush3.msra.mxu1 %v12929_v20  ;;  %v14320_v3 = vld [vmem:[#allocation29_spill] sm:$0xff] }
 0xd40   :  { %8839 = vmatprep.subr.mxu0 %v12935_v8  ;;  %8874 = vmatprep.subr.mxu1 %v12941_v22  ;;  %v13143_v22 = vld [vmem:[#allocation9 + $0x38] sm:$0xff] }
 0xd41   :  { %v6427_v55 = vpop.f32.mrf.mxu0  ;;  %v6540_v6 = vpop.f32.mrf.mxu1  ;;  %8840 = vmatpush3.msra.mxu0 %v12947_v52  ;;  %8875 = vmatpush3.msra.mxu1 %v12953_v13  ;;  %v13140_v52 = vld [vmem:[#allocation9 + $0x28] sm:$0xff]  ;;  %14319 = vst [vmem:[#allocation135_spill] sm:$0xff] %v13143_v22 }
 0xd42   :  { %v6428_v2 = vadd.f32 %v6427_v55, %v14284_v43  ;;  %8841 = vmatprep.subr.mxu0 %v12960_v1  ;;  %8876 = vmatprep.subr.mxu1 %v12966_v21  ;;  %v12987_v43 = vld [vmem:[%s13752_s4 + $0xa8] sm:$0xff]  ;;  %v13065_v1 = vld [vmem:[%s13752_s4 + $0x90] sm:$0xff]  ;;  %14318 = vst [vmem:[#allocation134_spill] sm:$0xff] %v13140_v52 }
 0xd43   :  { %v6429_v40 = vpop.f32.mrf.mxu0  ;;  %v6542_v41 = vpop.f32.mrf.mxu1  ;;  %8842 = vmatpush3.msra.mxu0 %v12972_v12  ;;  %8877 = vmatpush3.msra.mxu1 %v12978_v27  ;;  %14290 = vst [vmem:[#allocation98_spill] sm:$0xff] %v12987_v43  ;;  %v12993_v12 = vld [vmem:[%s13752_s4 + $0x1a8] sm:$0xff]  ;;  %14304 = vst [vmem:[#allocation105_spill] sm:$0xff] %v13065_v1 }
 0xd44   :  { %v12981_v18 = vadd.f32 %v6540_v6, %v6428_v2  ;;  %v6430_v55 = vadd.f32 %v6429_v40, %v14289_v4  ;;  %8843 = vmatprep.subr.mxu0 %v12987_v43  ;;  %14291 = vst [vmem:[#allocation55_spill] sm:$0xff] %v12993_v12  ;;  %8878 = vmatprep.subr.mxu1 %v12993_v12  ;;  %v12999_v6 = vld [vmem:[%s13752_s4 + $0x28] sm:$0xff]  ;;  %v13013_v4 = vld [vmem:[%s13752_s4 + $0xa0] sm:$0xff] }
 0xd45   :  { %14292 = vst [vmem:[#allocation58_spill] sm:$0xff] %v12999_v6  ;;  %8844 = vmatpush3.msra.mxu0 %v12999_v6  ;;  %v13005_v2 = vld [vmem:[%s13752_s4 + $0x128] sm:$0xff]  ;;  %14294 = vst [vmem:[#allocation109_spill] sm:$0xff] %v13013_v4  ;;  %v13019_v6 = vld [vmem:[%s13752_s4 + $0x1a0] sm:$0xff] }
 0xd46   :  { %14293 = vst [vmem:[#allocation107_spill] sm:$0xff] %v13005_v2  ;;  %8879 = vmatpush3.msra.mxu1 %v13005_v2  ;;  %v13008_v40 = vadd.f32 %v6542_v41, %v6430_v55  ;;  %8845 = vmatprep.subr.mxu0 %v13013_v4  ;;  %14295 = vst [vmem:[#allocation110_spill] sm:$0xff] %v13019_v6  ;;  %v13025_v41 = vld [vmem:[%s13752_s4 + $0x20] sm:$0xff]  ;;  %v14298_v4 = vld [vmem:[#allocation92_spill] sm:$0xff] }
 0xd47   :  { %8880 = vmatprep.subr.mxu1 %v13019_v6  ;;  %v6433_v12 = vpop.f32.mrf.mxu0  ;;  %v6546_v43 = vpop.f32.mrf.mxu1  ;;  %14296 = vst [vmem:[#allocation100_spill] sm:$0xff] %v13025_v41  ;;  %8846 = vmatpush3.msra.mxu0 %v13025_v41  ;;  %v13031_v55 = vld [vmem:[%s13752_s4 + $0x120] sm:$0xff]  ;;  %v13038_v6 = vld [vmem:[%s13752_s4 + $0x98] sm:$0xff] }
 0xd48   :  { %14297 = vst [vmem:[#allocation112_spill] sm:$0xff] %v13031_v55  ;;  %8881 = vmatpush3.msra.mxu1 %v13031_v55  ;;  %v6434_v2 = vadd.f32 %v6433_v12, %v14298_v4  ;;  %14299 = vst [vmem:[#allocation114_spill] sm:$0xff] %v13038_v6  ;;  %8847 = vmatprep.subr.mxu0 %v13038_v6  ;;  %v13044_v41 = vld [vmem:[%s13752_s4 + $0x198] sm:$0xff]  ;;  %v14303_v55 = vld [vmem:[#allocation93_spill] sm:$0xff] }
 0xd49   :  { %14300 = vst [vmem:[#allocation116_spill] sm:$0xff] %v13044_v41  ;;  %8882 = vmatprep.subr.mxu1 %v13044_v41  ;;  %v6435_v27 = vpop.f32.mrf.mxu0  ;;  %v6548_v21 = vpop.f32.mrf.mxu1  ;;  %v13050_v12 = vld [vmem:[%s13752_s4 + $0x18] sm:$0xff] }
 0xd4a   :  { %14301 = vst [vmem:[#allocation102_spill] sm:$0xff] %v13050_v12  ;;  %8848 = vmatpush3.msra.mxu0 %v13050_v12  ;;  %v13056_v4 = vld [vmem:[%s13752_s4 + $0x118] sm:$0xff]  ;;  %v13059_v6 = vadd.f32 %v6546_v43, %v6434_v2  ;;  %v6436_v41 = vadd.f32 %v6435_v27, %v14303_v55  ;;  %v13071_v12 = vld [vmem:[%s13752_s4 + $0x190] sm:$0xff]  ;;  %v13091_v55 = vld [vmem:[%s13752_s4 + $0x88] sm:$0xff] }
 0xd4b   :  { %14302 = vst [vmem:[#allocation104_spill] sm:$0xff] %v13056_v4  ;;  %8883 = vmatpush3.msra.mxu1 %v13056_v4  ;;  %8849 = vmatprep.subr.mxu0 %v13065_v1  ;;  %14305 = vst [vmem:[#allocation106_spill] sm:$0xff] %v13071_v12  ;;  %v13077_v43 = vld [vmem:[%s13752_s4 + $0x10] sm:$0xff] }
 0xd4c   :  { %8884 = vmatprep.subr.mxu1 %v13071_v12  ;;  %14306 = vst [vmem:[#allocation61_spill] sm:$0xff] %v13077_v43  ;;  %8850 = vmatpush3.msra.mxu0 %v13077_v43  ;;  %v13083_v27 = vld [vmem:[%s13752_s4 + $0x110] sm:$0xff]  ;;  %v13086_v2 = vadd.f32 %v6548_v21, %v6436_v41  ;;  %14308 = vst [vmem:[#allocation120_spill] sm:$0xff] %v13091_v55  ;;  %v13097_v43 = vld [vmem:[%s13752_s4 + $0x188] sm:$0xff] }
 0xd4d   :  { %14307 = vst [vmem:[#allocation118_spill] sm:$0xff] %v13083_v27  ;;  %8885 = vmatpush3.msra.mxu1 %v13083_v27  ;;  %8851 = vmatprep.subr.mxu0 %v13091_v55  ;;  %14309 = vst [vmem:[#allocation121_spill] sm:$0xff] %v13097_v43  ;;  %v6439_v12 = vpop.f32.mrf.mxu0  ;;  %v6552_v1 = vpop.f32.mrf.mxu1  ;;  %v13103_v21 = vld [vmem:[%s13752_s4 + $0x8] sm:$0xff]  ;;  %v14312_v55 = vld [vmem:[#allocation95_spill] sm:$0xff] }
 0xd4e   :  { %8886 = vmatprep.subr.mxu1 %v13097_v43  ;;  %14310 = vst [vmem:[#allocation124_spill] sm:$0xff] %v13103_v21  ;;  %8852 = vmatpush3.msra.mxu0 %v13103_v21  ;;  %v13109_v41 = vld [vmem:[%s13752_s4 + $0x108] sm:$0xff]  ;;  %v6440_v27 = vadd.f32 %v6439_v12, %v14312_v55  ;;  %v13116_v43 = vld [vmem:[%s13752_s4 + $0x80] sm:$0xff] }
 0xd4f   :  { %14311 = vst [vmem:[#allocation125_spill] sm:$0xff] %v13109_v41  ;;  %8887 = vmatpush3.msra.mxu1 %v13109_v41  ;;  %14313 = vst [vmem:[#allocation128_spill] sm:$0xff] %v13116_v43  ;;  %8853 = vmatprep.subr.mxu0 %v13116_v43  ;;  %v13122_v21 = vld [vmem:[%s13752_s4 + $0x180] sm:$0xff]  ;;  %v6441_v4 = vpop.f32.mrf.mxu0  ;;  %v6554_v13 = vpop.f32.mrf.mxu1  ;;  %v14317_v41 = vld [vmem:[#allocation96_spill] sm:$0xff] }
 0xd50   :  { %14314 = vst [vmem:[#allocation129_spill] sm:$0xff] %v13122_v21  ;;  %8888 = vmatprep.subr.mxu1 %v13122_v21  ;;  %v13128_v12 = vld [vmem:[%s13752_s4] sm:$0xff]  ;;  %v13137_v43 = vadd.f32 %v6552_v1, %v6440_v27  ;;  %v6442_v21 = vadd.f32 %v6441_v4, %v14317_v41 }
 0xd51   :  { %14315 = vst [vmem:[#allocation131_spill] sm:$0xff] %v13128_v12  ;;  %8854 = vmatpush3.msra.mxu0 %v13128_v12  ;;  %v13134_v55 = vld [vmem:[%s13752_s4 + $0x100] sm:$0xff]  ;;  %s9520_s4 = smov [#allocation21]  }
 0xd52   :  { %14316 = vst [vmem:[#allocation132_spill] sm:$0xff] %v13134_v55  ;;  %8889 = vmatpush3.msra.mxu1 %v13134_v55  ;;  %7688 = vmatprep.subr.mxu0 %v13140_v52  ;;  %v13146_v12 = vadd.f32 %v6554_v13, %v6442_v21  ;;  %v14321_v27 = vld [vmem:[#allocation31_spill] sm:$0xff]  ;;  %v14323_v21 = vld [vmem:[#allocation32_spill] sm:$0xff]  ;;  %s8567_s19 = sshll.u32 %s9520_s4, 4  ;;  %s8568_s19 = int_to_ptr.vmem [resolvable:$true] %s8567_s19 }
 0xd53   :  { %7759 = vmatprep.subr.mxu1 %v13143_v22  ;;  %v6445_v8 = vpop.f32.mrf.mxu0  ;;  %v6558_v20 = vpop.f32.mrf.mxu1  ;;  %s9469_s20 = scalar_lea.vmem %s8568_s19, 4096  ;;  %p9474_p0 = scmp.lt.s32.totalorder %s8568_s19, %s8568_s19 }
 0xd54   :  { %v6446_v61 = vadd.f32 %v6445_v8, %v14320_v3  ;;  %p9470_p13 = scmp.ne.s32.totalorder %s8568_s19, %s9469_s20  ;;  %p9475_p1 = scmp.lt.s32.totalorder %s9469_s20, %s9469_s20 }
 0xd55   :  { %v6447_v54 = vpop.f32.mrf.mxu0  ;;  %v6560_v55 = vpop.f32.mrf.mxu1 }
 0xd56   :  { %v13149_v1 = vadd.f32 %v6558_v20, %v6446_v61  ;;  %v6448_v4 = vadd.f32 %v6447_v54, %v14321_v27  ;;  %v14324_v61 = vld [vmem:[#allocation33_spill] sm:$0xff]  ;;  %v14325_v27 = vld [vmem:[#allocation35_spill] sm:$0xff]  ;;  %p9476_p2 = por %p9475_p1, %p9474_p0 }
 0xd58   :  { %v13152_v41 = vadd.f32 %v6560_v55, %v6448_v4  ;;  %p9477_p3 = pnand %p9476_p2, %p9470_p13 }
 0xd59   :  { %v6451_v35 = vpop.f32.mrf.mxu0  ;;  %v6564_v52 = vpop.f32.mrf.mxu1 }
 0xd5a   :  { %v6452_v25 = vadd.f32 %v6451_v35, %v14322_v57 }
 0xd5b   :  { %v6453_v58 = vpop.f32.mrf.mxu0  ;;  %v6566_v22 = vpop.f32.mrf.mxu1 }
 0xd5c   :  { %v13155_v13 = vadd.f32 %v6564_v52, %v6452_v25  ;;  %v6454_v11 = vadd.f32 %v6453_v58, %v14323_v21  ;;  %v14326_v25 = vld [vmem:[#allocation34_spill] sm:$0xff] }
 0xd5e   :  { %v13158_v33 = vadd.f32 %v6566_v22, %v6454_v11  ;;  %v14327_v22 = vld [vmem:[#allocation36_spill] sm:$0xff] }
 0xd5f   :  { %v6457_v3 = vpop.f32.mrf.mxu0  ;;  %v6570_v8 = vpop.f32.mrf.mxu1 }
 0xd60   :  { %v6458_v20 = vadd.f32 %v6457_v3, %v14324_v61 }
 0xd61   :  { %v6459_v29 = vpop.f32.mrf.mxu0  ;;  %v6572_v54 = vpop.f32.mrf.mxu1 }
 0xd62   :  { %v13161_v55 = vadd.f32 %v6570_v8, %v6458_v20  ;;  %v6460_v4 = vadd.f32 %v6459_v29, %v14325_v27  ;;  %v14328_v8 = vld [vmem:[#allocation37_spill] sm:$0xff] }
 0xd64   :  { %v13164_v36 = vadd.f32 %v6572_v54, %v6460_v4  ;;  %v14329_v54 = vld [vmem:[#allocation38_spill] sm:$0xff] }
 0xd65   :  { %v6463_v57 = vpop.f32.mrf.mxu0  ;;  %v6576_v35 = vpop.f32.mrf.mxu1 }
 0xd66   :  { %v6464_v52 = vadd.f32 %v6463_v57, %v14326_v25 }
 0xd67   :  { %v6465_v32 = vpop.f32.mrf.mxu0  ;;  %v6578_v58 = vpop.f32.mrf.mxu1 }
 0xd68   :  { %v13167_v11 = vadd.f32 %v6576_v35, %v6464_v52  ;;  %v6466_v21 = vadd.f32 %v6465_v32, %v14327_v22 }
 0xd6a   :  { %v13170_v48 = vadd.f32 %v6578_v58, %v6466_v21 }
 0xd6b   :  { %v6469_v3 = vpop.f32.mrf.mxu0  ;;  %v6582_v61 = vpop.f32.mrf.mxu1 }
 0xd6c   :  { %v6470_v20 = vadd.f32 %v6469_v3, %v14328_v8 }
 0xd6d   :  { %v6471_v23 = vpop.f32.mrf.mxu0  ;;  %v6584_v4 = vpop.f32.mrf.mxu1 }
 0xd6e   :  { %v13173_v29 = vadd.f32 %v6582_v61, %v6470_v20  ;;  %v6472_v27 = vadd.f32 %v6471_v23, %v14329_v54 }
 0xd70   :  { %v13176_v62 = vadd.f32 %v6584_v4, %v6472_v27 }
 0xd72   :  { %14330 = vst [vmem:[#allocation147_spill] sm:$0xff] %v13176_v62 }
 0xd91   :  { %v7046_v57 = vpop.f32.mrf.mxu0  ;;  %v7159_v25 = vpop.f32.mrf.mxu1 }
 0xd92   :  { %v7160_v39 = vadd.f32 %v7159_v25, %v7046_v57 }
 0xd93   :  { %v7048_v35 = vpop.f32.mrf.mxu0  ;;  %v7161_v52 = vpop.f32.mrf.mxu1 }
 0xd94   :  { %v7162_v26 = vadd.f32 %v7161_v52, %v7048_v35  ;;  %v13182_v34 = vadd.f32 %v7160_v39, %v12643_v53 }
 0xd97   :  { %v7052_v38 = vpop.f32.mrf.mxu0  ;;  %v7165_v32 = vpop.f32.mrf.mxu1 }
 0xd98   :  { %v7166_v27 = vadd.f32 %v7165_v32, %v7052_v38 }
 0xd99   :  { %v7054_v58 = vpop.f32.mrf.mxu0  ;;  %v7167_v22 = vpop.f32.mrf.mxu1 }
 0xd9a   :  { %v7168_v49 = vadd.f32 %v7167_v22, %v7054_v58  ;;  %v13179_v0 = vadd.f32 %v7166_v27, %v12665_v42  ;;  %v13191_v42 = vadd.f32 %v7162_v26, %v12654_v59 }
 0xd9c   :  { %v13185_v62 = vadd.f32 %v7168_v49, %v12670_v50 }
 0xd9d   :  { %v7058_v21 = vpop.f32.mrf.mxu0  ;;  %v7171_v17 = vpop.f32.mrf.mxu1 }
 0xd9e   :  { %v7172_v60 = vadd.f32 %v7171_v17, %v7058_v21 }
 0xd9f   :  { %v7060_v14 = vpop.f32.mrf.mxu0  ;;  %v7173_v3 = vpop.f32.mrf.mxu1 }
 0xda0   :  { %v7174_v7 = vadd.f32 %v7173_v3, %v7060_v14  ;;  %v13188_v38 = vadd.f32 %v7172_v60, %v12675_v46  ;;  %v7464_v14 = vadd.f32 %v13179_v0, %v13182_v34  ;;  %v7477_v46 = vadd.f32 %v13185_v62, %v13191_v42 }
 0xda2   :  { %v13196_v52 = vadd.f32 %v7174_v7, %v12678_v37  ;;  %v7465_v60 = vadd.f32 %v7464_v14, %v13188_v38 }
 0xda3   :  { %v7064_v8 = vpop.f32.mrf.mxu0  ;;  %v7177_v61 = vpop.f32.mrf.mxu1 }
 0xda4   :  { %v7178_v28 = vadd.f32 %v7177_v61, %v7064_v8 }
 0xda5   :  { %v7066_v20 = vpop.f32.mrf.mxu0  ;;  %v7179_v45 = vpop.f32.mrf.mxu1 }
 0xda6   :  { %v7180_v17 = vadd.f32 %v7179_v45, %v7066_v20  ;;  %v13199_v53 = vadd.f32 %v7178_v28, %v12681_v16  ;;  %v7478_v16 = vadd.f32 %v7477_v46, %v13196_v52 }
 0xda8   :  { %v13205_v59 = vadd.f32 %v7180_v17, %v12684_v63 }
 0xda9   :  { %v7070_v23 = vpop.f32.mrf.mxu0  ;;  %v7183_v54 = vpop.f32.mrf.mxu1 }
 0xdaa   :  { %v7184_v35 = vadd.f32 %v7183_v54, %v7070_v23  ;;  %v7479_v63 = vadd.f32 %v7478_v16, %v13205_v59 }
 0xdab   :  { %v7072_v4 = vpop.f32.mrf.mxu0  ;;  %v7185_v31 = vpop.f32.mrf.mxu1 }
 0xdac   :  { %v7186_v50 = vadd.f32 %v7185_v31, %v7072_v4  ;;  %v13208_v26 = vadd.f32 %v7184_v35, %v12687_v30 }
 0xdaf   :  { %v7076_v51 = vpop.f32.mrf.mxu0  ;;  %v7189_v47 = vpop.f32.mrf.mxu1 }
 0xdb0   :  { %v7190_v49 = vadd.f32 %v7189_v47, %v7076_v51  ;;  %v7466_v47 = vadd.f32 %v7465_v60, %v13199_v53  ;;  %v13213_v51 = vadd.f32 %v7186_v50, %v12690_v19 }
 0xdb1   :  { %v7078_v57 = vpop.f32.mrf.mxu0  ;;  %v7191_v25 = vpop.f32.mrf.mxu1 }
 0xdb2   :  { %v7192_v37 = vadd.f32 %v7191_v25, %v7078_v57  ;;  %v13216_v32 = vadd.f32 %v7190_v49, %v12693_v9  ;;  %v7467_v30 = vadd.f32 %v7466_v47, %v13208_v26  ;;  %v7480_v61 = vadd.f32 %v7479_v63, %v13213_v51  ;;  %v13249_v47 = vld [vmem:[#allocation9] sm:$0xff] }
 0xdb3   :  { %14332 = vst [vmem:[#allocation137_spill] sm:$0xff] %v13249_v47 }
 0xdb4   :  { %v13221_v22 = vadd.f32 %v7192_v37, %v12696_v44  ;;  %v7468_v19 = vadd.f32 %v7467_v30, %v13216_v32 }
 0xdb5   :  { %v7082_v39 = vpop.f32.mrf.mxu0  ;;  %v7195_v45 = vpop.f32.mrf.mxu1 }
 0xdb6   :  { %v7196_v7 = vadd.f32 %v7195_v45, %v7082_v39  ;;  %v7481_v27 = vadd.f32 %v7480_v61, %v13221_v22 }
 0xdb7   :  { %v7084_v28 = vpop.f32.mrf.mxu0  ;;  %v7197_v31 = vpop.f32.mrf.mxu1 }
 0xdb8   :  { %v7198_v58 = vadd.f32 %v7197_v31, %v7084_v28  ;;  %v13224_v21 = vadd.f32 %v7196_v7, %v12699_v24  ;;  %v13242_v28 = vld [vmem:[#allocation9 + $0x20] sm:$0xff]  ;;  %v13246_v31 = vld [vmem:[#allocation9 + $0x8] sm:$0xff] }
 0xdba   :  { %v13229_v9 = vadd.f32 %v7198_v58, %v12702_v5  ;;  %v7469_v44 = vadd.f32 %v7468_v19, %v13224_v21 }
 0xdbb   :  { %v7088_v3 = vpop.f32.mrf.mxu0  ;;  %v7201_v8 = vpop.f32.mrf.mxu1 }
 0xdbc   :  { %v7202_v20 = vadd.f32 %v7201_v8, %v7088_v3  ;;  %v7482_v57 = vadd.f32 %v7481_v27, %v13229_v9 }
 0xdbd   :  { %v7090_v23 = vpop.f32.mrf.mxu0  ;;  %v7203_v54 = vpop.f32.mrf.mxu1 }
 0xdbe   :  { %v13234_v4 = vadd.f32 %v7202_v20, %v12705_v10  ;;  %v7204_v24 = vadd.f32 %v7203_v54, %v7090_v23 }
 0xdc0   :  { %v7470_v25 = vadd.f32 %v7469_v44, %v13234_v4  ;;  %v13239_v17 = vadd.f32 %v7204_v24, %v12708_v15  ;;  %v14331_v15 = vmov 0.0  }
 0xdc2   :  { %v7471_v5 = vrot.slane %v7470_v25, 4  ;;  %v7483_v35 = vadd.f32 %v7482_v57, %v13239_v17 }
 0xdc4   :  { %v7472_v14 = vadd.f32 %v7471_v5, %v7470_v25  ;;  %v7484_v50 = vrot.slane %v7483_v35, 4 }
 0xdc6   :  { %v7473_v49 = vrot.slane %v7472_v14, 2  ;;  %v7485_v46 = vadd.f32 %v7484_v50, %v7483_v35 }
 0xdc8   :  { %v7474_v60 = vadd.f32 %v7473_v49, %v7472_v14  ;;  %v7486_v39 = vrot.slane %v7485_v46, 2 }
 0xdca   :  { %v7487_v45 = vadd.f32 %v7486_v39, %v7485_v46  ;;  %v7475_v10 = vrot.slane %v7474_v60, 1 }
 0xdcc   :  { %v7488_v37 = vrot.slane %v7487_v45, 1  ;;  %v7476_v16 = vadd.f32 %v7475_v10, %v7474_v60 }
 0xdce   :  { %v7489_v7 = vadd.f32 %v7488_v37, %v7487_v45 }
 0xdd0   :  { %7580 = vmatprep.mubr.f32.mxu0 %v7489_v7 }
 0xdd1   :  { %7581 = vmatmul.mubr.f32.vlgmr.msra.gmra.mxu0 %v7476_v16 }
 0xdd2   :  { %7689 = vmatpush1.msra.mxu0 %v13242_v28  ;;  %7724 = vmatprep.mubr.f32.mxu0 %v14331_v15 }
 0xdd3   :  { %7690 = vmatprep.subr.mxu0 %v13246_v31 }
 0xdd4   :  { %7691 = vmatpush1.msra.mxu0 %v13249_v47 }
 0xdd5   :  { %8893 = vmatprep.subr.mxu0 %v12717_v56 }
 0xde1   :  { %v7272_v58 = vpop.f32.mrf.mxu0  ;;  %v7385_v63 = vpop.f32.mrf.mxu1 }
 0xde2   :  { %v7386_v50 = vadd.f32 %v7385_v63, %v7272_v58 }
 0xde3   :  { %v7274_v30 = vpop.f32.mrf.mxu0  ;;  %v7387_v3 = vpop.f32.mrf.mxu1 }
 0xde4   :  { %v7388_v49 = vadd.f32 %v7387_v3, %v7274_v30 }
 0xde5   :  { %v7278_v8 = vpop.f32.mrf.mxu0  ;;  %v7391_v61 = vpop.f32.mrf.mxu1 }
 0xde6   :  { %v7392_v25 = vadd.f32 %v7391_v61, %v7278_v8  ;;  %v13260_v8 = vadd.f32 %v7386_v50, %v12981_v18  ;;  %v13266_v30 = vadd.f32 %v7388_v49, %v13008_v40 }
 0xde7   :  { %v7280_v19 = vpop.f32.mrf.mxu0  ;;  %v7393_v20 = vpop.f32.mrf.mxu1 }
 0xde8   :  { %v7394_v5 = vadd.f32 %v7393_v20, %v7280_v19  ;;  %v13254_v45 = vadd.f32 %v7392_v25, %v13059_v6 }
 0xde9   :  { %v7284_v23 = vpop.f32.mrf.mxu0  ;;  %v7397_v54 = vpop.f32.mrf.mxu1 }
 0xdea   :  { %v7398_v56 = vadd.f32 %v7397_v54, %v7284_v23  ;;  %v13257_v37 = vadd.f32 %v7394_v5, %v13086_v2  ;;  %v7490_v2 = vadd.f32 %v13254_v45, %v13260_v8 }
 0xdeb   :  { %v7286_v27 = vpop.f32.mrf.mxu0  ;;  %v7399_v44 = vpop.f32.mrf.mxu1 }
 0xdec   :  { %v7400_v46 = vadd.f32 %v7399_v44, %v7286_v27  ;;  %v13263_v58 = vadd.f32 %v7398_v56, %v13137_v43  ;;  %v7503_v43 = vadd.f32 %v13257_v37, %v13266_v30 }
 0xded   :  { %v7290_v24 = vpop.f32.mrf.mxu0  ;;  %v7403_v57 = vpop.f32.mrf.mxu1 }
 0xdee   :  { %v7404_v10 = vadd.f32 %v7403_v57, %v7290_v24  ;;  %v13269_v6 = vadd.f32 %v7400_v46, %v13146_v12  ;;  %v7491_v12 = vadd.f32 %v7490_v2, %v13263_v58 }
 0xdef   :  { %v7292_v35 = vpop.f32.mrf.mxu0  ;;  %v7405_v14 = vpop.f32.mrf.mxu1 }
 0xdf0   :  { %v7406_v7 = vadd.f32 %v7405_v14, %v7292_v35  ;;  %v13274_v19 = vadd.f32 %v7404_v10, %v13149_v1  ;;  %v7504_v24 = vadd.f32 %v7503_v43, %v13269_v6 }
 0xdf1   :  { %v7296_v60 = vpop.f32.mrf.mxu0  ;;  %v7409_v39 = vpop.f32.mrf.mxu1 }
 0xdf2   :  { %v7410_v63 = vadd.f32 %v7409_v39, %v7296_v60  ;;  %v13279_v23 = vadd.f32 %v7406_v7, %v13152_v41 }
 0xdf3   :  { %v7298_v16 = vpop.f32.mrf.mxu0  ;;  %v7411_v47 = vpop.f32.mrf.mxu1 }
 0xdf4   :  { %v7412_v18 = vadd.f32 %v7411_v47, %v7298_v16  ;;  %v13283_v27 = vadd.f32 %v7410_v63, %v13155_v13  ;;  %v7492_v47 = vadd.f32 %v7491_v12, %v13274_v19  ;;  %v7505_v35 = vadd.f32 %v7504_v24, %v13279_v23 }
 0xdf5   :  { %v7302_v3 = vpop.f32.mrf.mxu0  ;;  %v7415_v61 = vpop.f32.mrf.mxu1 }
 0xdf6   :  { %v7416_v20 = vadd.f32 %v7415_v61, %v7302_v3  ;;  %v13288_v25 = vadd.f32 %v7412_v18, %v13158_v33  ;;  %v7493_v13 = vadd.f32 %v7492_v47, %v13283_v27 }
 0xdf7   :  { %v7304_v40 = vpop.f32.mrf.mxu0  ;;  %v7417_v54 = vpop.f32.mrf.mxu1 }
 0xdf8   :  { %v7418_v44 = vadd.f32 %v7417_v54, %v7304_v40  ;;  %v13291_v41 = vadd.f32 %v7416_v20, %v13161_v55  ;;  %v7506_v39 = vadd.f32 %v7505_v35, %v13288_v25  ;;  %v14333_v20 = vld [vmem:[#allocation147_spill] sm:$0xff] }
 0xdf9   :  { %v7308_v1 = vpop.f32.mrf.mxu0  ;;  %v7421_v57 = vpop.f32.mrf.mxu1 }
 0xdfa   :  { %v7422_v5 = vadd.f32 %v7421_v57, %v7308_v1  ;;  %v13296_v56 = vadd.f32 %v7418_v44, %v13164_v36  ;;  %v7494_v55 = vadd.f32 %v7493_v13, %v13291_v41  ;;  %v13321_v13 = vld [vmem:[#allocation9 + $0x18] sm:$0xff] }
 0xdfb   :  { %v7310_v14 = vpop.f32.mrf.mxu0  ;;  %v7423_v50 = vpop.f32.mrf.mxu1 }
 0xdfc   :  { %v13299_v49 = vadd.f32 %v7422_v5, %v13167_v11  ;;  %v7424_v46 = vadd.f32 %v7423_v50, %v7310_v14  ;;  %v7507_v3 = vadd.f32 %v7506_v39, %v13296_v56  ;;  %v13317_v50 = vld [vmem:[#allocation9 + $0x30] sm:$0xff] }
 0xdfd   :  { %v7314_v60 = vpop.f32.mrf.mxu0  ;;  %v7427_v33 = vpop.f32.mrf.mxu1 }
 0xdfe   :  { %v13304_v10 = vadd.f32 %v7424_v46, %v13170_v48  ;;  %v7428_v7 = vadd.f32 %v7427_v33, %v7314_v60  ;;  %v7495_v36 = vadd.f32 %v7494_v55, %v13299_v49  ;;  %v13324_v46 = vld [vmem:[#allocation9 + $0x10] sm:$0xff]  ;;  %v14334_v60 = vld [vmem:[#allocation43_spill] sm:$0xff] }
 0xdff   :  { %v7316_v16 = vpop.f32.mrf.mxu0  ;;  %v7429_v63 = vpop.f32.mrf.mxu1 }
 0xe00   :  { %v13309_v11 = vadd.f32 %v7428_v7, %v13173_v29  ;;  %v7430_v61 = vadd.f32 %v7429_v63, %v7316_v16  ;;  %v7508_v2 = vadd.f32 %v7507_v3, %v13304_v10 }
 0xe02   :  { %v7496_v18 = vadd.f32 %v7495_v36, %v13309_v11  ;;  %v13314_v43 = vadd.f32 %v7430_v61, %v14333_v20  ;;  %v14335_v61 = vld [vmem:[#allocation44_spill] sm:$0xff]  ;;  %v14338_v20 = vld [vmem:[#allocation47_spill] sm:$0xff] }
 0xe04   :  { %v7497_v48 = vrot.slane %v7496_v18, 4  ;;  %v7509_v40 = vadd.f32 %v7508_v2, %v13314_v43  ;;  %v14336_v2 = vld [vmem:[#allocation45_spill] sm:$0xff] }
 0xe06   :  { %v7498_v54 = vadd.f32 %v7497_v48, %v7496_v18  ;;  %v7510_v12 = vrot.slane %v7509_v40, 4  ;;  %v14337_v18 = vld [vmem:[#allocation46_spill] sm:$0xff]  ;;  %v14339_v48 = vld [vmem:[#allocation48_spill] sm:$0xff] }
 0xe08   :  { %v7499_v44 = vrot.slane %v7498_v54, 2  ;;  %v7511_v24 = vadd.f32 %v7510_v12, %v7509_v40  ;;  %v14340_v40 = vld [vmem:[#allocation64_spill] sm:$0xff] }
 0xe09   :  { %v14342_v12 = vld [vmem:[#allocation68_spill] sm:$0xff] }
 0xe0a   :  { %v7500_v1 = vadd.f32 %v7499_v44, %v7498_v54  ;;  %v7512_v57 = vrot.slane %v7511_v24, 2  ;;  %v14341_v54 = vld [vmem:[#allocation66_spill] sm:$0xff] }
 0xe0b   :  { %v14343_v44 = vld [vmem:[#allocation70_spill] sm:$0xff] }
 0xe0c   :  { %v7513_v47 = vadd.f32 %v7512_v57, %v7511_v24  ;;  %v7501_v29 = vrot.slane %v7500_v1, 1  ;;  %v14344_v24 = vld [vmem:[#allocation49_spill] sm:$0xff]  ;;  %v14346_v57 = vld [vmem:[#allocation72_spill] sm:$0xff] }
 0xe0e   :  { %v7514_v5 = vrot.slane %v7513_v47, 1  ;;  %v7502_v14 = vadd.f32 %v7501_v29, %v7500_v1  ;;  %v14345_v1 = vld [vmem:[#allocation50_spill] sm:$0xff]  ;;  %v14348_v29 = vld [vmem:[#allocation76_spill] sm:$0xff] }
 0xe10   :  { %v7515_v35 = vadd.f32 %v7514_v5, %v7513_v47  ;;  %v14347_v47 = vld [vmem:[#allocation74_spill] sm:$0xff]  ;;  %v14349_v5 = vld [vmem:[#allocation51_spill] sm:$0xff] }
 0xe12   :  { %7650 = vmatprep.mubr.f32.mxu1 %v7515_v35  ;;  %v14350_v35 = vld [vmem:[#allocation52_spill] sm:$0xff] }
 0xe13   :  { %7651 = vmatmul.mubr.f32.vlgmr.msra.gmra.mxu1 %v7502_v14  ;;  %v14351_v14 = vld [vmem:[#allocation53_spill] sm:$0xff] }
 0xe14   :  { %7760 = vmatpush1.msra.mxu1 %v13317_v50  ;;  %7795 = vmatprep.mubr.f32.mxu1 %v14331_v15 }
 0xe15   :  { %7761 = vmatprep.subr.mxu1 %v13321_v13 }
 0xe16   :  { %7762 = vmatpush1.msra.mxu1 %v13324_v46 }
 0xe17   :  { %8928 = vmatprep.subr.mxu1 %v14334_v60  ;;  %v14352_v60 = vld [vmem:[#allocation54_spill] sm:$0xff] }
 0xe91   :  { %v8855_v33 = vpop.f32.mrf.mxu0 }
 0xe93   :  { %v8856_v39 = vpop.f32.mrf.mxu0 }
 0xe94   :  { %v8857_v16 = vadd.f32 %v8856_v39, %v8855_v33  ;;  %v14353_v33 = vld [vmem:[#allocation88_spill] sm:$0xff]  ;;  %v14354_v39 = vld [vmem:[#allocation94_spill] sm:$0xff] }
 0xed3   :  { %v8890_v55 = vpop.f32.mrf.mxu1 }
 0xed5   :  { %v8891_v7 = vpop.f32.mrf.mxu1 }
 0xed6   :  { %v8892_v63 = vadd.f32 %v8891_v7, %v8890_v55  ;;  %v14355_v55 = vld [vmem:[#allocation56_spill] sm:$0xff]  ;;  %v14356_v7 = vld [vmem:[#allocation57_spill] sm:$0xff] }
 0xed8   :  { %v7653_v3 = vadd.f32 %v8892_v63, %v8857_v16  ;;  %v14357_v16 = vld [vmem:[#allocation59_spill] sm:$0xff]  ;;  %v14358_v63 = vld [vmem:[#allocation60_spill] sm:$0xff] }
 0xeda   :  { %v7656_v36 = vmul.f32 0.00048828125, %v7653_v3  ;;  %v14359_v3 = vld [vmem:[#allocation62_spill] sm:$0xff] }
 0xedc   :  { %8602 = vmatmul.mubr.msk.f32.vlgmr.msra.gmra.mxu0 %vm3196_vm6, %v7656_v36  ;;  %8603 = vmatmul.mubr.msk.f32.vlgmr.msra.gmra.mxu1 %vm3196_vm6, %v7656_v36  ;;  %v14360_v36 = vld [vmem:[#allocation63_spill] sm:$0xff] }
 0xedd   :  { %8894 = vmatpush3.msra.mxu0 %v14335_v61  ;;  %8929 = vmatpush3.msra.mxu1 %v14336_v2  ;;  %v14361_v61 = vld [vmem:[#allocation65_spill] sm:$0xff]  ;;  %v14362_v2 = vld [vmem:[#allocation67_spill] sm:$0xff] }
 0xede   :  { %8895 = vmatprep.subr.mxu0 %v14337_v18  ;;  %8930 = vmatprep.subr.mxu1 %v14338_v20  ;;  %v14363_v18 = vld [vmem:[#allocation69_spill] sm:$0xff]  ;;  %v14364_v20 = vld [vmem:[#allocation71_spill] sm:$0xff] }
 0xedf   :  { %8896 = vmatpush3.msra.mxu0 %v14339_v48  ;;  %8931 = vmatpush3.msra.mxu1 %v14340_v40  ;;  %v14365_v48 = vld [vmem:[#allocation73_spill] sm:$0xff]  ;;  %v14366_v40 = vld [vmem:[#allocation75_spill] sm:$0xff] }
 0xee0   :  { %8897 = vmatprep.subr.mxu0 %v14341_v54  ;;  %8932 = vmatprep.subr.mxu1 %v14342_v12  ;;  %v14367_v54 = vld [vmem:[#allocation77_spill] sm:$0xff]  ;;  %v14368_v12 = vld [vmem:[#allocation99_spill] sm:$0xff] }
 0xee1   :  { %8898 = vmatpush3.msra.mxu0 %v14343_v44  ;;  %8933 = vmatpush3.msra.mxu1 %v14344_v24  ;;  %v14369_v44 = vld [vmem:[#allocation91_spill] sm:$0xff]  ;;  %v14370_v24 = vld [vmem:[#allocation97_spill] sm:$0xff] }
 0xee2   :  { %8899 = vmatprep.subr.mxu0 %v14345_v1  ;;  %8934 = vmatprep.subr.mxu1 %v14346_v57  ;;  %v14371_v1 = vld [vmem:[#allocation101_spill] sm:$0xff]  ;;  %v14372_v57 = vld [vmem:[#allocation103_spill] sm:$0xff] }
 0xee3   :  { %8900 = vmatpush3.msra.mxu0 %v14347_v47  ;;  %8935 = vmatpush3.msra.mxu1 %v14348_v29  ;;  %v14373_v47 = vld [vmem:[#allocation98_spill] sm:$0xff]  ;;  %v14374_v29 = vld [vmem:[#allocation55_spill] sm:$0xff] }
 0xee4   :  { %8901 = vmatprep.subr.mxu0 %v14349_v5  ;;  %8936 = vmatprep.subr.mxu1 %v14350_v35  ;;  %v14375_v5 = vld [vmem:[#allocation58_spill] sm:$0xff]  ;;  %v14376_v35 = vld [vmem:[#allocation107_spill] sm:$0xff] }
 0xee5   :  { %8902 = vmatpush3.msra.mxu0 %v14351_v14  ;;  %8937 = vmatpush3.msra.mxu1 %v14352_v60  ;;  %v14377_v14 = vld [vmem:[#allocation109_spill] sm:$0xff]  ;;  %v14378_v60 = vld [vmem:[#allocation110_spill] sm:$0xff] }
 0xee6   :  { %8903 = vmatprep.subr.mxu0 %v14353_v33  ;;  %8938 = vmatprep.subr.mxu1 %v14354_v39  ;;  %v14379_v33 = vld [vmem:[#allocation100_spill] sm:$0xff] }
 0xee7   :  { %8904 = vmatpush3.msra.mxu0 %v14355_v55  ;;  %8939 = vmatpush3.msra.mxu1 %v14356_v7  ;;  %v14380_v39 = vld [vmem:[#allocation112_spill] sm:$0xff]  ;;  %v14381_v55 = vld [vmem:[#allocation114_spill] sm:$0xff] }
 0xee8   :  { %8905 = vmatprep.subr.mxu0 %v14357_v16  ;;  %8940 = vmatprep.subr.mxu1 %v14358_v63  ;;  %v14382_v7 = vld [vmem:[#allocation116_spill] sm:$0xff]  ;;  %v14383_v16 = vld [vmem:[#allocation102_spill] sm:$0xff] }
 0xee9   :  { %8906 = vmatpush3.msra.mxu0 %v14359_v3  ;;  %8941 = vmatpush3.msra.mxu1 %v14360_v36  ;;  %v14384_v63 = vld [vmem:[#allocation104_spill] sm:$0xff]  ;;  %v14385_v3 = vld [vmem:[#allocation105_spill] sm:$0xff]  ;;  %v14386_v36 = vld [vmem:[#allocation106_spill] sm:$0xff] }
 0xeea   :  { %8907 = vmatprep.subr.mxu0 %v14361_v61  ;;  %8942 = vmatprep.subr.mxu1 %v14362_v2  ;;  %v14387_v61 = vld [vmem:[#allocation61_spill] sm:$0xff]  ;;  %v14388_v2 = vld [vmem:[#allocation118_spill] sm:$0xff] }
 0xeeb   :  { %8908 = vmatpush3.msra.mxu0 %v14363_v18  ;;  %8943 = vmatpush3.msra.mxu1 %v14364_v20  ;;  %v14389_v18 = vld [vmem:[#allocation120_spill] sm:$0xff]  ;;  %v14390_v20 = vld [vmem:[#allocation121_spill] sm:$0xff] }
 0xeec   :  { %8909 = vmatprep.subr.mxu0 %v14365_v48  ;;  %8944 = vmatprep.subr.mxu1 %v14366_v40  ;;  %v14391_v48 = vld [vmem:[#allocation124_spill] sm:$0xff]  ;;  %v14392_v40 = vld [vmem:[#allocation125_spill] sm:$0xff] }
 0xeed   :  { %8910 = vmatpush3.msra.mxu0 %v14367_v54  ;;  %8945 = vmatpush3.msra.mxu1 %v14368_v12  ;;  %v14393_v54 = vld [vmem:[#allocation128_spill] sm:$0xff]  ;;  %v14394_v12 = vld [vmem:[#allocation129_spill] sm:$0xff] }
 0xeee   :  { %8911 = vmatprep.subr.mxu0 %v14369_v44  ;;  %8946 = vmatprep.subr.mxu1 %v14370_v24  ;;  %v14395_v44 = vld [vmem:[#allocation131_spill] sm:$0xff]  ;;  %v14396_v24 = vld [vmem:[#allocation132_spill] sm:$0xff] }
 0xeef   :  { %8912 = vmatpush3.msra.mxu0 %v14371_v1  ;;  %8947 = vmatpush3.msra.mxu1 %v14372_v57  ;;  %v14397_v1 = vld [vmem:[#allocation134_spill] sm:$0xff]  ;;  %v14398_v57 = vld [vmem:[#allocation135_spill] sm:$0xff] }
 0xef0   :  { %8913 = vmatprep.subr.mxu0 %v14373_v47  ;;  %8948 = vmatprep.subr.mxu1 %v14374_v29 }
 0xef1   :  { %8914 = vmatpush3.msra.mxu0 %v14375_v5  ;;  %8949 = vmatpush3.msra.mxu1 %v14376_v35  ;;  %v14399_v35 = vld [vmem:[#allocation146_spill] sm:$0xff] }
 0xef2   :  { %8915 = vmatprep.subr.mxu0 %v14377_v14  ;;  %8950 = vmatprep.subr.mxu1 %v14378_v60 }
 0xef3   :  { %8916 = vmatpush3.msra.mxu0 %v14379_v33  ;;  %8951 = vmatpush3.msra.mxu1 %v14380_v39 }
 0xef4   :  { %8917 = vmatprep.subr.mxu0 %v14381_v55  ;;  %8952 = vmatprep.subr.mxu1 %v14382_v7 }
 0xef5   :  { %8918 = vmatpush3.msra.mxu0 %v14383_v16  ;;  %8953 = vmatpush3.msra.mxu1 %v14384_v63 }
 0xef6   :  { %8919 = vmatprep.subr.mxu0 %v14385_v3  ;;  %8954 = vmatprep.subr.mxu1 %v14386_v36 }
 0xef7   :  { %8920 = vmatpush3.msra.mxu0 %v14387_v61  ;;  %8955 = vmatpush3.msra.mxu1 %v14388_v2 }
 0xef8   :  { %8921 = vmatprep.subr.mxu0 %v14389_v18  ;;  %8956 = vmatprep.subr.mxu1 %v14390_v20 }
 0xef9   :  { %8922 = vmatpush3.msra.mxu0 %v14391_v48  ;;  %8957 = vmatpush3.msra.mxu1 %v14392_v40 }
 0xefa   :  { %8923 = vmatprep.subr.mxu0 %v14393_v54  ;;  %8958 = vmatprep.subr.mxu1 %v14394_v12 }
 0xefb   :  { %8924 = vmatpush3.msra.mxu0 %v14395_v44  ;;  %8959 = vmatpush3.msra.mxu1 %v14396_v24 }
 0xefc   :  { %8110 = vmatprep.subr.mxu0 %v14397_v1  ;;  %8181 = vmatprep.subr.mxu1 %v14398_v57 }
 0xf9c   :  { %v7726_v47 = vpop.f32.mrf.mxu0  ;;  %v7797_v29 = vpop.f32.mrf.mxu1 }
 0xf9d   :  { %v13395_v14 = vrot.slane %v7726_v47, %v14399_v35  ;;  %v13398_v33 = vrot.slane %v7797_v29, %v14399_v35 }
 0xf9e   :  { %v7728_v5 = vpop.f32.mrf.mxu0  ;;  %v7799_v60 = vpop.f32.mrf.mxu1 }
 0xf9f   :  { %v7809_v39 = vrot.slane %v7728_v5, %v14399_v35  ;;  %v7817_v55 = vrot.slane %v7799_v60, %v14399_v35  ;;  %v13413_v3 = vsub.f32 %v13182_v34, %v13395_v14  ;;  %v13417_v36 = vsub.f32 %v13179_v0, %v13395_v14 }
 0xfa0   :  { %v13466_v40 = vsub.f32 %v13208_v26, %v13395_v14  ;;  %v13482_v26 = vsub.f32 %v13216_v32, %v13395_v14 }
 0xfa1   :  { %v13403_v7 = vsub.f32 %v13191_v42, %v7809_v39  ;;  %v13406_v16 = vsub.f32 %v13185_v62, %v7809_v39  ;;  %v13409_v63 = vsub.f32 %v13196_v52, %v7809_v39  ;;  %v13420_v61 = vsub.f32 %v13205_v59, %v7809_v39 }
 0xfa2   :  { %v13424_v42 = vsub.f32 %v13260_v8, %v13398_v33  ;;  %v13428_v62 = vsub.f32 %v13254_v45, %v13398_v33  ;;  %v13435_v0 = vsub.f32 %v13213_v51, %v7809_v39  ;;  %v13441_v8 = vsub.f32 %v13188_v38, %v13395_v14 }
 0xfa3   :  { %v7851_v52 = vmul.f32 %v13403_v7, %v13403_v7  ;;  %v7855_v34 = vmul.f32 %v13406_v16, %v13406_v16  ;;  %v7859_v59 = vmul.f32 %v13409_v63, %v13409_v63  ;;  %v13445_v45 = vsub.f32 %v13199_v53, %v13395_v14 }
 0xfa4   :  { %v13448_v18 = vsub.f32 %v13266_v30, %v7817_v55  ;;  %v13451_v20 = vsub.f32 %v13257_v37, %v7817_v55  ;;  %v13454_v51 = vsub.f32 %v13269_v6, %v7817_v55  ;;  %v13457_v48 = vsub.f32 %v13221_v22, %v7809_v39 }
 0xfa5   :  { %v7895_v2 = vadd.f32 %v7855_v34, %v7851_v52  ;;  %v13460_v38 = vsub.f32 %v13229_v9, %v7809_v39  ;;  %v7863_v53 = vmul.f32 %v13420_v61, %v13420_v61  ;;  %v13469_v37 = vsub.f32 %v13279_v23, %v7817_v55 }
 0xfa6   :  { %v7853_v6 = vmul.f32 %v13448_v18, %v13448_v18  ;;  %v7857_v22 = vmul.f32 %v13451_v20, %v13451_v20  ;;  %v13476_v9 = vsub.f32 %v13239_v17, %v7809_v39  ;;  %v7867_v54 = vmul.f32 %v13435_v0, %v13435_v0 }
 0xfa7   :  { %v7896_v30 = vadd.f32 %v7895_v2, %v7859_v59  ;;  %v13486_v23 = vsub.f32 %v13224_v21, %v13395_v14  ;;  %v13489_v44 = vsub.f32 %v13288_v25, %v7817_v55  ;;  %v7861_v24 = vmul.f32 %v13454_v51, %v13454_v51 }
 0xfa8   :  { %v7921_v17 = vadd.f32 %v7857_v22, %v7853_v6  ;;  %v7871_v47 = vmul.f32 %v13457_v48, %v13457_v48  ;;  %v13496_v29 = vsub.f32 %v13296_v56, %v7817_v55  ;;  %v7850_v32 = vmul.f32 %v13413_v3, %v13413_v3 }
 0xfa9   :  { %v7897_v12 = vadd.f32 %v7896_v30, %v7863_v53  ;;  %v7854_v21 = vmul.f32 %v13417_v36, %v13417_v36  ;;  %v7875_v25 = vmul.f32 %v13460_v38, %v13460_v38  ;;  %v7865_v60 = vmul.f32 %v13469_v37, %v13469_v37 }
 0xfaa   :  { %v7922_v39 = vadd.f32 %v7921_v17, %v7861_v24  ;;  %v7879_v52 = vmul.f32 %v13476_v9, %v13476_v9  ;;  %v13509_v56 = vsub.f32 %v13304_v10, %v7817_v55  ;;  %v7858_v34 = vmul.f32 %v13441_v8, %v13441_v8 }
 0xfab   :  { %v7898_v5 = vadd.f32 %v7897_v12, %v7867_v54  ;;  %v7882_v59 = vadd.f32 %v7854_v21, %v7850_v32  ;;  %v13514_v53 = vsub.f32 %v13314_v43, %v7817_v55  ;;  %v7869_v30 = vmul.f32 %v13489_v44, %v13489_v44 }
 0xfac   :  { %v7923_v6 = vadd.f32 %v7922_v39, %v7865_v60  ;;  %v7873_v22 = vmul.f32 %v13496_v29, %v13496_v29  ;;  %v7862_v54 = vmul.f32 %v13445_v45, %v13445_v45  ;;  %v13524_v12 = vsub.f32 %v13263_v58, %v13398_v33 }
 0xfad   :  { %v7899_v2 = vadd.f32 %v7898_v5, %v7871_v47  ;;  %v7883_v10 = vadd.f32 %v7882_v59, %v7858_v34  ;;  %v7852_v43 = vmul.f32 %v13424_v42, %v13424_v42  ;;  %v7856_v55 = vmul.f32 %v13428_v62, %v13428_v62 }
 0xfae   :  { %v7924_v17 = vadd.f32 %v7923_v6, %v7869_v30  ;;  %v13532_v47 = vsub.f32 %v13234_v4, %v13395_v14  ;;  %v7866_v32 = vmul.f32 %v13466_v40, %v13466_v40  ;;  %v13538_v58 = vsub.f32 %v13274_v19, %v13398_v33 }
 0xfaf   :  { %v7900_v24 = vadd.f32 %v7899_v2, %v7875_v25  ;;  %v7884_v21 = vadd.f32 %v7883_v10, %v7862_v54  ;;  %v7877_v5 = vmul.f32 %v13509_v56, %v13509_v56  ;;  %v7870_v39 = vmul.f32 %v13482_v26, %v13482_v26 }
 0xfb0   :  { %v7925_v60 = vadd.f32 %v7924_v17, %v7873_v22  ;;  %v13546_v4 = vsub.f32 %v13283_v27, %v13398_v33  ;;  %v7860_v14 = vmul.f32 %v13524_v12, %v13524_v12  ;;  %v7908_v59 = vadd.f32 %v7856_v55, %v7852_v43 }
 0xfb1   :  { %v7901_v25 = vadd.f32 %v7900_v24, %v7879_v52  ;;  %v7885_v34 = vadd.f32 %v7884_v21, %v7866_v32  ;;  %v7881_v19 = vmul.f32 %v13514_v53, %v13514_v53  ;;  %v7874_v30 = vmul.f32 %v13486_v23, %v13486_v23 }
 0xfb2   :  { %v7926_v52 = vadd.f32 %v7925_v60, %v7877_v5  ;;  %v13556_v22 = vsub.f32 %v13291_v41, %v13398_v33  ;;  %v7864_v27 = vmul.f32 %v13538_v58, %v13538_v58  ;;  %v7909_v54 = vadd.f32 %v7908_v59, %v7860_v14 }
 0xfb3   :  { %v7902_v2 = vrot.slane %v7901_v25, 4  ;;  %v7886_v6 = vadd.f32 %v7885_v34, %v7870_v39  ;;  %v7878_v17 = vmul.f32 %v13532_v47, %v13532_v47  ;;  %v13564_v55 = vsub.f32 %v13299_v49, %v13398_v33 }
 0xfb4   :  { %v7927_v24 = vadd.f32 %v7926_v52, %v7881_v19  ;;  %v7868_v32 = vmul.f32 %v13546_v4, %v13546_v4  ;;  %v7910_v21 = vadd.f32 %v7909_v54, %v7864_v27  ;;  %v13570_v39 = vsub.f32 %v13309_v11, %v13398_v33 }
 0xfb5   :  { %v7903_v10 = vadd.f32 %v7902_v2, %v7901_v25  ;;  %v7887_v43 = vadd.f32 %v7886_v6, %v7874_v30  ;;  %v7872_v25 = vmul.f32 %v13556_v22, %v13556_v22  ;;  %v7876_v49 = vmul.f32 %v13564_v55, %v13564_v55 }
 0xfb6   :  { %v7928_v5 = vrot.slane %v7927_v24, 4  ;;  %v7911_v34 = vadd.f32 %v7910_v21, %v7868_v32  ;;  %v7880_v27 = vmul.f32 %v13570_v39, %v13570_v39 }
 0xfb7   :  { %v7904_v41 = vrot.slane %v7903_v10, 2  ;;  %v7888_v60 = vadd.f32 %v7887_v43, %v7878_v17 }
 0xfb8   :  { %v7929_v59 = vadd.f32 %v7928_v5, %v7927_v24  ;;  %v7912_v19 = vadd.f32 %v7911_v34, %v7872_v25 }
 0xfb9   :  { %v7905_v14 = vadd.f32 %v7904_v41, %v7903_v10  ;;  %v7889_v2 = vrot.slane %v7888_v60, 4 }
 0xfba   :  { %v7930_v30 = vrot.slane %v7929_v59, 2  ;;  %v7913_v54 = vadd.f32 %v7912_v19, %v7876_v49 }
 0xfbb   :  { %v7906_v52 = vrot.slane %v7905_v14, 1  ;;  %v7890_v6 = vadd.f32 %v7889_v2, %v7888_v60 }
 0xfbc   :  { %v7931_v33 = vadd.f32 %v7930_v30, %v7929_v59  ;;  %v7914_v43 = vadd.f32 %v7913_v54, %v7880_v27  ;;  %v14400_v59 = vld [vmem:[#allocation137_spill] sm:$0xff] }
 0xfbd   :  { %v7907_v11 = vadd.f32 %v7906_v52, %v7905_v14  ;;  %v7891_v17 = vrot.slane %v7890_v6, 2 }
 0xfbe   :  { %v7932_v32 = vrot.slane %v7931_v33, 1  ;;  %v7915_v24 = vrot.slane %v7914_v43, 4 }
 0xfbf   :  { %7998 = vmatprep.mubr.f32.mxu0 %v7907_v11  ;;  %v7892_v10 = vadd.f32 %v7891_v17, %v7890_v6 }
 0xfc0   :  { %v7933_v21 = vadd.f32 %v7932_v32, %v7931_v33  ;;  %v7916_v5 = vadd.f32 %v7915_v24, %v7914_v43  ;;  %v8075_v33 = vld [vmem:[#allocation18] sm:$0x1] }
 0xfc1   :  { %v7893_v41 = vrot.slane %v7892_v10, 1 }
 0xfc2   :  { %8068 = vmatprep.mubr.f32.mxu1 %v7933_v21  ;;  %v7917_v34 = vrot.slane %v7916_v5, 2 }
 0xfc3   :  { %v7894_v25 = vadd.f32 %v7893_v41, %v7892_v10 }
 0xfc4   :  { %v7918_v60 = vadd.f32 %v7917_v34, %v7916_v5 }
 0xfc5   :  { %7999 = vmatmul.mubr.f32.vlgmr.msra.gmra.mxu0 %v7894_v25 }
 0xfc6   :  { %8111 = vmatpush1.msra.mxu0 %v13242_v28  ;;  %8146 = vmatprep.mubr.f32.mxu0 %v14331_v15  ;;  %v7919_v14 = vrot.slane %v7918_v60, 1 }
 0xfc7   :  { %8112 = vmatprep.subr.mxu0 %v13246_v31 }
 0xfc8   :  { %8113 = vmatpush1.msra.mxu0 %v14400_v59  ;;  %v7920_v2 = vadd.f32 %v7919_v14, %v7918_v60 }
 0xfc9   :  { %8256 = vmatprep.subr.mxu0 %v14397_v1 }
 0xfca   :  { %8069 = vmatmul.mubr.f32.vlgmr.msra.gmra.mxu1 %v7920_v2 }
 0xfcb   :  { %8182 = vmatpush1.msra.mxu1 %v13317_v50  ;;  %8217 = vmatprep.mubr.f32.mxu1 %v14331_v15 }
 0xfcc   :  { %8183 = vmatprep.subr.mxu1 %v13321_v13 }
 0xfcd   :  { %8184 = vmatpush1.msra.mxu1 %v13324_v46 }
 0xfce   :  { %8327 = vmatprep.subr.mxu1 %v14398_v57  ;;  %v8224_v57 = vld [vmem:[#allocation20] sm:$0x1] }
0x1085   :  { %v8925_v49 = vpop.f32.mrf.mxu0 }
0x1087   :  { %v8926_v19 = vpop.f32.mrf.mxu0 }
0x1088   :  { %v8927_v30 = vadd.f32 %v8926_v19, %v8925_v49 }
0x108a   :  { %v8960_v52 = vpop.f32.mrf.mxu1 }
0x108c   :  { %v8961_v6 = vpop.f32.mrf.mxu1 }
0x108d   :  { %v8962_v27 = vadd.f32 %v8961_v6, %v8960_v52 }
0x108f   :  { %v8071_v54 = vadd.f32 %v8962_v27, %v8927_v30 }
0x1091   :  { %v8074_v11 = vmul.f32 0.00048828125, %v8071_v54 }
0x1093   :  { %v8076_v1 = vadd.f32 1e-05, %v8074_v11 }
0x1095   :  { %9001 = vrsqrt.f32 %v8076_v1 }
0x10a2   :  { %v9002_v17 = vpop.eup %9001 }
0x10a3   :  { %v8078_v43 = vmul.f32 %v9002_v17, %v8075_v33  ;;  %v9217_v33 = vld [vmem:[#allocation3] sm:$0xff] }
0x10a4   :  { %v9218_v17 = vld [vmem:[#allocation3 + $0x20] sm:$0xff] }
0x10a5   :  { %8604 = vmatmul.mubr.msk.f32.vlgmr.msra.gmra.mxu0 %vm3196_vm6, %v8078_v43  ;;  %8605 = vmatmul.mubr.msk.f32.vlgmr.msra.gmra.mxu1 %vm3196_vm6, %v8078_v43 }
0x10a6   :  { %8257 = vmatpush1.msra.mxu0 %v13242_v28  ;;  %8328 = vmatpush1.msra.mxu1 %v13317_v50 }
0x10a7   :  { %8258 = vmatprep.subr.mxu0 %v13246_v31  ;;  %8329 = vmatprep.subr.mxu1 %v13321_v13 }
0x10a8   :  { %8259 = vmatpush1.msra.mxu0 %v14400_v59  ;;  %8292 = vmatprep.mubr.f32.mxu0 %v14331_v15 }
0x10a9   :  { %8330 = vmatpush1.msra.mxu1 %v13324_v46  ;;  %8363 = vmatprep.mubr.f32.mxu1 %v14331_v15 }
0x10aa   :  { %8606 = vmatmul.mubr.msk.f32.vlgmr.msra.gmra.mxu0 %vm3196_vm6, %v8224_v57  ;;  %8607 = vmatmul.mubr.msk.f32.vlgmr.msra.gmra.mxu1 %vm3196_vm6, %v8224_v57 }
0x1165   :  { %v8148_v28 = vpop.f32.mrf.mxu0  ;;  %v8219_v32 = vpop.f32.mrf.mxu1 }
0x1166   :  { %v8373_v50 = vrot.slane %v8148_v28, %v14399_v35  ;;  %v8381_v31 = vrot.slane %v8219_v32, %v14399_v35  ;;  %v9220_v28 = vld [vmem:[#allocation3 + $0x60] sm:$0xff] }
0x1167   :  { %v8150_v13 = vpop.f32.mrf.mxu0  ;;  %v8221_v10 = vpop.f32.mrf.mxu1  ;;  %v9221_v32 = vld [vmem:[#allocation3 + $0x80] sm:$0xff] }
0x1168   :  { %v8386_v24 = vmul.f32 %v8373_v50, %v13413_v3  ;;  %v8390_v21 = vmul.f32 %v8373_v50, %v13417_v36  ;;  %v8394_v46 = vmul.f32 %v8373_v50, %v13441_v8  ;;  %v8398_v15 = vmul.f32 %v8373_v50, %v13445_v45 }
0x1169   :  { %v8402_v41 = vmul.f32 %v8373_v50, %v13466_v40  ;;  %v8406_v5 = vmul.f32 %v8373_v50, %v13482_v26  ;;  %v8410_v25 = vmul.f32 %v8373_v50, %v13486_v23  ;;  %v8414_v34 = vmul.f32 %v8373_v50, %v13532_v47 }
0x116a   :  { %v13611_v60 = vmul.f32 %v8381_v31, %v13424_v42  ;;  %v13614_v14 = vmul.f32 %v8381_v31, %v13428_v62  ;;  %v8294_v3 = vpop.f32.mrf.mxu0  ;;  %v8365_v36 = vpop.f32.mrf.mxu1  ;;  %v13617_v8 = vmul.f32 %v8381_v31, %v13524_v12  ;;  %v13620_v45 = vmul.f32 %v8381_v31, %v13538_v58 }
0x116b   :  { %v13623_v40 = vmul.f32 %v8381_v31, %v13546_v4  ;;  %v13626_v26 = vmul.f32 %v8381_v31, %v13556_v22  ;;  %v13629_v42 = vmul.f32 %v8381_v31, %v13564_v55  ;;  %v13632_v62 = vmul.f32 %v8381_v31, %v13570_v39 }
0x116c   :  { %v8377_v23 = vrot.slane %v8150_v13, %v14399_v35  ;;  %v8385_v12 = vrot.slane %v8221_v10, %v14399_v35  ;;  %v8296_v47 = vpop.f32.mrf.mxu0  ;;  %v8367_v59 = vpop.f32.mrf.mxu1  ;;  %v8421_v58 = vrot.slane %v8294_v3, %v14399_v35  ;;  %v13638_v4 = vrot.slane %v8365_v36, %v14399_v35  ;;  %v9223_v13 = vld [vmem:[#allocation3 + $0xc0] sm:$0xff] }
0x116d   :  { %v13641_v22 = vrot.slane %v8296_v47, %v14399_v35  ;;  %v13644_v55 = vrot.slane %v8367_v59, %v14399_v35 }
0x116e   :  { %v13647_v39 = vmul.f32 %v8377_v23, %v13403_v7  ;;  %v13650_v2 = vmul.f32 %v8377_v23, %v13406_v16  ;;  %v13653_v49 = vmul.f32 %v8377_v23, %v13409_v63  ;;  %v13656_v19 = vmul.f32 %v8377_v23, %v13420_v61 }
0x116f   :  { %v13659_v52 = vmul.f32 %v8377_v23, %v13435_v0  ;;  %v13662_v30 = vmul.f32 %v8377_v23, %v13457_v48  ;;  %v13665_v35 = vmul.f32 %v8377_v23, %v13460_v38  ;;  %v13668_v7 = vmul.f32 %v8377_v23, %v13476_v9 }
0x1170   :  { %v13671_v16 = vmul.f32 %v8385_v12, %v13448_v18  ;;  %v13674_v63 = vmul.f32 %v8385_v12, %v13451_v20  ;;  %v13677_v61 = vmul.f32 %v8385_v12, %v13454_v51  ;;  %v13680_v0 = vmul.f32 %v8385_v12, %v13469_v37 }
0x1171   :  { %v13683_v48 = vmul.f32 %v8385_v12, %v13489_v44  ;;  %v13686_v38 = vmul.f32 %v8385_v12, %v13496_v29  ;;  %v13689_v9 = vmul.f32 %v8385_v12, %v13509_v56  ;;  %v13692_v18 = vmul.f32 %v8385_v12, %v13514_v53  ;;  %v9219_v29 = vld [vmem:[#allocation3 + $0x40] sm:$0xff] }
0x1172   :  { %v8434_v20 = vadd.f32 %v8421_v58, %v8386_v24  ;;  %v8438_v6 = vadd.f32 %v8421_v58, %v8390_v21  ;;  %v8442_v27 = vadd.f32 %v8421_v58, %v8394_v46  ;;  %v8446_v51 = vadd.f32 %v8421_v58, %v8398_v15  ;;  %v9222_v53 = vld [vmem:[#allocation3 + $0xa0] sm:$0xff] }
0x1173   :  { %v8450_v54 = vadd.f32 %v8421_v58, %v8402_v41  ;;  %v8454_v11 = vadd.f32 %v8421_v58, %v8406_v5  ;;  %v8458_v37 = vadd.f32 %v8421_v58, %v8410_v25  ;;  %v8462_v1 = vadd.f32 %v8421_v58, %v8414_v34  ;;  %v9224_v24 = vld [vmem:[#allocation3 + $0xe0] sm:$0xff] }
0x1174   :  { %v8466_v44 = vadd.f32 %v9217_v33, %v8434_v20  ;;  %v8470_v43 = vadd.f32 %v9218_v17, %v8438_v6  ;;  %v8474_v57 = vadd.f32 %v9219_v29, %v8442_v27  ;;  %v8478_v56 = vadd.f32 %v9220_v28, %v8446_v51  ;;  %v9226_v27 = vld [vmem:[#allocation3 + $0x30] sm:$0xff] }
0x1175   :  { %v8482_v50 = vadd.f32 %v9221_v32, %v8450_v54  ;;  %v8486_v31 = vadd.f32 %v9222_v53, %v8454_v11  ;;  %v8490_v10 = vadd.f32 %v9223_v13, %v8458_v37  ;;  %v8494_v21 = vadd.f32 %v9224_v24, %v8462_v1  ;;  %v9227_v51 = vld [vmem:[#allocation3 + $0x50] sm:$0xff] }
0x1176   :  { %v8498_v46 = vmax.f32 %v8466_v44, 0.0  ;;  %v8502_v15 = vmax.f32 %v8470_v43, 0.0  ;;  %v8506_v41 = vmax.f32 %v8474_v57, 0.0  ;;  %v8510_v5 = vmax.f32 %v8478_v56, 0.0  ;;  %v9228_v11 = vld [vmem:[#allocation3 + $0x70] sm:$0xff] }
0x1177   :  { %v8514_v25 = vmax.f32 %v8482_v50, 0.0  ;;  %v8518_v34 = vmax.f32 %v8486_v31, 0.0  ;;  %v8522_v3 = vmax.f32 %v8490_v10, 0.0  ;;  %v8526_v36 = vmax.f32 %v8494_v21, 0.0  ;;  %v9229_v1 = vld [vmem:[#allocation3 + $0x90] sm:$0xff] }
0x1178   :  { %8530 = vst [vmem:[#allocation21] sm:$0xff] %v8498_v46  ;;  %8534 = vst [vmem:[#allocation21 + $0x20] sm:$0xff] %v8502_v15  ;;  %v8436_v23 = vadd.f32 %v13638_v4, %v13611_v60  ;;  %v8440_v12 = vadd.f32 %v13638_v4, %v13614_v14  ;;  %v8444_v47 = vadd.f32 %v13638_v4, %v13617_v8  ;;  %v9225_v8 = vld [vmem:[#allocation3 + $0x10] sm:$0xff]  ;;  %v9234_v15 = vld [vmem:[#allocation3 + $0x28] sm:$0xff] }
0x1179   :  { %8538 = vst [vmem:[#allocation21 + $0x40] sm:$0xff] %v8506_v41  ;;  %8542 = vst [vmem:[#allocation21 + $0x60] sm:$0xff] %v8510_v5  ;;  %v8448_v59 = vadd.f32 %v13638_v4, %v13620_v45  ;;  %v8452_v58 = vadd.f32 %v13638_v4, %v13623_v40  ;;  %v8456_v20 = vadd.f32 %v13638_v4, %v13626_v26  ;;  %v9230_v40 = vld [vmem:[#allocation3 + $0xb0] sm:$0xff]  ;;  %v9235_v41 = vld [vmem:[#allocation3 + $0x48] sm:$0xff] }
0x117a   :  { %8546 = vst [vmem:[#allocation21 + $0x80] sm:$0xff] %v8514_v25  ;;  %8550 = vst [vmem:[#allocation21 + $0xa0] sm:$0xff] %v8518_v34  ;;  %v8460_v60 = vadd.f32 %v13638_v4, %v13629_v42  ;;  %v8464_v14 = vadd.f32 %v13638_v4, %v13632_v62  ;;  %v8468_v6 = vadd.f32 %v9225_v8, %v8436_v23  ;;  %v9231_v17 = vld [vmem:[#allocation3 + $0xd0] sm:$0xff]  ;;  %v9236_v25 = vld [vmem:[#allocation3 + $0x68] sm:$0xff] }
0x117b   :  { %8554 = vst [vmem:[#allocation21 + $0xc0] sm:$0xff] %v8522_v3  ;;  %8558 = vst [vmem:[#allocation21 + $0xe0] sm:$0xff] %v8526_v36  ;;  %v8472_v45 = vadd.f32 %v9226_v27, %v8440_v12  ;;  %v8476_v54 = vadd.f32 %v9227_v51, %v8444_v47  ;;  %v8480_v37 = vadd.f32 %v9228_v11, %v8448_v59  ;;  %v9232_v43 = vld [vmem:[#allocation3 + $0xf0] sm:$0xff]  ;;  %v9237_v3 = vld [vmem:[#allocation3 + $0x88] sm:$0xff] }
0x117c   :  { %v8484_v33 = vadd.f32 %v9229_v1, %v8452_v58  ;;  %v8488_v44 = vadd.f32 %v9230_v40, %v8456_v20  ;;  %v8492_v26 = vadd.f32 %v9231_v17, %v8460_v60  ;;  %v8496_v29 = vadd.f32 %v9232_v43, %v8464_v14  ;;  %v9239_v12 = vld [vmem:[#allocation3 + $0xc8] sm:$0xff]  ;;  %v9242_v1 = vld [vmem:[#allocation3 + $0x38] sm:$0xff] }
0x117d   :  { %v8500_v42 = vmax.f32 %v8468_v6, 0.0  ;;  %v8504_v57 = vmax.f32 %v8472_v45, 0.0  ;;  %v8508_v28 = vmax.f32 %v8476_v54, 0.0  ;;  %v8512_v62 = vmax.f32 %v8480_v37, 0.0  ;;  %v9240_v47 = vld [vmem:[#allocation3 + $0xe8] sm:$0xff]  ;;  %v9246_v43 = vld [vmem:[#allocation3 + $0xb8] sm:$0xff] }
0x117e   :  { %v8516_v4 = vmax.f32 %v8484_v33, 0.0  ;;  %v8520_v56 = vmax.f32 %v8488_v44, 0.0  ;;  %v8524_v32 = vmax.f32 %v8492_v26, 0.0  ;;  %v8528_v50 = vmax.f32 %v8496_v29, 0.0  ;;  %v9243_v33 = vld [vmem:[#allocation3 + $0x58] sm:$0xff] }
0x117f   :  { %8532 = vst [vmem:[#allocation21 + $0x10] sm:$0xff] %v8500_v42  ;;  %8536 = vst [vmem:[#allocation21 + $0x30] sm:$0xff] %v8504_v57  ;;  %v8435_v53 = vadd.f32 %v13641_v22, %v13647_v39  ;;  %v8439_v31 = vadd.f32 %v13641_v22, %v13650_v2  ;;  %v8443_v13 = vadd.f32 %v13641_v22, %v13653_v49  ;;  %v9233_v49 = vld [vmem:[#allocation3 + $0x8] sm:$0xff]  ;;  %v9244_v44 = vld [vmem:[#allocation3 + $0x78] sm:$0xff] }
0x1180   :  { %8540 = vst [vmem:[#allocation21 + $0x50] sm:$0xff] %v8508_v28  ;;  %8544 = vst [vmem:[#allocation21 + $0x70] sm:$0xff] %v8512_v62  ;;  %v8447_v10 = vadd.f32 %v13641_v22, %v13656_v19  ;;  %v8451_v24 = vadd.f32 %v13641_v22, %v13659_v52  ;;  %v8455_v21 = vadd.f32 %v13641_v22, %v13662_v30  ;;  %v9238_v52 = vld [vmem:[#allocation3 + $0xa8] sm:$0xff]  ;;  %v9247_v29 = vld [vmem:[#allocation3 + $0xd8] sm:$0xff] }
0x1181   :  { %8548 = vst [vmem:[#allocation21 + $0x90] sm:$0xff] %v8516_v4  ;;  %8552 = vst [vmem:[#allocation21 + $0xb0] sm:$0xff] %v8520_v56  ;;  %v8459_v39 = vadd.f32 %v13641_v22, %v13665_v35  ;;  %v8463_v2 = vadd.f32 %v13641_v22, %v13668_v7  ;;  %v8467_v46 = vadd.f32 %v9233_v49, %v8435_v53 }
0x1182   :  { %8556 = vst [vmem:[#allocation21 + $0xd0] sm:$0xff] %v8524_v32  ;;  %8560 = vst [vmem:[#allocation21 + $0xf0] sm:$0xff] %v8528_v50  ;;  %v8471_v19 = vadd.f32 %v9234_v15, %v8439_v31  ;;  %v8475_v5 = vadd.f32 %v9235_v41, %v8443_v13  ;;  %v8479_v34 = vadd.f32 %v9236_v25, %v8447_v10 }
0x1183   :  { %v8483_v36 = vadd.f32 %v9237_v3, %v8451_v24  ;;  %v8487_v23 = vadd.f32 %v9238_v52, %v8455_v21  ;;  %v8491_v30 = vadd.f32 %v9239_v12, %v8459_v39  ;;  %v8495_v59 = vadd.f32 %v9240_v47, %v8463_v2 }
0x1184   :  { %v8499_v35 = vmax.f32 %v8467_v46, 0.0  ;;  %v8503_v58 = vmax.f32 %v8471_v19, 0.0  ;;  %v8507_v20 = vmax.f32 %v8475_v5, 0.0  ;;  %v8511_v22 = vmax.f32 %v8479_v34, 0.0 }
0x1185   :  { %v8515_v7 = vmax.f32 %v8483_v36, 0.0  ;;  %v8519_v60 = vmax.f32 %v8487_v23, 0.0  ;;  %v8523_v14 = vmax.f32 %v8491_v30, 0.0  ;;  %v8527_v8 = vmax.f32 %v8495_v59, 0.0 }
0x1186   :  { %8531 = vst [vmem:[#allocation21 + $0x8] sm:$0xff] %v8499_v35  ;;  %8535 = vst [vmem:[#allocation21 + $0x28] sm:$0xff] %v8503_v58  ;;  %v8437_v6 = vadd.f32 %v13644_v55, %v13671_v16  ;;  %v8441_v27 = vadd.f32 %v13644_v55, %v13674_v63  ;;  %v8445_v45 = vadd.f32 %v13644_v55, %v13677_v61  ;;  %v9241_v61 = vld [vmem:[#allocation3 + $0x18] sm:$0xff] }
0x1187   :  { %8539 = vst [vmem:[#allocation21 + $0x48] sm:$0xff] %v8507_v20  ;;  %8543 = vst [vmem:[#allocation21 + $0x68] sm:$0xff] %v8511_v22  ;;  %v8449_v51 = vadd.f32 %v13644_v55, %v13680_v0  ;;  %v8453_v54 = vadd.f32 %v13644_v55, %v13683_v48  ;;  %v8457_v11 = vadd.f32 %v13644_v55, %v13686_v38  ;;  %v9245_v48 = vld [vmem:[#allocation3 + $0x98] sm:$0xff] }
0x1188   :  { %8547 = vst [vmem:[#allocation21 + $0x88] sm:$0xff] %v8515_v7  ;;  %8551 = vst [vmem:[#allocation21 + $0xa8] sm:$0xff] %v8519_v60  ;;  %v8461_v16 = vadd.f32 %v13644_v55, %v13689_v9  ;;  %v8465_v63 = vadd.f32 %v13644_v55, %v13692_v18  ;;  %v8469_v37 = vadd.f32 %v9241_v61, %v8437_v6  ;;  %v9248_v9 = vld [vmem:[#allocation3 + $0xf8] sm:$0xff] }
0x1189   :  { %8555 = vst [vmem:[#allocation21 + $0xc8] sm:$0xff] %v8523_v14  ;;  %8559 = vst [vmem:[#allocation21 + $0xe8] sm:$0xff] %v8527_v8  ;;  %v8473_v0 = vadd.f32 %v9242_v1, %v8441_v27  ;;  %v8477_v40 = vadd.f32 %v9243_v33, %v8445_v45  ;;  %v8481_v17 = vadd.f32 %v9244_v44, %v8449_v51 }
0x118a   :  { %v8485_v26 = vadd.f32 %v9245_v48, %v8453_v54  ;;  %v8489_v38 = vadd.f32 %v9246_v43, %v8457_v11  ;;  %v8493_v42 = vadd.f32 %v9247_v29, %v8461_v16  ;;  %v8497_v57 = vadd.f32 %v9248_v9, %v8465_v63 }
0x118b   :  { %v8501_v28 = vmax.f32 %v8469_v37, 0.0  ;;  %v8505_v55 = vmax.f32 %v8473_v0, 0.0  ;;  %v8509_v18 = vmax.f32 %v8477_v40, 0.0  ;;  %v8513_v62 = vmax.f32 %v8481_v17, 0.0 }
0x118c   :  { %v8517_v4 = vmax.f32 %v8485_v26, 0.0  ;;  %v8521_v56 = vmax.f32 %v8489_v38, 0.0  ;;  %v8525_v32 = vmax.f32 %v8493_v42, 0.0  ;;  %v8529_v50 = vmax.f32 %v8497_v57, 0.0 }
0x118d   :  { %8533 = vst [vmem:[#allocation21 + $0x18] sm:$0xff] %v8501_v28  ;;  %8537 = vst [vmem:[#allocation21 + $0x38] sm:$0xff] %v8505_v55 }
0x118e   :  { %8541 = vst [vmem:[#allocation21 + $0x58] sm:$0xff] %v8509_v18  ;;  %8545 = vst [vmem:[#allocation21 + $0x78] sm:$0xff] %v8513_v62 }
0x118f   :  { %8549 = vst [vmem:[#allocation21 + $0x98] sm:$0xff] %v8517_v4  ;;  %8553 = vst [vmem:[#allocation21 + $0xb8] sm:$0xff] %v8521_v56 }
0x1190   :  { %8557 = vst [vmem:[#allocation21 + $0xd8] sm:$0xff] %v8525_v32  ;;  %8561 = vst [vmem:[#allocation21 + $0xf8] sm:$0xff] %v8529_v50 }
0x1191   :  { %9480 = shalt.err (!%p9477_p3)
}
0x1192   :  { %8573 = dma.vmem_to_hbm [thread:$0]  %s8568_s19, 4096, %s13761_s13, [#allocation5], %s9505_s30, %s9505_s30, %s9506_s14  }
0x1193   :  { %9501 = dma.done.wait [#allocation5], 4096  }
0x1194   :  { %9502 = vsyncadd [#allocation5], 4294963200 }
0x1195   :  { %8577 = vsyncpa [#allocation4], 1 }
0x1196   :  { %8578 = vsyncpa [#allocation7], 1 }
0x1197   :  { %8579 = vsyncpa [#allocation10], 1 }
0x1198   :  { %8580 = vsyncpa [#allocation13], 1 }
0x1199   :  { %8581 = vsyncpa [#allocation16], 1 }
0x119a   :  { %8582 = vsyncpa [#allocation19], 1 }
0x119b   :  { %8583 = vsyncpa [#allocation5], 1 }

</bundles_post_ra>
